<compile_context>
chip_gen: v6e
topology: v6e:2x2x1
jax: 0.10.0
libtpu: 0.0.40
codegen_flags: <defaults>
</compile_context>

<pallas_src>
import numpy as np
import jax
import jax.numpy as jnp
from jax import lax
from jax.experimental import pallas as pl
from jax.experimental.pallas import tpu as pltpu


def _round_up(n, m):
    return ((n + m - 1) // m) * m


def lstm_linear_kernel(x_ref, w_ih_ref, w_hh_ref, b_ref, w_lin_ref, b_lin_ref,
                       out_ref, h_ref, c_ref, xg_ref):
    """One (batch-block, time-chunk) grid step of the LSTM recurrence + fused head.

    Shapes (all padded / lane-aligned):
      x_ref:     (TS, Bb, Ip)     input chunk (time-major)
      w_ih_ref:  (Ip, 4*Hp)       input -> gates
      w_hh_ref:  (Hp, 4*Hp)       hidden -> gates
      b_ref:     (1, 4*Hp)        b_ih + b_hh (f32)
      w_lin_ref: (Hp, Op)         linear head
      b_lin_ref: (1, Op)          linear head bias (f32)
      out_ref:   (TS, Bb, Op)     head output for this chunk (lane-dense, f32)
      h_ref/c_ref: (Bb, Hp)       recurrent state, persists across time-chunk steps
      xg_ref:    (TS, Bb, 4*Hp)   hoisted x@W_ih + b for this chunk (f32)
    """
    s = pl.program_id(1)          # time-chunk index (axis 0 is the batch block)
    TS, Bb, Ip = x_ref.shape
    Hp = w_hh_ref.shape[0]

    @pl.when(s == 0)
    def _init():
        h_ref[...] = jnp.zeros_like(h_ref)
        c_ref[...] = jnp.zeros_like(c_ref)

    # --- Hoisted input projection: one large MXU matmul for the whole chunk,
    #     bias folded in once (not re-broadcast per timestep). ---
    x_flat = x_ref[...].reshape(TS * Bb, Ip)
    xg = jnp.dot(x_flat, w_ih_ref[...], preferred_element_type=jnp.float32)
    xg_ref[...] = (xg + b_ref[...]).reshape(TS, Bb, 4 * Hp)

    w_hh = w_hh_ref[...]          # hoisted out of the loop
    w_lin = w_lin_ref[...]
    b_lin = b_lin_ref[...]
    mm_dtype = w_hh.dtype

    def step(t, carry):
        h, c = carry
        gates = xg_ref[t] + jnp.dot(h.astype(mm_dtype), w_hh,
                                    preferred_element_type=jnp.float32)
        # Hp is a multiple of 128 -> each gate slice is a whole lane group.
        i_g = jax.nn.sigmoid(gates[:, 0 * Hp:1 * Hp])
        f_g = jax.nn.sigmoid(gates[:, 1 * Hp:2 * Hp])
        g_g = jnp.tanh(gates[:, 2 * Hp:3 * Hp])
        o_g = jax.nn.sigmoid(gates[:, 3 * Hp:4 * Hp])
        c_new = f_g * c + i_g * g_g
        h_new = o_g * jnp.tanh(c_new)
        # Fused head: (Bb, Hp) @ (Hp, Op) hides under the recurrence latency;
        # store is an unmasked lane-dense (Bb, Op) write.
        out_ref[t] = (jnp.dot(h_new.astype(mm_dtype), w_lin,
                              preferred_element_type=jnp.float32)
                      + b_lin).astype(out_ref.dtype)
        return (h_new, c_new)

    h_fin, c_fin = lax.fori_loop(0, TS, step, (h_ref[...], c_ref[...]),
                                 unroll=int(min(TS, 8)))
    h_ref[...] = h_fin
    c_ref[...] = c_fin


def simple_lstm_forward(x, params, *, time_chunk=None,
                        compute_dtype=jnp.bfloat16):
    """x: [B, S, I] (batch_first, like PyTorch). Returns [B, S, O] float32.

    compute_dtype=jnp.bfloat16 (default) feeds bf16 operands to the MXU;
    state, gate math and accumulation stay f32.  Use compute_dtype=jnp.float32
    for bit-level agreement (1e-5) with the pure-JAX / PyTorch reference.
    """
    w_ih, w_hh, b_ih, b_hh, w_lin, b_lin = params
    B, S, I = x.shape
    H = w_hh.shape[0]
    O = w_lin.shape[1]

    SUB, LANE = 8, 128
    # Batch blocking: two blocks when possible so a "parallel" grid axis can use
    # v7x's second TensorCore (harmless serial loop on 1-TC chips).
    B_pad = _round_up(B, SUB)
    if B_pad >= 16:
        Bb = _round_up((B_pad + 1) // 2, SUB)
        nb = 2
    else:
        Bb, nb = B_pad, 1
    Bp = nb * Bb
    Ip = _round_up(I, LANE)
    Hp = _round_up(H, LANE)
    Op = _round_up(O, LANE)

    csize = np.dtype(compute_dtype).itemsize

    # Generation-aware VMEM budget (v7x: 64 MiB, v5e/v6e: 128 MiB).
    try:
        vmem_cap = int(getattr(pltpu.get_tpu_info(), "vmem_capacity_bytes",
                               128 * 1024 * 1024))
    except Exception:
        vmem_cap = 128 * 1024 * 1024
    vmem_budget = int(vmem_cap * 0.70)

    # Bytes that do not scale with the time chunk (assume double-buffered
    # weights so the budget still holds if single-buffering is unavailable).
    fixed = ((Ip * 4 * Hp + Hp * 4 * Hp + Hp * Op) * csize * 2
             + (4 * Hp + Op) * 4 * 2
             + 2 * Bb * Hp * 4)
    # Bytes per unit of time-chunk length: x chunk (x2 buf), out chunk (x2 buf,
    # f32), hoisted-projection scratch (f32).
    per_ts = Bb * (2 * Ip * csize + 2 * Op * 4 + 4 * Hp * 4)
    max_ts = max(8, (vmem_budget - fixed) // per_ts)

    if time_chunk is not None:
        ts = int(time_chunk)
    else:
        cap = int(min(S, max_ts, 128))
        divisors = [d for d in range(1, cap + 1) if S % d == 0]
        ts = divisors[-1]
        if ts < max(1, cap // 2):   # no good divisor -> pad the tail instead
            ts = cap
    Sp = _round_up(S, ts)
    num_chunks = Sp // ts

    # Time-major, zero-padded input: (Sp, Bp, Ip).  Padded timesteps come after
    # the real ones and padded batch rows are independent, so results are exact.
    xs = jnp.transpose(x, (1, 0, 2)).astype(jnp.float32)
    xs = jnp.pad(xs, ((0, Sp - S), (0, Bp - B), (0, Ip - I)))
    xs = xs.astype(compute_dtype)

    # Pad H per gate (zero cols) so each gate block is 128-lane aligned; padded
    # hidden units stay exactly zero through the recurrence.
    def pad_gate_cols(w, rows, rows_p):
        w4 = w.reshape(rows, 4, H)
        w4 = jnp.pad(w4, ((0, rows_p - rows), (0, 0), (0, Hp - H)))
        return w4.reshape(rows_p, 4 * Hp)

    w_ih_p = pad_gate_cols(w_ih.astype(jnp.float32), I, Ip).astype(compute_dtype)
    w_hh_p = pad_gate_cols(w_hh.astype(jnp.float32), H, Hp).astype(compute_dtype)
    b_p = jnp.pad((b_ih + b_hh).astype(jnp.float32).reshape(4, H),
                  ((0, 0), (0, Hp - H))).reshape(1, 4 * Hp)
    w_lin_p = jnp.pad(w_lin.astype(jnp.float32),
                      ((0, Hp - H), (0, Op - O))).astype(compute_dtype)
    b_lin_p = jnp.pad(b_lin.astype(jnp.float32), (0, Op - O)).reshape(1, Op)

    needed = fixed + per_ts * ts + (1 << 20)
    vmem_limit = int(min(vmem_budget,
                         max(needed + needed // 4, 8 * 1024 * 1024)))

    def run(single_buffer_weights):
        if single_buffer_weights:
            def wspec(shape):
                return pl.BlockSpec(shape, lambda *_: (0,) * len(shape),
                                    pipeline_mode=pl.Buffered(1))
        else:
            def wspec(shape):
                return pl.BlockSpec(shape, lambda *_: (0,) * len(shape))

        return pl.pallas_call(
            lstm_linear_kernel,
            out_shape=jax.ShapeDtypeStruct((Sp, Bp, Op), jnp.float32),
            grid_spec=pltpu.PrefetchScalarGridSpec(
                num_scalar_prefetch=0,
                grid=(nb, num_chunks),                      # (batch blocks, time)
                in_specs=[
                    pl.BlockSpec((ts, Bb, Ip), lambda b, s: (s, b, 0)),  # x chunk
                    wspec((Ip, 4 * Hp)),                                 # w_ih
                    wspec((Hp, 4 * Hp)),                                 # w_hh
                    wspec((1, 4 * Hp)),                                  # bias
                    wspec((Hp, Op)),                                     # w_lin
                    wspec((1, Op)),                                      # b_lin
                ],
                out_specs=pl.BlockSpec((ts, Bb, Op), lambda b, s: (s, b, 0)),
                scratch_shapes=[
                    pltpu.VMEM((Bb, Hp), jnp.float32),           # h carry
                    pltpu.VMEM((Bb, Hp), jnp.float32),           # c carry
                    pltpu.VMEM((ts, Bb, 4 * Hp), jnp.float32),   # hoisted x@W_ih + b
                ],
            ),
            compiler_params=pltpu.CompilerParams(
                dimension_semantics=("parallel", "arbitrary"),
                vmem_limit_bytes=vmem_limit,
            ),
        )(xs, w_ih_p, w_hh_p, b_p, w_lin_p, b_lin_p)

    try:
        out = run(True)          # single-buffered loop-invariant weights
    except Exception:
        out = run(False)         # fallback: default (double-buffered) specs

    out = out[:S, :B, :O]
    return jnp.transpose(out, (1, 0, 2))                  # [B, S, O]


def reference_forward(x, params):
    """Pure-JAX reference matching PyTorch nn.LSTM + nn.Linear semantics."""
    w_ih, w_hh, b_ih, b_hh, w_lin, b_lin = params
    B = x.shape[0]
    H = w_hh.shape[0]

    def step(carry, xt):
        h, c = carry
        gates = xt @ w_ih + h @ w_hh + b_ih + b_hh
        i_g = jax.nn.sigmoid(gates[:, 0 * H:1 * H])
        f_g = jax.nn.sigmoid(gates[:, 1 * H:2 * H])
        g_g = jnp.tanh(gates[:, 2 * H:3 * H])
        o_g = jax.nn.sigmoid(gates[:, 3 * H:4 * H])
        c = f_g * c + i_g * g_g
        h = o_g * jnp.tanh(c)
        return (h, c), h

    xs = jnp.transpose(x, (1, 0, 2))
    (_, _), hs = lax.scan(step, (jnp.zeros((B, H)), jnp.zeros((B, H))), xs)
    y = hs @ w_lin + b_lin
    return jnp.transpose(y, (1, 0, 2))


def init_params(key, input_size, hidden_size, output_size):
    """Deterministic init (PyTorch-style uniform(-1/sqrt(H), 1/sqrt(H)))."""
    k = 1.0 / np.sqrt(hidden_size)
    keys = jax.random.split(key, 6)
    w_ih = jax.random.uniform(keys[0], (input_size, 4 * hidden_size), jnp.float32, -k, k)
    w_hh = jax.random.uniform(keys[1], (hidden_size, 4 * hidden_size), jnp.float32, -k, k)
    b_ih = jax.random.uniform(keys[2], (4 * hidden_size,), jnp.float32, -k, k)
    b_hh = jax.random.uniform(keys[3], (4 * hidden_size,), jnp.float32, -k, k)
    w_lin = jax.random.uniform(keys[4], (hidden_size, output_size), jnp.float32, -k, k)
    b_lin = jax.random.uniform(keys[5], (output_size,), jnp.float32, -k, k)
    return (w_ih, w_hh, b_ih, b_hh, w_lin, b_lin)


if __name__ == "__main__":
    B, S, I, H, O = 2, 8, 16, 32, 8
    key = jax.random.PRNGKey(0)
    kx, kp = jax.random.split(key)
    x = jax.random.normal(kx, (B, S, I), dtype=jnp.float32)
    params = init_params(kp, I, H, O)

    y_ref = reference_forward(x, params)

    # Strict check: f32 MXU operands reproduce the reference to 1e-5.
    y32 = simple_lstm_forward(x, params, compute_dtype=jnp.float32)
    y32 = jax.block_until_ready(y32)
    assert y32.shape == (B, S, O)
    assert np.allclose(np.asarray(y32), np.asarray(y_ref), atol=1e-5, rtol=1e-5), \
        "f32 kernel mismatch vs reference"

    # Default fast path: bf16 MXU operands, f32 accumulation/state (loose check).
    ybf = simple_lstm_forward(x, params)                  # compute_dtype=bfloat16
    ybf = jax.block_until_ready(ybf)
    assert ybf.shape == (B, S, O)
    assert np.allclose(np.asarray(ybf), np.asarray(y_ref), atol=1e-1, rtol=1e-1), \
        "bf16 kernel mismatch vs reference"

    print("KERNEL_OK")
</pallas_src>

<mosaic_0001>
module attributes {stable_mosaic.version = 11 : i64} {
  func.func @lstm_linear_kernel(%arg0: i32, %arg1: i32, %arg2: memref<8x8x128xf32, #tpu.memory_space<vmem>>, %arg3: memref<128x512xf32, #tpu.memory_space<vmem>>, %arg4: memref<128x512xf32, #tpu.memory_space<vmem>>, %arg5: memref<1x512xf32, #tpu.memory_space<vmem>>, %arg6: memref<128x128xf32, #tpu.memory_space<vmem>>, %arg7: memref<1x128xf32, #tpu.memory_space<vmem>>, %arg8: memref<8x8x128xf32, #tpu.memory_space<vmem>>, %arg9: memref<8x128xf32, #tpu.memory_space<vmem>>, %arg10: memref<8x128xf32, #tpu.memory_space<vmem>>, %arg11: memref<8x8x512xf32, #tpu.memory_space<vmem>>) attributes {dimension_semantics = [#tpu.dimension_semantics<parallel>, #tpu.dimension_semantics<arbitrary>], iteration_bounds = array<i64: 1, 1>, scalar_prefetch = 0 : i64, scratch_operands = 3 : i64, tpu.core_type = #tpu.core_type<tc>, window_params = [{transform_indices = @transform_0, window_bounds = array<i64: 8, 8, 128>}, {pipeline_mode = #tpu.pipeline_mode<synchronous>, transform_indices = @transform_1, window_bounds = array<i64: 128, 512>}, {pipeline_mode = #tpu.pipeline_mode<synchronous>, transform_indices = @transform_2, window_bounds = array<i64: 128, 512>}, {pipeline_mode = #tpu.pipeline_mode<synchronous>, transform_indices = @transform_3, window_bounds = array<i64: 1, 512>}, {pipeline_mode = #tpu.pipeline_mode<synchronous>, transform_indices = @transform_4, window_bounds = array<i64: 128, 128>}, {pipeline_mode = #tpu.pipeline_mode<synchronous>, transform_indices = @transform_5, window_bounds = array<i64: 1, 128>}, {transform_indices = @transform_6, window_bounds = array<i64: 8, 8, 128>}]} {
    %c0_i32 = arith.constant 0 : i32
    %0 = arith.cmpi eq, %arg1, %c0_i32 : i32
    %1 = arith.extui %0 : i1 to i32
    %c0_i32_0 = arith.constant 0 : i32
    %2 = arith.cmpi ne, %1, %c0_i32_0 : i32
    scf.if %2 {
      %cst_97 = arith.constant 0.000000e+00 : f32
      %315 = vector.broadcast %cst_97 : f32 to vector<8x128xf32>
      %c0_98 = arith.constant 0 : index
      %c0_99 = arith.constant 0 : index
      %316 = vector.load %arg9[%c0_98, %c0_99] : memref<8x128xf32, #tpu.memory_space<vmem>>, vector<8x128xf32>
      tpu.vector_store %arg9[%c0_98, %c0_99], %315 {strides = array<i32>} : memref<8x128xf32, #tpu.memory_space<vmem>>, vector<8x128xf32>,
      %cst_100 = arith.constant 0.000000e+00 : f32
      %317 = vector.broadcast %cst_100 : f32 to vector<8x128xf32>
      %c0_101 = arith.constant 0 : index
      %c0_102 = arith.constant 0 : index
      %318 = vector.load %arg10[%c0_101, %c0_102] : memref<8x128xf32, #tpu.memory_space<vmem>>, vector<8x128xf32>
      tpu.vector_store %arg10[%c0_101, %c0_102], %317 {strides = array<i32>} : memref<8x128xf32, #tpu.memory_space<vmem>>, vector<8x128xf32>,
    } else {
    }
    %c0 = arith.constant 0 : index
    %c0_1 = arith.constant 0 : index
    %c0_2 = arith.constant 0 : index
    %3 = vector.load %arg2[%c0, %c0_1, %c0_2] : memref<8x8x128xf32, #tpu.memory_space<vmem>>, vector<8x8x128xf32>
    %4 = vector.shape_cast %3 : vector<8x8x128xf32> to vector<64x128xf32>
    %c0_3 = arith.constant 0 : index
    %c0_4 = arith.constant 0 : index
    %5 = vector.load %arg3[%c0_3, %c0_4] : memref<128x512xf32, #tpu.memory_space<vmem>>, vector<128x512xf32>
    %cst = arith.constant dense<0.000000e+00> : vector<64x512xf32>
    %6 = tpu.matmul %4, %5, %cst {dimension_numbers = #tpu.dot_dimension_numbers<[1], [0], [0], [1], [0, 0, 1, 1], [], []>} : vector<64x128xf32>, vector<128x512xf32>, vector<64x512xf32> -> vector<64x512xf32>
    %c0_5 = arith.constant 0 : index
    %c0_6 = arith.constant 0 : index
    %7 = vector.load %arg5[%c0_5, %c0_6] : memref<1x512xf32, #tpu.memory_space<vmem>>, vector<1x512xf32>
    %8 = vector.broadcast %7 : vector<1x512xf32> to vector<64x512xf32>
    %9 = arith.addf %6, %8 : vector<64x512xf32>
    %10 = vector.shape_cast %9 : vector<64x512xf32> to vector<8x8x512xf32>
    %c0_7 = arith.constant 0 : index
    %c0_8 = arith.constant 0 : index
    %c0_9 = arith.constant 0 : index
    %11 = vector.load %arg11[%c0_7, %c0_8, %c0_9] : memref<8x8x512xf32, #tpu.memory_space<vmem>>, vector<8x8x512xf32>
    tpu.vector_store %arg11[%c0_7, %c0_8, %c0_9], %10 {strides = array<i32>} : memref<8x8x512xf32, #tpu.memory_space<vmem>>, vector<8x8x512xf32>,
    %c0_10 = arith.constant 0 : index
    %c0_11 = arith.constant 0 : index
    %12 = vector.load %arg4[%c0_10, %c0_11] : memref<128x512xf32, #tpu.memory_space<vmem>>, vector<128x512xf32>
    %c0_12 = arith.constant 0 : index
    %c0_13 = arith.constant 0 : index
    %13 = vector.load %arg6[%c0_12, %c0_13] : memref<128x128xf32, #tpu.memory_space<vmem>>, vector<128x128xf32>
    %c0_14 = arith.constant 0 : index
    %c0_15 = arith.constant 0 : index
    %14 = vector.load %arg7[%c0_14, %c0_15] : memref<1x128xf32, #tpu.memory_space<vmem>>, vector<1x128xf32>
    %c0_16 = arith.constant 0 : index
    %c0_17 = arith.constant 0 : index
    %15 = vector.load %arg9[%c0_16, %c0_17] : memref<8x128xf32, #tpu.memory_space<vmem>>, vector<8x128xf32>
    %c0_18 = arith.constant 0 : index
    %c0_19 = arith.constant 0 : index
    %16 = vector.load %arg10[%c0_18, %c0_19] : memref<8x128xf32, #tpu.memory_space<vmem>>, vector<8x128xf32>
    %c0_i32_20 = arith.constant 0 : i32
    %17 = arith.index_cast %c0_i32_20 : i32 to index
    %c0_21 = arith.constant 0 : index
    %c0_22 = arith.constant 0 : index
    %18 = vector.load %arg11[%17, %c0_21, %c0_22] : memref<8x8x512xf32, #tpu.memory_space<vmem>>, vector<1x8x512xf32>
    %19 = vector.shape_cast %18 : vector<1x8x512xf32> to vector<8x512xf32>
    %cst_23 = arith.constant dense<0.000000e+00> : vector<8x512xf32>
    %20 = tpu.matmul %15, %12, %cst_23 {dimension_numbers = #tpu.dot_dimension_numbers<[1], [0], [0], [1], [0, 0, 1, 1], [], []>} : vector<8x128xf32>, vector<128x512xf32>, vector<8x512xf32> -> vector<8x512xf32>
    %21 = arith.addf %19, %20 : vector<8x512xf32>
    %22 = vector.extract_strided_slice %21 {offsets = [0, 0], sizes = [8, 128], strides = [1, 1]} : vector<8x512xf32> to vector<8x128xf32>
    %23 = arith.negf %22 : vector<8x128xf32>
    %24 = math.exp %23 : vector<8x128xf32>
    %cst_24 = arith.constant 1.000000e+00 : f32
    %25 = vector.broadcast %cst_24 : f32 to vector<8x128xf32>
    %26 = arith.addf %25, %24 : vector<8x128xf32>
    %27 = arith.divf %25, %26 : vector<8x128xf32>
    %28 = vector.extract_strided_slice %21 {offsets = [0, 128], sizes = [8, 128], strides = [1, 1]} : vector<8x512xf32> to vector<8x128xf32>
    %29 = arith.negf %28 : vector<8x128xf32>
    %30 = math.exp %29 : vector<8x128xf32>
    %cst_25 = arith.constant 1.000000e+00 : f32
    %31 = vector.broadcast %cst_25 : f32 to vector<8x128xf32>
    %32 = arith.addf %31, %30 : vector<8x128xf32>
    %33 = arith.divf %31, %32 : vector<8x128xf32>
    %34 = vector.extract_strided_slice %21 {offsets = [0, 256], sizes = [8, 128], strides = [1, 1]} : vector<8x512xf32> to vector<8x128xf32>
    %35 = math.tanh %34 : vector<8x128xf32>
    %36 = vector.extract_strided_slice %21 {offsets = [0, 384], sizes = [8, 128], strides = [1, 1]} : vector<8x512xf32> to vector<8x128xf32>
    %37 = arith.negf %36 : vector<8x128xf32>
    %38 = math.exp %37 : vector<8x128xf32>
    %cst_26 = arith.constant 1.000000e+00 : f32
    %39 = vector.broadcast %cst_26 : f32 to vector<8x128xf32>
    %40 = arith.addf %39, %38 : vector<8x128xf32>
    %41 = arith.divf %39, %40 : vector<8x128xf32>
    %42 = arith.mulf %33, %16 : vector<8x128xf32>
    %43 = arith.mulf %27, %35 : vector<8x128xf32>
    %44 = arith.addf %42, %43 : vector<8x128xf32>
    %45 = math.tanh %44 : vector<8x128xf32>
    %46 = arith.mulf %41, %45 : vector<8x128xf32>
    %cst_27 = arith.constant dense<0.000000e+00> : vector<8x128xf32>
    %47 = tpu.matmul %46, %13, %cst_27 {dimension_numbers = #tpu.dot_dimension_numbers<[1], [0], [0], [1], [0, 0, 1, 1], [], []>} : vector<8x128xf32>, vector<128x128xf32>, vector<8x128xf32> -> vector<8x128xf32>
    %48 = vector.broadcast %14 : vector<1x128xf32> to vector<8x128xf32>
    %49 = arith.addf %47, %48 : vector<8x128xf32>
    %50 = arith.index_cast %c0_i32_20 : i32 to index
    %c0_28 = arith.constant 0 : index
    %c0_29 = arith.constant 0 : index
    %51 = vector.load %arg8[%50, %c0_28, %c0_29] : memref<8x8x128xf32, #tpu.memory_space<vmem>>, vector<1x8x128xf32>
    %52 = vector.shape_cast %51 : vector<1x8x128xf32> to vector<8x128xf32>
    %53 = vector.shape_cast %49 : vector<8x128xf32> to vector<1x8x128xf32>
    tpu.vector_store %arg8[%50, %c0_28, %c0_29], %53 {strides = array<i32>} : memref<8x8x128xf32, #tpu.memory_space<vmem>>, vector<1x8x128xf32>,
    %c1_i32 = arith.constant 1 : i32
    %54 = arith.index_cast %c1_i32 : i32 to index
    %c0_30 = arith.constant 0 : index
    %c0_31 = arith.constant 0 : index
    %55 = vector.load %arg11[%54, %c0_30, %c0_31] : memref<8x8x512xf32, #tpu.memory_space<vmem>>, vector<1x8x512xf32>
    %56 = vector.shape_cast %55 : vector<1x8x512xf32> to vector<8x512xf32>
    %cst_32 = arith.constant dense<0.000000e+00> : vector<8x512xf32>
    %57 = tpu.matmul %46, %12, %cst_32 {dimension_numbers = #tpu.dot_dimension_numbers<[1], [0], [0], [1], [0, 0, 1, 1], [], []>} : vector<8x128xf32>, vector<128x512xf32>, vector<8x512xf32> -> vector<8x512xf32>
    %58 = arith.addf %56, %57 : vector<8x512xf32>
    %59 = vector.extract_strided_slice %58 {offsets = [0, 0], sizes = [8, 128], strides = [1, 1]} : vector<8x512xf32> to vector<8x128xf32>
    %60 = arith.negf %59 : vector<8x128xf32>
    %61 = math.exp %60 : vector<8x128xf32>
    %cst_33 = arith.constant 1.000000e+00 : f32
    %62 = vector.broadcast %cst_33 : f32 to vector<8x128xf32>
    %63 = arith.addf %62, %61 : vector<8x128xf32>
    %64 = arith.divf %62, %63 : vector<8x128xf32>
    %65 = vector.extract_strided_slice %58 {offsets = [0, 128], sizes = [8, 128], strides = [1, 1]} : vector<8x512xf32> to vector<8x128xf32>
    %66 = arith.negf %65 : vector<8x128xf32>
    %67 = math.exp %66 : vector<8x128xf32>
    %cst_34 = arith.constant 1.000000e+00 : f32
    %68 = vector.broadcast %cst_34 : f32 to vector<8x128xf32>
    %69 = arith.addf %68, %67 : vector<8x128xf32>
    %70 = arith.divf %68, %69 : vector<8x128xf32>
    %71 = vector.extract_strided_slice %58 {offsets = [0, 256], sizes = [8, 128], strides = [1, 1]} : vector<8x512xf32> to vector<8x128xf32>
    %72 = math.tanh %71 : vector<8x128xf32>
    %73 = vector.extract_strided_slice %58 {offsets = [0, 384], sizes = [8, 128], strides = [1, 1]} : vector<8x512xf32> to vector<8x128xf32>
    %74 = arith.negf %73 : vector<8x128xf32>
    %75 = math.exp %74 : vector<8x128xf32>
    %cst_35 = arith.constant 1.000000e+00 : f32
    %76 = vector.broadcast %cst_35 : f32 to vector<8x128xf32>
    %77 = arith.addf %76, %75 : vector<8x128xf32>
    %78 = arith.divf %76, %77 : vector<8x128xf32>
    %79 = arith.mulf %70, %44 : vector<8x128xf32>
    %80 = arith.mulf %64, %72 : vector<8x128xf32>
    %81 = arith.addf %79, %80 : vector<8x128xf32>
    %82 = math.tanh %81 : vector<8x128xf32>
    %83 = arith.mulf %78, %82 : vector<8x128xf32>
    %cst_36 = arith.constant dense<0.000000e+00> : vector<8x128xf32>
    %84 = tpu.matmul %83, %13, %cst_36 {dimension_numbers = #tpu.dot_dimension_numbers<[1], [0], [0], [1], [0, 0, 1, 1], [], []>} : vector<8x128xf32>, vector<128x128xf32>, vector<8x128xf32> -> vector<8x128xf32>
    %85 = vector.broadcast %14 : vector<1x128xf32> to vector<8x128xf32>
    %86 = arith.addf %84, %85 : vector<8x128xf32>
    %87 = arith.index_cast %c1_i32 : i32 to index
    %c0_37 = arith.constant 0 : index
    %c0_38 = arith.constant 0 : index
    %88 = vector.load %arg8[%87, %c0_37, %c0_38] : memref<8x8x128xf32, #tpu.memory_space<vmem>>, vector<1x8x128xf32>
    %89 = vector.shape_cast %88 : vector<1x8x128xf32> to vector<8x128xf32>
    %90 = vector.shape_cast %86 : vector<8x128xf32> to vector<1x8x128xf32>
    tpu.vector_store %arg8[%87, %c0_37, %c0_38], %90 {strides = array<i32>} : memref<8x8x128xf32, #tpu.memory_space<vmem>>, vector<1x8x128xf32>,
    %c2_i32 = arith.constant 2 : i32
    %91 = arith.index_cast %c2_i32 : i32 to index
    %c0_39 = arith.constant 0 : index
    %c0_40 = arith.constant 0 : index
    %92 = vector.load %arg11[%91, %c0_39, %c0_40] : memref<8x8x512xf32, #tpu.memory_space<vmem>>, vector<1x8x512xf32>
    %93 = vector.shape_cast %92 : vector<1x8x512xf32> to vector<8x512xf32>
    %cst_41 = arith.constant dense<0.000000e+00> : vector<8x512xf32>
    %94 = tpu.matmul %83, %12, %cst_41 {dimension_numbers = #tpu.dot_dimension_numbers<[1], [0], [0], [1], [0, 0, 1, 1], [], []>} : vector<8x128xf32>, vector<128x512xf32>, vector<8x512xf32> -> vector<8x512xf32>
    %95 = arith.addf %93, %94 : vector<8x512xf32>
    %96 = vector.extract_strided_slice %95 {offsets = [0, 0], sizes = [8, 128], strides = [1, 1]} : vector<8x512xf32> to vector<8x128xf32>
    %97 = arith.negf %96 : vector<8x128xf32>
    %98 = math.exp %97 : vector<8x128xf32>
    %cst_42 = arith.constant 1.000000e+00 : f32
    %99 = vector.broadcast %cst_42 : f32 to vector<8x128xf32>
    %100 = arith.addf %99, %98 : vector<8x128xf32>
    %101 = arith.divf %99, %100 : vector<8x128xf32>
    %102 = vector.extract_strided_slice %95 {offsets = [0, 128], sizes = [8, 128], strides = [1, 1]} : vector<8x512xf32> to vector<8x128xf32>
    %103 = arith.negf %102 : vector<8x128xf32>
    %104 = math.exp %103 : vector<8x128xf32>
    %cst_43 = arith.constant 1.000000e+00 : f32
    %105 = vector.broadcast %cst_43 : f32 to vector<8x128xf32>
    %106 = arith.addf %105, %104 : vector<8x128xf32>
    %107 = arith.divf %105, %106 : vector<8x128xf32>
    %108 = vector.extract_strided_slice %95 {offsets = [0, 256], sizes = [8, 128], strides = [1, 1]} : vector<8x512xf32> to vector<8x128xf32>
    %109 = math.tanh %108 : vector<8x128xf32>
    %110 = vector.extract_strided_slice %95 {offsets = [0, 384], sizes = [8, 128], strides = [1, 1]} : vector<8x512xf32> to vector<8x128xf32>
    %111 = arith.negf %110 : vector<8x128xf32>
    %112 = math.exp %111 : vector<8x128xf32>
    %cst_44 = arith.constant 1.000000e+00 : f32
    %113 = vector.broadcast %cst_44 : f32 to vector<8x128xf32>
    %114 = arith.addf %113, %112 : vector<8x128xf32>
    %115 = arith.divf %113, %114 : vector<8x128xf32>
    %116 = arith.mulf %107, %81 : vector<8x128xf32>
    %117 = arith.mulf %101, %109 : vector<8x128xf32>
    %118 = arith.addf %116, %117 : vector<8x128xf32>
    %119 = math.tanh %118 : vector<8x128xf32>
    %120 = arith.mulf %115, %119 : vector<8x128xf32>
    %cst_45 = arith.constant dense<0.000000e+00> : vector<8x128xf32>
    %121 = tpu.matmul %120, %13, %cst_45 {dimension_numbers = #tpu.dot_dimension_numbers<[1], [0], [0], [1], [0, 0, 1, 1], [], []>} : vector<8x128xf32>, vector<128x128xf32>, vector<8x128xf32> -> vector<8x128xf32>
    %122 = vector.broadcast %14 : vector<1x128xf32> to vector<8x128xf32>
    %123 = arith.addf %121, %122 : vector<8x128xf32>
    %124 = arith.index_cast %c2_i32 : i32 to index
    %c0_46 = arith.constant 0 : index
    %c0_47 = arith.constant 0 : index
    %125 = vector.load %arg8[%124, %c0_46, %c0_47] : memref<8x8x128xf32, #tpu.memory_space<vmem>>, vector<1x8x128xf32>
    %126 = vector.shape_cast %125 : vector<1x8x128xf32> to vector<8x128xf32>
    %127 = vector.shape_cast %123 : vector<8x128xf32> to vector<1x8x128xf32>
    tpu.vector_store %arg8[%124, %c0_46, %c0_47], %127 {strides = array<i32>} : memref<8x8x128xf32, #tpu.memory_space<vmem>>, vector<1x8x128xf32>,
    %c3_i32 = arith.constant 3 : i32
    %128 = arith.index_cast %c3_i32 : i32 to index
    %c0_48 = arith.constant 0 : index
    %c0_49 = arith.constant 0 : index
    %129 = vector.load %arg11[%128, %c0_48, %c0_49] : memref<8x8x512xf32, #tpu.memory_space<vmem>>, vector<1x8x512xf32>
    %130 = vector.shape_cast %129 : vector<1x8x512xf32> to vector<8x512xf32>
    %cst_50 = arith.constant dense<0.000000e+00> : vector<8x512xf32>
    %131 = tpu.matmul %120, %12, %cst_50 {dimension_numbers = #tpu.dot_dimension_numbers<[1], [0], [0], [1], [0, 0, 1, 1], [], []>} : vector<8x128xf32>, vector<128x512xf32>, vector<8x512xf32> -> vector<8x512xf32>
    %132 = arith.addf %130, %131 : vector<8x512xf32>
    %133 = vector.extract_strided_slice %132 {offsets = [0, 0], sizes = [8, 128], strides = [1, 1]} : vector<8x512xf32> to vector<8x128xf32>
    %134 = arith.negf %133 : vector<8x128xf32>
    %135 = math.exp %134 : vector<8x128xf32>
    %cst_51 = arith.constant 1.000000e+00 : f32
    %136 = vector.broadcast %cst_51 : f32 to vector<8x128xf32>
    %137 = arith.addf %136, %135 : vector<8x128xf32>
    %138 = arith.divf %136, %137 : vector<8x128xf32>
    %139 = vector.extract_strided_slice %132 {offsets = [0, 128], sizes = [8, 128], strides = [1, 1]} : vector<8x512xf32> to vector<8x128xf32>
    %140 = arith.negf %139 : vector<8x128xf32>
    %141 = math.exp %140 : vector<8x128xf32>
    %cst_52 = arith.constant 1.000000e+00 : f32
    %142 = vector.broadcast %cst_52 : f32 to vector<8x128xf32>
    %143 = arith.addf %142, %141 : vector<8x128xf32>
    %144 = arith.divf %142, %143 : vector<8x128xf32>
    %145 = vector.extract_strided_slice %132 {offsets = [0, 256], sizes = [8, 128], strides = [1, 1]} : vector<8x512xf32> to vector<8x128xf32>
    %146 = math.tanh %145 : vector<8x128xf32>
    %147 = vector.extract_strided_slice %132 {offsets = [0, 384], sizes = [8, 128], strides = [1, 1]} : vector<8x512xf32> to vector<8x128xf32>
    %148 = arith.negf %147 : vector<8x128xf32>
    %149 = math.exp %148 : vector<8x128xf32>
    %cst_53 = arith.constant 1.000000e+00 : f32
    %150 = vector.broadcast %cst_53 : f32 to vector<8x128xf32>
    %151 = arith.addf %150, %149 : vector<8x128xf32>
    %152 = arith.divf %150, %151 : vector<8x128xf32>
    %153 = arith.mulf %144, %118 : vector<8x128xf32>
    %154 = arith.mulf %138, %146 : vector<8x128xf32>
    %155 = arith.addf %153, %154 : vector<8x128xf32>
    %156 = math.tanh %155 : vector<8x128xf32>
    %157 = arith.mulf %152, %156 : vector<8x128xf32>
    %cst_54 = arith.constant dense<0.000000e+00> : vector<8x128xf32>
    %158 = tpu.matmul %157, %13, %cst_54 {dimension_numbers = #tpu.dot_dimension_numbers<[1], [0], [0], [1], [0, 0, 1, 1], [], []>} : vector<8x128xf32>, vector<128x128xf32>, vector<8x128xf32> -> vector<8x128xf32>
    %159 = vector.broadcast %14 : vector<1x128xf32> to vector<8x128xf32>
    %160 = arith.addf %158, %159 : vector<8x128xf32>
    %161 = arith.index_cast %c3_i32 : i32 to index
    %c0_55 = arith.constant 0 : index
    %c0_56 = arith.constant 0 : index
    %162 = vector.load %arg8[%161, %c0_55, %c0_56] : memref<8x8x128xf32, #tpu.memory_space<vmem>>, vector<1x8x128xf32>
    %163 = vector.shape_cast %162 : vector<1x8x128xf32> to vector<8x128xf32>
    %164 = vector.shape_cast %160 : vector<8x128xf32> to vector<1x8x128xf32>
    tpu.vector_store %arg8[%161, %c0_55, %c0_56], %164 {strides = array<i32>} : memref<8x8x128xf32, #tpu.memory_space<vmem>>, vector<1x8x128xf32>,
    %c4_i32 = arith.constant 4 : i32
    %165 = arith.index_cast %c4_i32 : i32 to index
    %c0_57 = arith.constant 0 : index
    %c0_58 = arith.constant 0 : index
    %166 = vector.load %arg11[%165, %c0_57, %c0_58] : memref<8x8x512xf32, #tpu.memory_space<vmem>>, vector<1x8x512xf32>
    %167 = vector.shape_cast %166 : vector<1x8x512xf32> to vector<8x512xf32>
    %cst_59 = arith.constant dense<0.000000e+00> : vector<8x512xf32>
    %168 = tpu.matmul %157, %12, %cst_59 {dimension_numbers = #tpu.dot_dimension_numbers<[1], [0], [0], [1], [0, 0, 1, 1], [], []>} : vector<8x128xf32>, vector<128x512xf32>, vector<8x512xf32> -> vector<8x512xf32>
    %169 = arith.addf %167, %168 : vector<8x512xf32>
    %170 = vector.extract_strided_slice %169 {offsets = [0, 0], sizes = [8, 128], strides = [1, 1]} : vector<8x512xf32> to vector<8x128xf32>
    %171 = arith.negf %170 : vector<8x128xf32>
    %172 = math.exp %171 : vector<8x128xf32>
    %cst_60 = arith.constant 1.000000e+00 : f32
    %173 = vector.broadcast %cst_60 : f32 to vector<8x128xf32>
    %174 = arith.addf %173, %172 : vector<8x128xf32>
    %175 = arith.divf %173, %174 : vector<8x128xf32>
    %176 = vector.extract_strided_slice %169 {offsets = [0, 128], sizes = [8, 128], strides = [1, 1]} : vector<8x512xf32> to vector<8x128xf32>
    %177 = arith.negf %176 : vector<8x128xf32>
    %178 = math.exp %177 : vector<8x128xf32>
    %cst_61 = arith.constant 1.000000e+00 : f32
    %179 = vector.broadcast %cst_61 : f32 to vector<8x128xf32>
    %180 = arith.addf %179, %178 : vector<8x128xf32>
    %181 = arith.divf %179, %180 : vector<8x128xf32>
    %182 = vector.extract_strided_slice %169 {offsets = [0, 256], sizes = [8, 128], strides = [1, 1]} : vector<8x512xf32> to vector<8x128xf32>
    %183 = math.tanh %182 : vector<8x128xf32>
    %184 = vector.extract_strided_slice %169 {offsets = [0, 384], sizes = [8, 128], strides = [1, 1]} : vector<8x512xf32> to vector<8x128xf32>
    %185 = arith.negf %184 : vector<8x128xf32>
    %186 = math.exp %185 : vector<8x128xf32>
    %cst_62 = arith.constant 1.000000e+00 : f32
    %187 = vector.broadcast %cst_62 : f32 to vector<8x128xf32>
    %188 = arith.addf %187, %186 : vector<8x128xf32>
    %189 = arith.divf %187, %188 : vector<8x128xf32>
    %190 = arith.mulf %181, %155 : vector<8x128xf32>
    %191 = arith.mulf %175, %183 : vector<8x128xf32>
    %192 = arith.addf %190, %191 : vector<8x128xf32>
    %193 = math.tanh %192 : vector<8x128xf32>
    %194 = arith.mulf %189, %193 : vector<8x128xf32>
    %cst_63 = arith.constant dense<0.000000e+00> : vector<8x128xf32>
    %195 = tpu.matmul %194, %13, %cst_63 {dimension_numbers = #tpu.dot_dimension_numbers<[1], [0], [0], [1], [0, 0, 1, 1], [], []>} : vector<8x128xf32>, vector<128x128xf32>, vector<8x128xf32> -> vector<8x128xf32>
    %196 = vector.broadcast %14 : vector<1x128xf32> to vector<8x128xf32>
    %197 = arith.addf %195, %196 : vector<8x128xf32>
    %198 = arith.index_cast %c4_i32 : i32 to index
    %c0_64 = arith.constant 0 : index
    %c0_65 = arith.constant 0 : index
    %199 = vector.load %arg8[%198, %c0_64, %c0_65] : memref<8x8x128xf32, #tpu.memory_space<vmem>>, vector<1x8x128xf32>
    %200 = vector.shape_cast %199 : vector<1x8x128xf32> to vector<8x128xf32>
    %201 = vector.shape_cast %197 : vector<8x128xf32> to vector<1x8x128xf32>
    tpu.vector_store %arg8[%198, %c0_64, %c0_65], %201 {strides = array<i32>} : memref<8x8x128xf32, #tpu.memory_space<vmem>>, vector<1x8x128xf32>,
    %c5_i32 = arith.constant 5 : i32
    %202 = arith.index_cast %c5_i32 : i32 to index
    %c0_66 = arith.constant 0 : index
    %c0_67 = arith.constant 0 : index
    %203 = vector.load %arg11[%202, %c0_66, %c0_67] : memref<8x8x512xf32, #tpu.memory_space<vmem>>, vector<1x8x512xf32>
    %204 = vector.shape_cast %203 : vector<1x8x512xf32> to vector<8x512xf32>
    %cst_68 = arith.constant dense<0.000000e+00> : vector<8x512xf32>
    %205 = tpu.matmul %194, %12, %cst_68 {dimension_numbers = #tpu.dot_dimension_numbers<[1], [0], [0], [1], [0, 0, 1, 1], [], []>} : vector<8x128xf32>, vector<128x512xf32>, vector<8x512xf32> -> vector<8x512xf32>
    %206 = arith.addf %204, %205 : vector<8x512xf32>
    %207 = vector.extract_strided_slice %206 {offsets = [0, 0], sizes = [8, 128], strides = [1, 1]} : vector<8x512xf32> to vector<8x128xf32>
    %208 = arith.negf %207 : vector<8x128xf32>
    %209 = math.exp %208 : vector<8x128xf32>
    %cst_69 = arith.constant 1.000000e+00 : f32
    %210 = vector.broadcast %cst_69 : f32 to vector<8x128xf32>
    %211 = arith.addf %210, %209 : vector<8x128xf32>
    %212 = arith.divf %210, %211 : vector<8x128xf32>
    %213 = vector.extract_strided_slice %206 {offsets = [0, 128], sizes = [8, 128], strides = [1, 1]} : vector<8x512xf32> to vector<8x128xf32>
    %214 = arith.negf %213 : vector<8x128xf32>
    %215 = math.exp %214 : vector<8x128xf32>
    %cst_70 = arith.constant 1.000000e+00 : f32
    %216 = vector.broadcast %cst_70 : f32 to vector<8x128xf32>
    %217 = arith.addf %216, %215 : vector<8x128xf32>
    %218 = arith.divf %216, %217 : vector<8x128xf32>
    %219 = vector.extract_strided_slice %206 {offsets = [0, 256], sizes = [8, 128], strides = [1, 1]} : vector<8x512xf32> to vector<8x128xf32>
    %220 = math.tanh %219 : vector<8x128xf32>
    %221 = vector.extract_strided_slice %206 {offsets = [0, 384], sizes = [8, 128], strides = [1, 1]} : vector<8x512xf32> to vector<8x128xf32>
    %222 = arith.negf %221 : vector<8x128xf32>
    %223 = math.exp %222 : vector<8x128xf32>
    %cst_71 = arith.constant 1.000000e+00 : f32
    %224 = vector.broadcast %cst_71 : f32 to vector<8x128xf32>
    %225 = arith.addf %224, %223 : vector<8x128xf32>
    %226 = arith.divf %224, %225 : vector<8x128xf32>
    %227 = arith.mulf %218, %192 : vector<8x128xf32>
    %228 = arith.mulf %212, %220 : vector<8x128xf32>
    %229 = arith.addf %227, %228 : vector<8x128xf32>
    %230 = math.tanh %229 : vector<8x128xf32>
    %231 = arith.mulf %226, %230 : vector<8x128xf32>
    %cst_72 = arith.constant dense<0.000000e+00> : vector<8x128xf32>
    %232 = tpu.matmul %231, %13, %cst_72 {dimension_numbers = #tpu.dot_dimension_numbers<[1], [0], [0], [1], [0, 0, 1, 1], [], []>} : vector<8x128xf32>, vector<128x128xf32>, vector<8x128xf32> -> vector<8x128xf32>
    %233 = vector.broadcast %14 : vector<1x128xf32> to vector<8x128xf32>
    %234 = arith.addf %232, %233 : vector<8x128xf32>
    %235 = arith.index_cast %c5_i32 : i32 to index
    %c0_73 = arith.constant 0 : index
    %c0_74 = arith.constant 0 : index
    %236 = vector.load %arg8[%235, %c0_73, %c0_74] : memref<8x8x128xf32, #tpu.memory_space<vmem>>, vector<1x8x128xf32>
    %237 = vector.shape_cast %236 : vector<1x8x128xf32> to vector<8x128xf32>
    %238 = vector.shape_cast %234 : vector<8x128xf32> to vector<1x8x128xf32>
    tpu.vector_store %arg8[%235, %c0_73, %c0_74], %238 {strides = array<i32>} : memref<8x8x128xf32, #tpu.memory_space<vmem>>, vector<1x8x128xf32>,
    %c6_i32 = arith.constant 6 : i32
    %239 = arith.index_cast %c6_i32 : i32 to index
    %c0_75 = arith.constant 0 : index
    %c0_76 = arith.constant 0 : index
    %240 = vector.load %arg11[%239, %c0_75, %c0_76] : memref<8x8x512xf32, #tpu.memory_space<vmem>>, vector<1x8x512xf32>
    %241 = vector.shape_cast %240 : vector<1x8x512xf32> to vector<8x512xf32>
    %cst_77 = arith.constant dense<0.000000e+00> : vector<8x512xf32>
    %242 = tpu.matmul %231, %12, %cst_77 {dimension_numbers = #tpu.dot_dimension_numbers<[1], [0], [0], [1], [0, 0, 1, 1], [], []>} : vector<8x128xf32>, vector<128x512xf32>, vector<8x512xf32> -> vector<8x512xf32>
    %243 = arith.addf %241, %242 : vector<8x512xf32>
    %244 = vector.extract_strided_slice %243 {offsets = [0, 0], sizes = [8, 128], strides = [1, 1]} : vector<8x512xf32> to vector<8x128xf32>
    %245 = arith.negf %244 : vector<8x128xf32>
    %246 = math.exp %245 : vector<8x128xf32>
    %cst_78 = arith.constant 1.000000e+00 : f32
    %247 = vector.broadcast %cst_78 : f32 to vector<8x128xf32>
    %248 = arith.addf %247, %246 : vector<8x128xf32>
    %249 = arith.divf %247, %248 : vector<8x128xf32>
    %250 = vector.extract_strided_slice %243 {offsets = [0, 128], sizes = [8, 128], strides = [1, 1]} : vector<8x512xf32> to vector<8x128xf32>
    %251 = arith.negf %250 : vector<8x128xf32>
    %252 = math.exp %251 : vector<8x128xf32>
    %cst_79 = arith.constant 1.000000e+00 : f32
    %253 = vector.broadcast %cst_79 : f32 to vector<8x128xf32>
    %254 = arith.addf %253, %252 : vector<8x128xf32>
    %255 = arith.divf %253, %254 : vector<8x128xf32>
    %256 = vector.extract_strided_slice %243 {offsets = [0, 256], sizes = [8, 128], strides = [1, 1]} : vector<8x512xf32> to vector<8x128xf32>
    %257 = math.tanh %256 : vector<8x128xf32>
    %258 = vector.extract_strided_slice %243 {offsets = [0, 384], sizes = [8, 128], strides = [1, 1]} : vector<8x512xf32> to vector<8x128xf32>
    %259 = arith.negf %258 : vector<8x128xf32>
    %260 = math.exp %259 : vector<8x128xf32>
    %cst_80 = arith.constant 1.000000e+00 : f32
    %261 = vector.broadcast %cst_80 : f32 to vector<8x128xf32>
    %262 = arith.addf %261, %260 : vector<8x128xf32>
    %263 = arith.divf %261, %262 : vector<8x128xf32>
    %264 = arith.mulf %255, %229 : vector<8x128xf32>
    %265 = arith.mulf %249, %257 : vector<8x128xf32>
    %266 = arith.addf %264, %265 : vector<8x128xf32>
    %267 = math.tanh %266 : vector<8x128xf32>
    %268 = arith.mulf %263, %267 : vector<8x128xf32>
    %cst_81 = arith.constant dense<0.000000e+00> : vector<8x128xf32>
    %269 = tpu.matmul %268, %13, %cst_81 {dimension_numbers = #tpu.dot_dimension_numbers<[1], [0], [0], [1], [0, 0, 1, 1], [], []>} : vector<8x128xf32>, vector<128x128xf32>, vector<8x128xf32> -> vector<8x128xf32>
    %270 = vector.broadcast %14 : vector<1x128xf32> to vector<8x128xf32>
    %271 = arith.addf %269, %270 : vector<8x128xf32>
    %272 = arith.index_cast %c6_i32 : i32 to index
    %c0_82 = arith.constant 0 : index
    %c0_83 = arith.constant 0 : index
    %273 = vector.load %arg8[%272, %c0_82, %c0_83] : memref<8x8x128xf32, #tpu.memory_space<vmem>>, vector<1x8x128xf32>
    %274 = vector.shape_cast %273 : vector<1x8x128xf32> to vector<8x128xf32>
    %275 = vector.shape_cast %271 : vector<8x128xf32> to vector<1x8x128xf32>
    tpu.vector_store %arg8[%272, %c0_82, %c0_83], %275 {strides = array<i32>} : memref<8x8x128xf32, #tpu.memory_space<vmem>>, vector<1x8x128xf32>,
    %c7_i32 = arith.constant 7 : i32
    %276 = arith.index_cast %c7_i32 : i32 to index
    %c0_84 = arith.constant 0 : index
    %c0_85 = arith.constant 0 : index
    %277 = vector.load %arg11[%276, %c0_84, %c0_85] : memref<8x8x512xf32, #tpu.memory_space<vmem>>, vector<1x8x512xf32>
    %278 = vector.shape_cast %277 : vector<1x8x512xf32> to vector<8x512xf32>
    %cst_86 = arith.constant dense<0.000000e+00> : vector<8x512xf32>
    %279 = tpu.matmul %268, %12, %cst_86 {dimension_numbers = #tpu.dot_dimension_numbers<[1], [0], [0], [1], [0, 0, 1, 1], [], []>} : vector<8x128xf32>, vector<128x512xf32>, vector<8x512xf32> -> vector<8x512xf32>
    %280 = arith.addf %278, %279 : vector<8x512xf32>
    %281 = vector.extract_strided_slice %280 {offsets = [0, 0], sizes = [8, 128], strides = [1, 1]} : vector<8x512xf32> to vector<8x128xf32>
    %282 = arith.negf %281 : vector<8x128xf32>
    %283 = math.exp %282 : vector<8x128xf32>
    %cst_87 = arith.constant 1.000000e+00 : f32
    %284 = vector.broadcast %cst_87 : f32 to vector<8x128xf32>
    %285 = arith.addf %284, %283 : vector<8x128xf32>
    %286 = arith.divf %284, %285 : vector<8x128xf32>
    %287 = vector.extract_strided_slice %280 {offsets = [0, 128], sizes = [8, 128], strides = [1, 1]} : vector<8x512xf32> to vector<8x128xf32>
    %288 = arith.negf %287 : vector<8x128xf32>
    %289 = math.exp %288 : vector<8x128xf32>
    %cst_88 = arith.constant 1.000000e+00 : f32
    %290 = vector.broadcast %cst_88 : f32 to vector<8x128xf32>
    %291 = arith.addf %290, %289 : vector<8x128xf32>
    %292 = arith.divf %290, %291 : vector<8x128xf32>
    %293 = vector.extract_strided_slice %280 {offsets = [0, 256], sizes = [8, 128], strides = [1, 1]} : vector<8x512xf32> to vector<8x128xf32>
    %294 = math.tanh %293 : vector<8x128xf32>
    %295 = vector.extract_strided_slice %280 {offsets = [0, 384], sizes = [8, 128], strides = [1, 1]} : vector<8x512xf32> to vector<8x128xf32>
    %296 = arith.negf %295 : vector<8x128xf32>
    %297 = math.exp %296 : vector<8x128xf32>
    %cst_89 = arith.constant 1.000000e+00 : f32
    %298 = vector.broadcast %cst_89 : f32 to vector<8x128xf32>
    %299 = arith.addf %298, %297 : vector<8x128xf32>
    %300 = arith.divf %298, %299 : vector<8x128xf32>
    %301 = arith.mulf %292, %266 : vector<8x128xf32>
    %302 = arith.mulf %286, %294 : vector<8x128xf32>
    %303 = arith.addf %301, %302 : vector<8x128xf32>
    %304 = math.tanh %303 : vector<8x128xf32>
    %305 = arith.mulf %300, %304 : vector<8x128xf32>
    %cst_90 = arith.constant dense<0.000000e+00> : vector<8x128xf32>
    %306 = tpu.matmul %305, %13, %cst_90 {dimension_numbers = #tpu.dot_dimension_numbers<[1], [0], [0], [1], [0, 0, 1, 1], [], []>} : vector<8x128xf32>, vector<128x128xf32>, vector<8x128xf32> -> vector<8x128xf32>
    %307 = vector.broadcast %14 : vector<1x128xf32> to vector<8x128xf32>
    %308 = arith.addf %306, %307 : vector<8x128xf32>
    %309 = arith.index_cast %c7_i32 : i32 to index
    %c0_91 = arith.constant 0 : index
    %c0_92 = arith.constant 0 : index
    %310 = vector.load %arg8[%309, %c0_91, %c0_92] : memref<8x8x128xf32, #tpu.memory_space<vmem>>, vector<1x8x128xf32>
    %311 = vector.shape_cast %310 : vector<1x8x128xf32> to vector<8x128xf32>
    %312 = vector.shape_cast %308 : vector<8x128xf32> to vector<1x8x128xf32>
    tpu.vector_store %arg8[%309, %c0_91, %c0_92], %312 {strides = array<i32>} : memref<8x8x128xf32, #tpu.memory_space<vmem>>, vector<1x8x128xf32>,
    %c8_i32 = arith.constant 8 : i32
    %c0_93 = arith.constant 0 : index
    %c0_94 = arith.constant 0 : index
    %313 = vector.load %arg9[%c0_93, %c0_94] : memref<8x128xf32, #tpu.memory_space<vmem>>, vector<8x128xf32>
    tpu.vector_store %arg9[%c0_93, %c0_94], %305 {strides = array<i32>} : memref<8x128xf32, #tpu.memory_space<vmem>>, vector<8x128xf32>,
    %c0_95 = arith.constant 0 : index
    %c0_96 = arith.constant 0 : index
    %314 = vector.load %arg10[%c0_95, %c0_96] : memref<8x128xf32, #tpu.memory_space<vmem>>, vector<8x128xf32>
    tpu.vector_store %arg10[%c0_95, %c0_96], %303 {strides = array<i32>} : memref<8x128xf32, #tpu.memory_space<vmem>>, vector<8x128xf32>,
    return
  }
  func.func @transform_0(%arg0: i32, %arg1: i32) -> (i32, i32, i32) {
    %c0_i32 = arith.constant 0 : i32
    %c0_i32_0 = arith.constant 0 : i32
    return %arg1, %arg0, %c0_i32 : i32, i32, i32
  }
  func.func @transform_1(%arg0: i32, %arg1: i32) -> (i32, i32) {
    %c0_i32 = arith.constant 0 : i32
    %c0_i32_0 = arith.constant 0 : i32
    %c0_i32_1 = arith.constant 0 : i32
    return %c0_i32, %c0_i32_0 : i32, i32
  }
  func.func @transform_2(%arg0: i32, %arg1: i32) -> (i32, i32) {
    %c0_i32 = arith.constant 0 : i32
    %c0_i32_0 = arith.constant 0 : i32
    %c0_i32_1 = arith.constant 0 : i32
    return %c0_i32, %c0_i32_0 : i32, i32
  }
  func.func @transform_3(%arg0: i32, %arg1: i32) -> (i32, i32) {
    %c0_i32 = arith.constant 0 : i32
    %c0_i32_0 = arith.constant 0 : i32
    %c0_i32_1 = arith.constant 0 : i32
    return %c0_i32, %c0_i32_0 : i32, i32
  }
  func.func @transform_4(%arg0: i32, %arg1: i32) -> (i32, i32) {
    %c0_i32 = arith.constant 0 : i32
    %c0_i32_0 = arith.constant 0 : i32
    %c0_i32_1 = arith.constant 0 : i32
    return %c0_i32, %c0_i32_0 : i32, i32
  }
  func.func @transform_5(%arg0: i32, %arg1: i32) -> (i32, i32) {
    %c0_i32 = arith.constant 0 : i32
    %c0_i32_0 = arith.constant 0 : i32
    %c0_i32_1 = arith.constant 0 : i32
    return %c0_i32, %c0_i32_0 : i32, i32
  }
  func.func @transform_6(%arg0: i32, %arg1: i32) -> (i32, i32, i32) {
    %c0_i32 = arith.constant 0 : i32
    %c0_i32_0 = arith.constant 0 : i32
    return %arg1, %arg0, %c0_i32 : i32, i32, i32
  }
}

module attributes {stable_mosaic.version = 11 : i64} {
  func.func @lstm_linear_kernel(%arg0: i32, %arg1: i32, %arg2: memref<8x8x128xf32, #tpu.memory_space<vmem>>, %arg3: memref<128x512xf32, #tpu.memory_space<vmem>>, %arg4: memref<128x512xf32, #tpu.memory_space<vmem>>, %arg5: memref<1x512xf32, #tpu.memory_space<vmem>>, %arg6: memref<128x128xf32, #tpu.memory_space<vmem>>, %arg7: memref<1x128xf32, #tpu.memory_space<vmem>>, %arg8: memref<8x8x128xf32, #tpu.memory_space<vmem>>, %arg9: memref<8x128xf32, #tpu.memory_space<vmem>>, %arg10: memref<8x128xf32, #tpu.memory_space<vmem>>, %arg11: memref<8x8x512xf32, #tpu.memory_space<vmem>>) attributes {dimension_semantics = [#tpu.dimension_semantics<parallel>, #tpu.dimension_semantics<arbitrary>], iteration_bounds = array<i64: 1, 1>, scalar_prefetch = 0 : i64, scratch_operands = 3 : i64, tpu.core_type = #tpu.core_type<tc>, window_params = [{transform_indices = @transform_0, window_bounds = array<i64: 8, 8, 128>}, {pipeline_mode = #tpu.pipeline_mode<synchronous>, transform_indices = @transform_1, window_bounds = array<i64: 128, 512>}, {pipeline_mode = #tpu.pipeline_mode<synchronous>, transform_indices = @transform_2, window_bounds = array<i64: 128, 512>}, {pipeline_mode = #tpu.pipeline_mode<synchronous>, transform_indices = @transform_3, window_bounds = array<i64: 1, 512>}, {pipeline_mode = #tpu.pipeline_mode<synchronous>, transform_indices = @transform_4, window_bounds = array<i64: 128, 128>}, {pipeline_mode = #tpu.pipeline_mode<synchronous>, transform_indices = @transform_5, window_bounds = array<i64: 1, 128>}, {transform_indices = @transform_6, window_bounds = array<i64: 8, 8, 128>}]} {
    %c0_i32 = arith.constant 0 : i32
    %0 = arith.cmpi eq, %arg1, %c0_i32 : i32
    %1 = arith.extui %0 : i1 to i32
    %c0_i32_0 = arith.constant 0 : i32
    %2 = arith.cmpi ne, %1, %c0_i32_0 : i32
    scf.if %2 {
      %cst_97 = arith.constant 0.000000e+00 : f32
      %315 = vector.broadcast %cst_97 : f32 to vector<8x128xf32>
      %c0_98 = arith.constant 0 : index
      %c0_99 = arith.constant 0 : index
      %316 = vector.load %arg9[%c0_98, %c0_99] : memref<8x128xf32, #tpu.memory_space<vmem>>, vector<8x128xf32>
      tpu.vector_store %arg9[%c0_98, %c0_99], %315 {strides = array<i32>} : memref<8x128xf32, #tpu.memory_space<vmem>>, vector<8x128xf32>,
      %cst_100 = arith.constant 0.000000e+00 : f32
      %317 = vector.broadcast %cst_100 : f32 to vector<8x128xf32>
      %c0_101 = arith.constant 0 : index
      %c0_102 = arith.constant 0 : index
      %318 = vector.load %arg10[%c0_101, %c0_102] : memref<8x128xf32, #tpu.memory_space<vmem>>, vector<8x128xf32>
      tpu.vector_store %arg10[%c0_101, %c0_102], %317 {strides = array<i32>} : memref<8x128xf32, #tpu.memory_space<vmem>>, vector<8x128xf32>,
    } else {
    }
    %c0 = arith.constant 0 : index
    %c0_1 = arith.constant 0 : index
    %c0_2 = arith.constant 0 : index
    %3 = vector.load %arg2[%c0, %c0_1, %c0_2] : memref<8x8x128xf32, #tpu.memory_space<vmem>>, vector<8x8x128xf32>
    %4 = vector.shape_cast %3 : vector<8x8x128xf32> to vector<64x128xf32>
    %c0_3 = arith.constant 0 : index
    %c0_4 = arith.constant 0 : index
    %5 = vector.load %arg3[%c0_3, %c0_4] : memref<128x512xf32, #tpu.memory_space<vmem>>, vector<128x512xf32>
    %cst = arith.constant dense<0.000000e+00> : vector<64x512xf32>
    %6 = tpu.matmul %4, %5, %cst {dimension_numbers = #tpu.dot_dimension_numbers<[1], [0], [0], [1], [0, 0, 1, 1], [], []>} : vector<64x128xf32>, vector<128x512xf32>, vector<64x512xf32> -> vector<64x512xf32>
    %c0_5 = arith.constant 0 : index
    %c0_6 = arith.constant 0 : index
    %7 = vector.load %arg5[%c0_5, %c0_6] : memref<1x512xf32, #tpu.memory_space<vmem>>, vector<1x512xf32>
    %8 = vector.broadcast %7 : vector<1x512xf32> to vector<64x512xf32>
    %9 = arith.addf %6, %8 : vector<64x512xf32>
    %10 = vector.shape_cast %9 : vector<64x512xf32> to vector<8x8x512xf32>
    %c0_7 = arith.constant 0 : index
    %c0_8 = arith.constant 0 : index
    %c0_9 = arith.constant 0 : index
    %11 = vector.load %arg11[%c0_7, %c0_8, %c0_9] : memref<8x8x512xf32, #tpu.memory_space<vmem>>, vector<8x8x512xf32>
    tpu.vector_store %arg11[%c0_7, %c0_8, %c0_9], %10 {strides = array<i32>} : memref<8x8x512xf32, #tpu.memory_space<vmem>>, vector<8x8x512xf32>,
    %c0_10 = arith.constant 0 : index
    %c0_11 = arith.constant 0 : index
    %12 = vector.load %arg4[%c0_10, %c0_11] : memref<128x512xf32, #tpu.memory_space<vmem>>, vector<128x512xf32>
    %c0_12 = arith.constant 0 : index
    %c0_13 = arith.constant 0 : index
    %13 = vector.load %arg6[%c0_12, %c0_13] : memref<128x128xf32, #tpu.memory_space<vmem>>, vector<128x128xf32>
    %c0_14 = arith.constant 0 : index
    %c0_15 = arith.constant 0 : index
    %14 = vector.load %arg7[%c0_14, %c0_15] : memref<1x128xf32, #tpu.memory_space<vmem>>, vector<1x128xf32>
    %c0_16 = arith.constant 0 : index
    %c0_17 = arith.constant 0 : index
    %15 = vector.load %arg9[%c0_16, %c0_17] : memref<8x128xf32, #tpu.memory_space<vmem>>, vector<8x128xf32>
    %c0_18 = arith.constant 0 : index
    %c0_19 = arith.constant 0 : index
    %16 = vector.load %arg10[%c0_18, %c0_19] : memref<8x128xf32, #tpu.memory_space<vmem>>, vector<8x128xf32>
    %c0_i32_20 = arith.constant 0 : i32
    %17 = arith.index_cast %c0_i32_20 : i32 to index
    %c0_21 = arith.constant 0 : index
    %c0_22 = arith.constant 0 : index
    %18 = vector.load %arg11[%17, %c0_21, %c0_22] : memref<8x8x512xf32, #tpu.memory_space<vmem>>, vector<1x8x512xf32>
    %19 = vector.shape_cast %18 : vector<1x8x512xf32> to vector<8x512xf32>
    %cst_23 = arith.constant dense<0.000000e+00> : vector<8x512xf32>
    %20 = tpu.matmul %15, %12, %cst_23 {dimension_numbers = #tpu.dot_dimension_numbers<[1], [0], [0], [1], [0, 0, 1, 1], [], []>} : vector<8x128xf32>, vector<128x512xf32>, vector<8x512xf32> -> vector<8x512xf32>
    %21 = arith.addf %19, %20 : vector<8x512xf32>
    %22 = vector.extract_strided_slice %21 {offsets = [0, 0], sizes = [8, 128], strides = [1, 1]} : vector<8x512xf32> to vector<8x128xf32>
    %23 = arith.negf %22 : vector<8x128xf32>
    %24 = math.exp %23 : vector<8x128xf32>
    %cst_24 = arith.constant 1.000000e+00 : f32
    %25 = vector.broadcast %cst_24 : f32 to vector<8x128xf32>
    %26 = arith.addf %25, %24 : vector<8x128xf32>
    %27 = arith.divf %25, %26 : vector<8x128xf32>
    %28 = vector.extract_strided_slice %21 {offsets = [0, 128], sizes = [8, 128], strides = [1, 1]} : vector<8x512xf32> to vector<8x128xf32>
    %29 = arith.negf %28 : vector<8x128xf32>
    %30 = math.exp %29 : vector<8x128xf32>
    %cst_25 = arith.constant 1.000000e+00 : f32
    %31 = vector.broadcast %cst_25 : f32 to vector<8x128xf32>
    %32 = arith.addf %31, %30 : vector<8x128xf32>
    %33 = arith.divf %31, %32 : vector<8x128xf32>
    %34 = vector.extract_strided_slice %21 {offsets = [0, 256], sizes = [8, 128], strides = [1, 1]} : vector<8x512xf32> to vector<8x128xf32>
    %35 = math.tanh %34 : vector<8x128xf32>
    %36 = vector.extract_strided_slice %21 {offsets = [0, 384], sizes = [8, 128], strides = [1, 1]} : vector<8x512xf32> to vector<8x128xf32>
    %37 = arith.negf %36 : vector<8x128xf32>
    %38 = math.exp %37 : vector<8x128xf32>
    %cst_26 = arith.constant 1.000000e+00 : f32
    %39 = vector.broadcast %cst_26 : f32 to vector<8x128xf32>
    %40 = arith.addf %39, %38 : vector<8x128xf32>
    %41 = arith.divf %39, %40 : vector<8x128xf32>
    %42 = arith.mulf %33, %16 : vector<8x128xf32>
    %43 = arith.mulf %27, %35 : vector<8x128xf32>
    %44 = arith.addf %42, %43 : vector<8x128xf32>
    %45 = math.tanh %44 : vector<8x128xf32>
    %46 = arith.mulf %41, %45 : vector<8x128xf32>
    %cst_27 = arith.constant dense<0.000000e+00> : vector<8x128xf32>
    %47 = tpu.matmul %46, %13, %cst_27 {dimension_numbers = #tpu.dot_dimension_numbers<[1], [0], [0], [1], [0, 0, 1, 1], [], []>} : vector<8x128xf32>, vector<128x128xf32>, vector<8x128xf32> -> vector<8x128xf32>
    %48 = vector.broadcast %14 : vector<1x128xf32> to vector<8x128xf32>
    %49 = arith.addf %47, %48 : vector<8x128xf32>
    %50 = arith.index_cast %c0_i32_20 : i32 to index
    %c0_28 = arith.constant 0 : index
    %c0_29 = arith.constant 0 : index
    %51 = vector.load %arg8[%50, %c0_28, %c0_29] : memref<8x8x128xf32, #tpu.memory_space<vmem>>, vector<1x8x128xf32>
    %52 = vector.shape_cast %51 : vector<1x8x128xf32> to vector<8x128xf32>
    %53 = vector.shape_cast %49 : vector<8x128xf32> to vector<1x8x128xf32>
    tpu.vector_store %arg8[%50, %c0_28, %c0_29], %53 {strides = array<i32>} : memref<8x8x128xf32, #tpu.memory_space<vmem>>, vector<1x8x128xf32>,
    %c1_i32 = arith.constant 1 : i32
    %54 = arith.index_cast %c1_i32 : i32 to index
    %c0_30 = arith.constant 0 : index
    %c0_31 = arith.constant 0 : index
    %55 = vector.load %arg11[%54, %c0_30, %c0_31] : memref<8x8x512xf32, #tpu.memory_space<vmem>>, vector<1x8x512xf32>
    %56 = vector.shape_cast %55 : vector<1x8x512xf32> to vector<8x512xf32>
    %cst_32 = arith.constant dense<0.000000e+00> : vector<8x512xf32>
    %57 = tpu.matmul %46, %12, %cst_32 {dimension_numbers = #tpu.dot_dimension_numbers<[1], [0], [0], [1], [0, 0, 1, 1], [], []>} : vector<8x128xf32>, vector<128x512xf32>, vector<8x512xf32> -> vector<8x512xf32>
    %58 = arith.addf %56, %57 : vector<8x512xf32>
    %59 = vector.extract_strided_slice %58 {offsets = [0, 0], sizes = [8, 128], strides = [1, 1]} : vector<8x512xf32> to vector<8x128xf32>
    %60 = arith.negf %59 : vector<8x128xf32>
    %61 = math.exp %60 : vector<8x128xf32>
    %cst_33 = arith.constant 1.000000e+00 : f32
    %62 = vector.broadcast %cst_33 : f32 to vector<8x128xf32>
    %63 = arith.addf %62, %61 : vector<8x128xf32>
    %64 = arith.divf %62, %63 : vector<8x128xf32>
    %65 = vector.extract_strided_slice %58 {offsets = [0, 128], sizes = [8, 128], strides = [1, 1]} : vector<8x512xf32> to vector<8x128xf32>
    %66 = arith.negf %65 : vector<8x128xf32>
    %67 = math.exp %66 : vector<8x128xf32>
    %cst_34 = arith.constant 1.000000e+00 : f32
    %68 = vector.broadcast %cst_34 : f32 to vector<8x128xf32>
    %69 = arith.addf %68, %67 : vector<8x128xf32>
    %70 = arith.divf %68, %69 : vector<8x128xf32>
    %71 = vector.extract_strided_slice %58 {offsets = [0, 256], sizes = [8, 128], strides = [1, 1]} : vector<8x512xf32> to vector<8x128xf32>
    %72 = math.tanh %71 : vector<8x128xf32>
    %73 = vector.extract_strided_slice %58 {offsets = [0, 384], sizes = [8, 128], strides = [1, 1]} : vector<8x512xf32> to vector<8x128xf32>
    %74 = arith.negf %73 : vector<8x128xf32>
    %75 = math.exp %74 : vector<8x128xf32>
    %cst_35 = arith.constant 1.000000e+00 : f32
    %76 = vector.broadcast %cst_35 : f32 to vector<8x128xf32>
    %77 = arith.addf %76, %75 : vector<8x128xf32>
    %78 = arith.divf %76, %77 : vector<8x128xf32>
    %79 = arith.mulf %70, %44 : vector<8x128xf32>
    %80 = arith.mulf %64, %72 : vector<8x128xf32>
    %81 = arith.addf %79, %80 : vector<8x128xf32>
    %82 = math.tanh %81 : vector<8x128xf32>
    %83 = arith.mulf %78, %82 : vector<8x128xf32>
    %cst_36 = arith.constant dense<0.000000e+00> : vector<8x128xf32>
    %84 = tpu.matmul %83, %13, %cst_36 {dimension_numbers = #tpu.dot_dimension_numbers<[1], [0], [0], [1], [0, 0, 1, 1], [], []>} : vector<8x128xf32>, vector<128x128xf32>, vector<8x128xf32> -> vector<8x128xf32>
    %85 = vector.broadcast %14 : vector<1x128xf32> to vector<8x128xf32>
    %86 = arith.addf %84, %85 : vector<8x128xf32>
    %87 = arith.index_cast %c1_i32 : i32 to index
    %c0_37 = arith.constant 0 : index
    %c0_38 = arith.constant 0 : index
    %88 = vector.load %arg8[%87, %c0_37, %c0_38] : memref<8x8x128xf32, #tpu.memory_space<vmem>>, vector<1x8x128xf32>
    %89 = vector.shape_cast %88 : vector<1x8x128xf32> to vector<8x128xf32>
    %90 = vector.shape_cast %86 : vector<8x128xf32> to vector<1x8x128xf32>
    tpu.vector_store %arg8[%87, %c0_37, %c0_38], %90 {strides = array<i32>} : memref<8x8x128xf32, #tpu.memory_space<vmem>>, vector<1x8x128xf32>,
    %c2_i32 = arith.constant 2 : i32
    %91 = arith.index_cast %c2_i32 : i32 to index
    %c0_39 = arith.constant 0 : index
    %c0_40 = arith.constant 0 : index
    %92 = vector.load %arg11[%91, %c0_39, %c0_40] : memref<8x8x512xf32, #tpu.memory_space<vmem>>, vector<1x8x512xf32>
    %93 = vector.shape_cast %92 : vector<1x8x512xf32> to vector<8x512xf32>
    %cst_41 = arith.constant dense<0.000000e+00> : vector<8x512xf32>
    %94 = tpu.matmul %83, %12, %cst_41 {dimension_numbers = #tpu.dot_dimension_numbers<[1], [0], [0], [1], [0, 0, 1, 1], [], []>} : vector<8x128xf32>, vector<128x512xf32>, vector<8x512xf32> -> vector<8x512xf32>
    %95 = arith.addf %93, %94 : vector<8x512xf32>
    %96 = vector.extract_strided_slice %95 {offsets = [0, 0], sizes = [8, 128], strides = [1, 1]} : vector<8x512xf32> to vector<8x128xf32>
    %97 = arith.negf %96 : vector<8x128xf32>
    %98 = math.exp %97 : vector<8x128xf32>
    %cst_42 = arith.constant 1.000000e+00 : f32
    %99 = vector.broadcast %cst_42 : f32 to vector<8x128xf32>
    %100 = arith.addf %99, %98 : vector<8x128xf32>
    %101 = arith.divf %99, %100 : vector<8x128xf32>
    %102 = vector.extract_strided_slice %95 {offsets = [0, 128], sizes = [8, 128], strides = [1, 1]} : vector<8x512xf32> to vector<8x128xf32>
    %103 = arith.negf %102 : vector<8x128xf32>
    %104 = math.exp %103 : vector<8x128xf32>
    %cst_43 = arith.constant 1.000000e+00 : f32
    %105 = vector.broadcast %cst_43 : f32 to vector<8x128xf32>
    %106 = arith.addf %105, %104 : vector<8x128xf32>
    %107 = arith.divf %105, %106 : vector<8x128xf32>
    %108 = vector.extract_strided_slice %95 {offsets = [0, 256], sizes = [8, 128], strides = [1, 1]} : vector<8x512xf32> to vector<8x128xf32>
    %109 = math.tanh %108 : vector<8x128xf32>
    %110 = vector.extract_strided_slice %95 {offsets = [0, 384], sizes = [8, 128], strides = [1, 1]} : vector<8x512xf32> to vector<8x128xf32>
    %111 = arith.negf %110 : vector<8x128xf32>
    %112 = math.exp %111 : vector<8x128xf32>
    %cst_44 = arith.constant 1.000000e+00 : f32
    %113 = vector.broadcast %cst_44 : f32 to vector<8x128xf32>
    %114 = arith.addf %113, %112 : vector<8x128xf32>
    %115 = arith.divf %113, %114 : vector<8x128xf32>
    %116 = arith.mulf %107, %81 : vector<8x128xf32>
    %117 = arith.mulf %101, %109 : vector<8x128xf32>
    %118 = arith.addf %116, %117 : vector<8x128xf32>
    %119 = math.tanh %118 : vector<8x128xf32>
    %120 = arith.mulf %115, %119 : vector<8x128xf32>
    %cst_45 = arith.constant dense<0.000000e+00> : vector<8x128xf32>
    %121 = tpu.matmul %120, %13, %cst_45 {dimension_numbers = #tpu.dot_dimension_numbers<[1], [0], [0], [1], [0, 0, 1, 1], [], []>} : vector<8x128xf32>, vector<128x128xf32>, vector<8x128xf32> -> vector<8x128xf32>
    %122 = vector.broadcast %14 : vector<1x128xf32> to vector<8x128xf32>
    %123 = arith.addf %121, %122 : vector<8x128xf32>
    %124 = arith.index_cast %c2_i32 : i32 to index
    %c0_46 = arith.constant 0 : index
    %c0_47 = arith.constant 0 : index
    %125 = vector.load %arg8[%124, %c0_46, %c0_47] : memref<8x8x128xf32, #tpu.memory_space<vmem>>, vector<1x8x128xf32>
    %126 = vector.shape_cast %125 : vector<1x8x128xf32> to vector<8x128xf32>
    %127 = vector.shape_cast %123 : vector<8x128xf32> to vector<1x8x128xf32>
    tpu.vector_store %arg8[%124, %c0_46, %c0_47], %127 {strides = array<i32>} : memref<8x8x128xf32, #tpu.memory_space<vmem>>, vector<1x8x128xf32>,
    %c3_i32 = arith.constant 3 : i32
    %128 = arith.index_cast %c3_i32 : i32 to index
    %c0_48 = arith.constant 0 : index
    %c0_49 = arith.constant 0 : index
    %129 = vector.load %arg11[%128, %c0_48, %c0_49] : memref<8x8x512xf32, #tpu.memory_space<vmem>>, vector<1x8x512xf32>
    %130 = vector.shape_cast %129 : vector<1x8x512xf32> to vector<8x512xf32>
    %cst_50 = arith.constant dense<0.000000e+00> : vector<8x512xf32>
    %131 = tpu.matmul %120, %12, %cst_50 {dimension_numbers = #tpu.dot_dimension_numbers<[1], [0], [0], [1], [0, 0, 1, 1], [], []>} : vector<8x128xf32>, vector<128x512xf32>, vector<8x512xf32> -> vector<8x512xf32>
    %132 = arith.addf %130, %131 : vector<8x512xf32>
    %133 = vector.extract_strided_slice %132 {offsets = [0, 0], sizes = [8, 128], strides = [1, 1]} : vector<8x512xf32> to vector<8x128xf32>
    %134 = arith.negf %133 : vector<8x128xf32>
    %135 = math.exp %134 : vector<8x128xf32>
    %cst_51 = arith.constant 1.000000e+00 : f32
    %136 = vector.broadcast %cst_51 : f32 to vector<8x128xf32>
    %137 = arith.addf %136, %135 : vector<8x128xf32>
    %138 = arith.divf %136, %137 : vector<8x128xf32>
    %139 = vector.extract_strided_slice %132 {offsets = [0, 128], sizes = [8, 128], strides = [1, 1]} : vector<8x512xf32> to vector<8x128xf32>
    %140 = arith.negf %139 : vector<8x128xf32>
    %141 = math.exp %140 : vector<8x128xf32>
    %cst_52 = arith.constant 1.000000e+00 : f32
    %142 = vector.broadcast %cst_52 : f32 to vector<8x128xf32>
    %143 = arith.addf %142, %141 : vector<8x128xf32>
    %144 = arith.divf %142, %143 : vector<8x128xf32>
    %145 = vector.extract_strided_slice %132 {offsets = [0, 256], sizes = [8, 128], strides = [1, 1]} : vector<8x512xf32> to vector<8x128xf32>
    %146 = math.tanh %145 : vector<8x128xf32>
    %147 = vector.extract_strided_slice %132 {offsets = [0, 384], sizes = [8, 128], strides = [1, 1]} : vector<8x512xf32> to vector<8x128xf32>
    %148 = arith.negf %147 : vector<8x128xf32>
    %149 = math.exp %148 : vector<8x128xf32>
    %cst_53 = arith.constant 1.000000e+00 : f32
    %150 = vector.broadcast %cst_53 : f32 to vector<8x128xf32>
    %151 = arith.addf %150, %149 : vector<8x128xf32>
    %152 = arith.divf %150, %151 : vector<8x128xf32>
    %153 = arith.mulf %144, %118 : vector<8x128xf32>
    %154 = arith.mulf %138, %146 : vector<8x128xf32>
    %155 = arith.addf %153, %154 : vector<8x128xf32>
    %156 = math.tanh %155 : vector<8x128xf32>
    %157 = arith.mulf %152, %156 : vector<8x128xf32>
    %cst_54 = arith.constant dense<0.000000e+00> : vector<8x128xf32>
    %158 = tpu.matmul %157, %13, %cst_54 {dimension_numbers = #tpu.dot_dimension_numbers<[1], [0], [0], [1], [0, 0, 1, 1], [], []>} : vector<8x128xf32>, vector<128x128xf32>, vector<8x128xf32> -> vector<8x128xf32>
    %159 = vector.broadcast %14 : vector<1x128xf32> to vector<8x128xf32>
    %160 = arith.addf %158, %159 : vector<8x128xf32>
    %161 = arith.index_cast %c3_i32 : i32 to index
    %c0_55 = arith.constant 0 : index
    %c0_56 = arith.constant 0 : index
    %162 = vector.load %arg8[%161, %c0_55, %c0_56] : memref<8x8x128xf32, #tpu.memory_space<vmem>>, vector<1x8x128xf32>
    %163 = vector.shape_cast %162 : vector<1x8x128xf32> to vector<8x128xf32>
    %164 = vector.shape_cast %160 : vector<8x128xf32> to vector<1x8x128xf32>
    tpu.vector_store %arg8[%161, %c0_55, %c0_56], %164 {strides = array<i32>} : memref<8x8x128xf32, #tpu.memory_space<vmem>>, vector<1x8x128xf32>,
    %c4_i32 = arith.constant 4 : i32
    %165 = arith.index_cast %c4_i32 : i32 to index
    %c0_57 = arith.constant 0 : index
    %c0_58 = arith.constant 0 : index
    %166 = vector.load %arg11[%165, %c0_57, %c0_58] : memref<8x8x512xf32, #tpu.memory_space<vmem>>, vector<1x8x512xf32>
    %167 = vector.shape_cast %166 : vector<1x8x512xf32> to vector<8x512xf32>
    %cst_59 = arith.constant dense<0.000000e+00> : vector<8x512xf32>
    %168 = tpu.matmul %157, %12, %cst_59 {dimension_numbers = #tpu.dot_dimension_numbers<[1], [0], [0], [1], [0, 0, 1, 1], [], []>} : vector<8x128xf32>, vector<128x512xf32>, vector<8x512xf32> -> vector<8x512xf32>
    %169 = arith.addf %167, %168 : vector<8x512xf32>
    %170 = vector.extract_strided_slice %169 {offsets = [0, 0], sizes = [8, 128], strides = [1, 1]} : vector<8x512xf32> to vector<8x128xf32>
    %171 = arith.negf %170 : vector<8x128xf32>
    %172 = math.exp %171 : vector<8x128xf32>
    %cst_60 = arith.constant 1.000000e+00 : f32
    %173 = vector.broadcast %cst_60 : f32 to vector<8x128xf32>
    %174 = arith.addf %173, %172 : vector<8x128xf32>
    %175 = arith.divf %173, %174 : vector<8x128xf32>
    %176 = vector.extract_strided_slice %169 {offsets = [0, 128], sizes = [8, 128], strides = [1, 1]} : vector<8x512xf32> to vector<8x128xf32>
    %177 = arith.negf %176 : vector<8x128xf32>
    %178 = math.exp %177 : vector<8x128xf32>
    %cst_61 = arith.constant 1.000000e+00 : f32
    %179 = vector.broadcast %cst_61 : f32 to vector<8x128xf32>
    %180 = arith.addf %179, %178 : vector<8x128xf32>
    %181 = arith.divf %179, %180 : vector<8x128xf32>
    %182 = vector.extract_strided_slice %169 {offsets = [0, 256], sizes = [8, 128], strides = [1, 1]} : vector<8x512xf32> to vector<8x128xf32>
    %183 = math.tanh %182 : vector<8x128xf32>
    %184 = vector.extract_strided_slice %169 {offsets = [0, 384], sizes = [8, 128], strides = [1, 1]} : vector<8x512xf32> to vector<8x128xf32>
    %185 = arith.negf %184 : vector<8x128xf32>
    %186 = math.exp %185 : vector<8x128xf32>
    %cst_62 = arith.constant 1.000000e+00 : f32
    %187 = vector.broadcast %cst_62 : f32 to vector<8x128xf32>
    %188 = arith.addf %187, %186 : vector<8x128xf32>
    %189 = arith.divf %187, %188 : vector<8x128xf32>
    %190 = arith.mulf %181, %155 : vector<8x128xf32>
    %191 = arith.mulf %175, %183 : vector<8x128xf32>
    %192 = arith.addf %190, %191 : vector<8x128xf32>
    %193 = math.tanh %192 : vector<8x128xf32>
    %194 = arith.mulf %189, %193 : vector<8x128xf32>
    %cst_63 = arith.constant dense<0.000000e+00> : vector<8x128xf32>
    %195 = tpu.matmul %194, %13, %cst_63 {dimension_numbers = #tpu.dot_dimension_numbers<[1], [0], [0], [1], [0, 0, 1, 1], [], []>} : vector<8x128xf32>, vector<128x128xf32>, vector<8x128xf32> -> vector<8x128xf32>
    %196 = vector.broadcast %14 : vector<1x128xf32> to vector<8x128xf32>
    %197 = arith.addf %195, %196 : vector<8x128xf32>
    %198 = arith.index_cast %c4_i32 : i32 to index
    %c0_64 = arith.constant 0 : index
    %c0_65 = arith.constant 0 : index
    %199 = vector.load %arg8[%198, %c0_64, %c0_65] : memref<8x8x128xf32, #tpu.memory_space<vmem>>, vector<1x8x128xf32>
    %200 = vector.shape_cast %199 : vector<1x8x128xf32> to vector<8x128xf32>
    %201 = vector.shape_cast %197 : vector<8x128xf32> to vector<1x8x128xf32>
    tpu.vector_store %arg8[%198, %c0_64, %c0_65], %201 {strides = array<i32>} : memref<8x8x128xf32, #tpu.memory_space<vmem>>, vector<1x8x128xf32>,
    %c5_i32 = arith.constant 5 : i32
    %202 = arith.index_cast %c5_i32 : i32 to index
    %c0_66 = arith.constant 0 : index
    %c0_67 = arith.constant 0 : index
    %203 = vector.load %arg11[%202, %c0_66, %c0_67] : memref<8x8x512xf32, #tpu.memory_space<vmem>>, vector<1x8x512xf32>
    %204 = vector.shape_cast %203 : vector<1x8x512xf32> to vector<8x512xf32>
    %cst_68 = arith.constant dense<0.000000e+00> : vector<8x512xf32>
    %205 = tpu.matmul %194, %12, %cst_68 {dimension_numbers = #tpu.dot_dimension_numbers<[1], [0], [0], [1], [0, 0, 1, 1], [], []>} : vector<8x128xf32>, vector<128x512xf32>, vector<8x512xf32> -> vector<8x512xf32>
    %206 = arith.addf %204, %205 : vector<8x512xf32>
    %207 = vector.extract_strided_slice %206 {offsets = [0, 0], sizes = [8, 128], strides = [1, 1]} : vector<8x512xf32> to vector<8x128xf32>
    %208 = arith.negf %207 : vector<8x128xf32>
    %209 = math.exp %208 : vector<8x128xf32>
    %cst_69 = arith.constant 1.000000e+00 : f32
    %210 = vector.broadcast %cst_69 : f32 to vector<8x128xf32>
    %211 = arith.addf %210, %209 : vector<8x128xf32>
    %212 = arith.divf %210, %211 : vector<8x128xf32>
    %213 = vector.extract_strided_slice %206 {offsets = [0, 128], sizes = [8, 128], strides = [1, 1]} : vector<8x512xf32> to vector<8x128xf32>
    %214 = arith.negf %213 : vector<8x128xf32>
    %215 = math.exp %214 : vector<8x128xf32>
    %cst_70 = arith.constant 1.000000e+00 : f32
    %216 = vector.broadcast %cst_70 : f32 to vector<8x128xf32>
    %217 = arith.addf %216, %215 : vector<8x128xf32>
    %218 = arith.divf %216, %217 : vector<8x128xf32>
    %219 = vector.extract_strided_slice %206 {offsets = [0, 256], sizes = [8, 128], strides = [1, 1]} : vector<8x512xf32> to vector<8x128xf32>
    %220 = math.tanh %219 : vector<8x128xf32>
    %221 = vector.extract_strided_slice %206 {offsets = [0, 384], sizes = [8, 128], strides = [1, 1]} : vector<8x512xf32> to vector<8x128xf32>
    %222 = arith.negf %221 : vector<8x128xf32>
    %223 = math.exp %222 : vector<8x128xf32>
    %cst_71 = arith.constant 1.000000e+00 : f32
    %224 = vector.broadcast %cst_71 : f32 to vector<8x128xf32>
    %225 = arith.addf %224, %223 : vector<8x128xf32>
    %226 = arith.divf %224, %225 : vector<8x128xf32>
    %227 = arith.mulf %218, %192 : vector<8x128xf32>
    %228 = arith.mulf %212, %220 : vector<8x128xf32>
    %229 = arith.addf %227, %228 : vector<8x128xf32>
    %230 = math.tanh %229 : vector<8x128xf32>
    %231 = arith.mulf %226, %230 : vector<8x128xf32>
    %cst_72 = arith.constant dense<0.000000e+00> : vector<8x128xf32>
    %232 = tpu.matmul %231, %13, %cst_72 {dimension_numbers = #tpu.dot_dimension_numbers<[1], [0], [0], [1], [0, 0, 1, 1], [], []>} : vector<8x128xf32>, vector<128x128xf32>, vector<8x128xf32> -> vector<8x128xf32>
    %233 = vector.broadcast %14 : vector<1x128xf32> to vector<8x128xf32>
    %234 = arith.addf %232, %233 : vector<8x128xf32>
    %235 = arith.index_cast %c5_i32 : i32 to index
    %c0_73 = arith.constant 0 : index
    %c0_74 = arith.constant 0 : index
    %236 = vector.load %arg8[%235, %c0_73, %c0_74] : memref<8x8x128xf32, #tpu.memory_space<vmem>>, vector<1x8x128xf32>
    %237 = vector.shape_cast %236 : vector<1x8x128xf32> to vector<8x128xf32>
    %238 = vector.shape_cast %234 : vector<8x128xf32> to vector<1x8x128xf32>
    tpu.vector_store %arg8[%235, %c0_73, %c0_74], %238 {strides = array<i32>} : memref<8x8x128xf32, #tpu.memory_space<vmem>>, vector<1x8x128xf32>,
    %c6_i32 = arith.constant 6 : i32
    %239 = arith.index_cast %c6_i32 : i32 to index
    %c0_75 = arith.constant 0 : index
    %c0_76 = arith.constant 0 : index
    %240 = vector.load %arg11[%239, %c0_75, %c0_76] : memref<8x8x512xf32, #tpu.memory_space<vmem>>, vector<1x8x512xf32>
    %241 = vector.shape_cast %240 : vector<1x8x512xf32> to vector<8x512xf32>
    %cst_77 = arith.constant dense<0.000000e+00> : vector<8x512xf32>
    %242 = tpu.matmul %231, %12, %cst_77 {dimension_numbers = #tpu.dot_dimension_numbers<[1], [0], [0], [1], [0, 0, 1, 1], [], []>} : vector<8x128xf32>, vector<128x512xf32>, vector<8x512xf32> -> vector<8x512xf32>
    %243 = arith.addf %241, %242 : vector<8x512xf32>
    %244 = vector.extract_strided_slice %243 {offsets = [0, 0], sizes = [8, 128], strides = [1, 1]} : vector<8x512xf32> to vector<8x128xf32>
    %245 = arith.negf %244 : vector<8x128xf32>
    %246 = math.exp %245 : vector<8x128xf32>
    %cst_78 = arith.constant 1.000000e+00 : f32
    %247 = vector.broadcast %cst_78 : f32 to vector<8x128xf32>
    %248 = arith.addf %247, %246 : vector<8x128xf32>
    %249 = arith.divf %247, %248 : vector<8x128xf32>
    %250 = vector.extract_strided_slice %243 {offsets = [0, 128], sizes = [8, 128], strides = [1, 1]} : vector<8x512xf32> to vector<8x128xf32>
    %251 = arith.negf %250 : vector<8x128xf32>
    %252 = math.exp %251 : vector<8x128xf32>
    %cst_79 = arith.constant 1.000000e+00 : f32
    %253 = vector.broadcast %cst_79 : f32 to vector<8x128xf32>
    %254 = arith.addf %253, %252 : vector<8x128xf32>
    %255 = arith.divf %253, %254 : vector<8x128xf32>
    %256 = vector.extract_strided_slice %243 {offsets = [0, 256], sizes = [8, 128], strides = [1, 1]} : vector<8x512xf32> to vector<8x128xf32>
    %257 = math.tanh %256 : vector<8x128xf32>
    %258 = vector.extract_strided_slice %243 {offsets = [0, 384], sizes = [8, 128], strides = [1, 1]} : vector<8x512xf32> to vector<8x128xf32>
    %259 = arith.negf %258 : vector<8x128xf32>
    %260 = math.exp %259 : vector<8x128xf32>
    %cst_80 = arith.constant 1.000000e+00 : f32
    %261 = vector.broadcast %cst_80 : f32 to vector<8x128xf32>
    %262 = arith.addf %261, %260 : vector<8x128xf32>
    %263 = arith.divf %261, %262 : vector<8x128xf32>
    %264 = arith.mulf %255, %229 : vector<8x128xf32>
    %265 = arith.mulf %249, %257 : vector<8x128xf32>
    %266 = arith.addf %264, %265 : vector<8x128xf32>
    %267 = math.tanh %266 : vector<8x128xf32>
    %268 = arith.mulf %263, %267 : vector<8x128xf32>
    %cst_81 = arith.constant dense<0.000000e+00> : vector<8x128xf32>
    %269 = tpu.matmul %268, %13, %cst_81 {dimension_numbers = #tpu.dot_dimension_numbers<[1], [0], [0], [1], [0, 0, 1, 1], [], []>} : vector<8x128xf32>, vector<128x128xf32>, vector<8x128xf32> -> vector<8x128xf32>
    %270 = vector.broadcast %14 : vector<1x128xf32> to vector<8x128xf32>
    %271 = arith.addf %269, %270 : vector<8x128xf32>
    %272 = arith.index_cast %c6_i32 : i32 to index
    %c0_82 = arith.constant 0 : index
    %c0_83 = arith.constant 0 : index
    %273 = vector.load %arg8[%272, %c0_82, %c0_83] : memref<8x8x128xf32, #tpu.memory_space<vmem>>, vector<1x8x128xf32>
    %274 = vector.shape_cast %273 : vector<1x8x128xf32> to vector<8x128xf32>
    %275 = vector.shape_cast %271 : vector<8x128xf32> to vector<1x8x128xf32>
    tpu.vector_store %arg8[%272, %c0_82, %c0_83], %275 {strides = array<i32>} : memref<8x8x128xf32, #tpu.memory_space<vmem>>, vector<1x8x128xf32>,
    %c7_i32 = arith.constant 7 : i32
    %276 = arith.index_cast %c7_i32 : i32 to index
    %c0_84 = arith.constant 0 : index
    %c0_85 = arith.constant 0 : index
    %277 = vector.load %arg11[%276, %c0_84, %c0_85] : memref<8x8x512xf32, #tpu.memory_space<vmem>>, vector<1x8x512xf32>
    %278 = vector.shape_cast %277 : vector<1x8x512xf32> to vector<8x512xf32>
    %cst_86 = arith.constant dense<0.000000e+00> : vector<8x512xf32>
    %279 = tpu.matmul %268, %12, %cst_86 {dimension_numbers = #tpu.dot_dimension_numbers<[1], [0], [0], [1], [0, 0, 1, 1], [], []>} : vector<8x128xf32>, vector<128x512xf32>, vector<8x512xf32> -> vector<8x512xf32>
    %280 = arith.addf %278, %279 : vector<8x512xf32>
    %281 = vector.extract_strided_slice %280 {offsets = [0, 0], sizes = [8, 128], strides = [1, 1]} : vector<8x512xf32> to vector<8x128xf32>
    %282 = arith.negf %281 : vector<8x128xf32>
    %283 = math.exp %282 : vector<8x128xf32>
    %cst_87 = arith.constant 1.000000e+00 : f32
    %284 = vector.broadcast %cst_87 : f32 to vector<8x128xf32>
    %285 = arith.addf %284, %283 : vector<8x128xf32>
    %286 = arith.divf %284, %285 : vector<8x128xf32>
    %287 = vector.extract_strided_slice %280 {offsets = [0, 128], sizes = [8, 128], strides = [1, 1]} : vector<8x512xf32> to vector<8x128xf32>
    %288 = arith.negf %287 : vector<8x128xf32>
    %289 = math.exp %288 : vector<8x128xf32>
    %cst_88 = arith.constant 1.000000e+00 : f32
    %290 = vector.broadcast %cst_88 : f32 to vector<8x128xf32>
    %291 = arith.addf %290, %289 : vector<8x128xf32>
    %292 = arith.divf %290, %291 : vector<8x128xf32>
    %293 = vector.extract_strided_slice %280 {offsets = [0, 256], sizes = [8, 128], strides = [1, 1]} : vector<8x512xf32> to vector<8x128xf32>
    %294 = math.tanh %293 : vector<8x128xf32>
    %295 = vector.extract_strided_slice %280 {offsets = [0, 384], sizes = [8, 128], strides = [1, 1]} : vector<8x512xf32> to vector<8x128xf32>
    %296 = arith.negf %295 : vector<8x128xf32>
    %297 = math.exp %296 : vector<8x128xf32>
    %cst_89 = arith.constant 1.000000e+00 : f32
    %298 = vector.broadcast %cst_89 : f32 to vector<8x128xf32>
    %299 = arith.addf %298, %297 : vector<8x128xf32>
    %300 = arith.divf %298, %299 : vector<8x128xf32>
    %301 = arith.mulf %292, %266 : vector<8x128xf32>
    %302 = arith.mulf %286, %294 : vector<8x128xf32>
    %303 = arith.addf %301, %302 : vector<8x128xf32>
    %304 = math.tanh %303 : vector<8x128xf32>
    %305 = arith.mulf %300, %304 : vector<8x128xf32>
    %cst_90 = arith.constant dense<0.000000e+00> : vector<8x128xf32>
    %306 = tpu.matmul %305, %13, %cst_90 {dimension_numbers = #tpu.dot_dimension_numbers<[1], [0], [0], [1], [0, 0, 1, 1], [], []>} : vector<8x128xf32>, vector<128x128xf32>, vector<8x128xf32> -> vector<8x128xf32>
    %307 = vector.broadcast %14 : vector<1x128xf32> to vector<8x128xf32>
    %308 = arith.addf %306, %307 : vector<8x128xf32>
    %309 = arith.index_cast %c7_i32 : i32 to index
    %c0_91 = arith.constant 0 : index
    %c0_92 = arith.constant 0 : index
    %310 = vector.load %arg8[%309, %c0_91, %c0_92] : memref<8x8x128xf32, #tpu.memory_space<vmem>>, vector<1x8x128xf32>
    %311 = vector.shape_cast %310 : vector<1x8x128xf32> to vector<8x128xf32>
    %312 = vector.shape_cast %308 : vector<8x128xf32> to vector<1x8x128xf32>
    tpu.vector_store %arg8[%309, %c0_91, %c0_92], %312 {strides = array<i32>} : memref<8x8x128xf32, #tpu.memory_space<vmem>>, vector<1x8x128xf32>,
    %c8_i32 = arith.constant 8 : i32
    %c0_93 = arith.constant 0 : index
    %c0_94 = arith.constant 0 : index
    %313 = vector.load %arg9[%c0_93, %c0_94] : memref<8x128xf32, #tpu.memory_space<vmem>>, vector<8x128xf32>
    tpu.vector_store %arg9[%c0_93, %c0_94], %305 {strides = array<i32>} : memref<8x128xf32, #tpu.memory_space<vmem>>, vector<8x128xf32>,
    %c0_95 = arith.constant 0 : index
    %c0_96 = arith.constant 0 : index
    %314 = vector.load %arg10[%c0_95, %c0_96] : memref<8x128xf32, #tpu.memory_space<vmem>>, vector<8x128xf32>
    tpu.vector_store %arg10[%c0_95, %c0_96], %303 {strides = array<i32>} : memref<8x128xf32, #tpu.memory_space<vmem>>, vector<8x128xf32>,
    return
  }
  func.func @transform_0(%arg0: i32, %arg1: i32) -> (i32, i32, i32) {
    %c0_i32 = arith.constant 0 : i32
    %c0_i32_0 = arith.constant 0 : i32
    return %arg1, %arg0, %c0_i32 : i32, i32, i32
  }
  func.func @transform_1(%arg0: i32, %arg1: i32) -> (i32, i32) {
    %c0_i32 = arith.constant 0 : i32
    %c0_i32_0 = arith.constant 0 : i32
    %c0_i32_1 = arith.constant 0 : i32
    return %c0_i32, %c0_i32_0 : i32, i32
  }
  func.func @transform_2(%arg0: i32, %arg1: i32) -> (i32, i32) {
    %c0_i32 = arith.constant 0 : i32
    %c0_i32_0 = arith.constant 0 : i32
    %c0_i32_1 = arith.constant 0 : i32
    return %c0_i32, %c0_i32_0 : i32, i32
  }
  func.func @transform_3(%arg0: i32, %arg1: i32) -> (i32, i32) {
    %c0_i32 = arith.constant 0 : i32
    %c0_i32_0 = arith.constant 0 : i32
    %c0_i32_1 = arith.constant 0 : i32
    return %c0_i32, %c0_i32_0 : i32, i32
  }
  func.func @transform_4(%arg0: i32, %arg1: i32) -> (i32, i32) {
    %c0_i32 = arith.constant 0 : i32
    %c0_i32_0 = arith.constant 0 : i32
    %c0_i32_1 = arith.constant 0 : i32
    return %c0_i32, %c0_i32_0 : i32, i32
  }
  func.func @transform_5(%arg0: i32, %arg1: i32) -> (i32, i32) {
    %c0_i32 = arith.constant 0 : i32
    %c0_i32_0 = arith.constant 0 : i32
    %c0_i32_1 = arith.constant 0 : i32
    return %c0_i32, %c0_i32_0 : i32, i32
  }
  func.func @transform_6(%arg0: i32, %arg1: i32) -> (i32, i32, i32) {
    %c0_i32 = arith.constant 0 : i32
    %c0_i32_0 = arith.constant 0 : i32
    return %arg1, %arg0, %c0_i32 : i32, i32, i32
  }
}

</mosaic_0001>

<bundles_post_ra>
// kernel: tpu_custom_call.1
= control target key start
LH: loop header
LB: loop body
LE: loop exit
PB: predicated region body
PF: predicated region fallthrough
CT: control target
= control target key end

     0   :  { %11 = vsyncpa [#allocation6], 0  ;;  %s4704_s0 = inlined_call_operand.hbm [shape: f32[8,8,128], index: 0, kind: input, shape index: {}]   ;;  %s4705_s1 = inlined_call_operand.hbm [shape: f32[128,512], index: 1, kind: input, shape index: {}]   ;;  %s4706_s2 = inlined_call_operand.hbm [shape: f32[128,512], index: 2, kind: input, shape index: {}]   ;;  %s4707_s3 = inlined_call_operand.vmem [shape: f32[1,512], index: 3, kind: input, shape index: {}]   ;;  %s4708_s4 = inlined_call_operand.hbm [shape: f32[128,128], index: 4, kind: input, shape index: {}]   ;;  %s4709_s5 = inlined_call_operand.vmem [shape: f32[1,128], index: 5, kind: input, shape index: {}]   ;;  %s4710_s6 = inlined_call_operand.hbm [shape: f32[8,8,128], index: 6, kind: output, shape index: {}]  }
   0x1   :  { %12 = vsyncpa [#allocation9], 0 }
   0x2   :  { %13 = vsyncpa [#allocation12], 0 }
   0x3   :  { %14 = vsyncpa [#allocation7], 0  ;;  %s3338_s21 = smov [#allocation8]  }
   0x4   :  { %s32_s22 = sshll.u32 %s3338_s21, 4  ;;  %s33_s22 = int_to_ptr.vmem [resolvable:$true] %s32_s22 }
   0x5   :  { %s3238_s23 = scalar_lea.vmem %s33_s22, 8192  ;;  %p3243_p1 = scmp.lt.s32.totalorder %s33_s22, %s33_s22 }
   0x6   :  { %p3239_p0 = scmp.ne.s32.totalorder %s33_s22, %s3238_s23  ;;  %p3244_p2 = scmp.lt.s32.totalorder %s3238_s23, %s3238_s23 }
   0x8   :  { %p3245_p3 = por %p3244_p2, %p3243_p1 }
   0xa   :  { %p3246_p4 = pnand %p3245_p3, %p3239_p0 }
   0xc   :  { %3249 = shalt.err (!%p3246_p4)
}
   0xd   :  { %s3339_s24 = smov 512   ;;  %s3340_s25 = smov 32  }
   0xe   :  { %38 = dma.hbm_to_vmem [thread:$0]  %s4705_s1, 8192, %s33_s22, [#allocation9], %s3339_s24, %s3339_s24, %s3340_s25  }
   0xf   :  { %s3341_s28 = smov [#allocation5]  }
  0x10   :  { %s20_s29 = sshll.u32 %s3341_s28, 4  ;;  %s21_s29 = int_to_ptr.vmem [resolvable:$true] %s20_s29 }
  0x11   :  { %s3258_s30 = scalar_lea.vmem %s21_s29, 1024  ;;  %p3263_p6 = scmp.lt.s32.totalorder %s21_s29, %s21_s29 }
  0x12   :  { %p3259_p5 = scmp.ne.s32.totalorder %s21_s29, %s3258_s30  ;;  %p3264_p7 = scmp.lt.s32.totalorder %s3258_s30, %s3258_s30 }
  0x14   :  { %p3265_p8 = por %p3264_p7, %p3263_p6 }
  0x16   :  { %p3266_p9 = pnand %p3265_p8, %p3259_p5 }
  0x18   :  { %3269 = shalt.err (!%p3266_p9)
}
  0x19   :  { %s3342_s7 = smov 128   ;;  %s3343_s8 = smov 8  }
  0x1a   :  { %26 = dma.hbm_to_vmem [thread:$0]  %s4704_s0, 1024, %s21_s29, [#allocation6], %s3342_s7, %s3342_s7, %s3343_s8  }
  0x1b   :  { %s3344_s1 = smov [#allocation10]   ;;  %s3345_s12 = smov [#allocation11]  }
  0x1c   :  { %s44_s11 = sshll.u32 %s3344_s1, 4  ;;  %s58_s13 = sshll.u32 %s3345_s12, 4  ;;  %s45_s11 = int_to_ptr.vmem [resolvable:$true] %s44_s11  ;;  %s59_s13 = int_to_ptr.vmem [resolvable:$true] %s58_s13 }
  0x1d   :  { %s3278_s14 = scalar_lea.vmem %s45_s11, 8192  ;;  %p3283_p11 = scmp.lt.s32.totalorder %s45_s11, %s45_s11 }
  0x1e   :  { %p3279_p10 = scmp.ne.s32.totalorder %s45_s11, %s3278_s14  ;;  %p3284_p12 = scmp.lt.s32.totalorder %s3278_s14, %s3278_s14 }
  0x20   :  { %p3285_p13 = por %p3284_p12, %p3283_p11 }
  0x22   :  { %p3286_p0 = pnand %p3285_p13, %p3279_p10 }
  0x24   :  { %3289 = shalt.err (!%p3286_p0)
}
  0x25   :  { %50 = dma.hbm_to_vmem [thread:$0]  %s4706_s2, 8192, %s45_s11, [#allocation9], %s3339_s24, %s3339_s24, %s3340_s25  }
  0x26   :  { %s3298_s0 = scalar_lea.vmem %s59_s13, 2048  ;;  %p3303_p2 = scmp.lt.s32.totalorder %s59_s13, %s59_s13 }
  0x27   :  { %p3299_p1 = scmp.ne.s32.totalorder %s59_s13, %s3298_s0  ;;  %p3304_p3 = scmp.lt.s32.totalorder %s3298_s0, %s3298_s0 }
  0x29   :  { %p3305_p4 = por %p3304_p3, %p3303_p2 }
  0x2b   :  { %p3306_p5 = pnand %p3305_p4, %p3299_p1 }
  0x2d   :  { %3309 = shalt.err (!%p3306_p5)
}
  0x2e   :  { %64 = dma.hbm_to_vmem [thread:$0]  %s4708_s4, 2048, %s59_s13, [#allocation12], %s3342_s7, %s3342_s7, %s3343_s8  }
  0x2f   :  { %3330 = dma.done.wait [#allocation6], 1024  }
  0x30   :  { %3331 = vsyncadd [#allocation6], 4294966272 }
  0x31   :  { %3332 = dma.done.wait [#allocation9], 16384  }
  0x32   :  { %3333 = vsyncadd [#allocation9], 4294950912 }
  0x33   :  { %3334 = dma.done.wait [#allocation12], 2048  }
  0x34   :  { %3335 = vsyncadd [#allocation12], 4294965248  ;;  %v4711_v0 = vmov 0.0   ;;  %v154_v1 = vld [vmem:[#allocation8 + $0x1e8] sm:$0xff]  ;;  %v156_v2 = vld [vmem:[#allocation8 + $0x1f8] sm:$0xff]  ;;  %vm3347_vm0 = vmmov 0  }
  0x35   :  { %243 = vmatprep.mubr.f32.mxu0 %v4711_v0  ;;  %356 = vmatprep.mubr.f32.mxu1 %v4711_v0  ;;  %v153_v3 = vld [vmem:[#allocation8 + $0x1e0] sm:$0xff]  ;;  %v155_v4 = vld [vmem:[#allocation8 + $0x1f0] sm:$0xff]  ;;  %v150_v5 = vld [vmem:[#allocation8 + $0x1c8] sm:$0xff] }
  0x36   :  { %179 = vmatprep.subr.mxu0 %v154_v1  ;;  %292 = vmatprep.subr.mxu1 %v156_v2  ;;  %v152_v6 = vld [vmem:[#allocation8 + $0x1d8] sm:$0xff]  ;;  %v149_v7 = vld [vmem:[#allocation8 + $0x1c0] sm:$0xff]  ;;  %v151_v8 = vld [vmem:[#allocation8 + $0x1d0] sm:$0xff] }
  0x37   :  { %180 = vmatpush1.msra.mxu0 %v153_v3  ;;  %293 = vmatpush1.msra.mxu1 %v155_v4  ;;  %v146_v9 = vld [vmem:[#allocation8 + $0x1a8] sm:$0xff]  ;;  %v148_v10 = vld [vmem:[#allocation8 + $0x1b8] sm:$0xff]  ;;  %v145_v11 = vld [vmem:[#allocation8 + $0x1a0] sm:$0xff] }
  0x38   :  { %181 = vmatprep.subr.mxu0 %v150_v5  ;;  %294 = vmatprep.subr.mxu1 %v152_v6  ;;  %v147_v12 = vld [vmem:[#allocation8 + $0x1b0] sm:$0xff]  ;;  %v142_v13 = vld [vmem:[#allocation8 + $0x188] sm:$0xff]  ;;  %v144_v14 = vld [vmem:[#allocation8 + $0x198] sm:$0xff] }
  0x39   :  { %182 = vmatpush1.msra.mxu0 %v149_v7  ;;  %295 = vmatpush1.msra.mxu1 %v151_v8  ;;  %v141_v15 = vld [vmem:[#allocation8 + $0x180] sm:$0xff]  ;;  %v143_v16 = vld [vmem:[#allocation8 + $0x190] sm:$0xff]  ;;  %v138_v17 = vld [vmem:[#allocation8 + $0x168] sm:$0xff] }
  0x3a   :  { %183 = vmatprep.subr.mxu0 %v146_v9  ;;  %296 = vmatprep.subr.mxu1 %v148_v10  ;;  %v140_v18 = vld [vmem:[#allocation8 + $0x178] sm:$0xff]  ;;  %v137_v19 = vld [vmem:[#allocation8 + $0x160] sm:$0xff]  ;;  %v139_v20 = vld [vmem:[#allocation8 + $0x170] sm:$0xff] }
  0x3b   :  { %184 = vmatpush1.msra.mxu0 %v145_v11  ;;  %297 = vmatpush1.msra.mxu1 %v147_v12  ;;  %v134_v21 = vld [vmem:[#allocation8 + $0x148] sm:$0xff]  ;;  %v136_v22 = vld [vmem:[#allocation8 + $0x158] sm:$0xff]  ;;  %v133_v23 = vld [vmem:[#allocation8 + $0x140] sm:$0xff] }
  0x3c   :  { %185 = vmatprep.subr.mxu0 %v142_v13  ;;  %298 = vmatprep.subr.mxu1 %v144_v14  ;;  %v135_v24 = vld [vmem:[#allocation8 + $0x150] sm:$0xff]  ;;  %v130_v25 = vld [vmem:[#allocation8 + $0x128] sm:$0xff]  ;;  %v132_v26 = vld [vmem:[#allocation8 + $0x138] sm:$0xff] }
  0x3d   :  { %186 = vmatpush1.msra.mxu0 %v141_v15  ;;  %299 = vmatpush1.msra.mxu1 %v143_v16  ;;  %v129_v27 = vld [vmem:[#allocation8 + $0x120] sm:$0xff]  ;;  %v131_v28 = vld [vmem:[#allocation8 + $0x130] sm:$0xff]  ;;  %v126_v29 = vld [vmem:[#allocation8 + $0x108] sm:$0xff] }
  0x3e   :  { %187 = vmatprep.subr.mxu0 %v138_v17  ;;  %300 = vmatprep.subr.mxu1 %v140_v18  ;;  %v128_v30 = vld [vmem:[#allocation8 + $0x118] sm:$0xff]  ;;  %v125_v31 = vld [vmem:[#allocation8 + $0x100] sm:$0xff]  ;;  %v127_v32 = vld [vmem:[#allocation8 + $0x110] sm:$0xff] }
  0x3f   :  { %188 = vmatpush1.msra.mxu0 %v137_v19  ;;  %301 = vmatpush1.msra.mxu1 %v139_v20  ;;  %v122_v33 = vld [vmem:[#allocation8 + $0xe8] sm:$0xff]  ;;  %v124_v34 = vld [vmem:[#allocation8 + $0xf8] sm:$0xff]  ;;  %v121_v35 = vld [vmem:[#allocation8 + $0xe0] sm:$0xff] }
  0x40   :  { %189 = vmatprep.subr.mxu0 %v134_v21  ;;  %302 = vmatprep.subr.mxu1 %v136_v22  ;;  %v123_v36 = vld [vmem:[#allocation8 + $0xf0] sm:$0xff]  ;;  %v118_v37 = vld [vmem:[#allocation8 + $0xc8] sm:$0xff]  ;;  %v120_v38 = vld [vmem:[#allocation8 + $0xd8] sm:$0xff] }
  0x41   :  { %190 = vmatpush1.msra.mxu0 %v133_v23  ;;  %303 = vmatpush1.msra.mxu1 %v135_v24  ;;  %v117_v39 = vld [vmem:[#allocation8 + $0xc0] sm:$0xff]  ;;  %v119_v40 = vld [vmem:[#allocation8 + $0xd0] sm:$0xff]  ;;  %v114_v41 = vld [vmem:[#allocation8 + $0xa8] sm:$0xff] }
  0x42   :  { %191 = vmatprep.subr.mxu0 %v130_v25  ;;  %304 = vmatprep.subr.mxu1 %v132_v26  ;;  %v116_v42 = vld [vmem:[#allocation8 + $0xb8] sm:$0xff]  ;;  %v113_v43 = vld [vmem:[#allocation8 + $0xa0] sm:$0xff]  ;;  %v115_v44 = vld [vmem:[#allocation8 + $0xb0] sm:$0xff] }
  0x43   :  { %192 = vmatpush1.msra.mxu0 %v129_v27  ;;  %305 = vmatpush1.msra.mxu1 %v131_v28  ;;  %v110_v45 = vld [vmem:[#allocation8 + $0x88] sm:$0xff]  ;;  %v112_v46 = vld [vmem:[#allocation8 + $0x98] sm:$0xff]  ;;  %v109_v47 = vld [vmem:[#allocation8 + $0x80] sm:$0xff] }
  0x44   :  { %193 = vmatprep.subr.mxu0 %v126_v29  ;;  %306 = vmatprep.subr.mxu1 %v128_v30  ;;  %v111_v48 = vld [vmem:[#allocation8 + $0x90] sm:$0xff]  ;;  %v106_v49 = vld [vmem:[#allocation8 + $0x68] sm:$0xff]  ;;  %v108_v50 = vld [vmem:[#allocation8 + $0x78] sm:$0xff] }
  0x45   :  { %194 = vmatpush1.msra.mxu0 %v125_v31  ;;  %307 = vmatpush1.msra.mxu1 %v127_v32  ;;  %v105_v51 = vld [vmem:[#allocation8 + $0x60] sm:$0xff]  ;;  %v107_v52 = vld [vmem:[#allocation8 + $0x70] sm:$0xff]  ;;  %v102_v53 = vld [vmem:[#allocation8 + $0x48] sm:$0xff] }
  0x46   :  { %195 = vmatprep.subr.mxu0 %v122_v33  ;;  %308 = vmatprep.subr.mxu1 %v124_v34  ;;  %v104_v54 = vld [vmem:[#allocation8 + $0x58] sm:$0xff]  ;;  %v101_v55 = vld [vmem:[#allocation8 + $0x40] sm:$0xff]  ;;  %v103_v56 = vld [vmem:[#allocation8 + $0x50] sm:$0xff] }
  0x47   :  { %196 = vmatpush1.msra.mxu0 %v121_v35  ;;  %309 = vmatpush1.msra.mxu1 %v123_v36  ;;  %v98_v57 = vld [vmem:[#allocation8 + $0x28] sm:$0xff]  ;;  %v100_v58 = vld [vmem:[#allocation8 + $0x38] sm:$0xff]  ;;  %v97_v59 = vld [vmem:[#allocation8 + $0x20] sm:$0xff] }
  0x48   :  { %197 = vmatprep.subr.mxu0 %v118_v37  ;;  %310 = vmatprep.subr.mxu1 %v120_v38  ;;  %v99_v60 = vld [vmem:[#allocation8 + $0x30] sm:$0xff]  ;;  %v94_v61 = vld [vmem:[#allocation8 + $0x8] sm:$0xff]  ;;  %v96_v62 = vld [vmem:[#allocation8 + $0x18] sm:$0xff] }
  0x49   :  { %198 = vmatpush1.msra.mxu0 %v117_v39  ;;  %311 = vmatpush1.msra.mxu1 %v119_v40  ;;  %v93_v63 = vld [vmem:[#allocation8] sm:$0xff]  ;;  %v95_v1 = vld [vmem:[#allocation8 + $0x10] sm:$0xff]  ;;  %v3410_v3 = vld [vmem:[#allocation10 + $0x1e8] sm:$0xff] }
  0x4a   :  { %199 = vmatprep.subr.mxu0 %v114_v41  ;;  %312 = vmatprep.subr.mxu1 %v116_v42  ;;  %v85_v2 = vld [vmem:[#allocation5] sm:$0xff]  ;;  %4836 = vst [vmem:[#allocation18_spill] sm:$0xff] %v3410_v3  ;;  %v3412_v4 = vld [vmem:[#allocation10 + $0x1f8] sm:$0xff]  ;;  %v3416_v6 = vld [vmem:[#allocation10 + $0x1f0] sm:$0xff] }
  0x4b   :  { %200 = vmatpush1.msra.mxu0 %v113_v43  ;;  %313 = vmatpush1.msra.mxu1 %v115_v44  ;;  %4837 = vst [vmem:[#allocation19_spill] sm:$0xff] %v3412_v4  ;;  %v3414_v5 = vld [vmem:[#allocation10 + $0x1e0] sm:$0xff]  ;;  %v3418_v7 = vld [vmem:[#allocation10 + $0x1c8] sm:$0xff]  ;;  %v3420_v8 = vld [vmem:[#allocation10 + $0x1d8] sm:$0xff] }
  0x4c   :  { %201 = vmatprep.subr.mxu0 %v110_v45  ;;  %314 = vmatprep.subr.mxu1 %v112_v46  ;;  %4838 = vst [vmem:[#allocation20_spill] sm:$0xff] %v3414_v5  ;;  %4839 = vst [vmem:[#allocation21_spill] sm:$0xff] %v3418_v7  ;;  %v3426_v9 = vld [vmem:[#allocation10 + $0x1c0] sm:$0xff]  ;;  %v3428_v10 = vld [vmem:[#allocation10 + $0x1d0] sm:$0xff] }
  0x4d   :  { %202 = vmatpush1.msra.mxu0 %v109_v47  ;;  %315 = vmatpush1.msra.mxu1 %v111_v48  ;;  %4840 = vst [vmem:[#allocation22_spill] sm:$0xff] %v3426_v9  ;;  %v86_v11 = vld [vmem:[#allocation5 + $0x8] sm:$0xff]  ;;  %v3436_v13 = vld [vmem:[#allocation10 + $0x1b8] sm:$0xff]  ;;  %v3440_v14 = vld [vmem:[#allocation10 + $0x1a0] sm:$0xff] }
  0x4e   :  { %203 = vmatprep.subr.mxu0 %v106_v49  ;;  %316 = vmatprep.subr.mxu1 %v108_v50  ;;  %v3434_v12 = vld [vmem:[#allocation10 + $0x1a8] sm:$0xff]  ;;  %4842 = vst [vmem:[#allocation24_spill] sm:$0xff] %v3440_v14  ;;  %v3442_v15 = vld [vmem:[#allocation10 + $0x1b0] sm:$0xff]  ;;  %v3446_v17 = vld [vmem:[#allocation10 + $0x198] sm:$0xff] }
  0x4f   :  { %204 = vmatpush1.msra.mxu0 %v105_v51  ;;  %317 = vmatpush1.msra.mxu1 %v107_v52  ;;  %4841 = vst [vmem:[#allocation23_spill] sm:$0xff] %v3434_v12  ;;  %v3444_v16 = vld [vmem:[#allocation10 + $0x188] sm:$0xff]  ;;  %v3452_v18 = vld [vmem:[#allocation10 + $0x180] sm:$0xff]  ;;  %v3454_v19 = vld [vmem:[#allocation10 + $0x190] sm:$0xff] }
  0x50   :  { %205 = vmatprep.subr.mxu0 %v102_v53  ;;  %318 = vmatprep.subr.mxu1 %v104_v54  ;;  %4843 = vst [vmem:[#allocation25_spill] sm:$0xff] %v3444_v16  ;;  %4844 = vst [vmem:[#allocation26_spill] sm:$0xff] %v3452_v18  ;;  %v87_v20 = vld [vmem:[#allocation5 + $0x10] sm:$0xff]  ;;  %v3460_v21 = vld [vmem:[#allocation10 + $0x168] sm:$0xff] }
  0x51   :  { %206 = vmatpush1.msra.mxu0 %v101_v55  ;;  %319 = vmatpush1.msra.mxu1 %v103_v56  ;;  %4845 = vst [vmem:[#allocation27_spill] sm:$0xff] %v3460_v21  ;;  %v3462_v22 = vld [vmem:[#allocation10 + $0x178] sm:$0xff]  ;;  %v3466_v23 = vld [vmem:[#allocation10 + $0x160] sm:$0xff]  ;;  %v3468_v24 = vld [vmem:[#allocation10 + $0x170] sm:$0xff] }
  0x52   :  { %207 = vmatprep.subr.mxu0 %v98_v57  ;;  %320 = vmatprep.subr.mxu1 %v100_v58  ;;  %4846 = vst [vmem:[#allocation28_spill] sm:$0xff] %v3466_v23  ;;  %v3470_v25 = vld [vmem:[#allocation10 + $0x148] sm:$0xff]  ;;  %v3472_v26 = vld [vmem:[#allocation10 + $0x158] sm:$0xff]  ;;  %v3478_v27 = vld [vmem:[#allocation10 + $0x140] sm:$0xff] }
  0x53   :  { %208 = vmatpush1.msra.mxu0 %v97_v59  ;;  %321 = vmatpush1.msra.mxu1 %v99_v60  ;;  %4847 = vst [vmem:[#allocation29_spill] sm:$0xff] %v3470_v25  ;;  %4848 = vst [vmem:[#allocation30_spill] sm:$0xff] %v3478_v27  ;;  %v3480_v28 = vld [vmem:[#allocation10 + $0x150] sm:$0xff]  ;;  %v88_v29 = vld [vmem:[#allocation5 + $0x18] sm:$0xff] }
  0x54   :  { %209 = vmatprep.subr.mxu0 %v94_v61  ;;  %322 = vmatprep.subr.mxu1 %v96_v62  ;;  %v3486_v30 = vld [vmem:[#allocation10 + $0x128] sm:$0xff]  ;;  %v3488_v31 = vld [vmem:[#allocation10 + $0x138] sm:$0xff]  ;;  %v3492_v32 = vld [vmem:[#allocation10 + $0x120] sm:$0xff] }
  0x55   :  { %210 = vmatpush1.msra.mxu0 %v93_v63  ;;  %323 = vmatpush1.msra.mxu1 %v95_v1  ;;  %4849 = vst [vmem:[#allocation31_spill] sm:$0xff] %v3486_v30  ;;  %4850 = vst [vmem:[#allocation32_spill] sm:$0xff] %v3492_v32  ;;  %v3494_v33 = vld [vmem:[#allocation10 + $0x130] sm:$0xff]  ;;  %v3496_v34 = vld [vmem:[#allocation10 + $0x108] sm:$0xff] }
  0x56   :  { %244 = vmatmul.mubr.f32.vlgmr.msra.gmra.mxu0 %v85_v2  ;;  %357 = vmatmul.mubr.f32.vlgmr.msra.gmra.mxu1 %v85_v2  ;;  %4851 = vst [vmem:[#allocation33_spill] sm:$0xff] %v3496_v34  ;;  %v3498_v35 = vld [vmem:[#allocation10 + $0x118] sm:$0xff]  ;;  %v3504_v36 = vld [vmem:[#allocation10 + $0x100] sm:$0xff]  ;;  %v3506_v37 = vld [vmem:[#allocation10 + $0x110] sm:$0xff] }
  0x57   :  { %524 = vmatprep.subr.mxu0 %v3410_v3  ;;  %595 = vmatprep.subr.mxu1 %v3412_v4  ;;  %4852 = vst [vmem:[#allocation34_spill] sm:$0xff] %v3504_v36  ;;  %v89_v38 = vld [vmem:[#allocation5 + $0x20] sm:$0xff]  ;;  %v3512_v39 = vld [vmem:[#allocation10 + $0xe8] sm:$0xff]  ;;  %v3514_v40 = vld [vmem:[#allocation10 + $0xf8] sm:$0xff] }
  0x58   :  { %525 = vmatpush1.msra.mxu0 %v3414_v5  ;;  %596 = vmatpush1.msra.mxu1 %v3416_v6  ;;  %4853 = vst [vmem:[#allocation35_spill] sm:$0xff] %v3512_v39  ;;  %v3518_v41 = vld [vmem:[#allocation10 + $0xe0] sm:$0xff]  ;;  %v3520_v42 = vld [vmem:[#allocation10 + $0xf0] sm:$0xff]  ;;  %v3522_v43 = vld [vmem:[#allocation10 + $0xc8] sm:$0xff] }
  0x59   :  { %526 = vmatprep.subr.mxu0 %v3418_v7  ;;  %597 = vmatprep.subr.mxu1 %v3420_v8  ;;  %4854 = vst [vmem:[#allocation36_spill] sm:$0xff] %v3518_v41  ;;  %4855 = vst [vmem:[#allocation37_spill] sm:$0xff] %v3522_v43  ;;  %v3524_v44 = vld [vmem:[#allocation10 + $0xd8] sm:$0xff]  ;;  %v3530_v45 = vld [vmem:[#allocation10 + $0xc0] sm:$0xff] }
  0x5a   :  { %249 = vmatprep.mubr.f32.mxu0 %v4711_v0  ;;  %362 = vmatprep.mubr.f32.mxu1 %v4711_v0  ;;  %4856 = vst [vmem:[#allocation38_spill] sm:$0xff] %v3530_v45  ;;  %v3532_v46 = vld [vmem:[#allocation10 + $0xd0] sm:$0xff]  ;;  %v90_v47 = vld [vmem:[#allocation5 + $0x28] sm:$0xff]  ;;  %v3540_v49 = vld [vmem:[#allocation10 + $0xb8] sm:$0xff] }
  0x5b   :  { %527 = vmatpush1.msra.mxu0 %v3426_v9  ;;  %598 = vmatpush1.msra.mxu1 %v3428_v10  ;;  %v3538_v48 = vld [vmem:[#allocation10 + $0xa8] sm:$0xff]  ;;  %v3544_v50 = vld [vmem:[#allocation10 + $0xa0] sm:$0xff]  ;;  %v3546_v51 = vld [vmem:[#allocation10 + $0xb0] sm:$0xff] }
  0x5c   :  { %250 = vmatmul.mubr.f32.gmra.mxu0 %v86_v11  ;;  %363 = vmatmul.mubr.f32.gmra.mxu1 %v86_v11  ;;  %4857 = vst [vmem:[#allocation39_spill] sm:$0xff] %v3538_v48  ;;  %4858 = vst [vmem:[#allocation40_spill] sm:$0xff] %v3544_v50  ;;  %v3548_v52 = vld [vmem:[#allocation10 + $0x88] sm:$0xff]  ;;  %v3550_v53 = vld [vmem:[#allocation10 + $0x98] sm:$0xff] }
  0x5d   :  { %528 = vmatprep.subr.mxu0 %v3434_v12  ;;  %599 = vmatprep.subr.mxu1 %v3436_v13  ;;  %4859 = vst [vmem:[#allocation41_spill] sm:$0xff] %v3548_v52  ;;  %v3556_v54 = vld [vmem:[#allocation10 + $0x80] sm:$0xff]  ;;  %v3558_v55 = vld [vmem:[#allocation10 + $0x90] sm:$0xff]  ;;  %v3564_v57 = vld [vmem:[#allocation10 + $0x68] sm:$0xff] }
  0x5e   :  { %529 = vmatpush1.msra.mxu0 %v3440_v14  ;;  %600 = vmatpush1.msra.mxu1 %v3442_v15  ;;  %4860 = vst [vmem:[#allocation42_spill] sm:$0xff] %v3556_v54  ;;  %v91_v56 = vld [vmem:[#allocation5 + $0x30] sm:$0xff]  ;;  %4861 = vst [vmem:[#allocation43_spill] sm:$0xff] %v3564_v57  ;;  %v3566_v58 = vld [vmem:[#allocation10 + $0x78] sm:$0xff] }
  0x5f   :  { %530 = vmatprep.subr.mxu0 %v3444_v16  ;;  %601 = vmatprep.subr.mxu1 %v3446_v17  ;;  %v3570_v59 = vld [vmem:[#allocation10 + $0x60] sm:$0xff]  ;;  %v3572_v60 = vld [vmem:[#allocation10 + $0x70] sm:$0xff]  ;;  %v3574_v61 = vld [vmem:[#allocation10 + $0x48] sm:$0xff] }
  0x60   :  { %255 = vmatprep.mubr.f32.mxu0 %v4711_v0  ;;  %368 = vmatprep.mubr.f32.mxu1 %v4711_v0  ;;  %4862 = vst [vmem:[#allocation44_spill] sm:$0xff] %v3570_v59  ;;  %4863 = vst [vmem:[#allocation45_spill] sm:$0xff] %v3574_v61  ;;  %v3576_v62 = vld [vmem:[#allocation10 + $0x58] sm:$0xff]  ;;  %v3582_v63 = vld [vmem:[#allocation10 + $0x40] sm:$0xff] }
  0x61   :  { %531 = vmatpush1.msra.mxu0 %v3452_v18  ;;  %602 = vmatpush1.msra.mxu1 %v3454_v19  ;;  %4864 = vst [vmem:[#allocation46_spill] sm:$0xff] %v3582_v63  ;;  %v3584_v1 = vld [vmem:[#allocation10 + $0x50] sm:$0xff]  ;;  %v92_v2 = vld [vmem:[#allocation5 + $0x38] sm:$0xff]  ;;  %v3590_v11 = vld [vmem:[#allocation10 + $0x28] sm:$0xff] }
  0x62   :  { %256 = vmatmul.mubr.f32.gmra.mxu0 %v87_v20  ;;  %369 = vmatmul.mubr.f32.gmra.mxu1 %v87_v20  ;;  %4865 = vst [vmem:[#allocation47_spill] sm:$0xff] %v3584_v1  ;;  %4866 = vst [vmem:[#allocation48_spill] sm:$0xff] %v3590_v11  ;;  %v3592_v20 = vld [vmem:[#allocation10 + $0x38] sm:$0xff] }
  0x63   :  { %532 = vmatprep.subr.mxu0 %v3460_v21  ;;  %603 = vmatprep.subr.mxu1 %v3462_v22 }
  0x64   :  { %533 = vmatpush1.msra.mxu0 %v3466_v23  ;;  %604 = vmatpush1.msra.mxu1 %v3468_v24 }
  0x65   :  { %534 = vmatprep.subr.mxu0 %v3470_v25  ;;  %605 = vmatprep.subr.mxu1 %v3472_v26 }
  0x66   :  { %261 = vmatprep.mubr.f32.mxu0 %v4711_v0  ;;  %374 = vmatprep.mubr.f32.mxu1 %v4711_v0 }
  0x67   :  { %535 = vmatpush1.msra.mxu0 %v3478_v27  ;;  %606 = vmatpush1.msra.mxu1 %v3480_v28 }
  0x68   :  { %262 = vmatmul.mubr.f32.gmra.mxu0 %v88_v29  ;;  %375 = vmatmul.mubr.f32.gmra.mxu1 %v88_v29  ;;  %v3596_v29 = vld [vmem:[#allocation10 + $0x20] sm:$0xff] }
  0x69   :  { %536 = vmatprep.subr.mxu0 %v3486_v30  ;;  %607 = vmatprep.subr.mxu1 %v3488_v31  ;;  %4867 = vst [vmem:[#allocation49_spill] sm:$0xff] %v3596_v29 }
  0x6a   :  { %537 = vmatpush1.msra.mxu0 %v3492_v32  ;;  %608 = vmatpush1.msra.mxu1 %v3494_v33 }
  0x6b   :  { %538 = vmatprep.subr.mxu0 %v3496_v34  ;;  %609 = vmatprep.subr.mxu1 %v3498_v35 }
  0x6c   :  { %267 = vmatprep.mubr.f32.mxu0 %v4711_v0  ;;  %380 = vmatprep.mubr.f32.mxu1 %v4711_v0 }
  0x6d   :  { %539 = vmatpush1.msra.mxu0 %v3504_v36  ;;  %610 = vmatpush1.msra.mxu1 %v3506_v37 }
  0x6e   :  { %268 = vmatmul.mubr.f32.gmra.mxu0 %v89_v38  ;;  %381 = vmatmul.mubr.f32.gmra.mxu1 %v89_v38  ;;  %v3598_v38 = vld [vmem:[#allocation10 + $0x30] sm:$0xff] }
  0x6f   :  { %540 = vmatprep.subr.mxu0 %v3512_v39  ;;  %611 = vmatprep.subr.mxu1 %v3514_v40  ;;  %4868 = vst [vmem:[#allocation50_spill] sm:$0xff] %v3598_v38 }
  0x70   :  { %541 = vmatpush1.msra.mxu0 %v3518_v41  ;;  %612 = vmatpush1.msra.mxu1 %v3520_v42 }
  0x71   :  { %542 = vmatprep.subr.mxu0 %v3522_v43  ;;  %613 = vmatprep.subr.mxu1 %v3524_v44 }
  0x72   :  { %273 = vmatprep.mubr.f32.mxu0 %v4711_v0  ;;  %386 = vmatprep.mubr.f32.mxu1 %v4711_v0 }
  0x73   :  { %543 = vmatpush1.msra.mxu0 %v3530_v45  ;;  %614 = vmatpush1.msra.mxu1 %v3532_v46 }
  0x74   :  { %274 = vmatmul.mubr.f32.gmra.mxu0 %v90_v47  ;;  %387 = vmatmul.mubr.f32.gmra.mxu1 %v90_v47  ;;  %v3600_v47 = vld [vmem:[#allocation10 + $0x8] sm:$0xff] }
  0x75   :  { %544 = vmatprep.subr.mxu0 %v3538_v48  ;;  %615 = vmatprep.subr.mxu1 %v3540_v49  ;;  %4869 = vst [vmem:[#allocation51_spill] sm:$0xff] %v3600_v47 }
  0x76   :  { %545 = vmatpush1.msra.mxu0 %v3544_v50  ;;  %616 = vmatpush1.msra.mxu1 %v3546_v51 }
  0x77   :  { %546 = vmatprep.subr.mxu0 %v3548_v52  ;;  %617 = vmatprep.subr.mxu1 %v3550_v53 }
  0x78   :  { %279 = vmatprep.mubr.f32.mxu0 %v4711_v0  ;;  %392 = vmatprep.mubr.f32.mxu1 %v4711_v0 }
  0x79   :  { %547 = vmatpush1.msra.mxu0 %v3556_v54  ;;  %618 = vmatpush1.msra.mxu1 %v3558_v55 }
  0x7a   :  { %280 = vmatmul.mubr.f32.gmra.mxu0 %v91_v56  ;;  %393 = vmatmul.mubr.f32.gmra.mxu1 %v91_v56  ;;  %v3602_v56 = vld [vmem:[#allocation10 + $0x18] sm:$0xff] }
  0x7b   :  { %548 = vmatprep.subr.mxu0 %v3564_v57  ;;  %619 = vmatprep.subr.mxu1 %v3566_v58  ;;  %4870 = vst [vmem:[#allocation52_spill] sm:$0xff] %v3602_v56 }
  0x7c   :  { %549 = vmatpush1.msra.mxu0 %v3570_v59  ;;  %620 = vmatpush1.msra.mxu1 %v3572_v60 }
  0x7d   :  { %550 = vmatprep.subr.mxu0 %v3574_v61  ;;  %621 = vmatprep.subr.mxu1 %v3576_v62 }
  0x7e   :  { %285 = vmatprep.mubr.f32.mxu0 %v4711_v0  ;;  %398 = vmatprep.mubr.f32.mxu1 %v4711_v0  ;;  %v3606_v0 = vld [vmem:[#allocation10] sm:$0xff] }
  0x7f   :  { %551 = vmatpush1.msra.mxu0 %v3582_v63  ;;  %622 = vmatpush1.msra.mxu1 %v3584_v1  ;;  %4871 = vst [vmem:[#allocation53_spill] sm:$0xff] %v3606_v0  ;;  %v3610_v1 = vld [vmem:[#allocation10 + $0x10] sm:$0xff] }
  0x80   :  { %286 = vmatmul.mubr.f32.gmra.mxu0 %v92_v2  ;;  %399 = vmatmul.mubr.f32.gmra.mxu1 %v92_v2  ;;  %4872 = vst [vmem:[#allocation54_spill] sm:$0xff] %v3610_v1  ;;  %v4873_v2 = vmov 0.0  }
  0x81   :  { %552 = vmatprep.subr.mxu0 %v3590_v11  ;;  %623 = vmatprep.subr.mxu1 %v3592_v20 }
  0x82   :  { %553 = vmatpush1.msra.mxu0 %v3596_v29  ;;  %624 = vmatpush1.msra.mxu1 %v3598_v38 }
  0x83   :  { %554 = vmatprep.subr.mxu0 %v3600_v47  ;;  %625 = vmatprep.subr.mxu1 %v3602_v56 }
  0x84   :  { %555 = vmatpush1.msra.mxu0 %v3606_v0  ;;  %588 = vmatprep.mubr.f32.mxu0 %v4873_v2 }
  0x85   :  { %626 = vmatpush1.msra.mxu1 %v3610_v1  ;;  %659 = vmatprep.mubr.f32.mxu1 %v4873_v2 }
  0x86   :  { %589 = vmatmul.mubr.f32.vlgmr.msra.gmra.mxu0 %v4873_v2  ;;  %660 = vmatmul.mubr.f32.vlgmr.msra.gmra.mxu1 %v4873_v2 }
  0x87   :  { %2682 = vmatprep.subr.mxu0 %v4873_v2  ;;  %776 = vmatprep.subr.mxu1 %v3410_v3 }
  0x88   :  { %777 = vmatpush1.msra.mxu1 %v3414_v5  ;;  %840 = vmatprep.mubr.f32.mxu1 %v4873_v2 }
  0x89   :  { %778 = vmatprep.subr.mxu1 %v3418_v7  ;;  %2714 = vmatprep.mubr.msk.f32.mxu0 %vm3347_vm0, %v4873_v2 }
  0x8a   :  { %779 = vmatpush1.msra.mxu1 %v3426_v9 }
  0x8b   :  { %780 = vmatprep.subr.mxu1 %v3434_v12 }
  0x8c   :  { %781 = vmatpush1.msra.mxu1 %v3440_v14 }
  0x8d   :  { %782 = vmatprep.subr.mxu1 %v3444_v16 }
  0x8e   :  { %783 = vmatpush1.msra.mxu1 %v3452_v18 }
  0x8f   :  { %784 = vmatprep.subr.mxu1 %v3460_v21 }
  0x90   :  { %785 = vmatpush1.msra.mxu1 %v3466_v23  ;;  %v157_v23 = vld [vmem:[%s4707_s3] sm:$0xf] }
  0x91   :  { %786 = vmatprep.subr.mxu1 %v3470_v25 }
  0x92   :  { %787 = vmatpush1.msra.mxu1 %v3478_v27 }
  0x93   :  { %788 = vmatprep.subr.mxu1 %v3486_v30 }
  0x94   :  { %789 = vmatpush1.msra.mxu1 %v3492_v32 }
  0x95   :  { %790 = vmatprep.subr.mxu1 %v3496_v34 }
  0x96   :  { %791 = vmatpush1.msra.mxu1 %v3504_v36  ;;  %v159_v36 = vlaneseq }
  0x97   :  { %792 = vmatprep.subr.mxu1 %v3512_v39  ;;  %v3715_v39 = vld [vmem:[#allocation11] sm:$0xff] }
  0x98   :  { %793 = vmatpush1.msra.mxu1 %v3518_v41  ;;  %v3711_v41 = vld [vmem:[#allocation11 + $0x8] sm:$0xff]  ;;  %4875 = vst [vmem:[#allocation56_spill] sm:$0xff] %v3715_v39  ;;  %v160_v34 = vshrl.u32 %v159_v36, 7 }
  0x99   :  { %794 = vmatprep.subr.mxu1 %v3522_v43  ;;  %v3707_v43 = vld [vmem:[#allocation11 + $0x10] sm:$0xff]  ;;  %4874 = vst [vmem:[#allocation55_spill] sm:$0xff] %v3711_v41 }
  0x9a   :  { %795 = vmatpush1.msra.mxu1 %v3530_v45  ;;  %v3703_v45 = vld [vmem:[#allocation11 + $0x18] sm:$0xff]  ;;  %v161_v27 = vsub.s32 0, %v160_v34  ;;  %v169_v25 = vsub.s32 2, %v160_v34  ;;  %v165_v16 = vsub.s32 1, %v160_v34  ;;  %v173_v14 = vsub.s32 3, %v160_v34 }
  0x9b   :  { %796 = vmatprep.subr.mxu1 %v3538_v48  ;;  %v3699_v48 = vld [vmem:[#allocation11 + $0x20] sm:$0xff] }
  0x9c   :  { %797 = vmatpush1.msra.mxu1 %v3544_v50  ;;  %v3695_v50 = vld [vmem:[#allocation11 + $0x28] sm:$0xff]  ;;  %v162_v12 = vrot.slane %v157_v23, %v161_v27  ;;  %v166_v7 = vrot.slane %v157_v23, %v165_v16 }
  0x9d   :  { %798 = vmatprep.subr.mxu1 %v3548_v52  ;;  %v3655_v52 = vld [vmem:[#allocation11 + $0x78] sm:$0xff] }
  0x9e   :  { %799 = vmatpush1.msra.mxu1 %v3556_v54  ;;  %2683 = vmatpush3.msra.mxu0 %v3655_v52  ;;  %v3689_v54 = vld [vmem:[#allocation11 + $0x30] sm:$0xff] }
  0x9f   :  { %800 = vmatprep.subr.mxu1 %v3564_v57  ;;  %2684 = vmatprep.subr.mxu0 %v4873_v2  ;;  %v3687_v57 = vld [vmem:[#allocation11 + $0x38] sm:$0xff] }
  0xa0   :  { %801 = vmatpush1.msra.mxu1 %v3570_v59  ;;  %v3659_v59 = vld [vmem:[#allocation11 + $0x70] sm:$0xff] }
  0xa1   :  { %802 = vmatprep.subr.mxu1 %v3574_v61  ;;  %2685 = vmatpush3.msra.mxu0 %v3659_v59  ;;  %v3683_v61 = vld [vmem:[#allocation11 + $0x40] sm:$0xff] }
  0xa2   :  { %803 = vmatpush1.msra.mxu1 %v3582_v63  ;;  %2686 = vmatprep.subr.mxu0 %v4873_v2  ;;  %v3679_v63 = vld [vmem:[#allocation11 + $0x48] sm:$0xff] }
  0xa3   :  { %804 = vmatprep.subr.mxu1 %v3590_v11  ;;  %v3663_v11 = vld [vmem:[#allocation11 + $0x68] sm:$0xff] }
  0xa4   :  { %805 = vmatpush1.msra.mxu1 %v3596_v29  ;;  %2687 = vmatpush3.msra.mxu0 %v3663_v11  ;;  %v3675_v29 = vld [vmem:[#allocation11 + $0x50] sm:$0xff] }
  0xa5   :  { %806 = vmatprep.subr.mxu1 %v3600_v47  ;;  %2688 = vmatprep.subr.mxu0 %v4873_v2  ;;  %v3671_v47 = vld [vmem:[#allocation11 + $0x58] sm:$0xff] }
  0xa6   :  { %807 = vmatpush1.msra.mxu1 %v3606_v0  ;;  %v3667_v0 = vld [vmem:[#allocation11 + $0x60] sm:$0xff] }
  0xa7   :  { %2717 = vmatprep.subr.mxu1 %v4873_v2  ;;  %2689 = vmatpush3.msra.mxu0 %v3667_v0 }
  0xa8   :  { %2690 = vmatprep.subr.mxu0 %v4873_v2 }
  0xa9   :  { %2691 = vmatpush3.msra.mxu0 %v3671_v47 }
  0xaa   :  { %2692 = vmatprep.subr.mxu0 %v4873_v2 }
  0xab   :  { %2693 = vmatpush3.msra.mxu0 %v3675_v29 }
  0xac   :  { %2694 = vmatprep.subr.mxu0 %v4873_v2 }
  0xad   :  { %2695 = vmatpush3.msra.mxu0 %v3679_v63 }
  0xae   :  { %2696 = vmatprep.subr.mxu0 %v4873_v2 }
  0xaf   :  { %2697 = vmatpush3.msra.mxu0 %v3683_v61 }
  0xb0   :  { %2698 = vmatprep.subr.mxu0 %v4873_v2 }
  0xb1   :  { %2699 = vmatpush3.msra.mxu0 %v3687_v57 }
  0xb2   :  { %2700 = vmatprep.subr.mxu0 %v4873_v2 }
  0xb3   :  { %2701 = vmatpush3.msra.mxu0 %v3689_v54 }
  0xb4   :  { %2702 = vmatprep.subr.mxu0 %v4873_v2 }
  0xb5   :  { %2703 = vmatpush3.msra.mxu0 %v3695_v50 }
  0xb6   :  { %2704 = vmatprep.subr.mxu0 %v4873_v2 }
  0xb7   :  { %2705 = vmatpush3.msra.mxu0 %v3699_v48 }
  0xb8   :  { %2706 = vmatprep.subr.mxu0 %v4873_v2 }
  0xb9   :  { %2707 = vmatpush3.msra.mxu0 %v3703_v45 }
  0xba   :  { %2708 = vmatprep.subr.mxu0 %v4873_v2 }
  0xbb   :  { %2709 = vmatpush3.msra.mxu0 %v3707_v43 }
  0xbc   :  { %2710 = vmatprep.subr.mxu0 %v4873_v2 }
  0xbd   :  { %2711 = vmatpush3.msra.mxu0 %v3711_v41 }
  0xbe   :  { %2712 = vmatprep.subr.mxu0 %v4873_v2 }
  0xbf   :  { %2713 = vmatpush3.msra.mxu0 %v3715_v39  ;;  %v3734_v39 = vrot.slane %v157_v23, %v173_v14 }
  0xc0   :  { %847 = vmatprep.subr.mxu0 %v3412_v4  ;;  %v3732_v4 = vrot.slane %v157_v23, %v169_v25 }
 0x116   :  { %v3721_v32 = vpop.f32.mrf.mxu0  ;;  %v3723_v30 = vpop.f32.mrf.mxu1 }
 0x118   :  { %v3728_v21 = vpop.f32.mrf.mxu0  ;;  %v3730_v18 = vpop.f32.mrf.mxu1 }
 0x11c   :  { %v251_v36 = vpop.f32.mrf.mxu0  ;;  %v364_v9 = vpop.f32.mrf.mxu1 }
 0x11d   :  { %v3736_v5 = vadd.f32 %v251_v36, %v162_v12  ;;  %v3739_v3 = vadd.f32 %v364_v9, %v3732_v4 }
 0x11e   :  { %v253_v1 = vpop.f32.mrf.mxu0  ;;  %v366_v41 = vpop.f32.mrf.mxu1 }
 0x11f   :  { %4876 = vst [vmem:[#allocation57_spill] sm:$0xff] %v3736_v5  ;;  %4877 = vst [vmem:[#allocation58_spill] sm:$0xff] %v3739_v3  ;;  %v3741_v56 = vadd.f32 %v253_v1, %v166_v7  ;;  %v3744_v38 = vadd.f32 %v366_v41, %v3734_v39 }
 0x121   :  { %4878 = vst [vmem:[#allocation59_spill] sm:$0xff] %v3741_v56  ;;  %4879 = vst [vmem:[#allocation60_spill] sm:$0xff] %v3744_v38 }
 0x122   :  { %v257_v27 = vpop.f32.mrf.mxu0  ;;  %v370_v25 = vpop.f32.mrf.mxu1 }
 0x123   :  { %v3746_v34 = vadd.f32 %v257_v27, %v162_v12  ;;  %v3749_v16 = vadd.f32 %v370_v25, %v3732_v4 }
 0x124   :  { %v259_v14 = vpop.f32.mrf.mxu0  ;;  %v372_v23 = vpop.f32.mrf.mxu1 }
 0x125   :  { %4880 = vst [vmem:[#allocation61_spill] sm:$0xff] %v3746_v34  ;;  %4881 = vst [vmem:[#allocation62_spill] sm:$0xff] %v3749_v16  ;;  %v3751_v36 = vadd.f32 %v259_v14, %v166_v7  ;;  %v3754_v9 = vadd.f32 %v372_v23, %v3734_v39 }
 0x127   :  { %4882 = vst [vmem:[#allocation63_spill] sm:$0xff] %v3751_v36  ;;  %4883 = vst [vmem:[#allocation64_spill] sm:$0xff] %v3754_v9 }
 0x128   :  { %v263_v3 = vpop.f32.mrf.mxu0  ;;  %v376_v1 = vpop.f32.mrf.mxu1 }
 0x129   :  { %v3756_v5 = vadd.f32 %v263_v3, %v162_v12  ;;  %v3759_v41 = vadd.f32 %v376_v1, %v3732_v4 }
 0x12a   :  { %v265_v38 = vpop.f32.mrf.mxu0  ;;  %v378_v27 = vpop.f32.mrf.mxu1 }
 0x12b   :  { %4884 = vst [vmem:[#allocation65_spill] sm:$0xff] %v3756_v5  ;;  %4885 = vst [vmem:[#allocation66_spill] sm:$0xff] %v3759_v41  ;;  %v3761_v34 = vadd.f32 %v265_v38, %v166_v7  ;;  %v3764_v25 = vadd.f32 %v378_v27, %v3734_v39 }
 0x12d   :  { %4886 = vst [vmem:[#allocation67_spill] sm:$0xff] %v3761_v34  ;;  %4887 = vst [vmem:[#allocation68_spill] sm:$0xff] %v3764_v25 }
 0x12e   :  { %v269_v16 = vpop.f32.mrf.mxu0  ;;  %v382_v14 = vpop.f32.mrf.mxu1 }
 0x12f   :  { %v3766_v36 = vadd.f32 %v269_v16, %v162_v12  ;;  %v3769_v23 = vadd.f32 %v382_v14, %v3732_v4 }
 0x130   :  { %v271_v9 = vpop.f32.mrf.mxu0  ;;  %v384_v3 = vpop.f32.mrf.mxu1 }
 0x131   :  { %4888 = vst [vmem:[#allocation69_spill] sm:$0xff] %v3766_v36  ;;  %4889 = vst [vmem:[#allocation70_spill] sm:$0xff] %v3769_v23  ;;  %v3771_v5 = vadd.f32 %v271_v9, %v166_v7  ;;  %v3774_v1 = vadd.f32 %v384_v3, %v3734_v39 }
 0x133   :  { %4890 = vst [vmem:[#allocation71_spill] sm:$0xff] %v3771_v5  ;;  %4891 = vst [vmem:[#allocation72_spill] sm:$0xff] %v3774_v1 }
 0x134   :  { %v275_v41 = vpop.f32.mrf.mxu0  ;;  %v388_v38 = vpop.f32.mrf.mxu1 }
 0x135   :  { %v3776_v34 = vadd.f32 %v275_v41, %v162_v12  ;;  %v3779_v27 = vadd.f32 %v388_v38, %v3732_v4 }
 0x136   :  { %v277_v25 = vpop.f32.mrf.mxu0  ;;  %v390_v16 = vpop.f32.mrf.mxu1 }
 0x137   :  { %4892 = vst [vmem:[#allocation73_spill] sm:$0xff] %v3776_v34  ;;  %4893 = vst [vmem:[#allocation74_spill] sm:$0xff] %v3779_v27  ;;  %v3781_v36 = vadd.f32 %v277_v25, %v166_v7  ;;  %v3784_v14 = vadd.f32 %v390_v16, %v3734_v39 }
 0x139   :  { %4894 = vst [vmem:[#allocation75_spill] sm:$0xff] %v3781_v36  ;;  %4895 = vst [vmem:[#allocation76_spill] sm:$0xff] %v3784_v14 }
 0x13a   :  { %v281_v23 = vpop.f32.mrf.mxu0  ;;  %v394_v9 = vpop.f32.mrf.mxu1 }
 0x13b   :  { %v3786_v5 = vadd.f32 %v281_v23, %v162_v12  ;;  %v3789_v3 = vadd.f32 %v394_v9, %v3732_v4 }
 0x13c   :  { %v283_v1 = vpop.f32.mrf.mxu0  ;;  %v396_v41 = vpop.f32.mrf.mxu1 }
 0x13d   :  { %4896 = vst [vmem:[#allocation77_spill] sm:$0xff] %v3786_v5  ;;  %4897 = vst [vmem:[#allocation78_spill] sm:$0xff] %v3789_v3  ;;  %v3791_v34 = vadd.f32 %v283_v1, %v166_v7  ;;  %v3794_v38 = vadd.f32 %v396_v41, %v3734_v39  ;;  %v246_v1 = vadd.f32 %v3721_v32, %v162_v12 }
 0x13e   :  { %v248_v41 = vadd.f32 %v3728_v21, %v166_v7 }
 0x13f   :  { %4898 = vst [vmem:[#allocation79_spill] sm:$0xff] %v3791_v34  ;;  %4899 = vst [vmem:[#allocation80_spill] sm:$0xff] %v3794_v38 }
 0x140   :  { %v287_v27 = vpop.f32.mrf.mxu0  ;;  %v400_v25 = vpop.f32.mrf.mxu1 }
 0x141   :  { %v3796_v36 = vadd.f32 %v287_v27, %v162_v12  ;;  %v3799_v16 = vadd.f32 %v400_v25, %v3732_v4 }
 0x142   :  { %v289_v14 = vpop.f32.mrf.mxu0  ;;  %v402_v23 = vpop.f32.mrf.mxu1 }
 0x143   :  { %4900 = vst [vmem:[#allocation81_spill] sm:$0xff] %v3796_v36  ;;  %4901 = vst [vmem:[#allocation82_spill] sm:$0xff] %v3799_v16  ;;  %v3801_v5 = vadd.f32 %v289_v14, %v166_v7  ;;  %v3804_v9 = vadd.f32 %v402_v23, %v3734_v39  ;;  %v361_v14 = vadd.f32 %v3730_v18, %v3734_v39 }
 0x144   :  { %v359_v23 = vadd.f32 %v3723_v30, %v3732_v4 }
 0x145   :  { %4902 = vst [vmem:[#allocation83_spill] sm:$0xff] %v3801_v5  ;;  %4903 = vst [vmem:[#allocation84_spill] sm:$0xff] %v3804_v9 }
 0x146   :  { %v590_v3 = vpop.f32.mrf.mxu0  ;;  %v661_v36 = vpop.f32.mrf.mxu1 }
 0x147   :  { %v666_v38 = vadd.f32 %v590_v3, %v246_v1  ;;  %v668_v9 = vadd.f32 %v661_v36, %v359_v23  ;;  %v4904_v36 = vld [vmem:[#allocation47_spill] sm:$0xff]  ;;  %v4909_v23 = vld [vmem:[#allocation18_spill] sm:$0xff] }
 0x148   :  { %v592_v34 = vpop.f32.mrf.mxu0  ;;  %v663_v16 = vpop.f32.mrf.mxu1 }
 0x149   :  { %v2521_v56 = vmul.f32 -1.442695, %v666_v38  ;;  %v667_v27 = vadd.f32 %v592_v34, %v248_v41  ;;  %v669_v5 = vadd.f32 %v663_v16, %v361_v14  ;;  %v4908_v14 = vld [vmem:[#allocation54_spill] sm:$0xff] }
 0x14b   :  { %2973 = vpow2.f32 %v2521_v56  ;;  %v2522_v25 = vmul.f32 -1.442695, %v667_v27  ;;  %v2523_v12 = vmul.f32 -1.442695, %v669_v5  ;;  %v4906_v27 = vld [vmem:[#allocation52_spill] sm:$0xff] }
 0x14d   :  { %2975 = vpow2.f32 %v2522_v25  ;;  %v4907_v25 = vld [vmem:[#allocation55_spill] sm:$0xff] }
 0x14e   :  { %2977 = vpow2.f32 %v2523_v12  ;;  %v4910_v12 = vld [vmem:[#allocation20_spill] sm:$0xff] }
 0x158   :  { %v2974_v32 = vpop.eup %2973 }
 0x159   :  { %v673_v7 = vadd.f32 1.0, %v2974_v32  ;;  %v4911_v32 = vld [vmem:[#allocation56_spill] sm:$0xff] }
 0x15a   :  { %v2976_v21 = vpop.eup %2975 }
 0x15b   :  { %2979 = vrcp.f32 %v673_v7  ;;  %v679_v34 = vadd.f32 1.0, %v2976_v21  ;;  %v2978_v56 = vpop.eup %2977  ;;  %v4912_v7 = vld [vmem:[#allocation21_spill] sm:$0xff]  ;;  %v4913_v21 = vld [vmem:[#allocation22_spill] sm:$0xff] }
 0x15c   :  { %2981 = vtanh.f32 %v668_v9  ;;  %v686_v41 = vadd.f32 1.0, %v2978_v56  ;;  %v4905_v9 = vld [vmem:[#allocation50_spill] sm:$0xff]  ;;  %v4915_v56 = vld [vmem:[#allocation19_spill] sm:$0xff] }
 0x15d   :  { %2983 = vrcp.f32 %v679_v34  ;;  %v4914_v34 = vld [vmem:[#allocation23_spill] sm:$0xff] }
 0x15e   :  { %2985 = vrcp.f32 %v686_v41  ;;  %v4919_v41 = vld [vmem:[#allocation27_spill] sm:$0xff] }
 0x168   :  { %v2980_v3 = vpop.eup %2979 }
 0x169   :  { %v2982_v38 = vpop.eup %2981 }
 0x16a   :  { %v2984_v1 = vpop.eup %2983  ;;  %v690_v39 = vmul.f32 %v2982_v38, %v2980_v3  ;;  %v4916_v3 = vld [vmem:[#allocation24_spill] sm:$0xff]  ;;  %v4917_v38 = vld [vmem:[#allocation25_spill] sm:$0xff] }
 0x16b   :  { %v689_v18 = vmul.f32 0.0, %v2984_v1  ;;  %v2986_v4 = vpop.eup %2985  ;;  %v4918_v1 = vld [vmem:[#allocation26_spill] sm:$0xff] }
 0x16d   :  { %v3812_v16 = vadd.f32 %v690_v39, %v689_v18  ;;  %v4920_v18 = vld [vmem:[#allocation28_spill] sm:$0xff]  ;;  %v4921_v39 = vld [vmem:[#allocation29_spill] sm:$0xff] }
 0x16f   :  { %2987 = vtanh.f32 %v3812_v16 }
 0x17c   :  { %v2988_v5 = vpop.eup %2987 }
 0x17d   :  { %v3815_v30 = vmul.f32 %v2988_v5, %v2986_v4  ;;  %v4922_v4 = vld [vmem:[#allocation30_spill] sm:$0xff]  ;;  %v4923_v5 = vld [vmem:[#allocation31_spill] sm:$0xff] }
 0x17f   :  { %2715 = vmatmul.mubr.f32.vlgmr.msra.gmra.mxu0 %v3815_v30  ;;  %841 = vmatmul.mubr.f32.vlgmr.msra.gmra.mxu1 %v3815_v30 }
 0x180   :  { %848 = vmatpush1.msra.mxu0 %v3416_v6  ;;  %911 = vmatprep.mubr.f32.mxu0 %v4873_v2 }
 0x181   :  { %849 = vmatprep.subr.mxu0 %v3420_v8  ;;  %2718 = vmatpush3.msra.mxu1 %v3655_v52 }
 0x182   :  { %850 = vmatpush1.msra.mxu0 %v3428_v10  ;;  %2719 = vmatprep.subr.mxu1 %v4873_v2 }
 0x183   :  { %851 = vmatprep.subr.mxu0 %v3436_v13  ;;  %2720 = vmatpush3.msra.mxu1 %v3659_v59 }
 0x184   :  { %852 = vmatpush1.msra.mxu0 %v3442_v15  ;;  %2721 = vmatprep.subr.mxu1 %v4873_v2 }
 0x185   :  { %853 = vmatprep.subr.mxu0 %v3446_v17  ;;  %2722 = vmatpush3.msra.mxu1 %v3663_v11 }
 0x186   :  { %854 = vmatpush1.msra.mxu0 %v3454_v19  ;;  %2723 = vmatprep.subr.mxu1 %v4873_v2 }
 0x187   :  { %855 = vmatprep.subr.mxu0 %v3462_v22  ;;  %2724 = vmatpush3.msra.mxu1 %v3667_v0 }
 0x188   :  { %856 = vmatpush1.msra.mxu0 %v3468_v24  ;;  %2725 = vmatprep.subr.mxu1 %v4873_v2 }
 0x189   :  { %857 = vmatprep.subr.mxu0 %v3472_v26  ;;  %2726 = vmatpush3.msra.mxu1 %v3671_v47 }
 0x18a   :  { %858 = vmatpush1.msra.mxu0 %v3480_v28  ;;  %2727 = vmatprep.subr.mxu1 %v4873_v2 }
 0x18b   :  { %859 = vmatprep.subr.mxu0 %v3488_v31  ;;  %2728 = vmatpush3.msra.mxu1 %v3675_v29 }
 0x18c   :  { %860 = vmatpush1.msra.mxu0 %v3494_v33  ;;  %2729 = vmatprep.subr.mxu1 %v4873_v2 }
 0x18d   :  { %861 = vmatprep.subr.mxu0 %v3498_v35  ;;  %2730 = vmatpush3.msra.mxu1 %v3679_v63 }
 0x18e   :  { %862 = vmatpush1.msra.mxu0 %v3506_v37  ;;  %2731 = vmatprep.subr.mxu1 %v4873_v2 }
 0x18f   :  { %863 = vmatprep.subr.mxu0 %v3514_v40  ;;  %2732 = vmatpush3.msra.mxu1 %v3683_v61 }
 0x190   :  { %864 = vmatpush1.msra.mxu0 %v3520_v42  ;;  %2733 = vmatprep.subr.mxu1 %v4873_v2 }
 0x191   :  { %865 = vmatprep.subr.mxu0 %v3524_v44  ;;  %2734 = vmatpush3.msra.mxu1 %v3687_v57 }
 0x192   :  { %866 = vmatpush1.msra.mxu0 %v3532_v46  ;;  %2735 = vmatprep.subr.mxu1 %v4873_v2 }
 0x193   :  { %867 = vmatprep.subr.mxu0 %v3540_v49  ;;  %2736 = vmatpush3.msra.mxu1 %v3689_v54 }
 0x194   :  { %868 = vmatpush1.msra.mxu0 %v3546_v51  ;;  %2737 = vmatprep.subr.mxu1 %v4873_v2 }
 0x195   :  { %869 = vmatprep.subr.mxu0 %v3550_v53  ;;  %2738 = vmatpush3.msra.mxu1 %v3695_v50 }
 0x196   :  { %870 = vmatpush1.msra.mxu0 %v3558_v55  ;;  %2739 = vmatprep.subr.mxu1 %v4873_v2 }
 0x197   :  { %871 = vmatprep.subr.mxu0 %v3566_v58  ;;  %2740 = vmatpush3.msra.mxu1 %v3699_v48 }
 0x198   :  { %872 = vmatpush1.msra.mxu0 %v3572_v60  ;;  %2741 = vmatprep.subr.mxu1 %v4873_v2 }
 0x199   :  { %873 = vmatprep.subr.mxu0 %v3576_v62  ;;  %2742 = vmatpush3.msra.mxu1 %v3703_v45 }
 0x19a   :  { %874 = vmatpush1.msra.mxu0 %v4904_v36  ;;  %2743 = vmatprep.subr.mxu1 %v4873_v2 }
 0x19b   :  { %875 = vmatprep.subr.mxu0 %v3592_v20  ;;  %2744 = vmatpush3.msra.mxu1 %v3707_v43 }
 0x19c   :  { %876 = vmatpush1.msra.mxu0 %v4905_v9  ;;  %2745 = vmatprep.subr.mxu1 %v4873_v2 }
 0x19d   :  { %877 = vmatprep.subr.mxu0 %v4906_v27  ;;  %2746 = vmatpush3.msra.mxu1 %v4907_v25  ;;  %v4945_v25 = vld [vmem:[#allocation58_spill] sm:$0xff] }
 0x19e   :  { %878 = vmatpush1.msra.mxu0 %v4908_v14  ;;  %2747 = vmatprep.subr.mxu1 %v4873_v2 }
 0x19f   :  { %912 = vmatmul.mubr.f32.vlgmr.msra.gmra.mxu0 %v3815_v30  ;;  %1023 = vmatprep.subr.mxu0 %v4909_v23  ;;  %v4924_v30 = vld [vmem:[#allocation32_spill] sm:$0xff]  ;;  %v4925_v23 = vld [vmem:[#allocation33_spill] sm:$0xff] }
 0x1a0   :  { %1024 = vmatpush1.msra.mxu0 %v4910_v12  ;;  %2748 = vmatpush3.msra.mxu1 %v4911_v32  ;;  %v4926_v12 = vld [vmem:[#allocation34_spill] sm:$0xff] }
 0x1a1   :  { %1025 = vmatprep.subr.mxu0 %v4912_v7  ;;  %2749 = vmatprep.mubr.msk.f32.mxu1 %vm3347_vm0, %v4873_v2  ;;  %v4927_v7 = vld [vmem:[#allocation35_spill] sm:$0xff] }
 0x1a2   :  { %1026 = vmatpush1.msra.mxu0 %v4913_v21  ;;  %1087 = vmatprep.mubr.f32.mxu0 %v4873_v2  ;;  %v4928_v21 = vld [vmem:[#allocation36_spill] sm:$0xff] }
 0x1a3   :  { %1027 = vmatprep.subr.mxu0 %v4914_v34  ;;  %1094 = vmatprep.subr.mxu1 %v4915_v56  ;;  %v4929_v34 = vld [vmem:[#allocation37_spill] sm:$0xff]  ;;  %v4930_v56 = vld [vmem:[#allocation38_spill] sm:$0xff] }
 0x1a4   :  { %1028 = vmatpush1.msra.mxu0 %v4916_v3  ;;  %v4931_v3 = vld [vmem:[#allocation39_spill] sm:$0xff] }
 0x1a5   :  { %1029 = vmatprep.subr.mxu0 %v4917_v38  ;;  %v4932_v38 = vld [vmem:[#allocation40_spill] sm:$0xff] }
 0x1a6   :  { %1030 = vmatpush1.msra.mxu0 %v4918_v1  ;;  %v4933_v1 = vld [vmem:[#allocation41_spill] sm:$0xff] }
 0x1a7   :  { %1031 = vmatprep.subr.mxu0 %v4919_v41  ;;  %v4934_v41 = vld [vmem:[#allocation42_spill] sm:$0xff] }
 0x1a8   :  { %1032 = vmatpush1.msra.mxu0 %v4920_v18  ;;  %v4935_v18 = vld [vmem:[#allocation43_spill] sm:$0xff] }
 0x1a9   :  { %1033 = vmatprep.subr.mxu0 %v4921_v39  ;;  %v4936_v39 = vld [vmem:[#allocation44_spill] sm:$0xff] }
 0x1aa   :  { %1034 = vmatpush1.msra.mxu0 %v4922_v4  ;;  %v4937_v4 = vld [vmem:[#allocation45_spill] sm:$0xff] }
 0x1ab   :  { %1035 = vmatprep.subr.mxu0 %v4923_v5  ;;  %v4938_v5 = vld [vmem:[#allocation46_spill] sm:$0xff] }
 0x1ac   :  { %1036 = vmatpush1.msra.mxu0 %v4924_v30  ;;  %v4939_v30 = vld [vmem:[#allocation48_spill] sm:$0xff] }
 0x1ad   :  { %1037 = vmatprep.subr.mxu0 %v4925_v23  ;;  %v4940_v23 = vld [vmem:[#allocation49_spill] sm:$0xff] }
 0x1ae   :  { %1038 = vmatpush1.msra.mxu0 %v4926_v12  ;;  %v4941_v12 = vld [vmem:[#allocation51_spill] sm:$0xff] }
 0x1af   :  { %1039 = vmatprep.subr.mxu0 %v4927_v7 }
 0x1b0   :  { %1040 = vmatpush1.msra.mxu0 %v4928_v21 }
 0x1b1   :  { %1041 = vmatprep.subr.mxu0 %v4929_v34 }
 0x1b2   :  { %1042 = vmatpush1.msra.mxu0 %v4930_v56 }
 0x1b3   :  { %1043 = vmatprep.subr.mxu0 %v4931_v3  ;;  %v4942_v3 = vld [vmem:[#allocation53_spill] sm:$0xff] }
 0x1b4   :  { %1044 = vmatpush1.msra.mxu0 %v4932_v38  ;;  %v4944_v38 = vld [vmem:[#allocation57_spill] sm:$0xff] }
 0x1b5   :  { %1045 = vmatprep.subr.mxu0 %v4933_v1 }
 0x1b6   :  { %1046 = vmatpush1.msra.mxu0 %v4934_v41 }
 0x1b7   :  { %1047 = vmatprep.subr.mxu0 %v4935_v18  ;;  %v3923_v18 = vld [vmem:[%s4709_s5] ss:$0 sm:$0xff] }
 0x1b8   :  { %1048 = vmatpush1.msra.mxu0 %v4936_v39 }
 0x1b9   :  { %1049 = vmatprep.subr.mxu0 %v4937_v4 }
 0x1ba   :  { %1050 = vmatpush1.msra.mxu0 %v4938_v5 }
 0x1bb   :  { %1051 = vmatprep.subr.mxu0 %v4939_v30  ;;  %v4943_v30 = vld [vmem:[#allocation59_spill] sm:$0xff] }
 0x1bc   :  { %1052 = vmatpush1.msra.mxu0 %v4940_v23 }
 0x1bd   :  { %1053 = vmatprep.subr.mxu0 %v4941_v12 }
 0x1be   :  { %1054 = vmatpush1.msra.mxu0 %v4942_v3 }
 0x1bf   :  { %2752 = vmatprep.subr.mxu0 %v4873_v2 }
 0x23f   :  { %v766_v39 = vpop.f32.mrf.mxu0  ;;  %v842_v41 = vpop.f32.mrf.mxu1 }
 0x240   :  { %v767_v4 = vadd.f32 %v3923_v18, %v766_v39  ;;  %v918_v12 = vadd.f32 %v842_v41, %v4944_v38 }
 0x241   :  { %v2716_v5 = vpop.f32.mrf.mxu0  ;;  %v844_v1 = vpop.f32.mrf.mxu1 }
 0x242   :  { %770 = vst [vmem:[#allocation13] sm:$0xff] %v767_v4  ;;  %v919_v23 = vadd.f32 %v844_v1, %v4943_v30  ;;  %v2525_v3 = vmul.f32 -1.442695, %v918_v12  ;;  %v4946_v4 = vld [vmem:[#allocation60_spill] sm:$0xff]  ;;  %v4979_v12 = vld [vmem:[#allocation46_spill] sm:$0xff] }
 0x244   :  { %v2526_v56 = vmul.f32 -1.442695, %v919_v23 }
 0x246   :  { %2989 = vpow2.f32 %v2526_v56 }
 0x247   :  { %2991 = vpow2.f32 %v2525_v3 }
 0x253   :  { %v2990_v34 = vpop.eup %2989 }
 0x254   :  { %v2992_v21 = vpop.eup %2991  ;;  %v931_v7 = vadd.f32 1.0, %v2990_v34 }
 0x255   :  { %v925_v32 = vadd.f32 1.0, %v2992_v21 }
 0x256   :  { %2993 = vrcp.f32 %v931_v7  ;;  %v4978_v7 = vld [vmem:[#allocation45_spill] sm:$0xff] }
 0x257   :  { %2995 = vrcp.f32 %v925_v32  ;;  %v4977_v32 = vld [vmem:[#allocation44_spill] sm:$0xff] }
 0x25f   :  { %v913_v14 = vpop.f32.mrf.mxu0 }
 0x260   :  { %v920_v27 = vadd.f32 %v913_v14, %v4945_v25 }
 0x261   :  { %v915_v39 = vpop.f32.mrf.mxu0 }
 0x262   :  { %2997 = vtanh.f32 %v920_v27  ;;  %v921_v5 = vadd.f32 %v915_v39, %v4946_v4  ;;  %v4980_v39 = vld [vmem:[#allocation48_spill] sm:$0xff]  ;;  %v4981_v4 = vld [vmem:[#allocation49_spill] sm:$0xff] }
 0x263   :  { %v2994_v38 = vpop.eup %2993 }
 0x264   :  { %v2527_v1 = vmul.f32 -1.442695, %v921_v5  ;;  %v2996_v41 = vpop.eup %2995  ;;  %v941_v56 = vmul.f32 %v2994_v38, %v3812_v16  ;;  %v4974_v16 = vld [vmem:[#allocation41_spill] sm:$0xff]  ;;  %v4982_v5 = vld [vmem:[#allocation51_spill] sm:$0xff] }
 0x266   :  { %2999 = vpow2.f32 %v2527_v1  ;;  %v4983_v1 = vld [vmem:[#allocation53_spill] sm:$0xff] }
 0x26f   :  { %v2998_v30 = vpop.eup %2997 }
 0x270   :  { %v942_v3 = vmul.f32 %v2998_v30, %v2996_v41 }
 0x272   :  { %v3931_v23 = vadd.f32 %v942_v3, %v941_v56 }
 0x273   :  { %v3000_v21 = vpop.eup %2999 }
 0x274   :  { %v938_v34 = vadd.f32 1.0, %v3000_v21  ;;  %3001 = vtanh.f32 %v3931_v23  ;;  %v4984_v21 = vld [vmem:[#allocation63_spill] sm:$0xff] }
 0x276   :  { %3003 = vrcp.f32 %v938_v34 }
 0x281   :  { %v3002_v25 = vpop.eup %3001 }
 0x283   :  { %v3004_v14 = vpop.eup %3003 }
 0x284   :  { %v3934_v27 = vmul.f32 %v3004_v14, %v3002_v25  ;;  %v4985_v25 = vld [vmem:[#allocation61_spill] sm:$0xff] }
 0x286   :  { %2750 = vmatmul.mubr.f32.vlgmr.msra.gmra.mxu1 %v3934_v27  ;;  %1088 = vmatmul.mubr.f32.vlgmr.msra.gmra.mxu0 %v3934_v27 }
 0x287   :  { %1095 = vmatpush1.msra.mxu1 %v3416_v6  ;;  %1158 = vmatprep.mubr.f32.mxu1 %v4873_v2  ;;  %v4947_v6 = vld [vmem:[#allocation52_spill] sm:$0xff] }
 0x288   :  { %1096 = vmatprep.subr.mxu1 %v3420_v8  ;;  %2753 = vmatpush3.msra.mxu0 %v3655_v52  ;;  %v4948_v8 = vld [vmem:[#allocation55_spill] sm:$0xff] }
 0x289   :  { %1097 = vmatpush1.msra.mxu1 %v3428_v10  ;;  %2754 = vmatprep.subr.mxu0 %v4873_v2  ;;  %v4949_v10 = vld [vmem:[#allocation54_spill] sm:$0xff] }
 0x28a   :  { %1098 = vmatprep.subr.mxu1 %v3436_v13  ;;  %2755 = vmatpush3.msra.mxu0 %v3659_v59  ;;  %v4001_v13 = vld [vmem:[#allocation10 + $0x1e8] sm:$0xff] }
 0x28b   :  { %1099 = vmatpush1.msra.mxu1 %v3442_v15  ;;  %2756 = vmatprep.subr.mxu0 %v4873_v2  ;;  %4950 = vst [vmem:[#allocation47_spill] sm:$0xff] %v4001_v13  ;;  %v4004_v15 = vld [vmem:[#allocation10 + $0x1e0] sm:$0xff] }
 0x28c   :  { %1100 = vmatprep.subr.mxu1 %v3446_v17  ;;  %2757 = vmatpush3.msra.mxu0 %v3663_v11  ;;  %4951 = vst [vmem:[#allocation50_spill] sm:$0xff] %v4004_v15  ;;  %v4952_v17 = vld [vmem:[#allocation56_spill] sm:$0xff] }
 0x28d   :  { %1101 = vmatpush1.msra.mxu1 %v3454_v19  ;;  %2758 = vmatprep.subr.mxu0 %v4873_v2  ;;  %v4008_v19 = vld [vmem:[#allocation10 + $0x1c8] sm:$0xff] }
 0x28e   :  { %1102 = vmatprep.subr.mxu1 %v3462_v22  ;;  %2759 = vmatpush3.msra.mxu0 %v3667_v0  ;;  %4953 = vst [vmem:[#allocation18_spill] sm:$0xff] %v4008_v19  ;;  %v4013_v22 = vld [vmem:[#allocation10 + $0x1c0] sm:$0xff] }
 0x28f   :  { %1103 = vmatpush1.msra.mxu1 %v3468_v24  ;;  %2760 = vmatprep.subr.mxu0 %v4873_v2  ;;  %4954 = vst [vmem:[#allocation20_spill] sm:$0xff] %v4013_v22  ;;  %v4017_v24 = vld [vmem:[#allocation10 + $0x1a8] sm:$0xff] }
 0x290   :  { %1104 = vmatprep.subr.mxu1 %v3472_v26  ;;  %2761 = vmatpush3.msra.mxu0 %v3671_v47  ;;  %4955 = vst [vmem:[#allocation21_spill] sm:$0xff] %v4017_v24  ;;  %v4020_v26 = vld [vmem:[#allocation10 + $0x1f8] sm:$0xff] }
 0x291   :  { %1105 = vmatpush1.msra.mxu1 %v3480_v28  ;;  %2762 = vmatprep.subr.mxu0 %v4873_v2  ;;  %4956 = vst [vmem:[#allocation22_spill] sm:$0xff] %v4020_v26  ;;  %v4023_v28 = vld [vmem:[#allocation10 + $0x1a0] sm:$0xff] }
 0x292   :  { %1106 = vmatprep.subr.mxu1 %v3488_v31  ;;  %2763 = vmatpush3.msra.mxu0 %v3675_v29  ;;  %4957 = vst [vmem:[#allocation23_spill] sm:$0xff] %v4023_v28  ;;  %v4026_v31 = vld [vmem:[#allocation10 + $0x188] sm:$0xff] }
 0x293   :  { %1107 = vmatpush1.msra.mxu1 %v3494_v33  ;;  %2764 = vmatprep.subr.mxu0 %v4873_v2  ;;  %4958 = vst [vmem:[#allocation19_spill] sm:$0xff] %v4026_v31  ;;  %v4029_v33 = vld [vmem:[#allocation10 + $0x180] sm:$0xff] }
 0x294   :  { %1108 = vmatprep.subr.mxu1 %v3498_v35  ;;  %2765 = vmatpush3.msra.mxu0 %v3679_v63  ;;  %4959 = vst [vmem:[#allocation24_spill] sm:$0xff] %v4029_v33  ;;  %v4032_v35 = vld [vmem:[#allocation10 + $0x168] sm:$0xff] }
 0x295   :  { %1109 = vmatpush1.msra.mxu1 %v3506_v37  ;;  %2766 = vmatprep.subr.mxu0 %v4873_v2  ;;  %4960 = vst [vmem:[#allocation25_spill] sm:$0xff] %v4032_v35  ;;  %v4035_v37 = vld [vmem:[#allocation10 + $0x160] sm:$0xff] }
 0x296   :  { %1110 = vmatprep.subr.mxu1 %v3514_v40  ;;  %2767 = vmatpush3.msra.mxu0 %v3683_v61  ;;  %4961 = vst [vmem:[#allocation26_spill] sm:$0xff] %v4035_v37  ;;  %v4038_v40 = vld [vmem:[#allocation10 + $0x148] sm:$0xff] }
 0x297   :  { %1111 = vmatpush1.msra.mxu1 %v3520_v42  ;;  %2768 = vmatprep.subr.mxu0 %v4873_v2  ;;  %4962 = vst [vmem:[#allocation27_spill] sm:$0xff] %v4038_v40  ;;  %v4041_v42 = vld [vmem:[#allocation10 + $0x140] sm:$0xff] }
 0x298   :  { %1112 = vmatprep.subr.mxu1 %v3524_v44  ;;  %2769 = vmatpush3.msra.mxu0 %v3687_v57  ;;  %4963 = vst [vmem:[#allocation28_spill] sm:$0xff] %v4041_v42  ;;  %v4044_v44 = vld [vmem:[#allocation10 + $0x128] sm:$0xff] }
 0x299   :  { %1113 = vmatpush1.msra.mxu1 %v3532_v46  ;;  %2770 = vmatprep.subr.mxu0 %v4873_v2  ;;  %4964 = vst [vmem:[#allocation29_spill] sm:$0xff] %v4044_v44  ;;  %v4047_v46 = vld [vmem:[#allocation10 + $0x120] sm:$0xff] }
 0x29a   :  { %1114 = vmatprep.subr.mxu1 %v3540_v49  ;;  %2771 = vmatpush3.msra.mxu0 %v3689_v54  ;;  %4965 = vst [vmem:[#allocation30_spill] sm:$0xff] %v4047_v46  ;;  %v4050_v49 = vld [vmem:[#allocation10 + $0x108] sm:$0xff] }
 0x29b   :  { %1115 = vmatpush1.msra.mxu1 %v3546_v51  ;;  %2772 = vmatprep.subr.mxu0 %v4873_v2  ;;  %4966 = vst [vmem:[#allocation31_spill] sm:$0xff] %v4050_v49  ;;  %v4053_v51 = vld [vmem:[#allocation10 + $0x100] sm:$0xff] }
 0x29c   :  { %1116 = vmatprep.subr.mxu1 %v3550_v53  ;;  %2773 = vmatpush3.msra.mxu0 %v3695_v50  ;;  %4967 = vst [vmem:[#allocation32_spill] sm:$0xff] %v4053_v51  ;;  %v4968_v53 = vld [vmem:[#allocation35_spill] sm:$0xff] }
 0x29d   :  { %1117 = vmatpush1.msra.mxu1 %v3558_v55  ;;  %2774 = vmatprep.subr.mxu0 %v4873_v2  ;;  %v4969_v55 = vld [vmem:[#allocation36_spill] sm:$0xff] }
 0x29e   :  { %1118 = vmatprep.subr.mxu1 %v3566_v58  ;;  %2775 = vmatpush3.msra.mxu0 %v3699_v48  ;;  %v4970_v58 = vld [vmem:[#allocation37_spill] sm:$0xff] }
 0x29f   :  { %1119 = vmatpush1.msra.mxu1 %v3572_v60  ;;  %2776 = vmatprep.subr.mxu0 %v4873_v2  ;;  %v4971_v60 = vld [vmem:[#allocation38_spill] sm:$0xff] }
 0x2a0   :  { %1120 = vmatprep.subr.mxu1 %v3576_v62  ;;  %2777 = vmatpush3.msra.mxu0 %v3703_v45  ;;  %v4972_v62 = vld [vmem:[#allocation39_spill] sm:$0xff] }
 0x2a1   :  { %1121 = vmatpush1.msra.mxu1 %v4904_v36  ;;  %2778 = vmatprep.subr.mxu0 %v4873_v2  ;;  %v4975_v36 = vld [vmem:[#allocation42_spill] sm:$0xff] }
 0x2a2   :  { %1122 = vmatprep.subr.mxu1 %v3592_v20  ;;  %2779 = vmatpush3.msra.mxu0 %v3707_v43  ;;  %v4973_v20 = vld [vmem:[#allocation40_spill] sm:$0xff] }
 0x2a3   :  { %1123 = vmatpush1.msra.mxu1 %v4905_v9  ;;  %2780 = vmatprep.subr.mxu0 %v4873_v2  ;;  %v4976_v9 = vld [vmem:[#allocation43_spill] sm:$0xff] }
 0x2a4   :  { %1124 = vmatprep.subr.mxu1 %v4947_v6  ;;  %2781 = vmatpush3.msra.mxu0 %v4948_v8 }
 0x2a5   :  { %1125 = vmatpush1.msra.mxu1 %v4949_v10  ;;  %2782 = vmatprep.subr.mxu0 %v4873_v2 }
 0x2a6   :  { %1159 = vmatmul.mubr.f32.vlgmr.msra.gmra.mxu1 %v3934_v27  ;;  %1270 = vmatprep.subr.mxu1 %v4001_v13 }
 0x2a7   :  { %1271 = vmatpush1.msra.mxu1 %v4004_v15  ;;  %2783 = vmatpush3.msra.mxu0 %v4952_v17 }
 0x2a8   :  { %1272 = vmatprep.subr.mxu1 %v4008_v19  ;;  %2784 = vmatprep.mubr.msk.f32.mxu0 %vm3347_vm0, %v4873_v2 }
 0x2a9   :  { %1273 = vmatpush1.msra.mxu1 %v4013_v22  ;;  %1334 = vmatprep.mubr.f32.mxu1 %v4873_v2 }
 0x2aa   :  { %1274 = vmatprep.subr.mxu1 %v4017_v24  ;;  %1341 = vmatprep.subr.mxu0 %v4020_v26 }
 0x2ab   :  { %1275 = vmatpush1.msra.mxu1 %v4023_v28 }
 0x2ac   :  { %1276 = vmatprep.subr.mxu1 %v4026_v31 }
 0x2ad   :  { %1277 = vmatpush1.msra.mxu1 %v4029_v33 }
 0x2ae   :  { %1278 = vmatprep.subr.mxu1 %v4032_v35 }
 0x2af   :  { %1279 = vmatpush1.msra.mxu1 %v4035_v37 }
 0x2b0   :  { %1280 = vmatprep.subr.mxu1 %v4038_v40 }
 0x2b1   :  { %1281 = vmatpush1.msra.mxu1 %v4041_v42 }
 0x2b2   :  { %1282 = vmatprep.subr.mxu1 %v4044_v44 }
 0x2b3   :  { %1283 = vmatpush1.msra.mxu1 %v4047_v46 }
 0x2b4   :  { %1284 = vmatprep.subr.mxu1 %v4050_v49 }
 0x2b5   :  { %1285 = vmatpush1.msra.mxu1 %v4053_v51 }
 0x2b6   :  { %1286 = vmatprep.subr.mxu1 %v4968_v53 }
 0x2b7   :  { %1287 = vmatpush1.msra.mxu1 %v4969_v55 }
 0x2b8   :  { %1288 = vmatprep.subr.mxu1 %v4970_v58 }
 0x2b9   :  { %1289 = vmatpush1.msra.mxu1 %v4971_v60 }
 0x2ba   :  { %1290 = vmatprep.subr.mxu1 %v4972_v62  ;;  %v4986_v62 = vld [vmem:[#allocation62_spill] sm:$0xff] }
 0x2bb   :  { %1291 = vmatpush1.msra.mxu1 %v4973_v20 }
 0x2bc   :  { %1292 = vmatprep.subr.mxu1 %v4974_v16 }
 0x2bd   :  { %1293 = vmatpush1.msra.mxu1 %v4975_v36  ;;  %v4987_v36 = vld [vmem:[#allocation64_spill] sm:$0xff] }
 0x2be   :  { %1294 = vmatprep.subr.mxu1 %v4976_v9 }
 0x2bf   :  { %1295 = vmatpush1.msra.mxu1 %v4977_v32 }
 0x2c0   :  { %1296 = vmatprep.subr.mxu1 %v4978_v7 }
 0x2c1   :  { %1297 = vmatpush1.msra.mxu1 %v4979_v12 }
 0x2c2   :  { %1298 = vmatprep.subr.mxu1 %v4980_v39 }
 0x2c3   :  { %1299 = vmatpush1.msra.mxu1 %v4981_v4 }
 0x2c4   :  { %1300 = vmatprep.subr.mxu1 %v4982_v5 }
 0x2c5   :  { %1301 = vmatpush1.msra.mxu1 %v4983_v1 }
 0x2c6   :  { %2787 = vmatprep.subr.mxu1 %v4873_v2 }
 0x346   :  { %v1012_v38 = vpop.f32.mrf.mxu1  ;;  %v1089_v41 = vpop.f32.mrf.mxu0 }
 0x347   :  { %v1013_v30 = vadd.f32 %v3923_v18, %v1012_v38  ;;  %v1165_v14 = vadd.f32 %v1089_v41, %v4985_v25  ;;  %v4098_v25 = vld [vmem:[#allocation10 + $0x1b8] sm:$0xff] }
 0x348   :  { %v2751_v56 = vpop.f32.mrf.mxu1  ;;  %v1091_v3 = vpop.f32.mrf.mxu0 }
 0x349   :  { %1017 = vst [vmem:[#allocation13 + $0x8] sm:$0xff] %v1013_v30  ;;  %v1166_v34 = vadd.f32 %v1091_v3, %v4984_v21  ;;  %v2528_v6 = vmul.f32 -1.442695, %v1165_v14  ;;  %v4086_v21 = vld [vmem:[#allocation10 + $0x1f0] sm:$0xff] }
 0x34a   :  { %v4102_v14 = vld [vmem:[#allocation10 + $0x1b0] sm:$0xff] }
 0x34b   :  { %v2529_v27 = vmul.f32 -1.442695, %v1166_v34  ;;  %v4094_v34 = vld [vmem:[#allocation10 + $0x1d0] sm:$0xff] }
 0x34d   :  { %3005 = vpow2.f32 %v2529_v27  ;;  %v4106_v27 = vld [vmem:[#allocation10 + $0x198] sm:$0xff] }
 0x34e   :  { %3007 = vpow2.f32 %v2528_v6  ;;  %v4114_v6 = vld [vmem:[#allocation10 + $0x178] sm:$0xff] }
 0x35a   :  { %v3006_v10 = vpop.eup %3005 }
 0x35b   :  { %v3008_v53 = vpop.eup %3007  ;;  %v1178_v55 = vadd.f32 1.0, %v3006_v10  ;;  %v4122_v10 = vld [vmem:[#allocation10 + $0x158] sm:$0xff] }
 0x35c   :  { %v1172_v58 = vadd.f32 1.0, %v3008_v53  ;;  %v4130_v53 = vld [vmem:[#allocation10 + $0x138] sm:$0xff] }
 0x35d   :  { %3009 = vrcp.f32 %v1178_v55  ;;  %v4138_v55 = vld [vmem:[#allocation10 + $0x118] sm:$0xff] }
 0x35e   :  { %3011 = vrcp.f32 %v1172_v58  ;;  %v4146_v58 = vld [vmem:[#allocation10 + $0xf8] sm:$0xff] }
 0x366   :  { %v1160_v60 = vpop.f32.mrf.mxu1 }
 0x367   :  { %v1167_v20 = vadd.f32 %v1160_v60, %v4986_v62  ;;  %v4154_v60 = vld [vmem:[#allocation10 + $0xd8] sm:$0xff] }
 0x368   :  { %v1162_v16 = vpop.f32.mrf.mxu1  ;;  %v4162_v62 = vld [vmem:[#allocation10 + $0xb8] sm:$0xff] }
 0x369   :  { %3013 = vtanh.f32 %v1167_v20  ;;  %v1168_v9 = vadd.f32 %v1162_v16, %v4987_v36  ;;  %v4170_v20 = vld [vmem:[#allocation10 + $0x98] sm:$0xff] }
 0x36a   :  { %v3010_v7 = vpop.eup %3009  ;;  %v4178_v16 = vld [vmem:[#allocation10 + $0x78] sm:$0xff] }
 0x36b   :  { %v2530_v32 = vmul.f32 -1.442695, %v1168_v9  ;;  %v3012_v12 = vpop.eup %3011  ;;  %v1188_v4 = vmul.f32 %v3010_v7, %v3931_v23  ;;  %v4090_v23 = vld [vmem:[#allocation10 + $0x1d8] sm:$0xff]  ;;  %v4241_v7 = vld [vmem:[#allocation10 + $0xc0] sm:$0xff] }
 0x36c   :  { %v4186_v36 = vld [vmem:[#allocation10 + $0x58] sm:$0xff]  ;;  %4993 = vst [vmem:[#allocation60_spill] sm:$0xff] %v4241_v7 }
 0x36d   :  { %3015 = vpow2.f32 %v2530_v32  ;;  %v4194_v9 = vld [vmem:[#allocation10 + $0x38] sm:$0xff] }
 0x36e   :  { %v4202_v32 = vld [vmem:[#allocation10 + $0x18] sm:$0xff] }
 0x36f   :  { %4988 = vst [vmem:[#allocation33_spill] sm:$0xff] %v4202_v32 }
 0x376   :  { %v3014_v39 = vpop.eup %3013 }
 0x377   :  { %v1189_v5 = vmul.f32 %v3014_v39, %v3012_v12  ;;  %v4244_v12 = vld [vmem:[#allocation10 + $0xa8] sm:$0xff]  ;;  %v4247_v39 = vld [vmem:[#allocation10 + $0xa0] sm:$0xff] }
 0x378   :  { %4994 = vst [vmem:[#allocation52_spill] sm:$0xff] %v4244_v12  ;;  %4995 = vst [vmem:[#allocation55_spill] sm:$0xff] %v4247_v39 }
 0x379   :  { %v4079_v1 = vadd.f32 %v1189_v5, %v1188_v4  ;;  %v4250_v4 = vld [vmem:[#allocation10 + $0x88] sm:$0xff]  ;;  %v4253_v5 = vld [vmem:[#allocation10 + $0x80] sm:$0xff] }
 0x37a   :  { %v3016_v38 = vpop.eup %3015  ;;  %4996 = vst [vmem:[#allocation54_spill] sm:$0xff] %v4250_v4  ;;  %4997 = vst [vmem:[#allocation56_spill] sm:$0xff] %v4253_v5 }
 0x37b   :  { %v1185_v41 = vadd.f32 1.0, %v3016_v38  ;;  %3017 = vtanh.f32 %v4079_v1  ;;  %v4256_v38 = vld [vmem:[#allocation10 + $0x68] sm:$0xff] }
 0x37c   :  { %4998 = vst [vmem:[#allocation35_spill] sm:$0xff] %v4256_v38 }
 0x37d   :  { %3019 = vrcp.f32 %v1185_v41  ;;  %v4259_v41 = vld [vmem:[#allocation10 + $0x60] sm:$0xff] }
 0x37e   :  { %4999 = vst [vmem:[#allocation36_spill] sm:$0xff] %v4259_v41 }
 0x388   :  { %v3018_v30 = vpop.eup %3017 }
 0x38a   :  { %v3020_v56 = vpop.eup %3019 }
 0x38b   :  { %v4082_v3 = vmul.f32 %v3020_v56, %v3018_v30  ;;  %v4262_v30 = vld [vmem:[#allocation10 + $0x48] sm:$0xff]  ;;  %v4265_v56 = vld [vmem:[#allocation10 + $0x40] sm:$0xff] }
 0x38c   :  { %5000 = vst [vmem:[#allocation37_spill] sm:$0xff] %v4262_v30  ;;  %5001 = vst [vmem:[#allocation38_spill] sm:$0xff] %v4265_v56 }
 0x38d   :  { %2785 = vmatmul.mubr.f32.vlgmr.msra.gmra.mxu0 %v4082_v3  ;;  %1335 = vmatmul.mubr.f32.vlgmr.msra.gmra.mxu1 %v4082_v3 }
 0x38e   :  { %1342 = vmatpush1.msra.mxu0 %v4086_v21  ;;  %1405 = vmatprep.mubr.f32.mxu0 %v4873_v2 }
 0x38f   :  { %1343 = vmatprep.subr.mxu0 %v4090_v23  ;;  %2788 = vmatpush3.msra.mxu1 %v3655_v52  ;;  %v4110_v52 = vld [vmem:[#allocation10 + $0x190] sm:$0xff] }
 0x390   :  { %1344 = vmatpush1.msra.mxu0 %v4094_v34  ;;  %2789 = vmatprep.subr.mxu1 %v4873_v2 }
 0x391   :  { %1345 = vmatprep.subr.mxu0 %v4098_v25  ;;  %2790 = vmatpush3.msra.mxu1 %v3659_v59  ;;  %v4118_v59 = vld [vmem:[#allocation10 + $0x170] sm:$0xff] }
 0x392   :  { %1346 = vmatpush1.msra.mxu0 %v4102_v14  ;;  %2791 = vmatprep.subr.mxu1 %v4873_v2 }
 0x393   :  { %1347 = vmatprep.subr.mxu0 %v4106_v27  ;;  %2792 = vmatpush3.msra.mxu1 %v3663_v11  ;;  %v4126_v11 = vld [vmem:[#allocation10 + $0x150] sm:$0xff] }
 0x394   :  { %1348 = vmatpush1.msra.mxu0 %v4110_v52  ;;  %2793 = vmatprep.subr.mxu1 %v4873_v2 }
 0x395   :  { %1349 = vmatprep.subr.mxu0 %v4114_v6  ;;  %2794 = vmatpush3.msra.mxu1 %v3667_v0  ;;  %v4134_v0 = vld [vmem:[#allocation10 + $0x130] sm:$0xff] }
 0x396   :  { %1350 = vmatpush1.msra.mxu0 %v4118_v59  ;;  %2795 = vmatprep.subr.mxu1 %v4873_v2 }
 0x397   :  { %1351 = vmatprep.subr.mxu0 %v4122_v10  ;;  %2796 = vmatpush3.msra.mxu1 %v3671_v47  ;;  %v4142_v47 = vld [vmem:[#allocation10 + $0x110] sm:$0xff] }
 0x398   :  { %1352 = vmatpush1.msra.mxu0 %v4126_v11  ;;  %2797 = vmatprep.subr.mxu1 %v4873_v2 }
 0x399   :  { %1353 = vmatprep.subr.mxu0 %v4130_v53  ;;  %2798 = vmatpush3.msra.mxu1 %v3675_v29  ;;  %v4150_v29 = vld [vmem:[#allocation10 + $0xf0] sm:$0xff] }
 0x39a   :  { %1354 = vmatpush1.msra.mxu0 %v4134_v0  ;;  %2799 = vmatprep.subr.mxu1 %v4873_v2 }
 0x39b   :  { %1355 = vmatprep.subr.mxu0 %v4138_v55  ;;  %2800 = vmatpush3.msra.mxu1 %v3679_v63  ;;  %v4158_v63 = vld [vmem:[#allocation10 + $0xd0] sm:$0xff] }
 0x39c   :  { %1356 = vmatpush1.msra.mxu0 %v4142_v47  ;;  %2801 = vmatprep.subr.mxu1 %v4873_v2 }
 0x39d   :  { %1357 = vmatprep.subr.mxu0 %v4146_v58  ;;  %2802 = vmatpush3.msra.mxu1 %v3683_v61  ;;  %v4166_v61 = vld [vmem:[#allocation10 + $0xb0] sm:$0xff] }
 0x39e   :  { %1358 = vmatpush1.msra.mxu0 %v4150_v29  ;;  %2803 = vmatprep.subr.mxu1 %v4873_v2 }
 0x39f   :  { %1359 = vmatprep.subr.mxu0 %v4154_v60  ;;  %2804 = vmatpush3.msra.mxu1 %v3687_v57  ;;  %v4174_v57 = vld [vmem:[#allocation10 + $0x90] sm:$0xff] }
 0x3a0   :  { %1360 = vmatpush1.msra.mxu0 %v4158_v63  ;;  %2805 = vmatprep.subr.mxu1 %v4873_v2 }
 0x3a1   :  { %1361 = vmatprep.subr.mxu0 %v4162_v62  ;;  %2806 = vmatpush3.msra.mxu1 %v3689_v54  ;;  %v4182_v54 = vld [vmem:[#allocation10 + $0x70] sm:$0xff] }
 0x3a2   :  { %1362 = vmatpush1.msra.mxu0 %v4166_v61  ;;  %2807 = vmatprep.subr.mxu1 %v4873_v2 }
 0x3a3   :  { %1363 = vmatprep.subr.mxu0 %v4170_v20  ;;  %2808 = vmatpush3.msra.mxu1 %v3695_v50  ;;  %v4190_v50 = vld [vmem:[#allocation10 + $0x50] sm:$0xff] }
 0x3a4   :  { %1364 = vmatpush1.msra.mxu0 %v4174_v57  ;;  %2809 = vmatprep.subr.mxu1 %v4873_v2 }
 0x3a5   :  { %1365 = vmatprep.subr.mxu0 %v4178_v16  ;;  %2810 = vmatpush3.msra.mxu1 %v3699_v48  ;;  %v4198_v48 = vld [vmem:[#allocation10 + $0x30] sm:$0xff] }
 0x3a6   :  { %1366 = vmatpush1.msra.mxu0 %v4182_v54  ;;  %2811 = vmatprep.subr.mxu1 %v4873_v2 }
 0x3a7   :  { %1367 = vmatprep.subr.mxu0 %v4186_v36  ;;  %2812 = vmatpush3.msra.mxu1 %v3703_v45  ;;  %v4206_v45 = vld [vmem:[#allocation10 + $0x10] sm:$0xff] }
 0x3a8   :  { %1368 = vmatpush1.msra.mxu0 %v4190_v50  ;;  %2813 = vmatprep.subr.mxu1 %v4873_v2  ;;  %4989 = vst [vmem:[#allocation34_spill] sm:$0xff] %v4206_v45 }
 0x3a9   :  { %1369 = vmatprep.subr.mxu0 %v4194_v9  ;;  %2814 = vmatpush3.msra.mxu1 %v3707_v43  ;;  %v4232_v43 = vld [vmem:[#allocation10 + $0xe8] sm:$0xff] }
 0x3aa   :  { %1370 = vmatpush1.msra.mxu0 %v4198_v48  ;;  %2815 = vmatprep.subr.mxu1 %v4873_v2  ;;  %4990 = vst [vmem:[#allocation59_spill] sm:$0xff] %v4232_v43 }
 0x3ab   :  { %1371 = vmatprep.subr.mxu0 %v4202_v32  ;;  %2816 = vmatpush3.msra.mxu1 %v4948_v8  ;;  %v4235_v8 = vld [vmem:[#allocation10 + $0xe0] sm:$0xff] }
 0x3ac   :  { %1372 = vmatpush1.msra.mxu0 %v4206_v45  ;;  %2817 = vmatprep.subr.mxu1 %v4873_v2  ;;  %4991 = vst [vmem:[#allocation57_spill] sm:$0xff] %v4235_v8 }
 0x3ad   :  { %1406 = vmatmul.mubr.f32.vlgmr.msra.gmra.mxu0 %v4082_v3  ;;  %1517 = vmatprep.subr.mxu0 %v4001_v13  ;;  %v4268_v3 = vld [vmem:[#allocation10 + $0x28] sm:$0xff] }
 0x3ae   :  { %1518 = vmatpush1.msra.mxu0 %v4004_v15  ;;  %2818 = vmatpush3.msra.mxu1 %v4952_v17  ;;  %v4238_v17 = vld [vmem:[#allocation10 + $0xc8] sm:$0xff]  ;;  %5002 = vst [vmem:[#allocation39_spill] sm:$0xff] %v4268_v3 }
 0x3af   :  { %1519 = vmatprep.subr.mxu0 %v4008_v19  ;;  %2819 = vmatprep.mubr.msk.f32.mxu1 %vm3347_vm0, %v4873_v2  ;;  %4992 = vst [vmem:[#allocation58_spill] sm:$0xff] %v4238_v17 }
 0x3b0   :  { %1520 = vmatpush1.msra.mxu0 %v4013_v22  ;;  %1581 = vmatprep.mubr.f32.mxu0 %v4873_v2 }
 0x3b1   :  { %1521 = vmatprep.subr.mxu0 %v4017_v24  ;;  %1588 = vmatprep.subr.mxu1 %v4020_v26 }
 0x3b2   :  { %1522 = vmatpush1.msra.mxu0 %v4023_v28 }
 0x3b3   :  { %1523 = vmatprep.subr.mxu0 %v4026_v31 }
 0x3b4   :  { %1524 = vmatpush1.msra.mxu0 %v4029_v33 }
 0x3b5   :  { %1525 = vmatprep.subr.mxu0 %v4032_v35 }
 0x3b6   :  { %1526 = vmatpush1.msra.mxu0 %v4035_v37 }
 0x3b7   :  { %1527 = vmatprep.subr.mxu0 %v4038_v40 }
 0x3b8   :  { %1528 = vmatpush1.msra.mxu0 %v4041_v42 }
 0x3b9   :  { %1529 = vmatprep.subr.mxu0 %v4044_v44  ;;  %v5008_v44 = vld [vmem:[#allocation66_spill] sm:$0xff] }
 0x3ba   :  { %1530 = vmatpush1.msra.mxu0 %v4047_v46 }
 0x3bb   :  { %1531 = vmatprep.subr.mxu0 %v4050_v49 }
 0x3bc   :  { %1532 = vmatpush1.msra.mxu0 %v4053_v51 }
 0x3bd   :  { %1533 = vmatprep.subr.mxu0 %v4232_v43 }
 0x3be   :  { %1534 = vmatpush1.msra.mxu0 %v4235_v8 }
 0x3bf   :  { %1535 = vmatprep.subr.mxu0 %v4238_v17 }
 0x3c0   :  { %1536 = vmatpush1.msra.mxu0 %v4241_v7 }
 0x3c1   :  { %1537 = vmatprep.subr.mxu0 %v4244_v12  ;;  %v5006_v12 = vld [vmem:[#allocation67_spill] sm:$0xff] }
 0x3c2   :  { %1538 = vmatpush1.msra.mxu0 %v4247_v39 }
 0x3c3   :  { %1539 = vmatprep.subr.mxu0 %v4250_v4 }
 0x3c4   :  { %1540 = vmatpush1.msra.mxu0 %v4253_v5  ;;  %v4271_v5 = vld [vmem:[#allocation10 + $0x20] sm:$0xff] }
 0x3c5   :  { %1541 = vmatprep.subr.mxu0 %v4256_v38  ;;  %5003 = vst [vmem:[#allocation40_spill] sm:$0xff] %v4271_v5  ;;  %v4274_v38 = vld [vmem:[#allocation10 + $0x8] sm:$0xff] }
 0x3c6   :  { %1542 = vmatpush1.msra.mxu0 %v4259_v41  ;;  %5004 = vst [vmem:[#allocation41_spill] sm:$0xff] %v4274_v38  ;;  %v4277_v41 = vld [vmem:[#allocation10] sm:$0xff] }
 0x3c7   :  { %1543 = vmatprep.subr.mxu0 %v4262_v30  ;;  %5005 = vst [vmem:[#allocation42_spill] sm:$0xff] %v4277_v41 }
 0x3c8   :  { %1544 = vmatpush1.msra.mxu0 %v4265_v56 }
 0x3c9   :  { %1545 = vmatprep.subr.mxu0 %v4268_v3 }
 0x3ca   :  { %1546 = vmatpush1.msra.mxu0 %v4271_v5  ;;  %v5007_v5 = vld [vmem:[#allocation65_spill] sm:$0xff] }
 0x3cb   :  { %1547 = vmatprep.subr.mxu0 %v4274_v38 }
 0x3cc   :  { %1548 = vmatpush1.msra.mxu0 %v4277_v41 }
 0x3cd   :  { %2822 = vmatprep.subr.mxu0 %v4873_v2 }
 0x44d   :  { %v1259_v30 = vpop.f32.mrf.mxu0  ;;  %v1336_v56 = vpop.f32.mrf.mxu1 }
 0x44e   :  { %v1260_v4 = vadd.f32 %v3923_v18, %v1259_v30  ;;  %v1412_v17 = vadd.f32 %v1336_v56, %v5007_v5 }
 0x44f   :  { %v2786_v39 = vpop.f32.mrf.mxu0  ;;  %v1338_v3 = vpop.f32.mrf.mxu1 }
 0x450   :  { %1264 = vst [vmem:[#allocation13 + $0x10] sm:$0xff] %v1260_v4  ;;  %v1413_v7 = vadd.f32 %v1338_v3, %v5006_v12  ;;  %v2531_v43 = vmul.f32 -1.442695, %v1412_v17  ;;  %v5009_v4 = vld [vmem:[#allocation68_spill] sm:$0xff]  ;;  %v4315_v3 = vld [vmem:[#allocation11 + $0x60] sm:$0xff] }
 0x452   :  { %v2532_v8 = vmul.f32 -1.442695, %v1413_v7 }
 0x454   :  { %3021 = vpow2.f32 %v2532_v8 }
 0x455   :  { %3023 = vpow2.f32 %v2531_v43 }
 0x461   :  { %v3022_v38 = vpop.eup %3021 }
 0x462   :  { %v3024_v51 = vpop.eup %3023  ;;  %v1425_v41 = vadd.f32 1.0, %v3022_v38 }
 0x463   :  { %v1419_v49 = vadd.f32 1.0, %v3024_v51 }
 0x464   :  { %3025 = vrcp.f32 %v1425_v41  ;;  %v4309_v41 = vld [vmem:[#allocation11 + $0x68] sm:$0xff] }
 0x465   :  { %3027 = vrcp.f32 %v1419_v49  ;;  %v4297_v49 = vld [vmem:[#allocation11 + $0x78] sm:$0xff] }
 0x46d   :  { %v1407_v46 = vpop.f32.mrf.mxu0 }
 0x46e   :  { %v1414_v42 = vadd.f32 %v1407_v46, %v5008_v44 }
 0x46f   :  { %v1409_v39 = vpop.f32.mrf.mxu0 }
 0x470   :  { %3029 = vtanh.f32 %v1414_v42  ;;  %v1415_v30 = vadd.f32 %v1409_v39, %v5009_v4  ;;  %v4321_v39 = vld [vmem:[#allocation11 + $0x58] sm:$0xff]  ;;  %v4327_v4 = vld [vmem:[#allocation11 + $0x50] sm:$0xff] }
 0x471   :  { %v3026_v5 = vpop.eup %3025 }
 0x472   :  { %v2533_v12 = vmul.f32 -1.442695, %v1415_v30  ;;  %v3028_v7 = vpop.eup %3027  ;;  %v1435_v43 = vmul.f32 %v3026_v5, %v4079_v1  ;;  %v4303_v1 = vld [vmem:[#allocation11 + $0x70] sm:$0xff]  ;;  %v4333_v30 = vld [vmem:[#allocation11 + $0x48] sm:$0xff]  ;;  %v4345_v5 = vld [vmem:[#allocation11 + $0x38] sm:$0xff] }
 0x474   :  { %3031 = vpow2.f32 %v2533_v12  ;;  %v4339_v12 = vld [vmem:[#allocation11 + $0x40] sm:$0xff] }
 0x47d   :  { %v3030_v17 = vpop.eup %3029 }
 0x47e   :  { %v1436_v8 = vmul.f32 %v3030_v17, %v3028_v7  ;;  %v4351_v7 = vld [vmem:[#allocation11 + $0x30] sm:$0xff]  ;;  %v4357_v17 = vld [vmem:[#allocation11 + $0x28] sm:$0xff] }
 0x480   :  { %v4287_v56 = vadd.f32 %v1436_v8, %v1435_v43  ;;  %v4363_v43 = vld [vmem:[#allocation11 + $0x20] sm:$0xff]  ;;  %v4369_v8 = vld [vmem:[#allocation11 + $0x18] sm:$0xff] }
 0x481   :  { %v3032_v51 = vpop.eup %3031 }
 0x482   :  { %v1432_v38 = vadd.f32 1.0, %v3032_v51  ;;  %3033 = vtanh.f32 %v4287_v56  ;;  %v4375_v51 = vld [vmem:[#allocation11 + $0x10] sm:$0xff] }
 0x484   :  { %3035 = vrcp.f32 %v1432_v38  ;;  %v4381_v38 = vld [vmem:[#allocation11 + $0x8] sm:$0xff] }
 0x485   :  { %5010 = vst [vmem:[#allocation43_spill] sm:$0xff] %v4381_v38 }
 0x48f   :  { %v3034_v44 = vpop.eup %3033 }
 0x491   :  { %v3036_v46 = vpop.eup %3035 }
 0x492   :  { %v4290_v42 = vmul.f32 %v3036_v46, %v3034_v44  ;;  %v4389_v44 = vld [vmem:[#allocation11] sm:$0xff]  ;;  %v5012_v46 = vld [vmem:[#allocation28_spill] sm:$0xff] }
 0x493   :  { %5011 = vst [vmem:[#allocation44_spill] sm:$0xff] %v4389_v44 }
 0x494   :  { %2820 = vmatmul.mubr.f32.vlgmr.msra.gmra.mxu1 %v4290_v42  ;;  %1582 = vmatmul.mubr.f32.vlgmr.msra.gmra.mxu0 %v4290_v42 }
 0x495   :  { %1589 = vmatpush1.msra.mxu1 %v4086_v21  ;;  %1652 = vmatprep.mubr.f32.mxu1 %v4873_v2 }
 0x496   :  { %1590 = vmatprep.subr.mxu1 %v4090_v23  ;;  %2823 = vmatpush3.msra.mxu0 %v4297_v49 }
 0x497   :  { %1591 = vmatpush1.msra.mxu1 %v4094_v34  ;;  %2824 = vmatprep.subr.mxu0 %v4873_v2 }
 0x498   :  { %1592 = vmatprep.subr.mxu1 %v4098_v25  ;;  %2825 = vmatpush3.msra.mxu0 %v4303_v1 }
 0x499   :  { %1593 = vmatpush1.msra.mxu1 %v4102_v14  ;;  %2826 = vmatprep.subr.mxu0 %v4873_v2 }
 0x49a   :  { %1594 = vmatprep.subr.mxu1 %v4106_v27  ;;  %2827 = vmatpush3.msra.mxu0 %v4309_v41 }
 0x49b   :  { %1595 = vmatpush1.msra.mxu1 %v4110_v52  ;;  %2828 = vmatprep.subr.mxu0 %v4873_v2 }
 0x49c   :  { %1596 = vmatprep.subr.mxu1 %v4114_v6  ;;  %2829 = vmatpush3.msra.mxu0 %v4315_v3 }
 0x49d   :  { %1597 = vmatpush1.msra.mxu1 %v4118_v59  ;;  %2830 = vmatprep.subr.mxu0 %v4873_v2 }
 0x49e   :  { %1598 = vmatprep.subr.mxu1 %v4122_v10  ;;  %2831 = vmatpush3.msra.mxu0 %v4321_v39 }
 0x49f   :  { %1599 = vmatpush1.msra.mxu1 %v4126_v11  ;;  %2832 = vmatprep.subr.mxu0 %v4873_v2 }
 0x4a0   :  { %1600 = vmatprep.subr.mxu1 %v4130_v53  ;;  %2833 = vmatpush3.msra.mxu0 %v4327_v4 }
 0x4a1   :  { %1601 = vmatpush1.msra.mxu1 %v4134_v0  ;;  %2834 = vmatprep.subr.mxu0 %v4873_v2 }
 0x4a2   :  { %1602 = vmatprep.subr.mxu1 %v4138_v55  ;;  %2835 = vmatpush3.msra.mxu0 %v4333_v30 }
 0x4a3   :  { %1603 = vmatpush1.msra.mxu1 %v4142_v47  ;;  %2836 = vmatprep.subr.mxu0 %v4873_v2 }
 0x4a4   :  { %1604 = vmatprep.subr.mxu1 %v4146_v58  ;;  %2837 = vmatpush3.msra.mxu0 %v4339_v12 }
 0x4a5   :  { %1605 = vmatpush1.msra.mxu1 %v4150_v29  ;;  %2838 = vmatprep.subr.mxu0 %v4873_v2 }
 0x4a6   :  { %1606 = vmatprep.subr.mxu1 %v4154_v60  ;;  %2839 = vmatpush3.msra.mxu0 %v4345_v5 }
 0x4a7   :  { %1607 = vmatpush1.msra.mxu1 %v4158_v63  ;;  %2840 = vmatprep.subr.mxu0 %v4873_v2 }
 0x4a8   :  { %1608 = vmatprep.subr.mxu1 %v4162_v62  ;;  %2841 = vmatpush3.msra.mxu0 %v4351_v7 }
 0x4a9   :  { %1609 = vmatpush1.msra.mxu1 %v4166_v61  ;;  %2842 = vmatprep.subr.mxu0 %v4873_v2 }
 0x4aa   :  { %1610 = vmatprep.subr.mxu1 %v4170_v20  ;;  %2843 = vmatpush3.msra.mxu0 %v4357_v17 }
 0x4ab   :  { %1611 = vmatpush1.msra.mxu1 %v4174_v57  ;;  %2844 = vmatprep.subr.mxu0 %v4873_v2 }
 0x4ac   :  { %1612 = vmatprep.subr.mxu1 %v4178_v16  ;;  %2845 = vmatpush3.msra.mxu0 %v4363_v43 }
 0x4ad   :  { %1613 = vmatpush1.msra.mxu1 %v4182_v54  ;;  %2846 = vmatprep.subr.mxu0 %v4873_v2 }
 0x4ae   :  { %1614 = vmatprep.subr.mxu1 %v4186_v36  ;;  %2847 = vmatpush3.msra.mxu0 %v4369_v8 }
 0x4af   :  { %1615 = vmatpush1.msra.mxu1 %v4190_v50  ;;  %2848 = vmatprep.subr.mxu0 %v4873_v2 }
 0x4b0   :  { %1616 = vmatprep.subr.mxu1 %v4194_v9  ;;  %2849 = vmatpush3.msra.mxu0 %v4375_v51 }
 0x4b1   :  { %1617 = vmatpush1.msra.mxu1 %v4198_v48  ;;  %2850 = vmatprep.subr.mxu0 %v4873_v2 }
 0x4b2   :  { %1618 = vmatprep.subr.mxu1 %v4202_v32  ;;  %2851 = vmatpush3.msra.mxu0 %v4381_v38  ;;  %v5035_v38 = vld [vmem:[#allocation70_spill] sm:$0xff] }
 0x4b3   :  { %1619 = vmatpush1.msra.mxu1 %v4206_v45  ;;  %2852 = vmatprep.subr.mxu0 %v4873_v2 }
 0x4b4   :  { %1653 = vmatmul.mubr.f32.vlgmr.msra.gmra.mxu1 %v4290_v42  ;;  %1764 = vmatprep.subr.mxu1 %v4001_v13  ;;  %v5013_v42 = vld [vmem:[#allocation29_spill] sm:$0xff] }
 0x4b5   :  { %1765 = vmatpush1.msra.mxu1 %v4004_v15  ;;  %2853 = vmatpush3.msra.mxu0 %v4389_v44 }
 0x4b6   :  { %1766 = vmatprep.subr.mxu1 %v4008_v19  ;;  %2854 = vmatprep.mubr.msk.f32.mxu0 %vm3347_vm0, %v4873_v2 }
 0x4b7   :  { %1767 = vmatpush1.msra.mxu1 %v4013_v22  ;;  %1828 = vmatprep.mubr.f32.mxu1 %v4873_v2  ;;  %v5014_v22 = vld [vmem:[#allocation30_spill] sm:$0xff] }
 0x4b8   :  { %1768 = vmatprep.subr.mxu1 %v4017_v24  ;;  %1835 = vmatprep.subr.mxu0 %v4020_v26  ;;  %v5015_v24 = vld [vmem:[#allocation31_spill] sm:$0xff]  ;;  %v5016_v26 = vld [vmem:[#allocation32_spill] sm:$0xff] }
 0x4b9   :  { %1769 = vmatpush1.msra.mxu1 %v4023_v28  ;;  %v5017_v28 = vld [vmem:[#allocation59_spill] sm:$0xff] }
 0x4ba   :  { %1770 = vmatprep.subr.mxu1 %v4026_v31  ;;  %v5018_v31 = vld [vmem:[#allocation57_spill] sm:$0xff] }
 0x4bb   :  { %1771 = vmatpush1.msra.mxu1 %v4029_v33  ;;  %v5019_v33 = vld [vmem:[#allocation58_spill] sm:$0xff] }
 0x4bc   :  { %1772 = vmatprep.subr.mxu1 %v4032_v35  ;;  %v5020_v35 = vld [vmem:[#allocation60_spill] sm:$0xff] }
 0x4bd   :  { %1773 = vmatpush1.msra.mxu1 %v4035_v37  ;;  %v5021_v37 = vld [vmem:[#allocation52_spill] sm:$0xff] }
 0x4be   :  { %1774 = vmatprep.subr.mxu1 %v4038_v40  ;;  %v5022_v40 = vld [vmem:[#allocation55_spill] sm:$0xff] }
 0x4bf   :  { %1775 = vmatpush1.msra.mxu1 %v5012_v46  ;;  %v5023_v46 = vld [vmem:[#allocation54_spill] sm:$0xff] }
 0x4c0   :  { %1776 = vmatprep.subr.mxu1 %v5013_v42  ;;  %v5024_v42 = vld [vmem:[#allocation56_spill] sm:$0xff] }
 0x4c1   :  { %1777 = vmatpush1.msra.mxu1 %v5014_v22  ;;  %v5025_v22 = vld [vmem:[#allocation35_spill] sm:$0xff] }
 0x4c2   :  { %1778 = vmatprep.subr.mxu1 %v5015_v24  ;;  %v5026_v24 = vld [vmem:[#allocation36_spill] sm:$0xff] }
 0x4c3   :  { %1779 = vmatpush1.msra.mxu1 %v5016_v26  ;;  %v5027_v26 = vld [vmem:[#allocation37_spill] sm:$0xff] }
 0x4c4   :  { %1780 = vmatprep.subr.mxu1 %v5017_v28  ;;  %v5028_v28 = vld [vmem:[#allocation38_spill] sm:$0xff] }
 0x4c5   :  { %1781 = vmatpush1.msra.mxu1 %v5018_v31  ;;  %v5029_v31 = vld [vmem:[#allocation39_spill] sm:$0xff] }
 0x4c6   :  { %1782 = vmatprep.subr.mxu1 %v5019_v33  ;;  %v5030_v33 = vld [vmem:[#allocation40_spill] sm:$0xff] }
 0x4c7   :  { %1783 = vmatpush1.msra.mxu1 %v5020_v35  ;;  %v5031_v35 = vld [vmem:[#allocation41_spill] sm:$0xff] }
 0x4c8   :  { %1784 = vmatprep.subr.mxu1 %v5021_v37  ;;  %v5032_v37 = vld [vmem:[#allocation42_spill] sm:$0xff] }
 0x4c9   :  { %1785 = vmatpush1.msra.mxu1 %v5022_v40 }
 0x4ca   :  { %1786 = vmatprep.subr.mxu1 %v5023_v46 }
 0x4cb   :  { %1787 = vmatpush1.msra.mxu1 %v5024_v42 }
 0x4cc   :  { %1788 = vmatprep.subr.mxu1 %v5025_v22 }
 0x4cd   :  { %1789 = vmatpush1.msra.mxu1 %v5026_v24 }
 0x4ce   :  { %1790 = vmatprep.subr.mxu1 %v5027_v26  ;;  %v5033_v26 = vld [vmem:[#allocation71_spill] sm:$0xff] }
 0x4cf   :  { %1791 = vmatpush1.msra.mxu1 %v5028_v28  ;;  %v5034_v28 = vld [vmem:[#allocation69_spill] sm:$0xff] }
 0x4d0   :  { %1792 = vmatprep.subr.mxu1 %v5029_v31 }
 0x4d1   :  { %1793 = vmatpush1.msra.mxu1 %v5030_v33 }
 0x4d2   :  { %1794 = vmatprep.subr.mxu1 %v5031_v35 }
 0x4d3   :  { %1795 = vmatpush1.msra.mxu1 %v5032_v37 }
 0x4d4   :  { %2857 = vmatprep.subr.mxu1 %v4873_v2 }
 0x554   :  { %v1506_v46 = vpop.f32.mrf.mxu1  ;;  %v1583_v42 = vpop.f32.mrf.mxu0 }
 0x555   :  { %v1507_v22 = vadd.f32 %v3923_v18, %v1506_v46  ;;  %v1659_v44 = vadd.f32 %v1583_v42, %v5034_v28  ;;  %v5040_v46 = vld [vmem:[#allocation47_spill] sm:$0xff]  ;;  %v5041_v42 = vld [vmem:[#allocation50_spill] sm:$0xff] }
 0x556   :  { %v2821_v40 = vpop.f32.mrf.mxu1  ;;  %v1585_v24 = vpop.f32.mrf.mxu0 }
 0x557   :  { %1511 = vst [vmem:[#allocation13 + $0x18] sm:$0xff] %v1507_v22  ;;  %v1660_v19 = vadd.f32 %v1585_v24, %v5033_v26  ;;  %v2534_v15 = vmul.f32 -1.442695, %v1659_v44  ;;  %v5036_v22 = vld [vmem:[#allocation72_spill] sm:$0xff] }
 0x559   :  { %v2535_v31 = vmul.f32 -1.442695, %v1660_v19 }
 0x55b   :  { %3037 = vpow2.f32 %v2535_v31 }
 0x55c   :  { %3039 = vpow2.f32 %v2534_v15 }
 0x568   :  { %v3038_v35 = vpop.eup %3037 }
 0x569   :  { %v3040_v33 = vpop.eup %3039  ;;  %v1672_v37 = vadd.f32 1.0, %v3038_v35 }
 0x56a   :  { %v1666_v13 = vadd.f32 1.0, %v3040_v33 }
 0x56b   :  { %3041 = vrcp.f32 %v1672_v37 }
 0x56c   :  { %3043 = vrcp.f32 %v1666_v13 }
 0x574   :  { %v1654_v45 = vpop.f32.mrf.mxu1 }
 0x575   :  { %v1661_v32 = vadd.f32 %v1654_v45, %v5035_v38  ;;  %v5037_v45 = vld [vmem:[#allocation33_spill] sm:$0xff]  ;;  %v5039_v38 = vld [vmem:[#allocation34_spill] sm:$0xff] }
 0x576   :  { %v1656_v18 = vpop.f32.mrf.mxu1 }
 0x577   :  { %3045 = vtanh.f32 %v1661_v32  ;;  %v1662_v40 = vadd.f32 %v1656_v18, %v5036_v22  ;;  %v5042_v18 = vld [vmem:[#allocation44_spill] sm:$0xff]  ;;  %v5043_v22 = vld [vmem:[#allocation18_spill] sm:$0xff] }
 0x578   :  { %v3042_v26 = vpop.eup %3041 }
 0x579   :  { %v2536_v24 = vmul.f32 -1.442695, %v1662_v40  ;;  %v3044_v19 = vpop.eup %3043  ;;  %v1682_v15 = vmul.f32 %v3042_v26, %v4287_v56  ;;  %v5038_v56 = vld [vmem:[#allocation43_spill] sm:$0xff]  ;;  %v5044_v40 = vld [vmem:[#allocation20_spill] sm:$0xff]  ;;  %v5046_v26 = vld [vmem:[#allocation22_spill] sm:$0xff] }
 0x57b   :  { %3047 = vpow2.f32 %v2536_v24  ;;  %v5045_v24 = vld [vmem:[#allocation21_spill] sm:$0xff] }
 0x584   :  { %v3046_v28 = vpop.eup %3045 }
 0x585   :  { %v1683_v31 = vmul.f32 %v3046_v28, %v3044_v19  ;;  %v5047_v19 = vld [vmem:[#allocation23_spill] sm:$0xff] }
 0x586   :  { %v5048_v28 = vld [vmem:[#allocation19_spill] sm:$0xff] }
 0x587   :  { %v4433_v44 = vadd.f32 %v1683_v31, %v1682_v15  ;;  %v5049_v15 = vld [vmem:[#allocation24_spill] sm:$0xff]  ;;  %v5050_v31 = vld [vmem:[#allocation25_spill] sm:$0xff] }
 0x588   :  { %v3048_v33 = vpop.eup %3047 }
 0x589   :  { %v1679_v35 = vadd.f32 1.0, %v3048_v33  ;;  %3049 = vtanh.f32 %v4433_v44  ;;  %v5051_v33 = vld [vmem:[#allocation26_spill] sm:$0xff] }
 0x58b   :  { %3051 = vrcp.f32 %v1679_v35  ;;  %v5052_v35 = vld [vmem:[#allocation27_spill] sm:$0xff] }
 0x596   :  { %v3050_v13 = vpop.eup %3049 }
 0x598   :  { %v3052_v37 = vpop.eup %3051 }
 0x599   :  { %v4436_v32 = vmul.f32 %v3052_v37, %v3050_v13  ;;  %v5053_v13 = vld [vmem:[#allocation28_spill] sm:$0xff]  ;;  %v5054_v37 = vld [vmem:[#allocation29_spill] sm:$0xff] }
 0x59b   :  { %2855 = vmatmul.mubr.f32.vlgmr.msra.gmra.mxu0 %v4436_v32  ;;  %1829 = vmatmul.mubr.f32.vlgmr.msra.gmra.mxu1 %v4436_v32 }
 0x59c   :  { %1836 = vmatpush1.msra.mxu0 %v4086_v21  ;;  %1899 = vmatprep.mubr.f32.mxu0 %v4873_v2 }
 0x59d   :  { %1837 = vmatprep.subr.mxu0 %v4090_v23  ;;  %2858 = vmatpush3.msra.mxu1 %v4297_v49 }
 0x59e   :  { %1838 = vmatpush1.msra.mxu0 %v4094_v34  ;;  %2859 = vmatprep.subr.mxu1 %v4873_v2 }
 0x59f   :  { %1839 = vmatprep.subr.mxu0 %v4098_v25  ;;  %2860 = vmatpush3.msra.mxu1 %v4303_v1 }
 0x5a0   :  { %1840 = vmatpush1.msra.mxu0 %v4102_v14  ;;  %2861 = vmatprep.subr.mxu1 %v4873_v2 }
 0x5a1   :  { %1841 = vmatprep.subr.mxu0 %v4106_v27  ;;  %2862 = vmatpush3.msra.mxu1 %v4309_v41 }
 0x5a2   :  { %1842 = vmatpush1.msra.mxu0 %v4110_v52  ;;  %2863 = vmatprep.subr.mxu1 %v4873_v2 }
 0x5a3   :  { %1843 = vmatprep.subr.mxu0 %v4114_v6  ;;  %2864 = vmatpush3.msra.mxu1 %v4315_v3 }
 0x5a4   :  { %1844 = vmatpush1.msra.mxu0 %v4118_v59  ;;  %2865 = vmatprep.subr.mxu1 %v4873_v2 }
 0x5a5   :  { %1845 = vmatprep.subr.mxu0 %v4122_v10  ;;  %2866 = vmatpush3.msra.mxu1 %v4321_v39 }
 0x5a6   :  { %1846 = vmatpush1.msra.mxu0 %v4126_v11  ;;  %2867 = vmatprep.subr.mxu1 %v4873_v2 }
 0x5a7   :  { %1847 = vmatprep.subr.mxu0 %v4130_v53  ;;  %2868 = vmatpush3.msra.mxu1 %v4327_v4 }
 0x5a8   :  { %1848 = vmatpush1.msra.mxu0 %v4134_v0  ;;  %2869 = vmatprep.subr.mxu1 %v4873_v2 }
 0x5a9   :  { %1849 = vmatprep.subr.mxu0 %v4138_v55  ;;  %2870 = vmatpush3.msra.mxu1 %v4333_v30 }
 0x5aa   :  { %1850 = vmatpush1.msra.mxu0 %v4142_v47  ;;  %2871 = vmatprep.subr.mxu1 %v4873_v2 }
 0x5ab   :  { %1851 = vmatprep.subr.mxu0 %v4146_v58  ;;  %2872 = vmatpush3.msra.mxu1 %v4339_v12 }
 0x5ac   :  { %1852 = vmatpush1.msra.mxu0 %v4150_v29  ;;  %2873 = vmatprep.subr.mxu1 %v4873_v2 }
 0x5ad   :  { %1853 = vmatprep.subr.mxu0 %v4154_v60  ;;  %2874 = vmatpush3.msra.mxu1 %v4345_v5 }
 0x5ae   :  { %1854 = vmatpush1.msra.mxu0 %v4158_v63  ;;  %2875 = vmatprep.subr.mxu1 %v4873_v2 }
 0x5af   :  { %1855 = vmatprep.subr.mxu0 %v4162_v62  ;;  %2876 = vmatpush3.msra.mxu1 %v4351_v7 }
 0x5b0   :  { %1856 = vmatpush1.msra.mxu0 %v4166_v61  ;;  %2877 = vmatprep.subr.mxu1 %v4873_v2 }
 0x5b1   :  { %1857 = vmatprep.subr.mxu0 %v4170_v20  ;;  %2878 = vmatpush3.msra.mxu1 %v4357_v17 }
 0x5b2   :  { %1858 = vmatpush1.msra.mxu0 %v4174_v57  ;;  %2879 = vmatprep.subr.mxu1 %v4873_v2 }
 0x5b3   :  { %1859 = vmatprep.subr.mxu0 %v4178_v16  ;;  %2880 = vmatpush3.msra.mxu1 %v4363_v43 }
 0x5b4   :  { %1860 = vmatpush1.msra.mxu0 %v4182_v54  ;;  %2881 = vmatprep.subr.mxu1 %v4873_v2 }
 0x5b5   :  { %1861 = vmatprep.subr.mxu0 %v4186_v36  ;;  %2882 = vmatpush3.msra.mxu1 %v4369_v8 }
 0x5b6   :  { %1862 = vmatpush1.msra.mxu0 %v4190_v50  ;;  %2883 = vmatprep.subr.mxu1 %v4873_v2 }
 0x5b7   :  { %1863 = vmatprep.subr.mxu0 %v4194_v9  ;;  %2884 = vmatpush3.msra.mxu1 %v4375_v51 }
 0x5b8   :  { %1864 = vmatpush1.msra.mxu0 %v4198_v48  ;;  %2885 = vmatprep.subr.mxu1 %v4873_v2 }
 0x5b9   :  { %1865 = vmatprep.subr.mxu0 %v5037_v45  ;;  %2886 = vmatpush3.msra.mxu1 %v5038_v56  ;;  %v5076_v56 = vld [vmem:[#allocation74_spill] sm:$0xff] }
 0x5ba   :  { %1866 = vmatpush1.msra.mxu0 %v5039_v38  ;;  %2887 = vmatprep.subr.mxu1 %v4873_v2 }
 0x5bb   :  { %1900 = vmatmul.mubr.f32.vlgmr.msra.gmra.mxu0 %v4436_v32  ;;  %2011 = vmatprep.subr.mxu0 %v5040_v46  ;;  %v5055_v32 = vld [vmem:[#allocation30_spill] sm:$0xff]  ;;  %v5056_v46 = vld [vmem:[#allocation31_spill] sm:$0xff] }
 0x5bc   :  { %2012 = vmatpush1.msra.mxu0 %v5041_v42  ;;  %2888 = vmatpush3.msra.mxu1 %v5042_v18  ;;  %v5057_v42 = vld [vmem:[#allocation32_spill] sm:$0xff] }
 0x5bd   :  { %2013 = vmatprep.subr.mxu0 %v5043_v22  ;;  %2889 = vmatprep.mubr.msk.f32.mxu1 %vm3347_vm0, %v4873_v2  ;;  %v5058_v22 = vld [vmem:[#allocation59_spill] sm:$0xff] }
 0x5be   :  { %2014 = vmatpush1.msra.mxu0 %v5044_v40  ;;  %2075 = vmatprep.mubr.f32.mxu0 %v4873_v2  ;;  %v5059_v40 = vld [vmem:[#allocation57_spill] sm:$0xff] }
 0x5bf   :  { %2015 = vmatprep.subr.mxu0 %v5045_v24  ;;  %2082 = vmatprep.subr.mxu1 %v5046_v26  ;;  %v5060_v24 = vld [vmem:[#allocation58_spill] sm:$0xff]  ;;  %v5061_v26 = vld [vmem:[#allocation60_spill] sm:$0xff] }
 0x5c0   :  { %2016 = vmatpush1.msra.mxu0 %v5047_v19  ;;  %v5062_v19 = vld [vmem:[#allocation52_spill] sm:$0xff] }
 0x5c1   :  { %2017 = vmatprep.subr.mxu0 %v5048_v28  ;;  %v5063_v28 = vld [vmem:[#allocation55_spill] sm:$0xff] }
 0x5c2   :  { %2018 = vmatpush1.msra.mxu0 %v5049_v15  ;;  %v5064_v15 = vld [vmem:[#allocation54_spill] sm:$0xff] }
 0x5c3   :  { %2019 = vmatprep.subr.mxu0 %v5050_v31  ;;  %v5065_v31 = vld [vmem:[#allocation56_spill] sm:$0xff] }
 0x5c4   :  { %2020 = vmatpush1.msra.mxu0 %v5051_v33  ;;  %v5066_v33 = vld [vmem:[#allocation35_spill] sm:$0xff] }
 0x5c5   :  { %2021 = vmatprep.subr.mxu0 %v5052_v35  ;;  %v5067_v35 = vld [vmem:[#allocation36_spill] sm:$0xff] }
 0x5c6   :  { %2022 = vmatpush1.msra.mxu0 %v5053_v13  ;;  %v5068_v13 = vld [vmem:[#allocation37_spill] sm:$0xff] }
 0x5c7   :  { %2023 = vmatprep.subr.mxu0 %v5054_v37  ;;  %v5069_v37 = vld [vmem:[#allocation38_spill] sm:$0xff] }
 0x5c8   :  { %2024 = vmatpush1.msra.mxu0 %v5055_v32  ;;  %v5070_v32 = vld [vmem:[#allocation39_spill] sm:$0xff] }
 0x5c9   :  { %2025 = vmatprep.subr.mxu0 %v5056_v46  ;;  %v5071_v46 = vld [vmem:[#allocation40_spill] sm:$0xff] }
 0x5ca   :  { %2026 = vmatpush1.msra.mxu0 %v5057_v42  ;;  %v5072_v42 = vld [vmem:[#allocation41_spill] sm:$0xff] }
 0x5cb   :  { %2027 = vmatprep.subr.mxu0 %v5058_v22 }
 0x5cc   :  { %2028 = vmatpush1.msra.mxu0 %v5059_v40 }
 0x5cd   :  { %2029 = vmatprep.subr.mxu0 %v5060_v24 }
 0x5ce   :  { %2030 = vmatpush1.msra.mxu0 %v5061_v26 }
 0x5cf   :  { %2031 = vmatprep.subr.mxu0 %v5062_v19  ;;  %v5073_v19 = vld [vmem:[#allocation42_spill] sm:$0xff] }
 0x5d0   :  { %2032 = vmatpush1.msra.mxu0 %v5063_v28  ;;  %v5075_v28 = vld [vmem:[#allocation73_spill] sm:$0xff] }
 0x5d1   :  { %2033 = vmatprep.subr.mxu0 %v5064_v15 }
 0x5d2   :  { %2034 = vmatpush1.msra.mxu0 %v5065_v31 }
 0x5d3   :  { %2035 = vmatprep.subr.mxu0 %v5066_v33 }
 0x5d4   :  { %2036 = vmatpush1.msra.mxu0 %v5067_v35  ;;  %v4544_v35 = vld [vmem:[%s4709_s5] ss:$0 sm:$0xff]  ;;  %s3348_s5 = smov [#allocation13]  }
 0x5d5   :  { %2037 = vmatprep.subr.mxu0 %v5068_v13  ;;  %s2507_s22 = sshll.u32 %s3348_s5, 4  ;;  %s2508_s22 = int_to_ptr.vmem [resolvable:$true] %s2507_s22 }
 0x5d6   :  { %2038 = vmatpush1.msra.mxu0 %v5069_v37  ;;  %s3310_s23 = scalar_lea.vmem %s2508_s22, 1024  ;;  %p3315_p7 = scmp.lt.s32.totalorder %s2508_s22, %s2508_s22 }
 0x5d7   :  { %2039 = vmatprep.subr.mxu0 %v5070_v32  ;;  %v5074_v32 = vld [vmem:[#allocation75_spill] sm:$0xff]  ;;  %p3311_p6 = scmp.ne.s32.totalorder %s2508_s22, %s3310_s23  ;;  %p3316_p8 = scmp.lt.s32.totalorder %s3310_s23, %s3310_s23 }
 0x5d8   :  { %2040 = vmatpush1.msra.mxu0 %v5071_v46 }
 0x5d9   :  { %2041 = vmatprep.subr.mxu0 %v5072_v42  ;;  %p3317_p9 = por %p3316_p8, %p3315_p7 }
 0x5da   :  { %2042 = vmatpush1.msra.mxu0 %v5073_v19 }
 0x5db   :  { %2892 = vmatprep.subr.mxu0 %v4873_v2  ;;  %p3318_p10 = pnand %p3317_p9, %p3311_p6 }
 0x65b   :  { %v1753_v15 = vpop.f32.mrf.mxu0  ;;  %v1830_v31 = vpop.f32.mrf.mxu1 }
 0x65c   :  { %v1754_v13 = vadd.f32 %v4544_v35, %v1753_v15  ;;  %v1906_v42 = vadd.f32 %v1830_v31, %v5075_v28 }
 0x65d   :  { %v2856_v37 = vpop.f32.mrf.mxu0  ;;  %v1832_v33 = vpop.f32.mrf.mxu1 }
 0x65e   :  { %1758 = vst [vmem:[#allocation13 + $0x20] sm:$0xff] %v1754_v13  ;;  %v1907_v46 = vadd.f32 %v1832_v33, %v5074_v32  ;;  %v2537_v19 = vmul.f32 -1.442695, %v1906_v42  ;;  %v5077_v13 = vld [vmem:[#allocation76_spill] sm:$0xff]  ;;  %v5093_v42 = vld [vmem:[#allocation38_spill] sm:$0xff] }
 0x660   :  { %v2538_v26 = vmul.f32 -1.442695, %v1907_v46 }
 0x662   :  { %3053 = vpow2.f32 %v2538_v26 }
 0x663   :  { %3055 = vpow2.f32 %v2537_v19 }
 0x66f   :  { %v3054_v24 = vpop.eup %3053 }
 0x670   :  { %v3056_v40 = vpop.eup %3055  ;;  %v1919_v22 = vadd.f32 1.0, %v3054_v24 }
 0x671   :  { %v1913_v18 = vadd.f32 1.0, %v3056_v40 }
 0x672   :  { %3057 = vrcp.f32 %v1919_v22  ;;  %v5092_v22 = vld [vmem:[#allocation37_spill] sm:$0xff] }
 0x673   :  { %3059 = vrcp.f32 %v1913_v18  ;;  %v5091_v18 = vld [vmem:[#allocation36_spill] sm:$0xff] }
 0x67b   :  { %v1901_v38 = vpop.f32.mrf.mxu0 }
 0x67c   :  { %v1908_v45 = vadd.f32 %v1901_v38, %v5076_v56 }
 0x67d   :  { %v1903_v15 = vpop.f32.mrf.mxu0 }
 0x67e   :  { %3061 = vtanh.f32 %v1908_v45  ;;  %v1909_v37 = vadd.f32 %v1903_v15, %v5077_v13  ;;  %v5094_v15 = vld [vmem:[#allocation39_spill] sm:$0xff]  ;;  %v5095_v13 = vld [vmem:[#allocation40_spill] sm:$0xff] }
 0x67f   :  { %v3058_v28 = vpop.eup %3057 }
 0x680   :  { %v2539_v33 = vmul.f32 -1.442695, %v1909_v37  ;;  %v3060_v31 = vpop.eup %3059  ;;  %v1929_v26 = vmul.f32 %v3058_v28, %v4433_v44  ;;  %v5090_v44 = vld [vmem:[#allocation35_spill] sm:$0xff]  ;;  %v5096_v37 = vld [vmem:[#allocation41_spill] sm:$0xff] }
 0x682   :  { %3063 = vpow2.f32 %v2539_v33  ;;  %v5097_v33 = vld [vmem:[#allocation42_spill] sm:$0xff] }
 0x68b   :  { %v3062_v32 = vpop.eup %3061 }
 0x68c   :  { %v1930_v19 = vmul.f32 %v3062_v32, %v3060_v31 }
 0x68e   :  { %v4552_v46 = vadd.f32 %v1930_v19, %v1929_v26 }
 0x68f   :  { %v3064_v40 = vpop.eup %3063 }
 0x690   :  { %v1926_v24 = vadd.f32 1.0, %v3064_v40  ;;  %3065 = vtanh.f32 %v4552_v46  ;;  %v5098_v40 = vld [vmem:[#allocation79_spill] sm:$0xff] }
 0x692   :  { %3067 = vrcp.f32 %v1926_v24 }
 0x69d   :  { %v3066_v56 = vpop.eup %3065 }
 0x69f   :  { %v3068_v38 = vpop.eup %3067 }
 0x6a0   :  { %v4555_v45 = vmul.f32 %v3068_v38, %v3066_v56  ;;  %v5099_v56 = vld [vmem:[#allocation77_spill] sm:$0xff] }
 0x6a2   :  { %2890 = vmatmul.mubr.f32.vlgmr.msra.gmra.mxu1 %v4555_v45  ;;  %2076 = vmatmul.mubr.f32.vlgmr.msra.gmra.mxu0 %v4555_v45 }
 0x6a3   :  { %2083 = vmatpush1.msra.mxu1 %v4086_v21  ;;  %2146 = vmatprep.mubr.f32.mxu1 %v4873_v2  ;;  %v5078_v21 = vld [vmem:[#allocation33_spill] sm:$0xff] }
 0x6a4   :  { %2084 = vmatprep.subr.mxu1 %v4090_v23  ;;  %2893 = vmatpush3.msra.mxu0 %v4297_v49  ;;  %v5079_v23 = vld [vmem:[#allocation43_spill] sm:$0xff] }
 0x6a5   :  { %2085 = vmatpush1.msra.mxu1 %v4094_v34  ;;  %2894 = vmatprep.subr.mxu0 %v4873_v2  ;;  %v5080_v34 = vld [vmem:[#allocation34_spill] sm:$0xff] }
 0x6a6   :  { %2086 = vmatprep.subr.mxu1 %v4098_v25  ;;  %2895 = vmatpush3.msra.mxu0 %v4303_v1  ;;  %v3182_v25 = vld [vmem:[#allocation10 + $0x1e8] sm:$0xff] }
 0x6a7   :  { %2087 = vmatpush1.msra.mxu1 %v4102_v14  ;;  %2896 = vmatprep.subr.mxu0 %v4873_v2  ;;  %v3183_v14 = vld [vmem:[#allocation10 + $0x1e0] sm:$0xff] }
 0x6a8   :  { %2088 = vmatprep.subr.mxu1 %v4106_v27  ;;  %2897 = vmatpush3.msra.mxu0 %v4309_v41  ;;  %v5081_v27 = vld [vmem:[#allocation44_spill] sm:$0xff] }
 0x6a9   :  { %2089 = vmatpush1.msra.mxu1 %v4110_v52  ;;  %2898 = vmatprep.subr.mxu0 %v4873_v2  ;;  %v3184_v52 = vld [vmem:[#allocation10 + $0x1c8] sm:$0xff] }
 0x6aa   :  { %2090 = vmatprep.subr.mxu1 %v4114_v6  ;;  %2899 = vmatpush3.msra.mxu0 %v4315_v3  ;;  %v3185_v6 = vld [vmem:[#allocation10 + $0x1c0] sm:$0xff] }
 0x6ab   :  { %2091 = vmatpush1.msra.mxu1 %v4118_v59  ;;  %2900 = vmatprep.subr.mxu0 %v4873_v2  ;;  %v3186_v59 = vld [vmem:[#allocation10 + $0x1a8] sm:$0xff] }
 0x6ac   :  { %2092 = vmatprep.subr.mxu1 %v4122_v10  ;;  %2901 = vmatpush3.msra.mxu0 %v4321_v39  ;;  %v3187_v10 = vld [vmem:[#allocation10 + $0x1f8] sm:$0xff] }
 0x6ad   :  { %2093 = vmatpush1.msra.mxu1 %v4126_v11  ;;  %2902 = vmatprep.subr.mxu0 %v4873_v2  ;;  %v3188_v11 = vld [vmem:[#allocation10 + $0x1a0] sm:$0xff] }
 0x6ae   :  { %2094 = vmatprep.subr.mxu1 %v4130_v53  ;;  %2903 = vmatpush3.msra.mxu0 %v4327_v4  ;;  %v3189_v53 = vld [vmem:[#allocation10 + $0x188] sm:$0xff] }
 0x6af   :  { %2095 = vmatpush1.msra.mxu1 %v4134_v0  ;;  %2904 = vmatprep.subr.mxu0 %v4873_v2  ;;  %v3190_v0 = vld [vmem:[#allocation10 + $0x180] sm:$0xff] }
 0x6b0   :  { %2096 = vmatprep.subr.mxu1 %v4138_v55  ;;  %2905 = vmatpush3.msra.mxu0 %v4333_v30  ;;  %v3191_v55 = vld [vmem:[#allocation10 + $0x168] sm:$0xff] }
 0x6b1   :  { %2097 = vmatpush1.msra.mxu1 %v4142_v47  ;;  %2906 = vmatprep.subr.mxu0 %v4873_v2  ;;  %v3192_v47 = vld [vmem:[#allocation10 + $0x160] sm:$0xff] }
 0x6b2   :  { %2098 = vmatprep.subr.mxu1 %v4146_v58  ;;  %2907 = vmatpush3.msra.mxu0 %v4339_v12  ;;  %v3193_v58 = vld [vmem:[#allocation10 + $0x148] sm:$0xff] }
 0x6b3   :  { %2099 = vmatpush1.msra.mxu1 %v4150_v29  ;;  %2908 = vmatprep.subr.mxu0 %v4873_v2  ;;  %v3194_v29 = vld [vmem:[#allocation10 + $0x140] sm:$0xff] }
 0x6b4   :  { %2100 = vmatprep.subr.mxu1 %v4154_v60  ;;  %2909 = vmatpush3.msra.mxu0 %v4345_v5  ;;  %v3195_v60 = vld [vmem:[#allocation10 + $0x128] sm:$0xff] }
 0x6b5   :  { %2101 = vmatpush1.msra.mxu1 %v4158_v63  ;;  %2910 = vmatprep.subr.mxu0 %v4873_v2  ;;  %v3196_v63 = vld [vmem:[#allocation10 + $0x120] sm:$0xff] }
 0x6b6   :  { %2102 = vmatprep.subr.mxu1 %v4162_v62  ;;  %2911 = vmatpush3.msra.mxu0 %v4351_v7  ;;  %v3197_v62 = vld [vmem:[#allocation10 + $0x108] sm:$0xff] }
 0x6b7   :  { %2103 = vmatpush1.msra.mxu1 %v4166_v61  ;;  %2912 = vmatprep.subr.mxu0 %v4873_v2  ;;  %v3198_v61 = vld [vmem:[#allocation10 + $0x100] sm:$0xff] }
 0x6b8   :  { %2104 = vmatprep.subr.mxu1 %v4170_v20  ;;  %2913 = vmatpush3.msra.mxu0 %v4357_v17  ;;  %v5082_v20 = vld [vmem:[#allocation59_spill] sm:$0xff] }
 0x6b9   :  { %2105 = vmatpush1.msra.mxu1 %v4174_v57  ;;  %2914 = vmatprep.subr.mxu0 %v4873_v2  ;;  %v5083_v57 = vld [vmem:[#allocation57_spill] sm:$0xff] }
 0x6ba   :  { %2106 = vmatprep.subr.mxu1 %v4178_v16  ;;  %2915 = vmatpush3.msra.mxu0 %v4363_v43  ;;  %v5084_v16 = vld [vmem:[#allocation58_spill] sm:$0xff] }
 0x6bb   :  { %2107 = vmatpush1.msra.mxu1 %v4182_v54  ;;  %2916 = vmatprep.subr.mxu0 %v4873_v2  ;;  %v5085_v54 = vld [vmem:[#allocation60_spill] sm:$0xff] }
 0x6bc   :  { %2108 = vmatprep.subr.mxu1 %v4186_v36  ;;  %2917 = vmatpush3.msra.mxu0 %v4369_v8  ;;  %v5086_v36 = vld [vmem:[#allocation52_spill] sm:$0xff] }
 0x6bd   :  { %2109 = vmatpush1.msra.mxu1 %v4190_v50  ;;  %2918 = vmatprep.subr.mxu0 %v4873_v2  ;;  %v5087_v50 = vld [vmem:[#allocation55_spill] sm:$0xff] }
 0x6be   :  { %2110 = vmatprep.subr.mxu1 %v4194_v9  ;;  %2919 = vmatpush3.msra.mxu0 %v4375_v51  ;;  %v5088_v9 = vld [vmem:[#allocation54_spill] sm:$0xff] }
 0x6bf   :  { %2111 = vmatpush1.msra.mxu1 %v4198_v48  ;;  %2920 = vmatprep.subr.mxu0 %v4873_v2  ;;  %v5089_v48 = vld [vmem:[#allocation56_spill] sm:$0xff] }
 0x6c0   :  { %2112 = vmatprep.subr.mxu1 %v5078_v21  ;;  %2921 = vmatpush3.msra.mxu0 %v5079_v23 }
 0x6c1   :  { %2113 = vmatpush1.msra.mxu1 %v5080_v34  ;;  %2922 = vmatprep.subr.mxu0 %v4873_v2 }
 0x6c2   :  { %2147 = vmatmul.mubr.f32.vlgmr.msra.gmra.mxu1 %v4555_v45  ;;  %2258 = vmatprep.subr.mxu1 %v3182_v25 }
 0x6c3   :  { %2259 = vmatpush1.msra.mxu1 %v3183_v14  ;;  %2923 = vmatpush3.msra.mxu0 %v5081_v27 }
 0x6c4   :  { %2260 = vmatprep.subr.mxu1 %v3184_v52  ;;  %2924 = vmatprep.mubr.msk.f32.mxu0 %vm3347_vm0, %v4873_v2 }
 0x6c5   :  { %2261 = vmatpush1.msra.mxu1 %v3185_v6  ;;  %2322 = vmatprep.mubr.f32.mxu1 %v4873_v2 }
 0x6c6   :  { %2262 = vmatprep.subr.mxu1 %v3186_v59  ;;  %2329 = vmatprep.subr.mxu0 %v3187_v10  ;;  %v5100_v59 = vld [vmem:[#allocation78_spill] sm:$0xff] }
 0x6c7   :  { %2263 = vmatpush1.msra.mxu1 %v3188_v11 }
 0x6c8   :  { %2264 = vmatprep.subr.mxu1 %v3189_v53  ;;  %v5101_v53 = vld [vmem:[#allocation80_spill] sm:$0xff] }
 0x6c9   :  { %2265 = vmatpush1.msra.mxu1 %v3190_v0 }
 0x6ca   :  { %2266 = vmatprep.subr.mxu1 %v3191_v55 }
 0x6cb   :  { %2267 = vmatpush1.msra.mxu1 %v3192_v47 }
 0x6cc   :  { %2268 = vmatprep.subr.mxu1 %v3193_v58 }
 0x6cd   :  { %2269 = vmatpush1.msra.mxu1 %v3194_v29 }
 0x6ce   :  { %2270 = vmatprep.subr.mxu1 %v3195_v60 }
 0x6cf   :  { %2271 = vmatpush1.msra.mxu1 %v3196_v63 }
 0x6d0   :  { %2272 = vmatprep.subr.mxu1 %v3197_v62 }
 0x6d1   :  { %2273 = vmatpush1.msra.mxu1 %v3198_v61 }
 0x6d2   :  { %2274 = vmatprep.subr.mxu1 %v5082_v20 }
 0x6d3   :  { %2275 = vmatpush1.msra.mxu1 %v5083_v57 }
 0x6d4   :  { %2276 = vmatprep.subr.mxu1 %v5084_v16 }
 0x6d5   :  { %2277 = vmatpush1.msra.mxu1 %v5085_v54 }
 0x6d6   :  { %2278 = vmatprep.subr.mxu1 %v5086_v36  ;;  %v3199_v36 = vld [vmem:[#allocation10 + $0x1f0] sm:$0xff] }
 0x6d7   :  { %2279 = vmatpush1.msra.mxu1 %v5087_v50  ;;  %v3201_v50 = vld [vmem:[#allocation10 + $0x1d0] sm:$0xff] }
 0x6d8   :  { %2280 = vmatprep.subr.mxu1 %v5088_v9  ;;  %v3202_v9 = vld [vmem:[#allocation10 + $0x1b8] sm:$0xff] }
 0x6d9   :  { %2281 = vmatpush1.msra.mxu1 %v5089_v48  ;;  %v3203_v48 = vld [vmem:[#allocation10 + $0x1b0] sm:$0xff] }
 0x6da   :  { %2282 = vmatprep.subr.mxu1 %v5090_v44  ;;  %v3204_v44 = vld [vmem:[#allocation10 + $0x198] sm:$0xff] }
 0x6db   :  { %2283 = vmatpush1.msra.mxu1 %v5091_v18  ;;  %v3205_v18 = vld [vmem:[#allocation10 + $0x190] sm:$0xff] }
 0x6dc   :  { %2284 = vmatprep.subr.mxu1 %v5092_v22  ;;  %v3207_v22 = vld [vmem:[#allocation10 + $0x170] sm:$0xff] }
 0x6dd   :  { %2285 = vmatpush1.msra.mxu1 %v5093_v42  ;;  %v3209_v42 = vld [vmem:[#allocation10 + $0x150] sm:$0xff] }
 0x6de   :  { %2286 = vmatprep.subr.mxu1 %v5094_v15  ;;  %v3211_v15 = vld [vmem:[#allocation10 + $0x130] sm:$0xff] }
 0x6df   :  { %2287 = vmatpush1.msra.mxu1 %v5095_v13  ;;  %v3213_v13 = vld [vmem:[#allocation10 + $0x110] sm:$0xff] }
 0x6e0   :  { %2288 = vmatprep.subr.mxu1 %v5096_v37  ;;  %v3215_v37 = vld [vmem:[#allocation10 + $0xf0] sm:$0xff] }
 0x6e1   :  { %2289 = vmatpush1.msra.mxu1 %v5097_v33  ;;  %v3217_v33 = vld [vmem:[#allocation10 + $0xd0] sm:$0xff] }
 0x6e2   :  { %2927 = vmatprep.subr.mxu1 %v4873_v2 }
 0x762   :  { %v2000_v28 = vpop.f32.mrf.mxu1  ;;  %v2077_v31 = vpop.f32.mrf.mxu0 }
 0x763   :  { %v2001_v32 = vadd.f32 %v4544_v35, %v2000_v28  ;;  %v2153_v38 = vadd.f32 %v2077_v31, %v5099_v56  ;;  %v3219_v28 = vld [vmem:[#allocation10 + $0xb0] sm:$0xff] }
 0x764   :  { %v2891_v26 = vpop.f32.mrf.mxu1  ;;  %v2079_v19 = vpop.f32.mrf.mxu0  ;;  %v3221_v31 = vld [vmem:[#allocation10 + $0x90] sm:$0xff] }
 0x765   :  { %2005 = vst [vmem:[#allocation13 + $0x28] sm:$0xff] %v2001_v32  ;;  %v2154_v24 = vadd.f32 %v2079_v19, %v5098_v40  ;;  %v2540_v21 = vmul.f32 -1.442695, %v2153_v38  ;;  %v3223_v32 = vld [vmem:[#allocation10 + $0x70] sm:$0xff] }
 0x766   :  { %v3225_v26 = vld [vmem:[#allocation10 + $0x50] sm:$0xff] }
 0x767   :  { %v2541_v45 = vmul.f32 -1.442695, %v2154_v24  ;;  %v3227_v19 = vld [vmem:[#allocation10 + $0x30] sm:$0xff] }
 0x768   :  { %v3229_v40 = vld [vmem:[#allocation10 + $0x10] sm:$0xff] }
 0x769   :  { %3069 = vpow2.f32 %v2541_v45  ;;  %v5102_v45 = vld [vmem:[#allocation83_spill] sm:$0xff] }
 0x76a   :  { %3071 = vpow2.f32 %v2540_v21  ;;  %v5103_v21 = vld [vmem:[#allocation81_spill] sm:$0xff] }
 0x776   :  { %v3070_v34 = vpop.eup %3069 }
 0x777   :  { %v3072_v25 = vpop.eup %3071  ;;  %v2166_v14 = vadd.f32 1.0, %v3070_v34 }
 0x778   :  { %v2160_v52 = vadd.f32 1.0, %v3072_v25 }
 0x779   :  { %3073 = vrcp.f32 %v2166_v14 }
 0x77a   :  { %3075 = vrcp.f32 %v2160_v52 }
 0x782   :  { %v2148_v6 = vpop.f32.mrf.mxu1 }
 0x783   :  { %v2155_v10 = vadd.f32 %v2148_v6, %v5100_v59 }
 0x784   :  { %v2150_v11 = vpop.f32.mrf.mxu1 }
 0x785   :  { %3077 = vtanh.f32 %v2155_v10  ;;  %v2156_v0 = vadd.f32 %v2150_v11, %v5101_v53  ;;  %v5104_v10 = vld [vmem:[#allocation82_spill] sm:$0xff] }
 0x786   :  { %v3074_v47 = vpop.eup %3073 }
 0x787   :  { %v2542_v55 = vmul.f32 -1.442695, %v2156_v0  ;;  %v3076_v58 = vpop.eup %3075  ;;  %v2176_v60 = vmul.f32 %v3074_v47, %v4552_v46  ;;  %v3200_v46 = vld [vmem:[#allocation10 + $0x1d8] sm:$0xff]  ;;  %v5105_v0 = vld [vmem:[#allocation84_spill] sm:$0xff] }
 0x789   :  { %3079 = vpow2.f32 %v2542_v55 }
 0x792   :  { %v3078_v29 = vpop.eup %3077 }
 0x793   :  { %v2177_v63 = vmul.f32 %v3078_v29, %v3076_v58 }
 0x795   :  { %v4649_v62 = vadd.f32 %v2177_v63, %v2176_v60 }
 0x796   :  { %v3080_v61 = vpop.eup %3079 }
 0x797   :  { %v2173_v20 = vadd.f32 1.0, %v3080_v61  ;;  %3081 = vtanh.f32 %v4649_v62 }
 0x799   :  { %3083 = vrcp.f32 %v2173_v20 }
 0x7a4   :  { %v3082_v57 = vpop.eup %3081 }
 0x7a6   :  { %v3084_v16 = vpop.eup %3083 }
 0x7a7   :  { %v4652_v54 = vmul.f32 %v3084_v16, %v3082_v57 }
 0x7a9   :  { %2925 = vmatmul.mubr.f32.vlgmr.msra.gmra.mxu0 %v4652_v54  ;;  %2323 = vmatmul.mubr.f32.vlgmr.msra.gmra.mxu1 %v4652_v54 }
 0x7aa   :  { %2330 = vmatpush1.msra.mxu0 %v3199_v36  ;;  %2393 = vmatprep.mubr.f32.mxu0 %v4873_v2 }
 0x7ab   :  { %2331 = vmatprep.subr.mxu0 %v3200_v46  ;;  %2928 = vmatpush3.msra.mxu1 %v4297_v49  ;;  %v3206_v49 = vld [vmem:[#allocation10 + $0x178] sm:$0xff] }
 0x7ac   :  { %2332 = vmatpush1.msra.mxu0 %v3201_v50  ;;  %2929 = vmatprep.subr.mxu1 %v4873_v2 }
 0x7ad   :  { %2333 = vmatprep.subr.mxu0 %v3202_v9  ;;  %2930 = vmatpush3.msra.mxu1 %v4303_v1  ;;  %v3208_v1 = vld [vmem:[#allocation10 + $0x158] sm:$0xff] }
 0x7ae   :  { %2334 = vmatpush1.msra.mxu0 %v3203_v48  ;;  %2931 = vmatprep.subr.mxu1 %v4873_v2 }
 0x7af   :  { %2335 = vmatprep.subr.mxu0 %v3204_v44  ;;  %2932 = vmatpush3.msra.mxu1 %v4309_v41  ;;  %v3210_v41 = vld [vmem:[#allocation10 + $0x138] sm:$0xff] }
 0x7b0   :  { %2336 = vmatpush1.msra.mxu0 %v3205_v18  ;;  %2933 = vmatprep.subr.mxu1 %v4873_v2 }
 0x7b1   :  { %2337 = vmatprep.subr.mxu0 %v3206_v49  ;;  %2934 = vmatpush3.msra.mxu1 %v4315_v3  ;;  %v3212_v3 = vld [vmem:[#allocation10 + $0x118] sm:$0xff] }
 0x7b2   :  { %2338 = vmatpush1.msra.mxu0 %v3207_v22  ;;  %2935 = vmatprep.subr.mxu1 %v4873_v2 }
 0x7b3   :  { %2339 = vmatprep.subr.mxu0 %v3208_v1  ;;  %2936 = vmatpush3.msra.mxu1 %v4321_v39  ;;  %v3214_v39 = vld [vmem:[#allocation10 + $0xf8] sm:$0xff] }
 0x7b4   :  { %2340 = vmatpush1.msra.mxu0 %v3209_v42  ;;  %2937 = vmatprep.subr.mxu1 %v4873_v2 }
 0x7b5   :  { %2341 = vmatprep.subr.mxu0 %v3210_v41  ;;  %2938 = vmatpush3.msra.mxu1 %v4327_v4  ;;  %v3216_v4 = vld [vmem:[#allocation10 + $0xd8] sm:$0xff] }
 0x7b6   :  { %2342 = vmatpush1.msra.mxu0 %v3211_v15  ;;  %2939 = vmatprep.subr.mxu1 %v4873_v2 }
 0x7b7   :  { %2343 = vmatprep.subr.mxu0 %v3212_v3  ;;  %2940 = vmatpush3.msra.mxu1 %v4333_v30  ;;  %v3218_v30 = vld [vmem:[#allocation10 + $0xb8] sm:$0xff] }
 0x7b8   :  { %2344 = vmatpush1.msra.mxu0 %v3213_v13  ;;  %2941 = vmatprep.subr.mxu1 %v4873_v2 }
 0x7b9   :  { %2345 = vmatprep.subr.mxu0 %v3214_v39  ;;  %2942 = vmatpush3.msra.mxu1 %v4339_v12  ;;  %v3220_v12 = vld [vmem:[#allocation10 + $0x98] sm:$0xff] }
 0x7ba   :  { %2346 = vmatpush1.msra.mxu0 %v3215_v37  ;;  %2943 = vmatprep.subr.mxu1 %v4873_v2 }
 0x7bb   :  { %2347 = vmatprep.subr.mxu0 %v3216_v4  ;;  %2944 = vmatpush3.msra.mxu1 %v4345_v5  ;;  %v3222_v5 = vld [vmem:[#allocation10 + $0x78] sm:$0xff] }
 0x7bc   :  { %2348 = vmatpush1.msra.mxu0 %v3217_v33  ;;  %2945 = vmatprep.subr.mxu1 %v4873_v2 }
 0x7bd   :  { %2349 = vmatprep.subr.mxu0 %v3218_v30  ;;  %2946 = vmatpush3.msra.mxu1 %v4351_v7  ;;  %v3224_v7 = vld [vmem:[#allocation10 + $0x58] sm:$0xff] }
 0x7be   :  { %2350 = vmatpush1.msra.mxu0 %v3219_v28  ;;  %2947 = vmatprep.subr.mxu1 %v4873_v2 }
 0x7bf   :  { %2351 = vmatprep.subr.mxu0 %v3220_v12  ;;  %2948 = vmatpush3.msra.mxu1 %v4357_v17  ;;  %v3226_v17 = vld [vmem:[#allocation10 + $0x38] sm:$0xff] }
 0x7c0   :  { %2352 = vmatpush1.msra.mxu0 %v3221_v31  ;;  %2949 = vmatprep.subr.mxu1 %v4873_v2 }
 0x7c1   :  { %2353 = vmatprep.subr.mxu0 %v3222_v5  ;;  %2950 = vmatpush3.msra.mxu1 %v4363_v43  ;;  %v3228_v43 = vld [vmem:[#allocation10 + $0x18] sm:$0xff] }
 0x7c2   :  { %2354 = vmatpush1.msra.mxu0 %v3223_v32  ;;  %2951 = vmatprep.subr.mxu1 %v4873_v2 }
 0x7c3   :  { %2355 = vmatprep.subr.mxu0 %v3224_v7  ;;  %2952 = vmatpush3.msra.mxu1 %v4369_v8 }
 0x7c4   :  { %2356 = vmatpush1.msra.mxu0 %v3225_v26  ;;  %2953 = vmatprep.subr.mxu1 %v4873_v2 }
 0x7c5   :  { %2357 = vmatprep.subr.mxu0 %v3226_v17  ;;  %2954 = vmatpush3.msra.mxu1 %v4375_v51 }
 0x7c6   :  { %2358 = vmatpush1.msra.mxu0 %v3227_v19  ;;  %2955 = vmatprep.subr.mxu1 %v4873_v2 }
 0x7c7   :  { %2359 = vmatprep.subr.mxu0 %v3228_v43  ;;  %2956 = vmatpush3.msra.mxu1 %v5079_v23 }
 0x7c8   :  { %2360 = vmatpush1.msra.mxu0 %v3229_v40  ;;  %2957 = vmatprep.subr.mxu1 %v4873_v2 }
 0x7c9   :  { %2394 = vmatmul.mubr.f32.vlgmr.msra.gmra.mxu0 %v4652_v54  ;;  %2958 = vmatpush3.msra.mxu1 %v5081_v27 }
 0x7ca   :  { %2959 = vmatprep.mubr.msk.f32.mxu1 %vm3347_vm0, %v4873_v2 }
 0x869   :  { %v2247_v8 = vpop.f32.mrf.mxu0  ;;  %v2324_v51 = vpop.f32.mrf.mxu1 }
 0x86a   :  { %v2248_v24 = vadd.f32 %v4544_v35, %v2247_v8  ;;  %v2400_v34 = vadd.f32 %v2324_v51, %v5103_v21 }
 0x86b   :  { %v2926_v56 = vpop.f32.mrf.mxu0  ;;  %v2326_v38 = vpop.f32.mrf.mxu1 }
 0x86c   :  { %2252 = vst [vmem:[#allocation13 + $0x30] sm:$0xff] %v2248_v24  ;;  %v2401_v23 = vadd.f32 %v2326_v38, %v5102_v45  ;;  %v2543_v14 = vmul.f32 -1.442695, %v2400_v34 }
 0x86e   :  { %v2544_v25 = vmul.f32 -1.442695, %v2401_v23 }
 0x870   :  { %3085 = vpow2.f32 %v2544_v25 }
 0x871   :  { %3087 = vpow2.f32 %v2543_v14 }
 0x87d   :  { %v3086_v52 = vpop.eup %3085 }
 0x87e   :  { %v3088_v27 = vpop.eup %3087  ;;  %v2413_v6 = vadd.f32 1.0, %v3086_v52 }
 0x87f   :  { %v2407_v59 = vadd.f32 1.0, %v3088_v27 }
 0x880   :  { %3089 = vrcp.f32 %v2413_v6 }
 0x881   :  { %3091 = vrcp.f32 %v2407_v59 }
 0x889   :  { %v2395_v2 = vpop.f32.mrf.mxu0 }
 0x88a   :  { %v2402_v11 = vadd.f32 %v2395_v2, %v5104_v10 }
 0x88b   :  { %v2397_v53 = vpop.f32.mrf.mxu0 }
 0x88c   :  { %3093 = vtanh.f32 %v2402_v11  ;;  %v2403_v55 = vadd.f32 %v2397_v53, %v5105_v0 }
 0x88d   :  { %v3090_v58 = vpop.eup %3089 }
 0x88e   :  { %v2545_v47 = vmul.f32 -1.442695, %v2403_v55  ;;  %v3092_v29 = vpop.eup %3091  ;;  %v2423_v63 = vmul.f32 %v3090_v58, %v4649_v62 }
 0x890   :  { %3095 = vpow2.f32 %v2545_v47 }
 0x899   :  { %v3094_v60 = vpop.eup %3093 }
 0x89a   :  { %v2424_v61 = vmul.f32 %v3094_v60, %v3092_v29 }
 0x89c   :  { %v2425_v20 = vadd.f32 %v2424_v61, %v2423_v63 }
 0x89d   :  { %v3096_v57 = vpop.eup %3095 }
 0x89e   :  { %v2420_v16 = vadd.f32 1.0, %v3096_v57  ;;  %3097 = vtanh.f32 %v2425_v20 }
 0x8a0   :  { %3099 = vrcp.f32 %v2420_v16 }
 0x8ab   :  { %v3098_v54 = vpop.eup %3097 }
 0x8ad   :  { %v3100_v36 = vpop.eup %3099 }
 0x8ae   :  { %v2427_v46 = vmul.f32 %v3100_v36, %v3098_v54 }
 0x8b0   :  { %2960 = vmatmul.mubr.f32.vlgmr.msra.gmra.mxu1 %v2427_v46 }
 0x970   :  { %v2494_v50 = vpop.f32.mrf.mxu1 }
 0x971   :  { %v2495_v9 = vadd.f32 %v4544_v35, %v2494_v50 }
 0x972   :  { %v2961_v48 = vpop.f32.mrf.mxu1 }
 0x973   :  { %2499 = vst [vmem:[#allocation13 + $0x38] sm:$0xff] %v2495_v9 }
 0x974   :  { %3321 = shalt.err (!%p3318_p10)
}
 0x975   :  { %2513 = dma.vmem_to_hbm [thread:$0]  %s2508_s22, 1024, %s4710_s6, [#allocation7], %s3342_s7, %s3342_s7, %s3343_s8  }
 0x976   :  { %3336 = dma.done.wait [#allocation7], 1024  }
 0x977   :  { %3337 = vsyncadd [#allocation7], 4294966272 }
 0x978   :  { %2517 = vsyncpa [#allocation6], 1 }
 0x979   :  { %2518 = vsyncpa [#allocation9], 1 }
 0x97a   :  { %2519 = vsyncpa [#allocation12], 1 }
 0x97b   :  { %2520 = vsyncpa [#allocation7], 1 }

// kernel: tpu_custom_call.1
= control target key start
LH: loop header
LB: loop body
LE: loop exit
PB: predicated region body
PF: predicated region fallthrough
CT: control target
= control target key end

     0   :  { %11 = vsyncpa [#allocation6], 0  ;;  %s4704_s0 = inlined_call_operand.hbm [shape: f32[8,8,128], index: 0, kind: input, shape index: {}]   ;;  %s4705_s1 = inlined_call_operand.hbm [shape: f32[128,512], index: 1, kind: input, shape index: {}]   ;;  %s4706_s2 = inlined_call_operand.hbm [shape: f32[128,512], index: 2, kind: input, shape index: {}]   ;;  %s4707_s3 = inlined_call_operand.vmem [shape: f32[1,512], index: 3, kind: input, shape index: {}]   ;;  %s4708_s4 = inlined_call_operand.hbm [shape: f32[128,128], index: 4, kind: input, shape index: {}]   ;;  %s4709_s5 = inlined_call_operand.vmem [shape: f32[1,128], index: 5, kind: input, shape index: {}]   ;;  %s4710_s6 = inlined_call_operand.hbm [shape: f32[8,8,128], index: 6, kind: output, shape index: {}]  }
   0x1   :  { %12 = vsyncpa [#allocation9], 0 }
   0x2   :  { %13 = vsyncpa [#allocation12], 0 }
   0x3   :  { %14 = vsyncpa [#allocation7], 0  ;;  %s3338_s21 = smov [#allocation8]  }
   0x4   :  { %s32_s22 = sshll.u32 %s3338_s21, 4  ;;  %s33_s22 = int_to_ptr.vmem [resolvable:$true] %s32_s22 }
   0x5   :  { %s3238_s23 = scalar_lea.vmem %s33_s22, 8192  ;;  %p3243_p1 = scmp.lt.s32.totalorder %s33_s22, %s33_s22 }
   0x6   :  { %p3239_p0 = scmp.ne.s32.totalorder %s33_s22, %s3238_s23  ;;  %p3244_p2 = scmp.lt.s32.totalorder %s3238_s23, %s3238_s23 }
   0x8   :  { %p3245_p3 = por %p3244_p2, %p3243_p1 }
   0xa   :  { %p3246_p4 = pnand %p3245_p3, %p3239_p0 }
   0xc   :  { %3249 = shalt.err (!%p3246_p4)
}
   0xd   :  { %s3339_s24 = smov 512   ;;  %s3340_s25 = smov 32  }
   0xe   :  { %38 = dma.hbm_to_vmem [thread:$0]  %s4705_s1, 8192, %s33_s22, [#allocation9], %s3339_s24, %s3339_s24, %s3340_s25  }
   0xf   :  { %s3341_s28 = smov [#allocation5]  }
  0x10   :  { %s20_s29 = sshll.u32 %s3341_s28, 4  ;;  %s21_s29 = int_to_ptr.vmem [resolvable:$true] %s20_s29 }
  0x11   :  { %s3258_s30 = scalar_lea.vmem %s21_s29, 1024  ;;  %p3263_p6 = scmp.lt.s32.totalorder %s21_s29, %s21_s29 }
  0x12   :  { %p3259_p5 = scmp.ne.s32.totalorder %s21_s29, %s3258_s30  ;;  %p3264_p7 = scmp.lt.s32.totalorder %s3258_s30, %s3258_s30 }
  0x14   :  { %p3265_p8 = por %p3264_p7, %p3263_p6 }
  0x16   :  { %p3266_p9 = pnand %p3265_p8, %p3259_p5 }
  0x18   :  { %3269 = shalt.err (!%p3266_p9)
}
  0x19   :  { %s3342_s7 = smov 128   ;;  %s3343_s8 = smov 8  }
  0x1a   :  { %26 = dma.hbm_to_vmem [thread:$0]  %s4704_s0, 1024, %s21_s29, [#allocation6], %s3342_s7, %s3342_s7, %s3343_s8  }
  0x1b   :  { %s3344_s1 = smov [#allocation10]   ;;  %s3345_s12 = smov [#allocation11]  }
  0x1c   :  { %s44_s11 = sshll.u32 %s3344_s1, 4  ;;  %s58_s13 = sshll.u32 %s3345_s12, 4  ;;  %s45_s11 = int_to_ptr.vmem [resolvable:$true] %s44_s11  ;;  %s59_s13 = int_to_ptr.vmem [resolvable:$true] %s58_s13 }
  0x1d   :  { %s3278_s14 = scalar_lea.vmem %s45_s11, 8192  ;;  %p3283_p11 = scmp.lt.s32.totalorder %s45_s11, %s45_s11 }
  0x1e   :  { %p3279_p10 = scmp.ne.s32.totalorder %s45_s11, %s3278_s14  ;;  %p3284_p12 = scmp.lt.s32.totalorder %s3278_s14, %s3278_s14 }
  0x20   :  { %p3285_p13 = por %p3284_p12, %p3283_p11 }
  0x22   :  { %p3286_p0 = pnand %p3285_p13, %p3279_p10 }
  0x24   :  { %3289 = shalt.err (!%p3286_p0)
}
  0x25   :  { %50 = dma.hbm_to_vmem [thread:$0]  %s4706_s2, 8192, %s45_s11, [#allocation9], %s3339_s24, %s3339_s24, %s3340_s25  }
  0x26   :  { %s3298_s0 = scalar_lea.vmem %s59_s13, 2048  ;;  %p3303_p2 = scmp.lt.s32.totalorder %s59_s13, %s59_s13 }
  0x27   :  { %p3299_p1 = scmp.ne.s32.totalorder %s59_s13, %s3298_s0  ;;  %p3304_p3 = scmp.lt.s32.totalorder %s3298_s0, %s3298_s0 }
  0x29   :  { %p3305_p4 = por %p3304_p3, %p3303_p2 }
  0x2b   :  { %p3306_p5 = pnand %p3305_p4, %p3299_p1 }
  0x2d   :  { %3309 = shalt.err (!%p3306_p5)
}
  0x2e   :  { %64 = dma.hbm_to_vmem [thread:$0]  %s4708_s4, 2048, %s59_s13, [#allocation12], %s3342_s7, %s3342_s7, %s3343_s8  }
  0x2f   :  { %3330 = dma.done.wait [#allocation6], 1024  }
  0x30   :  { %3331 = vsyncadd [#allocation6], 4294966272 }
  0x31   :  { %3332 = dma.done.wait [#allocation9], 16384  }
  0x32   :  { %3333 = vsyncadd [#allocation9], 4294950912 }
  0x33   :  { %3334 = dma.done.wait [#allocation12], 2048  }
  0x34   :  { %3335 = vsyncadd [#allocation12], 4294965248  ;;  %v4711_v0 = vmov 0.0   ;;  %v154_v1 = vld [vmem:[#allocation8 + $0x1e8] sm:$0xff]  ;;  %v156_v2 = vld [vmem:[#allocation8 + $0x1f8] sm:$0xff]  ;;  %vm3347_vm0 = vmmov 0  }
  0x35   :  { %243 = vmatprep.mubr.f32.mxu0 %v4711_v0  ;;  %356 = vmatprep.mubr.f32.mxu1 %v4711_v0  ;;  %v153_v3 = vld [vmem:[#allocation8 + $0x1e0] sm:$0xff]  ;;  %v155_v4 = vld [vmem:[#allocation8 + $0x1f0] sm:$0xff]  ;;  %v150_v5 = vld [vmem:[#allocation8 + $0x1c8] sm:$0xff] }
  0x36   :  { %179 = vmatprep.subr.mxu0 %v154_v1  ;;  %292 = vmatprep.subr.mxu1 %v156_v2  ;;  %v152_v6 = vld [vmem:[#allocation8 + $0x1d8] sm:$0xff]  ;;  %v149_v7 = vld [vmem:[#allocation8 + $0x1c0] sm:$0xff]  ;;  %v151_v8 = vld [vmem:[#allocation8 + $0x1d0] sm:$0xff] }
  0x37   :  { %180 = vmatpush1.msra.mxu0 %v153_v3  ;;  %293 = vmatpush1.msra.mxu1 %v155_v4  ;;  %v146_v9 = vld [vmem:[#allocation8 + $0x1a8] sm:$0xff]  ;;  %v148_v10 = vld [vmem:[#allocation8 + $0x1b8] sm:$0xff]  ;;  %v145_v11 = vld [vmem:[#allocation8 + $0x1a0] sm:$0xff] }
  0x38   :  { %181 = vmatprep.subr.mxu0 %v150_v5  ;;  %294 = vmatprep.subr.mxu1 %v152_v6  ;;  %v147_v12 = vld [vmem:[#allocation8 + $0x1b0] sm:$0xff]  ;;  %v142_v13 = vld [vmem:[#allocation8 + $0x188] sm:$0xff]  ;;  %v144_v14 = vld [vmem:[#allocation8 + $0x198] sm:$0xff] }
  0x39   :  { %182 = vmatpush1.msra.mxu0 %v149_v7  ;;  %295 = vmatpush1.msra.mxu1 %v151_v8  ;;  %v141_v15 = vld [vmem:[#allocation8 + $0x180] sm:$0xff]  ;;  %v143_v16 = vld [vmem:[#allocation8 + $0x190] sm:$0xff]  ;;  %v138_v17 = vld [vmem:[#allocation8 + $0x168] sm:$0xff] }
  0x3a   :  { %183 = vmatprep.subr.mxu0 %v146_v9  ;;  %296 = vmatprep.subr.mxu1 %v148_v10  ;;  %v140_v18 = vld [vmem:[#allocation8 + $0x178] sm:$0xff]  ;;  %v137_v19 = vld [vmem:[#allocation8 + $0x160] sm:$0xff]  ;;  %v139_v20 = vld [vmem:[#allocation8 + $0x170] sm:$0xff] }
  0x3b   :  { %184 = vmatpush1.msra.mxu0 %v145_v11  ;;  %297 = vmatpush1.msra.mxu1 %v147_v12  ;;  %v134_v21 = vld [vmem:[#allocation8 + $0x148] sm:$0xff]  ;;  %v136_v22 = vld [vmem:[#allocation8 + $0x158] sm:$0xff]  ;;  %v133_v23 = vld [vmem:[#allocation8 + $0x140] sm:$0xff] }
  0x3c   :  { %185 = vmatprep.subr.mxu0 %v142_v13  ;;  %298 = vmatprep.subr.mxu1 %v144_v14  ;;  %v135_v24 = vld [vmem:[#allocation8 + $0x150] sm:$0xff]  ;;  %v130_v25 = vld [vmem:[#allocation8 + $0x128] sm:$0xff]  ;;  %v132_v26 = vld [vmem:[#allocation8 + $0x138] sm:$0xff] }
  0x3d   :  { %186 = vmatpush1.msra.mxu0 %v141_v15  ;;  %299 = vmatpush1.msra.mxu1 %v143_v16  ;;  %v129_v27 = vld [vmem:[#allocation8 + $0x120] sm:$0xff]  ;;  %v131_v28 = vld [vmem:[#allocation8 + $0x130] sm:$0xff]  ;;  %v126_v29 = vld [vmem:[#allocation8 + $0x108] sm:$0xff] }
  0x3e   :  { %187 = vmatprep.subr.mxu0 %v138_v17  ;;  %300 = vmatprep.subr.mxu1 %v140_v18  ;;  %v128_v30 = vld [vmem:[#allocation8 + $0x118] sm:$0xff]  ;;  %v125_v31 = vld [vmem:[#allocation8 + $0x100] sm:$0xff]  ;;  %v127_v32 = vld [vmem:[#allocation8 + $0x110] sm:$0xff] }
  0x3f   :  { %188 = vmatpush1.msra.mxu0 %v137_v19  ;;  %301 = vmatpush1.msra.mxu1 %v139_v20  ;;  %v122_v33 = vld [vmem:[#allocation8 + $0xe8] sm:$0xff]  ;;  %v124_v34 = vld [vmem:[#allocation8 + $0xf8] sm:$0xff]  ;;  %v121_v35 = vld [vmem:[#allocation8 + $0xe0] sm:$0xff] }
  0x40   :  { %189 = vmatprep.subr.mxu0 %v134_v21  ;;  %302 = vmatprep.subr.mxu1 %v136_v22  ;;  %v123_v36 = vld [vmem:[#allocation8 + $0xf0] sm:$0xff]  ;;  %v118_v37 = vld [vmem:[#allocation8 + $0xc8] sm:$0xff]  ;;  %v120_v38 = vld [vmem:[#allocation8 + $0xd8] sm:$0xff] }
  0x41   :  { %190 = vmatpush1.msra.mxu0 %v133_v23  ;;  %303 = vmatpush1.msra.mxu1 %v135_v24  ;;  %v117_v39 = vld [vmem:[#allocation8 + $0xc0] sm:$0xff]  ;;  %v119_v40 = vld [vmem:[#allocation8 + $0xd0] sm:$0xff]  ;;  %v114_v41 = vld [vmem:[#allocation8 + $0xa8] sm:$0xff] }
  0x42   :  { %191 = vmatprep.subr.mxu0 %v130_v25  ;;  %304 = vmatprep.subr.mxu1 %v132_v26  ;;  %v116_v42 = vld [vmem:[#allocation8 + $0xb8] sm:$0xff]  ;;  %v113_v43 = vld [vmem:[#allocation8 + $0xa0] sm:$0xff]  ;;  %v115_v44 = vld [vmem:[#allocation8 + $0xb0] sm:$0xff] }
  0x43   :  { %192 = vmatpush1.msra.mxu0 %v129_v27  ;;  %305 = vmatpush1.msra.mxu1 %v131_v28  ;;  %v110_v45 = vld [vmem:[#allocation8 + $0x88] sm:$0xff]  ;;  %v112_v46 = vld [vmem:[#allocation8 + $0x98] sm:$0xff]  ;;  %v109_v47 = vld [vmem:[#allocation8 + $0x80] sm:$0xff] }
  0x44   :  { %193 = vmatprep.subr.mxu0 %v126_v29  ;;  %306 = vmatprep.subr.mxu1 %v128_v30  ;;  %v111_v48 = vld [vmem:[#allocation8 + $0x90] sm:$0xff]  ;;  %v106_v49 = vld [vmem:[#allocation8 + $0x68] sm:$0xff]  ;;  %v108_v50 = vld [vmem:[#allocation8 + $0x78] sm:$0xff] }
  0x45   :  { %194 = vmatpush1.msra.mxu0 %v125_v31  ;;  %307 = vmatpush1.msra.mxu1 %v127_v32  ;;  %v105_v51 = vld [vmem:[#allocation8 + $0x60] sm:$0xff]  ;;  %v107_v52 = vld [vmem:[#allocation8 + $0x70] sm:$0xff]  ;;  %v102_v53 = vld [vmem:[#allocation8 + $0x48] sm:$0xff] }
  0x46   :  { %195 = vmatprep.subr.mxu0 %v122_v33  ;;  %308 = vmatprep.subr.mxu1 %v124_v34  ;;  %v104_v54 = vld [vmem:[#allocation8 + $0x58] sm:$0xff]  ;;  %v101_v55 = vld [vmem:[#allocation8 + $0x40] sm:$0xff]  ;;  %v103_v56 = vld [vmem:[#allocation8 + $0x50] sm:$0xff] }
  0x47   :  { %196 = vmatpush1.msra.mxu0 %v121_v35  ;;  %309 = vmatpush1.msra.mxu1 %v123_v36  ;;  %v98_v57 = vld [vmem:[#allocation8 + $0x28] sm:$0xff]  ;;  %v100_v58 = vld [vmem:[#allocation8 + $0x38] sm:$0xff]  ;;  %v97_v59 = vld [vmem:[#allocation8 + $0x20] sm:$0xff] }
  0x48   :  { %197 = vmatprep.subr.mxu0 %v118_v37  ;;  %310 = vmatprep.subr.mxu1 %v120_v38  ;;  %v99_v60 = vld [vmem:[#allocation8 + $0x30] sm:$0xff]  ;;  %v94_v61 = vld [vmem:[#allocation8 + $0x8] sm:$0xff]  ;;  %v96_v62 = vld [vmem:[#allocation8 + $0x18] sm:$0xff] }
  0x49   :  { %198 = vmatpush1.msra.mxu0 %v117_v39  ;;  %311 = vmatpush1.msra.mxu1 %v119_v40  ;;  %v93_v63 = vld [vmem:[#allocation8] sm:$0xff]  ;;  %v95_v1 = vld [vmem:[#allocation8 + $0x10] sm:$0xff]  ;;  %v3410_v3 = vld [vmem:[#allocation10 + $0x1e8] sm:$0xff] }
  0x4a   :  { %199 = vmatprep.subr.mxu0 %v114_v41  ;;  %312 = vmatprep.subr.mxu1 %v116_v42  ;;  %v85_v2 = vld [vmem:[#allocation5] sm:$0xff]  ;;  %4836 = vst [vmem:[#allocation18_spill] sm:$0xff] %v3410_v3  ;;  %v3412_v4 = vld [vmem:[#allocation10 + $0x1f8] sm:$0xff]  ;;  %v3416_v6 = vld [vmem:[#allocation10 + $0x1f0] sm:$0xff] }
  0x4b   :  { %200 = vmatpush1.msra.mxu0 %v113_v43  ;;  %313 = vmatpush1.msra.mxu1 %v115_v44  ;;  %4837 = vst [vmem:[#allocation19_spill] sm:$0xff] %v3412_v4  ;;  %v3414_v5 = vld [vmem:[#allocation10 + $0x1e0] sm:$0xff]  ;;  %v3418_v7 = vld [vmem:[#allocation10 + $0x1c8] sm:$0xff]  ;;  %v3420_v8 = vld [vmem:[#allocation10 + $0x1d8] sm:$0xff] }
  0x4c   :  { %201 = vmatprep.subr.mxu0 %v110_v45  ;;  %314 = vmatprep.subr.mxu1 %v112_v46  ;;  %4838 = vst [vmem:[#allocation20_spill] sm:$0xff] %v3414_v5  ;;  %4839 = vst [vmem:[#allocation21_spill] sm:$0xff] %v3418_v7  ;;  %v3426_v9 = vld [vmem:[#allocation10 + $0x1c0] sm:$0xff]  ;;  %v3428_v10 = vld [vmem:[#allocation10 + $0x1d0] sm:$0xff] }
  0x4d   :  { %202 = vmatpush1.msra.mxu0 %v109_v47  ;;  %315 = vmatpush1.msra.mxu1 %v111_v48  ;;  %4840 = vst [vmem:[#allocation22_spill] sm:$0xff] %v3426_v9  ;;  %v86_v11 = vld [vmem:[#allocation5 + $0x8] sm:$0xff]  ;;  %v3436_v13 = vld [vmem:[#allocation10 + $0x1b8] sm:$0xff]  ;;  %v3440_v14 = vld [vmem:[#allocation10 + $0x1a0] sm:$0xff] }
  0x4e   :  { %203 = vmatprep.subr.mxu0 %v106_v49  ;;  %316 = vmatprep.subr.mxu1 %v108_v50  ;;  %v3434_v12 = vld [vmem:[#allocation10 + $0x1a8] sm:$0xff]  ;;  %4842 = vst [vmem:[#allocation24_spill] sm:$0xff] %v3440_v14  ;;  %v3442_v15 = vld [vmem:[#allocation10 + $0x1b0] sm:$0xff]  ;;  %v3446_v17 = vld [vmem:[#allocation10 + $0x198] sm:$0xff] }
  0x4f   :  { %204 = vmatpush1.msra.mxu0 %v105_v51  ;;  %317 = vmatpush1.msra.mxu1 %v107_v52  ;;  %4841 = vst [vmem:[#allocation23_spill] sm:$0xff] %v3434_v12  ;;  %v3444_v16 = vld [vmem:[#allocation10 + $0x188] sm:$0xff]  ;;  %v3452_v18 = vld [vmem:[#allocation10 + $0x180] sm:$0xff]  ;;  %v3454_v19 = vld [vmem:[#allocation10 + $0x190] sm:$0xff] }
  0x50   :  { %205 = vmatprep.subr.mxu0 %v102_v53  ;;  %318 = vmatprep.subr.mxu1 %v104_v54  ;;  %4843 = vst [vmem:[#allocation25_spill] sm:$0xff] %v3444_v16  ;;  %4844 = vst [vmem:[#allocation26_spill] sm:$0xff] %v3452_v18  ;;  %v87_v20 = vld [vmem:[#allocation5 + $0x10] sm:$0xff]  ;;  %v3460_v21 = vld [vmem:[#allocation10 + $0x168] sm:$0xff] }
  0x51   :  { %206 = vmatpush1.msra.mxu0 %v101_v55  ;;  %319 = vmatpush1.msra.mxu1 %v103_v56  ;;  %4845 = vst [vmem:[#allocation27_spill] sm:$0xff] %v3460_v21  ;;  %v3462_v22 = vld [vmem:[#allocation10 + $0x178] sm:$0xff]  ;;  %v3466_v23 = vld [vmem:[#allocation10 + $0x160] sm:$0xff]  ;;  %v3468_v24 = vld [vmem:[#allocation10 + $0x170] sm:$0xff] }
  0x52   :  { %207 = vmatprep.subr.mxu0 %v98_v57  ;;  %320 = vmatprep.subr.mxu1 %v100_v58  ;;  %4846 = vst [vmem:[#allocation28_spill] sm:$0xff] %v3466_v23  ;;  %v3470_v25 = vld [vmem:[#allocation10 + $0x148] sm:$0xff]  ;;  %v3472_v26 = vld [vmem:[#allocation10 + $0x158] sm:$0xff]  ;;  %v3478_v27 = vld [vmem:[#allocation10 + $0x140] sm:$0xff] }
  0x53   :  { %208 = vmatpush1.msra.mxu0 %v97_v59  ;;  %321 = vmatpush1.msra.mxu1 %v99_v60  ;;  %4847 = vst [vmem:[#allocation29_spill] sm:$0xff] %v3470_v25  ;;  %4848 = vst [vmem:[#allocation30_spill] sm:$0xff] %v3478_v27  ;;  %v3480_v28 = vld [vmem:[#allocation10 + $0x150] sm:$0xff]  ;;  %v88_v29 = vld [vmem:[#allocation5 + $0x18] sm:$0xff] }
  0x54   :  { %209 = vmatprep.subr.mxu0 %v94_v61  ;;  %322 = vmatprep.subr.mxu1 %v96_v62  ;;  %v3486_v30 = vld [vmem:[#allocation10 + $0x128] sm:$0xff]  ;;  %v3488_v31 = vld [vmem:[#allocation10 + $0x138] sm:$0xff]  ;;  %v3492_v32 = vld [vmem:[#allocation10 + $0x120] sm:$0xff] }
  0x55   :  { %210 = vmatpush1.msra.mxu0 %v93_v63  ;;  %323 = vmatpush1.msra.mxu1 %v95_v1  ;;  %4849 = vst [vmem:[#allocation31_spill] sm:$0xff] %v3486_v30  ;;  %4850 = vst [vmem:[#allocation32_spill] sm:$0xff] %v3492_v32  ;;  %v3494_v33 = vld [vmem:[#allocation10 + $0x130] sm:$0xff]  ;;  %v3496_v34 = vld [vmem:[#allocation10 + $0x108] sm:$0xff] }
  0x56   :  { %244 = vmatmul.mubr.f32.vlgmr.msra.gmra.mxu0 %v85_v2  ;;  %357 = vmatmul.mubr.f32.vlgmr.msra.gmra.mxu1 %v85_v2  ;;  %4851 = vst [vmem:[#allocation33_spill] sm:$0xff] %v3496_v34  ;;  %v3498_v35 = vld [vmem:[#allocation10 + $0x118] sm:$0xff]  ;;  %v3504_v36 = vld [vmem:[#allocation10 + $0x100] sm:$0xff]  ;;  %v3506_v37 = vld [vmem:[#allocation10 + $0x110] sm:$0xff] }
  0x57   :  { %524 = vmatprep.subr.mxu0 %v3410_v3  ;;  %595 = vmatprep.subr.mxu1 %v3412_v4  ;;  %4852 = vst [vmem:[#allocation34_spill] sm:$0xff] %v3504_v36  ;;  %v89_v38 = vld [vmem:[#allocation5 + $0x20] sm:$0xff]  ;;  %v3512_v39 = vld [vmem:[#allocation10 + $0xe8] sm:$0xff]  ;;  %v3514_v40 = vld [vmem:[#allocation10 + $0xf8] sm:$0xff] }
  0x58   :  { %525 = vmatpush1.msra.mxu0 %v3414_v5  ;;  %596 = vmatpush1.msra.mxu1 %v3416_v6  ;;  %4853 = vst [vmem:[#allocation35_spill] sm:$0xff] %v3512_v39  ;;  %v3518_v41 = vld [vmem:[#allocation10 + $0xe0] sm:$0xff]  ;;  %v3520_v42 = vld [vmem:[#allocation10 + $0xf0] sm:$0xff]  ;;  %v3522_v43 = vld [vmem:[#allocation10 + $0xc8] sm:$0xff] }
  0x59   :  { %526 = vmatprep.subr.mxu0 %v3418_v7  ;;  %597 = vmatprep.subr.mxu1 %v3420_v8  ;;  %4854 = vst [vmem:[#allocation36_spill] sm:$0xff] %v3518_v41  ;;  %4855 = vst [vmem:[#allocation37_spill] sm:$0xff] %v3522_v43  ;;  %v3524_v44 = vld [vmem:[#allocation10 + $0xd8] sm:$0xff]  ;;  %v3530_v45 = vld [vmem:[#allocation10 + $0xc0] sm:$0xff] }
  0x5a   :  { %249 = vmatprep.mubr.f32.mxu0 %v4711_v0  ;;  %362 = vmatprep.mubr.f32.mxu1 %v4711_v0  ;;  %4856 = vst [vmem:[#allocation38_spill] sm:$0xff] %v3530_v45  ;;  %v3532_v46 = vld [vmem:[#allocation10 + $0xd0] sm:$0xff]  ;;  %v90_v47 = vld [vmem:[#allocation5 + $0x28] sm:$0xff]  ;;  %v3540_v49 = vld [vmem:[#allocation10 + $0xb8] sm:$0xff] }
  0x5b   :  { %527 = vmatpush1.msra.mxu0 %v3426_v9  ;;  %598 = vmatpush1.msra.mxu1 %v3428_v10  ;;  %v3538_v48 = vld [vmem:[#allocation10 + $0xa8] sm:$0xff]  ;;  %v3544_v50 = vld [vmem:[#allocation10 + $0xa0] sm:$0xff]  ;;  %v3546_v51 = vld [vmem:[#allocation10 + $0xb0] sm:$0xff] }
  0x5c   :  { %250 = vmatmul.mubr.f32.gmra.mxu0 %v86_v11  ;;  %363 = vmatmul.mubr.f32.gmra.mxu1 %v86_v11  ;;  %4857 = vst [vmem:[#allocation39_spill] sm:$0xff] %v3538_v48  ;;  %4858 = vst [vmem:[#allocation40_spill] sm:$0xff] %v3544_v50  ;;  %v3548_v52 = vld [vmem:[#allocation10 + $0x88] sm:$0xff]  ;;  %v3550_v53 = vld [vmem:[#allocation10 + $0x98] sm:$0xff] }
  0x5d   :  { %528 = vmatprep.subr.mxu0 %v3434_v12  ;;  %599 = vmatprep.subr.mxu1 %v3436_v13  ;;  %4859 = vst [vmem:[#allocation41_spill] sm:$0xff] %v3548_v52  ;;  %v3556_v54 = vld [vmem:[#allocation10 + $0x80] sm:$0xff]  ;;  %v3558_v55 = vld [vmem:[#allocation10 + $0x90] sm:$0xff]  ;;  %v3564_v57 = vld [vmem:[#allocation10 + $0x68] sm:$0xff] }
  0x5e   :  { %529 = vmatpush1.msra.mxu0 %v3440_v14  ;;  %600 = vmatpush1.msra.mxu1 %v3442_v15  ;;  %4860 = vst [vmem:[#allocation42_spill] sm:$0xff] %v3556_v54  ;;  %v91_v56 = vld [vmem:[#allocation5 + $0x30] sm:$0xff]  ;;  %4861 = vst [vmem:[#allocation43_spill] sm:$0xff] %v3564_v57  ;;  %v3566_v58 = vld [vmem:[#allocation10 + $0x78] sm:$0xff] }
  0x5f   :  { %530 = vmatprep.subr.mxu0 %v3444_v16  ;;  %601 = vmatprep.subr.mxu1 %v3446_v17  ;;  %v3570_v59 = vld [vmem:[#allocation10 + $0x60] sm:$0xff]  ;;  %v3572_v60 = vld [vmem:[#allocation10 + $0x70] sm:$0xff]  ;;  %v3574_v61 = vld [vmem:[#allocation10 + $0x48] sm:$0xff] }
  0x60   :  { %255 = vmatprep.mubr.f32.mxu0 %v4711_v0  ;;  %368 = vmatprep.mubr.f32.mxu1 %v4711_v0  ;;  %4862 = vst [vmem:[#allocation44_spill] sm:$0xff] %v3570_v59  ;;  %4863 = vst [vmem:[#allocation45_spill] sm:$0xff] %v3574_v61  ;;  %v3576_v62 = vld [vmem:[#allocation10 + $0x58] sm:$0xff]  ;;  %v3582_v63 = vld [vmem:[#allocation10 + $0x40] sm:$0xff] }
  0x61   :  { %531 = vmatpush1.msra.mxu0 %v3452_v18  ;;  %602 = vmatpush1.msra.mxu1 %v3454_v19  ;;  %4864 = vst [vmem:[#allocation46_spill] sm:$0xff] %v3582_v63  ;;  %v3584_v1 = vld [vmem:[#allocation10 + $0x50] sm:$0xff]  ;;  %v92_v2 = vld [vmem:[#allocation5 + $0x38] sm:$0xff]  ;;  %v3590_v11 = vld [vmem:[#allocation10 + $0x28] sm:$0xff] }
  0x62   :  { %256 = vmatmul.mubr.f32.gmra.mxu0 %v87_v20  ;;  %369 = vmatmul.mubr.f32.gmra.mxu1 %v87_v20  ;;  %4865 = vst [vmem:[#allocation47_spill] sm:$0xff] %v3584_v1  ;;  %4866 = vst [vmem:[#allocation48_spill] sm:$0xff] %v3590_v11  ;;  %v3592_v20 = vld [vmem:[#allocation10 + $0x38] sm:$0xff] }
  0x63   :  { %532 = vmatprep.subr.mxu0 %v3460_v21  ;;  %603 = vmatprep.subr.mxu1 %v3462_v22 }
  0x64   :  { %533 = vmatpush1.msra.mxu0 %v3466_v23  ;;  %604 = vmatpush1.msra.mxu1 %v3468_v24 }
  0x65   :  { %534 = vmatprep.subr.mxu0 %v3470_v25  ;;  %605 = vmatprep.subr.mxu1 %v3472_v26 }
  0x66   :  { %261 = vmatprep.mubr.f32.mxu0 %v4711_v0  ;;  %374 = vmatprep.mubr.f32.mxu1 %v4711_v0 }
  0x67   :  { %535 = vmatpush1.msra.mxu0 %v3478_v27  ;;  %606 = vmatpush1.msra.mxu1 %v3480_v28 }
  0x68   :  { %262 = vmatmul.mubr.f32.gmra.mxu0 %v88_v29  ;;  %375 = vmatmul.mubr.f32.gmra.mxu1 %v88_v29  ;;  %v3596_v29 = vld [vmem:[#allocation10 + $0x20] sm:$0xff] }
  0x69   :  { %536 = vmatprep.subr.mxu0 %v3486_v30  ;;  %607 = vmatprep.subr.mxu1 %v3488_v31  ;;  %4867 = vst [vmem:[#allocation49_spill] sm:$0xff] %v3596_v29 }
  0x6a   :  { %537 = vmatpush1.msra.mxu0 %v3492_v32  ;;  %608 = vmatpush1.msra.mxu1 %v3494_v33 }
  0x6b   :  { %538 = vmatprep.subr.mxu0 %v3496_v34  ;;  %609 = vmatprep.subr.mxu1 %v3498_v35 }
  0x6c   :  { %267 = vmatprep.mubr.f32.mxu0 %v4711_v0  ;;  %380 = vmatprep.mubr.f32.mxu1 %v4711_v0 }
  0x6d   :  { %539 = vmatpush1.msra.mxu0 %v3504_v36  ;;  %610 = vmatpush1.msra.mxu1 %v3506_v37 }
  0x6e   :  { %268 = vmatmul.mubr.f32.gmra.mxu0 %v89_v38  ;;  %381 = vmatmul.mubr.f32.gmra.mxu1 %v89_v38  ;;  %v3598_v38 = vld [vmem:[#allocation10 + $0x30] sm:$0xff] }
  0x6f   :  { %540 = vmatprep.subr.mxu0 %v3512_v39  ;;  %611 = vmatprep.subr.mxu1 %v3514_v40  ;;  %4868 = vst [vmem:[#allocation50_spill] sm:$0xff] %v3598_v38 }
  0x70   :  { %541 = vmatpush1.msra.mxu0 %v3518_v41  ;;  %612 = vmatpush1.msra.mxu1 %v3520_v42 }
  0x71   :  { %542 = vmatprep.subr.mxu0 %v3522_v43  ;;  %613 = vmatprep.subr.mxu1 %v3524_v44 }
  0x72   :  { %273 = vmatprep.mubr.f32.mxu0 %v4711_v0  ;;  %386 = vmatprep.mubr.f32.mxu1 %v4711_v0 }
  0x73   :  { %543 = vmatpush1.msra.mxu0 %v3530_v45  ;;  %614 = vmatpush1.msra.mxu1 %v3532_v46 }
  0x74   :  { %274 = vmatmul.mubr.f32.gmra.mxu0 %v90_v47  ;;  %387 = vmatmul.mubr.f32.gmra.mxu1 %v90_v47  ;;  %v3600_v47 = vld [vmem:[#allocation10 + $0x8] sm:$0xff] }
  0x75   :  { %544 = vmatprep.subr.mxu0 %v3538_v48  ;;  %615 = vmatprep.subr.mxu1 %v3540_v49  ;;  %4869 = vst [vmem:[#allocation51_spill] sm:$0xff] %v3600_v47 }
  0x76   :  { %545 = vmatpush1.msra.mxu0 %v3544_v50  ;;  %616 = vmatpush1.msra.mxu1 %v3546_v51 }
  0x77   :  { %546 = vmatprep.subr.mxu0 %v3548_v52  ;;  %617 = vmatprep.subr.mxu1 %v3550_v53 }
  0x78   :  { %279 = vmatprep.mubr.f32.mxu0 %v4711_v0  ;;  %392 = vmatprep.mubr.f32.mxu1 %v4711_v0 }
  0x79   :  { %547 = vmatpush1.msra.mxu0 %v3556_v54  ;;  %618 = vmatpush1.msra.mxu1 %v3558_v55 }
  0x7a   :  { %280 = vmatmul.mubr.f32.gmra.mxu0 %v91_v56  ;;  %393 = vmatmul.mubr.f32.gmra.mxu1 %v91_v56  ;;  %v3602_v56 = vld [vmem:[#allocation10 + $0x18] sm:$0xff] }
  0x7b   :  { %548 = vmatprep.subr.mxu0 %v3564_v57  ;;  %619 = vmatprep.subr.mxu1 %v3566_v58  ;;  %4870 = vst [vmem:[#allocation52_spill] sm:$0xff] %v3602_v56 }
  0x7c   :  { %549 = vmatpush1.msra.mxu0 %v3570_v59  ;;  %620 = vmatpush1.msra.mxu1 %v3572_v60 }
  0x7d   :  { %550 = vmatprep.subr.mxu0 %v3574_v61  ;;  %621 = vmatprep.subr.mxu1 %v3576_v62 }
  0x7e   :  { %285 = vmatprep.mubr.f32.mxu0 %v4711_v0  ;;  %398 = vmatprep.mubr.f32.mxu1 %v4711_v0  ;;  %v3606_v0 = vld [vmem:[#allocation10] sm:$0xff] }
  0x7f   :  { %551 = vmatpush1.msra.mxu0 %v3582_v63  ;;  %622 = vmatpush1.msra.mxu1 %v3584_v1  ;;  %4871 = vst [vmem:[#allocation53_spill] sm:$0xff] %v3606_v0  ;;  %v3610_v1 = vld [vmem:[#allocation10 + $0x10] sm:$0xff] }
  0x80   :  { %286 = vmatmul.mubr.f32.gmra.mxu0 %v92_v2  ;;  %399 = vmatmul.mubr.f32.gmra.mxu1 %v92_v2  ;;  %4872 = vst [vmem:[#allocation54_spill] sm:$0xff] %v3610_v1  ;;  %v4873_v2 = vmov 0.0  }
  0x81   :  { %552 = vmatprep.subr.mxu0 %v3590_v11  ;;  %623 = vmatprep.subr.mxu1 %v3592_v20 }
  0x82   :  { %553 = vmatpush1.msra.mxu0 %v3596_v29  ;;  %624 = vmatpush1.msra.mxu1 %v3598_v38 }
  0x83   :  { %554 = vmatprep.subr.mxu0 %v3600_v47  ;;  %625 = vmatprep.subr.mxu1 %v3602_v56 }
  0x84   :  { %555 = vmatpush1.msra.mxu0 %v3606_v0  ;;  %588 = vmatprep.mubr.f32.mxu0 %v4873_v2 }
  0x85   :  { %626 = vmatpush1.msra.mxu1 %v3610_v1  ;;  %659 = vmatprep.mubr.f32.mxu1 %v4873_v2 }
  0x86   :  { %589 = vmatmul.mubr.f32.vlgmr.msra.gmra.mxu0 %v4873_v2  ;;  %660 = vmatmul.mubr.f32.vlgmr.msra.gmra.mxu1 %v4873_v2 }
  0x87   :  { %2682 = vmatprep.subr.mxu0 %v4873_v2  ;;  %776 = vmatprep.subr.mxu1 %v3410_v3 }
  0x88   :  { %777 = vmatpush1.msra.mxu1 %v3414_v5  ;;  %840 = vmatprep.mubr.f32.mxu1 %v4873_v2 }
  0x89   :  { %778 = vmatprep.subr.mxu1 %v3418_v7  ;;  %2714 = vmatprep.mubr.msk.f32.mxu0 %vm3347_vm0, %v4873_v2 }
  0x8a   :  { %779 = vmatpush1.msra.mxu1 %v3426_v9 }
  0x8b   :  { %780 = vmatprep.subr.mxu1 %v3434_v12 }
  0x8c   :  { %781 = vmatpush1.msra.mxu1 %v3440_v14 }
  0x8d   :  { %782 = vmatprep.subr.mxu1 %v3444_v16 }
  0x8e   :  { %783 = vmatpush1.msra.mxu1 %v3452_v18 }
  0x8f   :  { %784 = vmatprep.subr.mxu1 %v3460_v21 }
  0x90   :  { %785 = vmatpush1.msra.mxu1 %v3466_v23  ;;  %v157_v23 = vld [vmem:[%s4707_s3] sm:$0xf] }
  0x91   :  { %786 = vmatprep.subr.mxu1 %v3470_v25 }
  0x92   :  { %787 = vmatpush1.msra.mxu1 %v3478_v27 }
  0x93   :  { %788 = vmatprep.subr.mxu1 %v3486_v30 }
  0x94   :  { %789 = vmatpush1.msra.mxu1 %v3492_v32 }
  0x95   :  { %790 = vmatprep.subr.mxu1 %v3496_v34 }
  0x96   :  { %791 = vmatpush1.msra.mxu1 %v3504_v36  ;;  %v159_v36 = vlaneseq }
  0x97   :  { %792 = vmatprep.subr.mxu1 %v3512_v39  ;;  %v3715_v39 = vld [vmem:[#allocation11] sm:$0xff] }
  0x98   :  { %793 = vmatpush1.msra.mxu1 %v3518_v41  ;;  %v3711_v41 = vld [vmem:[#allocation11 + $0x8] sm:$0xff]  ;;  %4875 = vst [vmem:[#allocation56_spill] sm:$0xff] %v3715_v39  ;;  %v160_v34 = vshrl.u32 %v159_v36, 7 }
  0x99   :  { %794 = vmatprep.subr.mxu1 %v3522_v43  ;;  %v3707_v43 = vld [vmem:[#allocation11 + $0x10] sm:$0xff]  ;;  %4874 = vst [vmem:[#allocation55_spill] sm:$0xff] %v3711_v41 }
  0x9a   :  { %795 = vmatpush1.msra.mxu1 %v3530_v45  ;;  %v3703_v45 = vld [vmem:[#allocation11 + $0x18] sm:$0xff]  ;;  %v161_v27 = vsub.s32 0, %v160_v34  ;;  %v169_v25 = vsub.s32 2, %v160_v34  ;;  %v165_v16 = vsub.s32 1, %v160_v34  ;;  %v173_v14 = vsub.s32 3, %v160_v34 }
  0x9b   :  { %796 = vmatprep.subr.mxu1 %v3538_v48  ;;  %v3699_v48 = vld [vmem:[#allocation11 + $0x20] sm:$0xff] }
  0x9c   :  { %797 = vmatpush1.msra.mxu1 %v3544_v50  ;;  %v3695_v50 = vld [vmem:[#allocation11 + $0x28] sm:$0xff]  ;;  %v162_v12 = vrot.slane %v157_v23, %v161_v27  ;;  %v166_v7 = vrot.slane %v157_v23, %v165_v16 }
  0x9d   :  { %798 = vmatprep.subr.mxu1 %v3548_v52  ;;  %v3655_v52 = vld [vmem:[#allocation11 + $0x78] sm:$0xff] }
  0x9e   :  { %799 = vmatpush1.msra.mxu1 %v3556_v54  ;;  %2683 = vmatpush3.msra.mxu0 %v3655_v52  ;;  %v3689_v54 = vld [vmem:[#allocation11 + $0x30] sm:$0xff] }
  0x9f   :  { %800 = vmatprep.subr.mxu1 %v3564_v57  ;;  %2684 = vmatprep.subr.mxu0 %v4873_v2  ;;  %v3687_v57 = vld [vmem:[#allocation11 + $0x38] sm:$0xff] }
  0xa0   :  { %801 = vmatpush1.msra.mxu1 %v3570_v59  ;;  %v3659_v59 = vld [vmem:[#allocation11 + $0x70] sm:$0xff] }
  0xa1   :  { %802 = vmatprep.subr.mxu1 %v3574_v61  ;;  %2685 = vmatpush3.msra.mxu0 %v3659_v59  ;;  %v3683_v61 = vld [vmem:[#allocation11 + $0x40] sm:$0xff] }
  0xa2   :  { %803 = vmatpush1.msra.mxu1 %v3582_v63  ;;  %2686 = vmatprep.subr.mxu0 %v4873_v2  ;;  %v3679_v63 = vld [vmem:[#allocation11 + $0x48] sm:$0xff] }
  0xa3   :  { %804 = vmatprep.subr.mxu1 %v3590_v11  ;;  %v3663_v11 = vld [vmem:[#allocation11 + $0x68] sm:$0xff] }
  0xa4   :  { %805 = vmatpush1.msra.mxu1 %v3596_v29  ;;  %2687 = vmatpush3.msra.mxu0 %v3663_v11  ;;  %v3675_v29 = vld [vmem:[#allocation11 + $0x50] sm:$0xff] }
  0xa5   :  { %806 = vmatprep.subr.mxu1 %v3600_v47  ;;  %2688 = vmatprep.subr.mxu0 %v4873_v2  ;;  %v3671_v47 = vld [vmem:[#allocation11 + $0x58] sm:$0xff] }
  0xa6   :  { %807 = vmatpush1.msra.mxu1 %v3606_v0  ;;  %v3667_v0 = vld [vmem:[#allocation11 + $0x60] sm:$0xff] }
  0xa7   :  { %2717 = vmatprep.subr.mxu1 %v4873_v2  ;;  %2689 = vmatpush3.msra.mxu0 %v3667_v0 }
  0xa8   :  { %2690 = vmatprep.subr.mxu0 %v4873_v2 }
  0xa9   :  { %2691 = vmatpush3.msra.mxu0 %v3671_v47 }
  0xaa   :  { %2692 = vmatprep.subr.mxu0 %v4873_v2 }
  0xab   :  { %2693 = vmatpush3.msra.mxu0 %v3675_v29 }
  0xac   :  { %2694 = vmatprep.subr.mxu0 %v4873_v2 }
  0xad   :  { %2695 = vmatpush3.msra.mxu0 %v3679_v63 }
  0xae   :  { %2696 = vmatprep.subr.mxu0 %v4873_v2 }
  0xaf   :  { %2697 = vmatpush3.msra.mxu0 %v3683_v61 }
  0xb0   :  { %2698 = vmatprep.subr.mxu0 %v4873_v2 }
  0xb1   :  { %2699 = vmatpush3.msra.mxu0 %v3687_v57 }
  0xb2   :  { %2700 = vmatprep.subr.mxu0 %v4873_v2 }
  0xb3   :  { %2701 = vmatpush3.msra.mxu0 %v3689_v54 }
  0xb4   :  { %2702 = vmatprep.subr.mxu0 %v4873_v2 }
  0xb5   :  { %2703 = vmatpush3.msra.mxu0 %v3695_v50 }
  0xb6   :  { %2704 = vmatprep.subr.mxu0 %v4873_v2 }
  0xb7   :  { %2705 = vmatpush3.msra.mxu0 %v3699_v48 }
  0xb8   :  { %2706 = vmatprep.subr.mxu0 %v4873_v2 }
  0xb9   :  { %2707 = vmatpush3.msra.mxu0 %v3703_v45 }
  0xba   :  { %2708 = vmatprep.subr.mxu0 %v4873_v2 }
  0xbb   :  { %2709 = vmatpush3.msra.mxu0 %v3707_v43 }
  0xbc   :  { %2710 = vmatprep.subr.mxu0 %v4873_v2 }
  0xbd   :  { %2711 = vmatpush3.msra.mxu0 %v3711_v41 }
  0xbe   :  { %2712 = vmatprep.subr.mxu0 %v4873_v2 }
  0xbf   :  { %2713 = vmatpush3.msra.mxu0 %v3715_v39  ;;  %v3734_v39 = vrot.slane %v157_v23, %v173_v14 }
  0xc0   :  { %847 = vmatprep.subr.mxu0 %v3412_v4  ;;  %v3732_v4 = vrot.slane %v157_v23, %v169_v25 }
 0x116   :  { %v3721_v32 = vpop.f32.mrf.mxu0  ;;  %v3723_v30 = vpop.f32.mrf.mxu1 }
 0x118   :  { %v3728_v21 = vpop.f32.mrf.mxu0  ;;  %v3730_v18 = vpop.f32.mrf.mxu1 }
 0x11c   :  { %v251_v36 = vpop.f32.mrf.mxu0  ;;  %v364_v9 = vpop.f32.mrf.mxu1 }
 0x11d   :  { %v3736_v5 = vadd.f32 %v251_v36, %v162_v12  ;;  %v3739_v3 = vadd.f32 %v364_v9, %v3732_v4 }
 0x11e   :  { %v253_v1 = vpop.f32.mrf.mxu0  ;;  %v366_v41 = vpop.f32.mrf.mxu1 }
 0x11f   :  { %4876 = vst [vmem:[#allocation57_spill] sm:$0xff] %v3736_v5  ;;  %4877 = vst [vmem:[#allocation58_spill] sm:$0xff] %v3739_v3  ;;  %v3741_v56 = vadd.f32 %v253_v1, %v166_v7  ;;  %v3744_v38 = vadd.f32 %v366_v41, %v3734_v39 }
 0x121   :  { %4878 = vst [vmem:[#allocation59_spill] sm:$0xff] %v3741_v56  ;;  %4879 = vst [vmem:[#allocation60_spill] sm:$0xff] %v3744_v38 }
 0x122   :  { %v257_v27 = vpop.f32.mrf.mxu0  ;;  %v370_v25 = vpop.f32.mrf.mxu1 }
 0x123   :  { %v3746_v34 = vadd.f32 %v257_v27, %v162_v12  ;;  %v3749_v16 = vadd.f32 %v370_v25, %v3732_v4 }
 0x124   :  { %v259_v14 = vpop.f32.mrf.mxu0  ;;  %v372_v23 = vpop.f32.mrf.mxu1 }
 0x125   :  { %4880 = vst [vmem:[#allocation61_spill] sm:$0xff] %v3746_v34  ;;  %4881 = vst [vmem:[#allocation62_spill] sm:$0xff] %v3749_v16  ;;  %v3751_v36 = vadd.f32 %v259_v14, %v166_v7  ;;  %v3754_v9 = vadd.f32 %v372_v23, %v3734_v39 }
 0x127   :  { %4882 = vst [vmem:[#allocation63_spill] sm:$0xff] %v3751_v36  ;;  %4883 = vst [vmem:[#allocation64_spill] sm:$0xff] %v3754_v9 }
 0x128   :  { %v263_v3 = vpop.f32.mrf.mxu0  ;;  %v376_v1 = vpop.f32.mrf.mxu1 }
 0x129   :  { %v3756_v5 = vadd.f32 %v263_v3, %v162_v12  ;;  %v3759_v41 = vadd.f32 %v376_v1, %v3732_v4 }
 0x12a   :  { %v265_v38 = vpop.f32.mrf.mxu0  ;;  %v378_v27 = vpop.f32.mrf.mxu1 }
 0x12b   :  { %4884 = vst [vmem:[#allocation65_spill] sm:$0xff] %v3756_v5  ;;  %4885 = vst [vmem:[#allocation66_spill] sm:$0xff] %v3759_v41  ;;  %v3761_v34 = vadd.f32 %v265_v38, %v166_v7  ;;  %v3764_v25 = vadd.f32 %v378_v27, %v3734_v39 }
 0x12d   :  { %4886 = vst [vmem:[#allocation67_spill] sm:$0xff] %v3761_v34  ;;  %4887 = vst [vmem:[#allocation68_spill] sm:$0xff] %v3764_v25 }
 0x12e   :  { %v269_v16 = vpop.f32.mrf.mxu0  ;;  %v382_v14 = vpop.f32.mrf.mxu1 }
 0x12f   :  { %v3766_v36 = vadd.f32 %v269_v16, %v162_v12  ;;  %v3769_v23 = vadd.f32 %v382_v14, %v3732_v4 }
 0x130   :  { %v271_v9 = vpop.f32.mrf.mxu0  ;;  %v384_v3 = vpop.f32.mrf.mxu1 }
 0x131   :  { %4888 = vst [vmem:[#allocation69_spill] sm:$0xff] %v3766_v36  ;;  %4889 = vst [vmem:[#allocation70_spill] sm:$0xff] %v3769_v23  ;;  %v3771_v5 = vadd.f32 %v271_v9, %v166_v7  ;;  %v3774_v1 = vadd.f32 %v384_v3, %v3734_v39 }
 0x133   :  { %4890 = vst [vmem:[#allocation71_spill] sm:$0xff] %v3771_v5  ;;  %4891 = vst [vmem:[#allocation72_spill] sm:$0xff] %v3774_v1 }
 0x134   :  { %v275_v41 = vpop.f32.mrf.mxu0  ;;  %v388_v38 = vpop.f32.mrf.mxu1 }
 0x135   :  { %v3776_v34 = vadd.f32 %v275_v41, %v162_v12  ;;  %v3779_v27 = vadd.f32 %v388_v38, %v3732_v4 }
 0x136   :  { %v277_v25 = vpop.f32.mrf.mxu0  ;;  %v390_v16 = vpop.f32.mrf.mxu1 }
 0x137   :  { %4892 = vst [vmem:[#allocation73_spill] sm:$0xff] %v3776_v34  ;;  %4893 = vst [vmem:[#allocation74_spill] sm:$0xff] %v3779_v27  ;;  %v3781_v36 = vadd.f32 %v277_v25, %v166_v7  ;;  %v3784_v14 = vadd.f32 %v390_v16, %v3734_v39 }
 0x139   :  { %4894 = vst [vmem:[#allocation75_spill] sm:$0xff] %v3781_v36  ;;  %4895 = vst [vmem:[#allocation76_spill] sm:$0xff] %v3784_v14 }
 0x13a   :  { %v281_v23 = vpop.f32.mrf.mxu0  ;;  %v394_v9 = vpop.f32.mrf.mxu1 }
 0x13b   :  { %v3786_v5 = vadd.f32 %v281_v23, %v162_v12  ;;  %v3789_v3 = vadd.f32 %v394_v9, %v3732_v4 }
 0x13c   :  { %v283_v1 = vpop.f32.mrf.mxu0  ;;  %v396_v41 = vpop.f32.mrf.mxu1 }
 0x13d   :  { %4896 = vst [vmem:[#allocation77_spill] sm:$0xff] %v3786_v5  ;;  %4897 = vst [vmem:[#allocation78_spill] sm:$0xff] %v3789_v3  ;;  %v3791_v34 = vadd.f32 %v283_v1, %v166_v7  ;;  %v3794_v38 = vadd.f32 %v396_v41, %v3734_v39  ;;  %v246_v1 = vadd.f32 %v3721_v32, %v162_v12 }
 0x13e   :  { %v248_v41 = vadd.f32 %v3728_v21, %v166_v7 }
 0x13f   :  { %4898 = vst [vmem:[#allocation79_spill] sm:$0xff] %v3791_v34  ;;  %4899 = vst [vmem:[#allocation80_spill] sm:$0xff] %v3794_v38 }
 0x140   :  { %v287_v27 = vpop.f32.mrf.mxu0  ;;  %v400_v25 = vpop.f32.mrf.mxu1 }
 0x141   :  { %v3796_v36 = vadd.f32 %v287_v27, %v162_v12  ;;  %v3799_v16 = vadd.f32 %v400_v25, %v3732_v4 }
 0x142   :  { %v289_v14 = vpop.f32.mrf.mxu0  ;;  %v402_v23 = vpop.f32.mrf.mxu1 }
 0x143   :  { %4900 = vst [vmem:[#allocation81_spill] sm:$0xff] %v3796_v36  ;;  %4901 = vst [vmem:[#allocation82_spill] sm:$0xff] %v3799_v16  ;;  %v3801_v5 = vadd.f32 %v289_v14, %v166_v7  ;;  %v3804_v9 = vadd.f32 %v402_v23, %v3734_v39  ;;  %v361_v14 = vadd.f32 %v3730_v18, %v3734_v39 }
 0x144   :  { %v359_v23 = vadd.f32 %v3723_v30, %v3732_v4 }
 0x145   :  { %4902 = vst [vmem:[#allocation83_spill] sm:$0xff] %v3801_v5  ;;  %4903 = vst [vmem:[#allocation84_spill] sm:$0xff] %v3804_v9 }
 0x146   :  { %v590_v3 = vpop.f32.mrf.mxu0  ;;  %v661_v36 = vpop.f32.mrf.mxu1 }
 0x147   :  { %v666_v38 = vadd.f32 %v590_v3, %v246_v1  ;;  %v668_v9 = vadd.f32 %v661_v36, %v359_v23  ;;  %v4904_v36 = vld [vmem:[#allocation47_spill] sm:$0xff]  ;;  %v4909_v23 = vld [vmem:[#allocation18_spill] sm:$0xff] }
 0x148   :  { %v592_v34 = vpop.f32.mrf.mxu0  ;;  %v663_v16 = vpop.f32.mrf.mxu1 }
 0x149   :  { %v2521_v56 = vmul.f32 -1.442695, %v666_v38  ;;  %v667_v27 = vadd.f32 %v592_v34, %v248_v41  ;;  %v669_v5 = vadd.f32 %v663_v16, %v361_v14  ;;  %v4908_v14 = vld [vmem:[#allocation54_spill] sm:$0xff] }
 0x14b   :  { %2973 = vpow2.f32 %v2521_v56  ;;  %v2522_v25 = vmul.f32 -1.442695, %v667_v27  ;;  %v2523_v12 = vmul.f32 -1.442695, %v669_v5  ;;  %v4906_v27 = vld [vmem:[#allocation52_spill] sm:$0xff] }
 0x14d   :  { %2975 = vpow2.f32 %v2522_v25  ;;  %v4907_v25 = vld [vmem:[#allocation55_spill] sm:$0xff] }
 0x14e   :  { %2977 = vpow2.f32 %v2523_v12  ;;  %v4910_v12 = vld [vmem:[#allocation20_spill] sm:$0xff] }
 0x158   :  { %v2974_v32 = vpop.eup %2973 }
 0x159   :  { %v673_v7 = vadd.f32 1.0, %v2974_v32  ;;  %v4911_v32 = vld [vmem:[#allocation56_spill] sm:$0xff] }
 0x15a   :  { %v2976_v21 = vpop.eup %2975 }
 0x15b   :  { %2979 = vrcp.f32 %v673_v7  ;;  %v679_v34 = vadd.f32 1.0, %v2976_v21  ;;  %v2978_v56 = vpop.eup %2977  ;;  %v4912_v7 = vld [vmem:[#allocation21_spill] sm:$0xff]  ;;  %v4913_v21 = vld [vmem:[#allocation22_spill] sm:$0xff] }
 0x15c   :  { %2981 = vtanh.f32 %v668_v9  ;;  %v686_v41 = vadd.f32 1.0, %v2978_v56  ;;  %v4905_v9 = vld [vmem:[#allocation50_spill] sm:$0xff]  ;;  %v4915_v56 = vld [vmem:[#allocation19_spill] sm:$0xff] }
 0x15d   :  { %2983 = vrcp.f32 %v679_v34  ;;  %v4914_v34 = vld [vmem:[#allocation23_spill] sm:$0xff] }
 0x15e   :  { %2985 = vrcp.f32 %v686_v41  ;;  %v4919_v41 = vld [vmem:[#allocation27_spill] sm:$0xff] }
 0x168   :  { %v2980_v3 = vpop.eup %2979 }
 0x169   :  { %v2982_v38 = vpop.eup %2981 }
 0x16a   :  { %v2984_v1 = vpop.eup %2983  ;;  %v690_v39 = vmul.f32 %v2982_v38, %v2980_v3  ;;  %v4916_v3 = vld [vmem:[#allocation24_spill] sm:$0xff]  ;;  %v4917_v38 = vld [vmem:[#allocation25_spill] sm:$0xff] }
 0x16b   :  { %v689_v18 = vmul.f32 0.0, %v2984_v1  ;;  %v2986_v4 = vpop.eup %2985  ;;  %v4918_v1 = vld [vmem:[#allocation26_spill] sm:$0xff] }
 0x16d   :  { %v3812_v16 = vadd.f32 %v690_v39, %v689_v18  ;;  %v4920_v18 = vld [vmem:[#allocation28_spill] sm:$0xff]  ;;  %v4921_v39 = vld [vmem:[#allocation29_spill] sm:$0xff] }
 0x16f   :  { %2987 = vtanh.f32 %v3812_v16 }
 0x17c   :  { %v2988_v5 = vpop.eup %2987 }
 0x17d   :  { %v3815_v30 = vmul.f32 %v2988_v5, %v2986_v4  ;;  %v4922_v4 = vld [vmem:[#allocation30_spill] sm:$0xff]  ;;  %v4923_v5 = vld [vmem:[#allocation31_spill] sm:$0xff] }
 0x17f   :  { %2715 = vmatmul.mubr.f32.vlgmr.msra.gmra.mxu0 %v3815_v30  ;;  %841 = vmatmul.mubr.f32.vlgmr.msra.gmra.mxu1 %v3815_v30 }
 0x180   :  { %848 = vmatpush1.msra.mxu0 %v3416_v6  ;;  %911 = vmatprep.mubr.f32.mxu0 %v4873_v2 }
 0x181   :  { %849 = vmatprep.subr.mxu0 %v3420_v8  ;;  %2718 = vmatpush3.msra.mxu1 %v3655_v52 }
 0x182   :  { %850 = vmatpush1.msra.mxu0 %v3428_v10  ;;  %2719 = vmatprep.subr.mxu1 %v4873_v2 }
 0x183   :  { %851 = vmatprep.subr.mxu0 %v3436_v13  ;;  %2720 = vmatpush3.msra.mxu1 %v3659_v59 }
 0x184   :  { %852 = vmatpush1.msra.mxu0 %v3442_v15  ;;  %2721 = vmatprep.subr.mxu1 %v4873_v2 }
 0x185   :  { %853 = vmatprep.subr.mxu0 %v3446_v17  ;;  %2722 = vmatpush3.msra.mxu1 %v3663_v11 }
 0x186   :  { %854 = vmatpush1.msra.mxu0 %v3454_v19  ;;  %2723 = vmatprep.subr.mxu1 %v4873_v2 }
 0x187   :  { %855 = vmatprep.subr.mxu0 %v3462_v22  ;;  %2724 = vmatpush3.msra.mxu1 %v3667_v0 }
 0x188   :  { %856 = vmatpush1.msra.mxu0 %v3468_v24  ;;  %2725 = vmatprep.subr.mxu1 %v4873_v2 }
 0x189   :  { %857 = vmatprep.subr.mxu0 %v3472_v26  ;;  %2726 = vmatpush3.msra.mxu1 %v3671_v47 }
 0x18a   :  { %858 = vmatpush1.msra.mxu0 %v3480_v28  ;;  %2727 = vmatprep.subr.mxu1 %v4873_v2 }
 0x18b   :  { %859 = vmatprep.subr.mxu0 %v3488_v31  ;;  %2728 = vmatpush3.msra.mxu1 %v3675_v29 }
 0x18c   :  { %860 = vmatpush1.msra.mxu0 %v3494_v33  ;;  %2729 = vmatprep.subr.mxu1 %v4873_v2 }
 0x18d   :  { %861 = vmatprep.subr.mxu0 %v3498_v35  ;;  %2730 = vmatpush3.msra.mxu1 %v3679_v63 }
 0x18e   :  { %862 = vmatpush1.msra.mxu0 %v3506_v37  ;;  %2731 = vmatprep.subr.mxu1 %v4873_v2 }
 0x18f   :  { %863 = vmatprep.subr.mxu0 %v3514_v40  ;;  %2732 = vmatpush3.msra.mxu1 %v3683_v61 }
 0x190   :  { %864 = vmatpush1.msra.mxu0 %v3520_v42  ;;  %2733 = vmatprep.subr.mxu1 %v4873_v2 }
 0x191   :  { %865 = vmatprep.subr.mxu0 %v3524_v44  ;;  %2734 = vmatpush3.msra.mxu1 %v3687_v57 }
 0x192   :  { %866 = vmatpush1.msra.mxu0 %v3532_v46  ;;  %2735 = vmatprep.subr.mxu1 %v4873_v2 }
 0x193   :  { %867 = vmatprep.subr.mxu0 %v3540_v49  ;;  %2736 = vmatpush3.msra.mxu1 %v3689_v54 }
 0x194   :  { %868 = vmatpush1.msra.mxu0 %v3546_v51  ;;  %2737 = vmatprep.subr.mxu1 %v4873_v2 }
 0x195   :  { %869 = vmatprep.subr.mxu0 %v3550_v53  ;;  %2738 = vmatpush3.msra.mxu1 %v3695_v50 }
 0x196   :  { %870 = vmatpush1.msra.mxu0 %v3558_v55  ;;  %2739 = vmatprep.subr.mxu1 %v4873_v2 }
 0x197   :  { %871 = vmatprep.subr.mxu0 %v3566_v58  ;;  %2740 = vmatpush3.msra.mxu1 %v3699_v48 }
 0x198   :  { %872 = vmatpush1.msra.mxu0 %v3572_v60  ;;  %2741 = vmatprep.subr.mxu1 %v4873_v2 }
 0x199   :  { %873 = vmatprep.subr.mxu0 %v3576_v62  ;;  %2742 = vmatpush3.msra.mxu1 %v3703_v45 }
 0x19a   :  { %874 = vmatpush1.msra.mxu0 %v4904_v36  ;;  %2743 = vmatprep.subr.mxu1 %v4873_v2 }
 0x19b   :  { %875 = vmatprep.subr.mxu0 %v3592_v20  ;;  %2744 = vmatpush3.msra.mxu1 %v3707_v43 }
 0x19c   :  { %876 = vmatpush1.msra.mxu0 %v4905_v9  ;;  %2745 = vmatprep.subr.mxu1 %v4873_v2 }
 0x19d   :  { %877 = vmatprep.subr.mxu0 %v4906_v27  ;;  %2746 = vmatpush3.msra.mxu1 %v4907_v25  ;;  %v4945_v25 = vld [vmem:[#allocation58_spill] sm:$0xff] }
 0x19e   :  { %878 = vmatpush1.msra.mxu0 %v4908_v14  ;;  %2747 = vmatprep.subr.mxu1 %v4873_v2 }
 0x19f   :  { %912 = vmatmul.mubr.f32.vlgmr.msra.gmra.mxu0 %v3815_v30  ;;  %1023 = vmatprep.subr.mxu0 %v4909_v23  ;;  %v4924_v30 = vld [vmem:[#allocation32_spill] sm:$0xff]  ;;  %v4925_v23 = vld [vmem:[#allocation33_spill] sm:$0xff] }
 0x1a0   :  { %1024 = vmatpush1.msra.mxu0 %v4910_v12  ;;  %2748 = vmatpush3.msra.mxu1 %v4911_v32  ;;  %v4926_v12 = vld [vmem:[#allocation34_spill] sm:$0xff] }
 0x1a1   :  { %1025 = vmatprep.subr.mxu0 %v4912_v7  ;;  %2749 = vmatprep.mubr.msk.f32.mxu1 %vm3347_vm0, %v4873_v2  ;;  %v4927_v7 = vld [vmem:[#allocation35_spill] sm:$0xff] }
 0x1a2   :  { %1026 = vmatpush1.msra.mxu0 %v4913_v21  ;;  %1087 = vmatprep.mubr.f32.mxu0 %v4873_v2  ;;  %v4928_v21 = vld [vmem:[#allocation36_spill] sm:$0xff] }
 0x1a3   :  { %1027 = vmatprep.subr.mxu0 %v4914_v34  ;;  %1094 = vmatprep.subr.mxu1 %v4915_v56  ;;  %v4929_v34 = vld [vmem:[#allocation37_spill] sm:$0xff]  ;;  %v4930_v56 = vld [vmem:[#allocation38_spill] sm:$0xff] }
 0x1a4   :  { %1028 = vmatpush1.msra.mxu0 %v4916_v3  ;;  %v4931_v3 = vld [vmem:[#allocation39_spill] sm:$0xff] }
 0x1a5   :  { %1029 = vmatprep.subr.mxu0 %v4917_v38  ;;  %v4932_v38 = vld [vmem:[#allocation40_spill] sm:$0xff] }
 0x1a6   :  { %1030 = vmatpush1.msra.mxu0 %v4918_v1  ;;  %v4933_v1 = vld [vmem:[#allocation41_spill] sm:$0xff] }
 0x1a7   :  { %1031 = vmatprep.subr.mxu0 %v4919_v41  ;;  %v4934_v41 = vld [vmem:[#allocation42_spill] sm:$0xff] }
 0x1a8   :  { %1032 = vmatpush1.msra.mxu0 %v4920_v18  ;;  %v4935_v18 = vld [vmem:[#allocation43_spill] sm:$0xff] }
 0x1a9   :  { %1033 = vmatprep.subr.mxu0 %v4921_v39  ;;  %v4936_v39 = vld [vmem:[#allocation44_spill] sm:$0xff] }
 0x1aa   :  { %1034 = vmatpush1.msra.mxu0 %v4922_v4  ;;  %v4937_v4 = vld [vmem:[#allocation45_spill] sm:$0xff] }
 0x1ab   :  { %1035 = vmatprep.subr.mxu0 %v4923_v5  ;;  %v4938_v5 = vld [vmem:[#allocation46_spill] sm:$0xff] }
 0x1ac   :  { %1036 = vmatpush1.msra.mxu0 %v4924_v30  ;;  %v4939_v30 = vld [vmem:[#allocation48_spill] sm:$0xff] }
 0x1ad   :  { %1037 = vmatprep.subr.mxu0 %v4925_v23  ;;  %v4940_v23 = vld [vmem:[#allocation49_spill] sm:$0xff] }
 0x1ae   :  { %1038 = vmatpush1.msra.mxu0 %v4926_v12  ;;  %v4941_v12 = vld [vmem:[#allocation51_spill] sm:$0xff] }
 0x1af   :  { %1039 = vmatprep.subr.mxu0 %v4927_v7 }
 0x1b0   :  { %1040 = vmatpush1.msra.mxu0 %v4928_v21 }
 0x1b1   :  { %1041 = vmatprep.subr.mxu0 %v4929_v34 }
 0x1b2   :  { %1042 = vmatpush1.msra.mxu0 %v4930_v56 }
 0x1b3   :  { %1043 = vmatprep.subr.mxu0 %v4931_v3  ;;  %v4942_v3 = vld [vmem:[#allocation53_spill] sm:$0xff] }
 0x1b4   :  { %1044 = vmatpush1.msra.mxu0 %v4932_v38  ;;  %v4944_v38 = vld [vmem:[#allocation57_spill] sm:$0xff] }
 0x1b5   :  { %1045 = vmatprep.subr.mxu0 %v4933_v1 }
 0x1b6   :  { %1046 = vmatpush1.msra.mxu0 %v4934_v41 }
 0x1b7   :  { %1047 = vmatprep.subr.mxu0 %v4935_v18  ;;  %v3923_v18 = vld [vmem:[%s4709_s5] ss:$0 sm:$0xff] }
 0x1b8   :  { %1048 = vmatpush1.msra.mxu0 %v4936_v39 }
 0x1b9   :  { %1049 = vmatprep.subr.mxu0 %v4937_v4 }
 0x1ba   :  { %1050 = vmatpush1.msra.mxu0 %v4938_v5 }
 0x1bb   :  { %1051 = vmatprep.subr.mxu0 %v4939_v30  ;;  %v4943_v30 = vld [vmem:[#allocation59_spill] sm:$0xff] }
 0x1bc   :  { %1052 = vmatpush1.msra.mxu0 %v4940_v23 }
 0x1bd   :  { %1053 = vmatprep.subr.mxu0 %v4941_v12 }
 0x1be   :  { %1054 = vmatpush1.msra.mxu0 %v4942_v3 }
 0x1bf   :  { %2752 = vmatprep.subr.mxu0 %v4873_v2 }
 0x23f   :  { %v766_v39 = vpop.f32.mrf.mxu0  ;;  %v842_v41 = vpop.f32.mrf.mxu1 }
 0x240   :  { %v767_v4 = vadd.f32 %v3923_v18, %v766_v39  ;;  %v918_v12 = vadd.f32 %v842_v41, %v4944_v38 }
 0x241   :  { %v2716_v5 = vpop.f32.mrf.mxu0  ;;  %v844_v1 = vpop.f32.mrf.mxu1 }
 0x242   :  { %770 = vst [vmem:[#allocation13] sm:$0xff] %v767_v4  ;;  %v919_v23 = vadd.f32 %v844_v1, %v4943_v30  ;;  %v2525_v3 = vmul.f32 -1.442695, %v918_v12  ;;  %v4946_v4 = vld [vmem:[#allocation60_spill] sm:$0xff]  ;;  %v4979_v12 = vld [vmem:[#allocation46_spill] sm:$0xff] }
 0x244   :  { %v2526_v56 = vmul.f32 -1.442695, %v919_v23 }
 0x246   :  { %2989 = vpow2.f32 %v2526_v56 }
 0x247   :  { %2991 = vpow2.f32 %v2525_v3 }
 0x253   :  { %v2990_v34 = vpop.eup %2989 }
 0x254   :  { %v2992_v21 = vpop.eup %2991  ;;  %v931_v7 = vadd.f32 1.0, %v2990_v34 }
 0x255   :  { %v925_v32 = vadd.f32 1.0, %v2992_v21 }
 0x256   :  { %2993 = vrcp.f32 %v931_v7  ;;  %v4978_v7 = vld [vmem:[#allocation45_spill] sm:$0xff] }
 0x257   :  { %2995 = vrcp.f32 %v925_v32  ;;  %v4977_v32 = vld [vmem:[#allocation44_spill] sm:$0xff] }
 0x25f   :  { %v913_v14 = vpop.f32.mrf.mxu0 }
 0x260   :  { %v920_v27 = vadd.f32 %v913_v14, %v4945_v25 }
 0x261   :  { %v915_v39 = vpop.f32.mrf.mxu0 }
 0x262   :  { %2997 = vtanh.f32 %v920_v27  ;;  %v921_v5 = vadd.f32 %v915_v39, %v4946_v4  ;;  %v4980_v39 = vld [vmem:[#allocation48_spill] sm:$0xff]  ;;  %v4981_v4 = vld [vmem:[#allocation49_spill] sm:$0xff] }
 0x263   :  { %v2994_v38 = vpop.eup %2993 }
 0x264   :  { %v2527_v1 = vmul.f32 -1.442695, %v921_v5  ;;  %v2996_v41 = vpop.eup %2995  ;;  %v941_v56 = vmul.f32 %v2994_v38, %v3812_v16  ;;  %v4974_v16 = vld [vmem:[#allocation41_spill] sm:$0xff]  ;;  %v4982_v5 = vld [vmem:[#allocation51_spill] sm:$0xff] }
 0x266   :  { %2999 = vpow2.f32 %v2527_v1  ;;  %v4983_v1 = vld [vmem:[#allocation53_spill] sm:$0xff] }
 0x26f   :  { %v2998_v30 = vpop.eup %2997 }
 0x270   :  { %v942_v3 = vmul.f32 %v2998_v30, %v2996_v41 }
 0x272   :  { %v3931_v23 = vadd.f32 %v942_v3, %v941_v56 }
 0x273   :  { %v3000_v21 = vpop.eup %2999 }
 0x274   :  { %v938_v34 = vadd.f32 1.0, %v3000_v21  ;;  %3001 = vtanh.f32 %v3931_v23  ;;  %v4984_v21 = vld [vmem:[#allocation63_spill] sm:$0xff] }
 0x276   :  { %3003 = vrcp.f32 %v938_v34 }
 0x281   :  { %v3002_v25 = vpop.eup %3001 }
 0x283   :  { %v3004_v14 = vpop.eup %3003 }
 0x284   :  { %v3934_v27 = vmul.f32 %v3004_v14, %v3002_v25  ;;  %v4985_v25 = vld [vmem:[#allocation61_spill] sm:$0xff] }
 0x286   :  { %2750 = vmatmul.mubr.f32.vlgmr.msra.gmra.mxu1 %v3934_v27  ;;  %1088 = vmatmul.mubr.f32.vlgmr.msra.gmra.mxu0 %v3934_v27 }
 0x287   :  { %1095 = vmatpush1.msra.mxu1 %v3416_v6  ;;  %1158 = vmatprep.mubr.f32.mxu1 %v4873_v2  ;;  %v4947_v6 = vld [vmem:[#allocation52_spill] sm:$0xff] }
 0x288   :  { %1096 = vmatprep.subr.mxu1 %v3420_v8  ;;  %2753 = vmatpush3.msra.mxu0 %v3655_v52  ;;  %v4948_v8 = vld [vmem:[#allocation55_spill] sm:$0xff] }
 0x289   :  { %1097 = vmatpush1.msra.mxu1 %v3428_v10  ;;  %2754 = vmatprep.subr.mxu0 %v4873_v2  ;;  %v4949_v10 = vld [vmem:[#allocation54_spill] sm:$0xff] }
 0x28a   :  { %1098 = vmatprep.subr.mxu1 %v3436_v13  ;;  %2755 = vmatpush3.msra.mxu0 %v3659_v59  ;;  %v4001_v13 = vld [vmem:[#allocation10 + $0x1e8] sm:$0xff] }
 0x28b   :  { %1099 = vmatpush1.msra.mxu1 %v3442_v15  ;;  %2756 = vmatprep.subr.mxu0 %v4873_v2  ;;  %4950 = vst [vmem:[#allocation47_spill] sm:$0xff] %v4001_v13  ;;  %v4004_v15 = vld [vmem:[#allocation10 + $0x1e0] sm:$0xff] }
 0x28c   :  { %1100 = vmatprep.subr.mxu1 %v3446_v17  ;;  %2757 = vmatpush3.msra.mxu0 %v3663_v11  ;;  %4951 = vst [vmem:[#allocation50_spill] sm:$0xff] %v4004_v15  ;;  %v4952_v17 = vld [vmem:[#allocation56_spill] sm:$0xff] }
 0x28d   :  { %1101 = vmatpush1.msra.mxu1 %v3454_v19  ;;  %2758 = vmatprep.subr.mxu0 %v4873_v2  ;;  %v4008_v19 = vld [vmem:[#allocation10 + $0x1c8] sm:$0xff] }
 0x28e   :  { %1102 = vmatprep.subr.mxu1 %v3462_v22  ;;  %2759 = vmatpush3.msra.mxu0 %v3667_v0  ;;  %4953 = vst [vmem:[#allocation18_spill] sm:$0xff] %v4008_v19  ;;  %v4013_v22 = vld [vmem:[#allocation10 + $0x1c0] sm:$0xff] }
 0x28f   :  { %1103 = vmatpush1.msra.mxu1 %v3468_v24  ;;  %2760 = vmatprep.subr.mxu0 %v4873_v2  ;;  %4954 = vst [vmem:[#allocation20_spill] sm:$0xff] %v4013_v22  ;;  %v4017_v24 = vld [vmem:[#allocation10 + $0x1a8] sm:$0xff] }
 0x290   :  { %1104 = vmatprep.subr.mxu1 %v3472_v26  ;;  %2761 = vmatpush3.msra.mxu0 %v3671_v47  ;;  %4955 = vst [vmem:[#allocation21_spill] sm:$0xff] %v4017_v24  ;;  %v4020_v26 = vld [vmem:[#allocation10 + $0x1f8] sm:$0xff] }
 0x291   :  { %1105 = vmatpush1.msra.mxu1 %v3480_v28  ;;  %2762 = vmatprep.subr.mxu0 %v4873_v2  ;;  %4956 = vst [vmem:[#allocation22_spill] sm:$0xff] %v4020_v26  ;;  %v4023_v28 = vld [vmem:[#allocation10 + $0x1a0] sm:$0xff] }
 0x292   :  { %1106 = vmatprep.subr.mxu1 %v3488_v31  ;;  %2763 = vmatpush3.msra.mxu0 %v3675_v29  ;;  %4957 = vst [vmem:[#allocation23_spill] sm:$0xff] %v4023_v28  ;;  %v4026_v31 = vld [vmem:[#allocation10 + $0x188] sm:$0xff] }
 0x293   :  { %1107 = vmatpush1.msra.mxu1 %v3494_v33  ;;  %2764 = vmatprep.subr.mxu0 %v4873_v2  ;;  %4958 = vst [vmem:[#allocation19_spill] sm:$0xff] %v4026_v31  ;;  %v4029_v33 = vld [vmem:[#allocation10 + $0x180] sm:$0xff] }
 0x294   :  { %1108 = vmatprep.subr.mxu1 %v3498_v35  ;;  %2765 = vmatpush3.msra.mxu0 %v3679_v63  ;;  %4959 = vst [vmem:[#allocation24_spill] sm:$0xff] %v4029_v33  ;;  %v4032_v35 = vld [vmem:[#allocation10 + $0x168] sm:$0xff] }
 0x295   :  { %1109 = vmatpush1.msra.mxu1 %v3506_v37  ;;  %2766 = vmatprep.subr.mxu0 %v4873_v2  ;;  %4960 = vst [vmem:[#allocation25_spill] sm:$0xff] %v4032_v35  ;;  %v4035_v37 = vld [vmem:[#allocation10 + $0x160] sm:$0xff] }
 0x296   :  { %1110 = vmatprep.subr.mxu1 %v3514_v40  ;;  %2767 = vmatpush3.msra.mxu0 %v3683_v61  ;;  %4961 = vst [vmem:[#allocation26_spill] sm:$0xff] %v4035_v37  ;;  %v4038_v40 = vld [vmem:[#allocation10 + $0x148] sm:$0xff] }
 0x297   :  { %1111 = vmatpush1.msra.mxu1 %v3520_v42  ;;  %2768 = vmatprep.subr.mxu0 %v4873_v2  ;;  %4962 = vst [vmem:[#allocation27_spill] sm:$0xff] %v4038_v40  ;;  %v4041_v42 = vld [vmem:[#allocation10 + $0x140] sm:$0xff] }
 0x298   :  { %1112 = vmatprep.subr.mxu1 %v3524_v44  ;;  %2769 = vmatpush3.msra.mxu0 %v3687_v57  ;;  %4963 = vst [vmem:[#allocation28_spill] sm:$0xff] %v4041_v42  ;;  %v4044_v44 = vld [vmem:[#allocation10 + $0x128] sm:$0xff] }
 0x299   :  { %1113 = vmatpush1.msra.mxu1 %v3532_v46  ;;  %2770 = vmatprep.subr.mxu0 %v4873_v2  ;;  %4964 = vst [vmem:[#allocation29_spill] sm:$0xff] %v4044_v44  ;;  %v4047_v46 = vld [vmem:[#allocation10 + $0x120] sm:$0xff] }
 0x29a   :  { %1114 = vmatprep.subr.mxu1 %v3540_v49  ;;  %2771 = vmatpush3.msra.mxu0 %v3689_v54  ;;  %4965 = vst [vmem:[#allocation30_spill] sm:$0xff] %v4047_v46  ;;  %v4050_v49 = vld [vmem:[#allocation10 + $0x108] sm:$0xff] }
 0x29b   :  { %1115 = vmatpush1.msra.mxu1 %v3546_v51  ;;  %2772 = vmatprep.subr.mxu0 %v4873_v2  ;;  %4966 = vst [vmem:[#allocation31_spill] sm:$0xff] %v4050_v49  ;;  %v4053_v51 = vld [vmem:[#allocation10 + $0x100] sm:$0xff] }
 0x29c   :  { %1116 = vmatprep.subr.mxu1 %v3550_v53  ;;  %2773 = vmatpush3.msra.mxu0 %v3695_v50  ;;  %4967 = vst [vmem:[#allocation32_spill] sm:$0xff] %v4053_v51  ;;  %v4968_v53 = vld [vmem:[#allocation35_spill] sm:$0xff] }
 0x29d   :  { %1117 = vmatpush1.msra.mxu1 %v3558_v55  ;;  %2774 = vmatprep.subr.mxu0 %v4873_v2  ;;  %v4969_v55 = vld [vmem:[#allocation36_spill] sm:$0xff] }
 0x29e   :  { %1118 = vmatprep.subr.mxu1 %v3566_v58  ;;  %2775 = vmatpush3.msra.mxu0 %v3699_v48  ;;  %v4970_v58 = vld [vmem:[#allocation37_spill] sm:$0xff] }
 0x29f   :  { %1119 = vmatpush1.msra.mxu1 %v3572_v60  ;;  %2776 = vmatprep.subr.mxu0 %v4873_v2  ;;  %v4971_v60 = vld [vmem:[#allocation38_spill] sm:$0xff] }
 0x2a0   :  { %1120 = vmatprep.subr.mxu1 %v3576_v62  ;;  %2777 = vmatpush3.msra.mxu0 %v3703_v45  ;;  %v4972_v62 = vld [vmem:[#allocation39_spill] sm:$0xff] }
 0x2a1   :  { %1121 = vmatpush1.msra.mxu1 %v4904_v36  ;;  %2778 = vmatprep.subr.mxu0 %v4873_v2  ;;  %v4975_v36 = vld [vmem:[#allocation42_spill] sm:$0xff] }
 0x2a2   :  { %1122 = vmatprep.subr.mxu1 %v3592_v20  ;;  %2779 = vmatpush3.msra.mxu0 %v3707_v43  ;;  %v4973_v20 = vld [vmem:[#allocation40_spill] sm:$0xff] }
 0x2a3   :  { %1123 = vmatpush1.msra.mxu1 %v4905_v9  ;;  %2780 = vmatprep.subr.mxu0 %v4873_v2  ;;  %v4976_v9 = vld [vmem:[#allocation43_spill] sm:$0xff] }
 0x2a4   :  { %1124 = vmatprep.subr.mxu1 %v4947_v6  ;;  %2781 = vmatpush3.msra.mxu0 %v4948_v8 }
 0x2a5   :  { %1125 = vmatpush1.msra.mxu1 %v4949_v10  ;;  %2782 = vmatprep.subr.mxu0 %v4873_v2 }
 0x2a6   :  { %1159 = vmatmul.mubr.f32.vlgmr.msra.gmra.mxu1 %v3934_v27  ;;  %1270 = vmatprep.subr.mxu1 %v4001_v13 }
 0x2a7   :  { %1271 = vmatpush1.msra.mxu1 %v4004_v15  ;;  %2783 = vmatpush3.msra.mxu0 %v4952_v17 }
 0x2a8   :  { %1272 = vmatprep.subr.mxu1 %v4008_v19  ;;  %2784 = vmatprep.mubr.msk.f32.mxu0 %vm3347_vm0, %v4873_v2 }
 0x2a9   :  { %1273 = vmatpush1.msra.mxu1 %v4013_v22  ;;  %1334 = vmatprep.mubr.f32.mxu1 %v4873_v2 }
 0x2aa   :  { %1274 = vmatprep.subr.mxu1 %v4017_v24  ;;  %1341 = vmatprep.subr.mxu0 %v4020_v26 }
 0x2ab   :  { %1275 = vmatpush1.msra.mxu1 %v4023_v28 }
 0x2ac   :  { %1276 = vmatprep.subr.mxu1 %v4026_v31 }
 0x2ad   :  { %1277 = vmatpush1.msra.mxu1 %v4029_v33 }
 0x2ae   :  { %1278 = vmatprep.subr.mxu1 %v4032_v35 }
 0x2af   :  { %1279 = vmatpush1.msra.mxu1 %v4035_v37 }
 0x2b0   :  { %1280 = vmatprep.subr.mxu1 %v4038_v40 }
 0x2b1   :  { %1281 = vmatpush1.msra.mxu1 %v4041_v42 }
 0x2b2   :  { %1282 = vmatprep.subr.mxu1 %v4044_v44 }
 0x2b3   :  { %1283 = vmatpush1.msra.mxu1 %v4047_v46 }
 0x2b4   :  { %1284 = vmatprep.subr.mxu1 %v4050_v49 }
 0x2b5   :  { %1285 = vmatpush1.msra.mxu1 %v4053_v51 }
 0x2b6   :  { %1286 = vmatprep.subr.mxu1 %v4968_v53 }
 0x2b7   :  { %1287 = vmatpush1.msra.mxu1 %v4969_v55 }
 0x2b8   :  { %1288 = vmatprep.subr.mxu1 %v4970_v58 }
 0x2b9   :  { %1289 = vmatpush1.msra.mxu1 %v4971_v60 }
 0x2ba   :  { %1290 = vmatprep.subr.mxu1 %v4972_v62  ;;  %v4986_v62 = vld [vmem:[#allocation62_spill] sm:$0xff] }
 0x2bb   :  { %1291 = vmatpush1.msra.mxu1 %v4973_v20 }
 0x2bc   :  { %1292 = vmatprep.subr.mxu1 %v4974_v16 }
 0x2bd   :  { %1293 = vmatpush1.msra.mxu1 %v4975_v36  ;;  %v4987_v36 = vld [vmem:[#allocation64_spill] sm:$0xff] }
 0x2be   :  { %1294 = vmatprep.subr.mxu1 %v4976_v9 }
 0x2bf   :  { %1295 = vmatpush1.msra.mxu1 %v4977_v32 }
 0x2c0   :  { %1296 = vmatprep.subr.mxu1 %v4978_v7 }
 0x2c1   :  { %1297 = vmatpush1.msra.mxu1 %v4979_v12 }
 0x2c2   :  { %1298 = vmatprep.subr.mxu1 %v4980_v39 }
 0x2c3   :  { %1299 = vmatpush1.msra.mxu1 %v4981_v4 }
 0x2c4   :  { %1300 = vmatprep.subr.mxu1 %v4982_v5 }
 0x2c5   :  { %1301 = vmatpush1.msra.mxu1 %v4983_v1 }
 0x2c6   :  { %2787 = vmatprep.subr.mxu1 %v4873_v2 }
 0x346   :  { %v1012_v38 = vpop.f32.mrf.mxu1  ;;  %v1089_v41 = vpop.f32.mrf.mxu0 }
 0x347   :  { %v1013_v30 = vadd.f32 %v3923_v18, %v1012_v38  ;;  %v1165_v14 = vadd.f32 %v1089_v41, %v4985_v25  ;;  %v4098_v25 = vld [vmem:[#allocation10 + $0x1b8] sm:$0xff] }
 0x348   :  { %v2751_v56 = vpop.f32.mrf.mxu1  ;;  %v1091_v3 = vpop.f32.mrf.mxu0 }
 0x349   :  { %1017 = vst [vmem:[#allocation13 + $0x8] sm:$0xff] %v1013_v30  ;;  %v1166_v34 = vadd.f32 %v1091_v3, %v4984_v21  ;;  %v2528_v6 = vmul.f32 -1.442695, %v1165_v14  ;;  %v4086_v21 = vld [vmem:[#allocation10 + $0x1f0] sm:$0xff] }
 0x34a   :  { %v4102_v14 = vld [vmem:[#allocation10 + $0x1b0] sm:$0xff] }
 0x34b   :  { %v2529_v27 = vmul.f32 -1.442695, %v1166_v34  ;;  %v4094_v34 = vld [vmem:[#allocation10 + $0x1d0] sm:$0xff] }
 0x34d   :  { %3005 = vpow2.f32 %v2529_v27  ;;  %v4106_v27 = vld [vmem:[#allocation10 + $0x198] sm:$0xff] }
 0x34e   :  { %3007 = vpow2.f32 %v2528_v6  ;;  %v4114_v6 = vld [vmem:[#allocation10 + $0x178] sm:$0xff] }
 0x35a   :  { %v3006_v10 = vpop.eup %3005 }
 0x35b   :  { %v3008_v53 = vpop.eup %3007  ;;  %v1178_v55 = vadd.f32 1.0, %v3006_v10  ;;  %v4122_v10 = vld [vmem:[#allocation10 + $0x158] sm:$0xff] }
 0x35c   :  { %v1172_v58 = vadd.f32 1.0, %v3008_v53  ;;  %v4130_v53 = vld [vmem:[#allocation10 + $0x138] sm:$0xff] }
 0x35d   :  { %3009 = vrcp.f32 %v1178_v55  ;;  %v4138_v55 = vld [vmem:[#allocation10 + $0x118] sm:$0xff] }
 0x35e   :  { %3011 = vrcp.f32 %v1172_v58  ;;  %v4146_v58 = vld [vmem:[#allocation10 + $0xf8] sm:$0xff] }
 0x366   :  { %v1160_v60 = vpop.f32.mrf.mxu1 }
 0x367   :  { %v1167_v20 = vadd.f32 %v1160_v60, %v4986_v62  ;;  %v4154_v60 = vld [vmem:[#allocation10 + $0xd8] sm:$0xff] }
 0x368   :  { %v1162_v16 = vpop.f32.mrf.mxu1  ;;  %v4162_v62 = vld [vmem:[#allocation10 + $0xb8] sm:$0xff] }
 0x369   :  { %3013 = vtanh.f32 %v1167_v20  ;;  %v1168_v9 = vadd.f32 %v1162_v16, %v4987_v36  ;;  %v4170_v20 = vld [vmem:[#allocation10 + $0x98] sm:$0xff] }
 0x36a   :  { %v3010_v7 = vpop.eup %3009  ;;  %v4178_v16 = vld [vmem:[#allocation10 + $0x78] sm:$0xff] }
 0x36b   :  { %v2530_v32 = vmul.f32 -1.442695, %v1168_v9  ;;  %v3012_v12 = vpop.eup %3011  ;;  %v1188_v4 = vmul.f32 %v3010_v7, %v3931_v23  ;;  %v4090_v23 = vld [vmem:[#allocation10 + $0x1d8] sm:$0xff]  ;;  %v4241_v7 = vld [vmem:[#allocation10 + $0xc0] sm:$0xff] }
 0x36c   :  { %v4186_v36 = vld [vmem:[#allocation10 + $0x58] sm:$0xff]  ;;  %4993 = vst [vmem:[#allocation60_spill] sm:$0xff] %v4241_v7 }
 0x36d   :  { %3015 = vpow2.f32 %v2530_v32  ;;  %v4194_v9 = vld [vmem:[#allocation10 + $0x38] sm:$0xff] }
 0x36e   :  { %v4202_v32 = vld [vmem:[#allocation10 + $0x18] sm:$0xff] }
 0x36f   :  { %4988 = vst [vmem:[#allocation33_spill] sm:$0xff] %v4202_v32 }
 0x376   :  { %v3014_v39 = vpop.eup %3013 }
 0x377   :  { %v1189_v5 = vmul.f32 %v3014_v39, %v3012_v12  ;;  %v4244_v12 = vld [vmem:[#allocation10 + $0xa8] sm:$0xff]  ;;  %v4247_v39 = vld [vmem:[#allocation10 + $0xa0] sm:$0xff] }
 0x378   :  { %4994 = vst [vmem:[#allocation52_spill] sm:$0xff] %v4244_v12  ;;  %4995 = vst [vmem:[#allocation55_spill] sm:$0xff] %v4247_v39 }
 0x379   :  { %v4079_v1 = vadd.f32 %v1189_v5, %v1188_v4  ;;  %v4250_v4 = vld [vmem:[#allocation10 + $0x88] sm:$0xff]  ;;  %v4253_v5 = vld [vmem:[#allocation10 + $0x80] sm:$0xff] }
 0x37a   :  { %v3016_v38 = vpop.eup %3015  ;;  %4996 = vst [vmem:[#allocation54_spill] sm:$0xff] %v4250_v4  ;;  %4997 = vst [vmem:[#allocation56_spill] sm:$0xff] %v4253_v5 }
 0x37b   :  { %v1185_v41 = vadd.f32 1.0, %v3016_v38  ;;  %3017 = vtanh.f32 %v4079_v1  ;;  %v4256_v38 = vld [vmem:[#allocation10 + $0x68] sm:$0xff] }
 0x37c   :  { %4998 = vst [vmem:[#allocation35_spill] sm:$0xff] %v4256_v38 }
 0x37d   :  { %3019 = vrcp.f32 %v1185_v41  ;;  %v4259_v41 = vld [vmem:[#allocation10 + $0x60] sm:$0xff] }
 0x37e   :  { %4999 = vst [vmem:[#allocation36_spill] sm:$0xff] %v4259_v41 }
 0x388   :  { %v3018_v30 = vpop.eup %3017 }
 0x38a   :  { %v3020_v56 = vpop.eup %3019 }
 0x38b   :  { %v4082_v3 = vmul.f32 %v3020_v56, %v3018_v30  ;;  %v4262_v30 = vld [vmem:[#allocation10 + $0x48] sm:$0xff]  ;;  %v4265_v56 = vld [vmem:[#allocation10 + $0x40] sm:$0xff] }
 0x38c   :  { %5000 = vst [vmem:[#allocation37_spill] sm:$0xff] %v4262_v30  ;;  %5001 = vst [vmem:[#allocation38_spill] sm:$0xff] %v4265_v56 }
 0x38d   :  { %2785 = vmatmul.mubr.f32.vlgmr.msra.gmra.mxu0 %v4082_v3  ;;  %1335 = vmatmul.mubr.f32.vlgmr.msra.gmra.mxu1 %v4082_v3 }
 0x38e   :  { %1342 = vmatpush1.msra.mxu0 %v4086_v21  ;;  %1405 = vmatprep.mubr.f32.mxu0 %v4873_v2 }
 0x38f   :  { %1343 = vmatprep.subr.mxu0 %v4090_v23  ;;  %2788 = vmatpush3.msra.mxu1 %v3655_v52  ;;  %v4110_v52 = vld [vmem:[#allocation10 + $0x190] sm:$0xff] }
 0x390   :  { %1344 = vmatpush1.msra.mxu0 %v4094_v34  ;;  %2789 = vmatprep.subr.mxu1 %v4873_v2 }
 0x391   :  { %1345 = vmatprep.subr.mxu0 %v4098_v25  ;;  %2790 = vmatpush3.msra.mxu1 %v3659_v59  ;;  %v4118_v59 = vld [vmem:[#allocation10 + $0x170] sm:$0xff] }
 0x392   :  { %1346 = vmatpush1.msra.mxu0 %v4102_v14  ;;  %2791 = vmatprep.subr.mxu1 %v4873_v2 }
 0x393   :  { %1347 = vmatprep.subr.mxu0 %v4106_v27  ;;  %2792 = vmatpush3.msra.mxu1 %v3663_v11  ;;  %v4126_v11 = vld [vmem:[#allocation10 + $0x150] sm:$0xff] }
 0x394   :  { %1348 = vmatpush1.msra.mxu0 %v4110_v52  ;;  %2793 = vmatprep.subr.mxu1 %v4873_v2 }
 0x395   :  { %1349 = vmatprep.subr.mxu0 %v4114_v6  ;;  %2794 = vmatpush3.msra.mxu1 %v3667_v0  ;;  %v4134_v0 = vld [vmem:[#allocation10 + $0x130] sm:$0xff] }
 0x396   :  { %1350 = vmatpush1.msra.mxu0 %v4118_v59  ;;  %2795 = vmatprep.subr.mxu1 %v4873_v2 }
 0x397   :  { %1351 = vmatprep.subr.mxu0 %v4122_v10  ;;  %2796 = vmatpush3.msra.mxu1 %v3671_v47  ;;  %v4142_v47 = vld [vmem:[#allocation10 + $0x110] sm:$0xff] }
 0x398   :  { %1352 = vmatpush1.msra.mxu0 %v4126_v11  ;;  %2797 = vmatprep.subr.mxu1 %v4873_v2 }
 0x399   :  { %1353 = vmatprep.subr.mxu0 %v4130_v53  ;;  %2798 = vmatpush3.msra.mxu1 %v3675_v29  ;;  %v4150_v29 = vld [vmem:[#allocation10 + $0xf0] sm:$0xff] }
 0x39a   :  { %1354 = vmatpush1.msra.mxu0 %v4134_v0  ;;  %2799 = vmatprep.subr.mxu1 %v4873_v2 }
 0x39b   :  { %1355 = vmatprep.subr.mxu0 %v4138_v55  ;;  %2800 = vmatpush3.msra.mxu1 %v3679_v63  ;;  %v4158_v63 = vld [vmem:[#allocation10 + $0xd0] sm:$0xff] }
 0x39c   :  { %1356 = vmatpush1.msra.mxu0 %v4142_v47  ;;  %2801 = vmatprep.subr.mxu1 %v4873_v2 }
 0x39d   :  { %1357 = vmatprep.subr.mxu0 %v4146_v58  ;;  %2802 = vmatpush3.msra.mxu1 %v3683_v61  ;;  %v4166_v61 = vld [vmem:[#allocation10 + $0xb0] sm:$0xff] }
 0x39e   :  { %1358 = vmatpush1.msra.mxu0 %v4150_v29  ;;  %2803 = vmatprep.subr.mxu1 %v4873_v2 }
 0x39f   :  { %1359 = vmatprep.subr.mxu0 %v4154_v60  ;;  %2804 = vmatpush3.msra.mxu1 %v3687_v57  ;;  %v4174_v57 = vld [vmem:[#allocation10 + $0x90] sm:$0xff] }
 0x3a0   :  { %1360 = vmatpush1.msra.mxu0 %v4158_v63  ;;  %2805 = vmatprep.subr.mxu1 %v4873_v2 }
 0x3a1   :  { %1361 = vmatprep.subr.mxu0 %v4162_v62  ;;  %2806 = vmatpush3.msra.mxu1 %v3689_v54  ;;  %v4182_v54 = vld [vmem:[#allocation10 + $0x70] sm:$0xff] }
 0x3a2   :  { %1362 = vmatpush1.msra.mxu0 %v4166_v61  ;;  %2807 = vmatprep.subr.mxu1 %v4873_v2 }
 0x3a3   :  { %1363 = vmatprep.subr.mxu0 %v4170_v20  ;;  %2808 = vmatpush3.msra.mxu1 %v3695_v50  ;;  %v4190_v50 = vld [vmem:[#allocation10 + $0x50] sm:$0xff] }
 0x3a4   :  { %1364 = vmatpush1.msra.mxu0 %v4174_v57  ;;  %2809 = vmatprep.subr.mxu1 %v4873_v2 }
 0x3a5   :  { %1365 = vmatprep.subr.mxu0 %v4178_v16  ;;  %2810 = vmatpush3.msra.mxu1 %v3699_v48  ;;  %v4198_v48 = vld [vmem:[#allocation10 + $0x30] sm:$0xff] }
 0x3a6   :  { %1366 = vmatpush1.msra.mxu0 %v4182_v54  ;;  %2811 = vmatprep.subr.mxu1 %v4873_v2 }
 0x3a7   :  { %1367 = vmatprep.subr.mxu0 %v4186_v36  ;;  %2812 = vmatpush3.msra.mxu1 %v3703_v45  ;;  %v4206_v45 = vld [vmem:[#allocation10 + $0x10] sm:$0xff] }
 0x3a8   :  { %1368 = vmatpush1.msra.mxu0 %v4190_v50  ;;  %2813 = vmatprep.subr.mxu1 %v4873_v2  ;;  %4989 = vst [vmem:[#allocation34_spill] sm:$0xff] %v4206_v45 }
 0x3a9   :  { %1369 = vmatprep.subr.mxu0 %v4194_v9  ;;  %2814 = vmatpush3.msra.mxu1 %v3707_v43  ;;  %v4232_v43 = vld [vmem:[#allocation10 + $0xe8] sm:$0xff] }
 0x3aa   :  { %1370 = vmatpush1.msra.mxu0 %v4198_v48  ;;  %2815 = vmatprep.subr.mxu1 %v4873_v2  ;;  %4990 = vst [vmem:[#allocation59_spill] sm:$0xff] %v4232_v43 }
 0x3ab   :  { %1371 = vmatprep.subr.mxu0 %v4202_v32  ;;  %2816 = vmatpush3.msra.mxu1 %v4948_v8  ;;  %v4235_v8 = vld [vmem:[#allocation10 + $0xe0] sm:$0xff] }
 0x3ac   :  { %1372 = vmatpush1.msra.mxu0 %v4206_v45  ;;  %2817 = vmatprep.subr.mxu1 %v4873_v2  ;;  %4991 = vst [vmem:[#allocation57_spill] sm:$0xff] %v4235_v8 }
 0x3ad   :  { %1406 = vmatmul.mubr.f32.vlgmr.msra.gmra.mxu0 %v4082_v3  ;;  %1517 = vmatprep.subr.mxu0 %v4001_v13  ;;  %v4268_v3 = vld [vmem:[#allocation10 + $0x28] sm:$0xff] }
 0x3ae   :  { %1518 = vmatpush1.msra.mxu0 %v4004_v15  ;;  %2818 = vmatpush3.msra.mxu1 %v4952_v17  ;;  %v4238_v17 = vld [vmem:[#allocation10 + $0xc8] sm:$0xff]  ;;  %5002 = vst [vmem:[#allocation39_spill] sm:$0xff] %v4268_v3 }
 0x3af   :  { %1519 = vmatprep.subr.mxu0 %v4008_v19  ;;  %2819 = vmatprep.mubr.msk.f32.mxu1 %vm3347_vm0, %v4873_v2  ;;  %4992 = vst [vmem:[#allocation58_spill] sm:$0xff] %v4238_v17 }
 0x3b0   :  { %1520 = vmatpush1.msra.mxu0 %v4013_v22  ;;  %1581 = vmatprep.mubr.f32.mxu0 %v4873_v2 }
 0x3b1   :  { %1521 = vmatprep.subr.mxu0 %v4017_v24  ;;  %1588 = vmatprep.subr.mxu1 %v4020_v26 }
 0x3b2   :  { %1522 = vmatpush1.msra.mxu0 %v4023_v28 }
 0x3b3   :  { %1523 = vmatprep.subr.mxu0 %v4026_v31 }
 0x3b4   :  { %1524 = vmatpush1.msra.mxu0 %v4029_v33 }
 0x3b5   :  { %1525 = vmatprep.subr.mxu0 %v4032_v35 }
 0x3b6   :  { %1526 = vmatpush1.msra.mxu0 %v4035_v37 }
 0x3b7   :  { %1527 = vmatprep.subr.mxu0 %v4038_v40 }
 0x3b8   :  { %1528 = vmatpush1.msra.mxu0 %v4041_v42 }
 0x3b9   :  { %1529 = vmatprep.subr.mxu0 %v4044_v44  ;;  %v5008_v44 = vld [vmem:[#allocation66_spill] sm:$0xff] }
 0x3ba   :  { %1530 = vmatpush1.msra.mxu0 %v4047_v46 }
 0x3bb   :  { %1531 = vmatprep.subr.mxu0 %v4050_v49 }
 0x3bc   :  { %1532 = vmatpush1.msra.mxu0 %v4053_v51 }
 0x3bd   :  { %1533 = vmatprep.subr.mxu0 %v4232_v43 }
 0x3be   :  { %1534 = vmatpush1.msra.mxu0 %v4235_v8 }
 0x3bf   :  { %1535 = vmatprep.subr.mxu0 %v4238_v17 }
 0x3c0   :  { %1536 = vmatpush1.msra.mxu0 %v4241_v7 }
 0x3c1   :  { %1537 = vmatprep.subr.mxu0 %v4244_v12  ;;  %v5006_v12 = vld [vmem:[#allocation67_spill] sm:$0xff] }
 0x3c2   :  { %1538 = vmatpush1.msra.mxu0 %v4247_v39 }
 0x3c3   :  { %1539 = vmatprep.subr.mxu0 %v4250_v4 }
 0x3c4   :  { %1540 = vmatpush1.msra.mxu0 %v4253_v5  ;;  %v4271_v5 = vld [vmem:[#allocation10 + $0x20] sm:$0xff] }
 0x3c5   :  { %1541 = vmatprep.subr.mxu0 %v4256_v38  ;;  %5003 = vst [vmem:[#allocation40_spill] sm:$0xff] %v4271_v5  ;;  %v4274_v38 = vld [vmem:[#allocation10 + $0x8] sm:$0xff] }
 0x3c6   :  { %1542 = vmatpush1.msra.mxu0 %v4259_v41  ;;  %5004 = vst [vmem:[#allocation41_spill] sm:$0xff] %v4274_v38  ;;  %v4277_v41 = vld [vmem:[#allocation10] sm:$0xff] }
 0x3c7   :  { %1543 = vmatprep.subr.mxu0 %v4262_v30  ;;  %5005 = vst [vmem:[#allocation42_spill] sm:$0xff] %v4277_v41 }
 0x3c8   :  { %1544 = vmatpush1.msra.mxu0 %v4265_v56 }
 0x3c9   :  { %1545 = vmatprep.subr.mxu0 %v4268_v3 }
 0x3ca   :  { %1546 = vmatpush1.msra.mxu0 %v4271_v5  ;;  %v5007_v5 = vld [vmem:[#allocation65_spill] sm:$0xff] }
 0x3cb   :  { %1547 = vmatprep.subr.mxu0 %v4274_v38 }
 0x3cc   :  { %1548 = vmatpush1.msra.mxu0 %v4277_v41 }
 0x3cd   :  { %2822 = vmatprep.subr.mxu0 %v4873_v2 }
 0x44d   :  { %v1259_v30 = vpop.f32.mrf.mxu0  ;;  %v1336_v56 = vpop.f32.mrf.mxu1 }
 0x44e   :  { %v1260_v4 = vadd.f32 %v3923_v18, %v1259_v30  ;;  %v1412_v17 = vadd.f32 %v1336_v56, %v5007_v5 }
 0x44f   :  { %v2786_v39 = vpop.f32.mrf.mxu0  ;;  %v1338_v3 = vpop.f32.mrf.mxu1 }
 0x450   :  { %1264 = vst [vmem:[#allocation13 + $0x10] sm:$0xff] %v1260_v4  ;;  %v1413_v7 = vadd.f32 %v1338_v3, %v5006_v12  ;;  %v2531_v43 = vmul.f32 -1.442695, %v1412_v17  ;;  %v5009_v4 = vld [vmem:[#allocation68_spill] sm:$0xff]  ;;  %v4315_v3 = vld [vmem:[#allocation11 + $0x60] sm:$0xff] }
 0x452   :  { %v2532_v8 = vmul.f32 -1.442695, %v1413_v7 }
 0x454   :  { %3021 = vpow2.f32 %v2532_v8 }
 0x455   :  { %3023 = vpow2.f32 %v2531_v43 }
 0x461   :  { %v3022_v38 = vpop.eup %3021 }
 0x462   :  { %v3024_v51 = vpop.eup %3023  ;;  %v1425_v41 = vadd.f32 1.0, %v3022_v38 }
 0x463   :  { %v1419_v49 = vadd.f32 1.0, %v3024_v51 }
 0x464   :  { %3025 = vrcp.f32 %v1425_v41  ;;  %v4309_v41 = vld [vmem:[#allocation11 + $0x68] sm:$0xff] }
 0x465   :  { %3027 = vrcp.f32 %v1419_v49  ;;  %v4297_v49 = vld [vmem:[#allocation11 + $0x78] sm:$0xff] }
 0x46d   :  { %v1407_v46 = vpop.f32.mrf.mxu0 }
 0x46e   :  { %v1414_v42 = vadd.f32 %v1407_v46, %v5008_v44 }
 0x46f   :  { %v1409_v39 = vpop.f32.mrf.mxu0 }
 0x470   :  { %3029 = vtanh.f32 %v1414_v42  ;;  %v1415_v30 = vadd.f32 %v1409_v39, %v5009_v4  ;;  %v4321_v39 = vld [vmem:[#allocation11 + $0x58] sm:$0xff]  ;;  %v4327_v4 = vld [vmem:[#allocation11 + $0x50] sm:$0xff] }
 0x471   :  { %v3026_v5 = vpop.eup %3025 }
 0x472   :  { %v2533_v12 = vmul.f32 -1.442695, %v1415_v30  ;;  %v3028_v7 = vpop.eup %3027  ;;  %v1435_v43 = vmul.f32 %v3026_v5, %v4079_v1  ;;  %v4303_v1 = vld [vmem:[#allocation11 + $0x70] sm:$0xff]  ;;  %v4333_v30 = vld [vmem:[#allocation11 + $0x48] sm:$0xff]  ;;  %v4345_v5 = vld [vmem:[#allocation11 + $0x38] sm:$0xff] }
 0x474   :  { %3031 = vpow2.f32 %v2533_v12  ;;  %v4339_v12 = vld [vmem:[#allocation11 + $0x40] sm:$0xff] }
 0x47d   :  { %v3030_v17 = vpop.eup %3029 }
 0x47e   :  { %v1436_v8 = vmul.f32 %v3030_v17, %v3028_v7  ;;  %v4351_v7 = vld [vmem:[#allocation11 + $0x30] sm:$0xff]  ;;  %v4357_v17 = vld [vmem:[#allocation11 + $0x28] sm:$0xff] }
 0x480   :  { %v4287_v56 = vadd.f32 %v1436_v8, %v1435_v43  ;;  %v4363_v43 = vld [vmem:[#allocation11 + $0x20] sm:$0xff]  ;;  %v4369_v8 = vld [vmem:[#allocation11 + $0x18] sm:$0xff] }
 0x481   :  { %v3032_v51 = vpop.eup %3031 }
 0x482   :  { %v1432_v38 = vadd.f32 1.0, %v3032_v51  ;;  %3033 = vtanh.f32 %v4287_v56  ;;  %v4375_v51 = vld [vmem:[#allocation11 + $0x10] sm:$0xff] }
 0x484   :  { %3035 = vrcp.f32 %v1432_v38  ;;  %v4381_v38 = vld [vmem:[#allocation11 + $0x8] sm:$0xff] }
 0x485   :  { %5010 = vst [vmem:[#allocation43_spill] sm:$0xff] %v4381_v38 }
 0x48f   :  { %v3034_v44 = vpop.eup %3033 }
 0x491   :  { %v3036_v46 = vpop.eup %3035 }
 0x492   :  { %v4290_v42 = vmul.f32 %v3036_v46, %v3034_v44  ;;  %v4389_v44 = vld [vmem:[#allocation11] sm:$0xff]  ;;  %v5012_v46 = vld [vmem:[#allocation28_spill] sm:$0xff] }
 0x493   :  { %5011 = vst [vmem:[#allocation44_spill] sm:$0xff] %v4389_v44 }
 0x494   :  { %2820 = vmatmul.mubr.f32.vlgmr.msra.gmra.mxu1 %v4290_v42  ;;  %1582 = vmatmul.mubr.f32.vlgmr.msra.gmra.mxu0 %v4290_v42 }
 0x495   :  { %1589 = vmatpush1.msra.mxu1 %v4086_v21  ;;  %1652 = vmatprep.mubr.f32.mxu1 %v4873_v2 }
 0x496   :  { %1590 = vmatprep.subr.mxu1 %v4090_v23  ;;  %2823 = vmatpush3.msra.mxu0 %v4297_v49 }
 0x497   :  { %1591 = vmatpush1.msra.mxu1 %v4094_v34  ;;  %2824 = vmatprep.subr.mxu0 %v4873_v2 }
 0x498   :  { %1592 = vmatprep.subr.mxu1 %v4098_v25  ;;  %2825 = vmatpush3.msra.mxu0 %v4303_v1 }
 0x499   :  { %1593 = vmatpush1.msra.mxu1 %v4102_v14  ;;  %2826 = vmatprep.subr.mxu0 %v4873_v2 }
 0x49a   :  { %1594 = vmatprep.subr.mxu1 %v4106_v27  ;;  %2827 = vmatpush3.msra.mxu0 %v4309_v41 }
 0x49b   :  { %1595 = vmatpush1.msra.mxu1 %v4110_v52  ;;  %2828 = vmatprep.subr.mxu0 %v4873_v2 }
 0x49c   :  { %1596 = vmatprep.subr.mxu1 %v4114_v6  ;;  %2829 = vmatpush3.msra.mxu0 %v4315_v3 }
 0x49d   :  { %1597 = vmatpush1.msra.mxu1 %v4118_v59  ;;  %2830 = vmatprep.subr.mxu0 %v4873_v2 }
 0x49e   :  { %1598 = vmatprep.subr.mxu1 %v4122_v10  ;;  %2831 = vmatpush3.msra.mxu0 %v4321_v39 }
 0x49f   :  { %1599 = vmatpush1.msra.mxu1 %v4126_v11  ;;  %2832 = vmatprep.subr.mxu0 %v4873_v2 }
 0x4a0   :  { %1600 = vmatprep.subr.mxu1 %v4130_v53  ;;  %2833 = vmatpush3.msra.mxu0 %v4327_v4 }
 0x4a1   :  { %1601 = vmatpush1.msra.mxu1 %v4134_v0  ;;  %2834 = vmatprep.subr.mxu0 %v4873_v2 }
 0x4a2   :  { %1602 = vmatprep.subr.mxu1 %v4138_v55  ;;  %2835 = vmatpush3.msra.mxu0 %v4333_v30 }
 0x4a3   :  { %1603 = vmatpush1.msra.mxu1 %v4142_v47  ;;  %2836 = vmatprep.subr.mxu0 %v4873_v2 }
 0x4a4   :  { %1604 = vmatprep.subr.mxu1 %v4146_v58  ;;  %2837 = vmatpush3.msra.mxu0 %v4339_v12 }
 0x4a5   :  { %1605 = vmatpush1.msra.mxu1 %v4150_v29  ;;  %2838 = vmatprep.subr.mxu0 %v4873_v2 }
 0x4a6   :  { %1606 = vmatprep.subr.mxu1 %v4154_v60  ;;  %2839 = vmatpush3.msra.mxu0 %v4345_v5 }
 0x4a7   :  { %1607 = vmatpush1.msra.mxu1 %v4158_v63  ;;  %2840 = vmatprep.subr.mxu0 %v4873_v2 }
 0x4a8   :  { %1608 = vmatprep.subr.mxu1 %v4162_v62  ;;  %2841 = vmatpush3.msra.mxu0 %v4351_v7 }
 0x4a9   :  { %1609 = vmatpush1.msra.mxu1 %v4166_v61  ;;  %2842 = vmatprep.subr.mxu0 %v4873_v2 }
 0x4aa   :  { %1610 = vmatprep.subr.mxu1 %v4170_v20  ;;  %2843 = vmatpush3.msra.mxu0 %v4357_v17 }
 0x4ab   :  { %1611 = vmatpush1.msra.mxu1 %v4174_v57  ;;  %2844 = vmatprep.subr.mxu0 %v4873_v2 }
 0x4ac   :  { %1612 = vmatprep.subr.mxu1 %v4178_v16  ;;  %2845 = vmatpush3.msra.mxu0 %v4363_v43 }
 0x4ad   :  { %1613 = vmatpush1.msra.mxu1 %v4182_v54  ;;  %2846 = vmatprep.subr.mxu0 %v4873_v2 }
 0x4ae   :  { %1614 = vmatprep.subr.mxu1 %v4186_v36  ;;  %2847 = vmatpush3.msra.mxu0 %v4369_v8 }
 0x4af   :  { %1615 = vmatpush1.msra.mxu1 %v4190_v50  ;;  %2848 = vmatprep.subr.mxu0 %v4873_v2 }
 0x4b0   :  { %1616 = vmatprep.subr.mxu1 %v4194_v9  ;;  %2849 = vmatpush3.msra.mxu0 %v4375_v51 }
 0x4b1   :  { %1617 = vmatpush1.msra.mxu1 %v4198_v48  ;;  %2850 = vmatprep.subr.mxu0 %v4873_v2 }
 0x4b2   :  { %1618 = vmatprep.subr.mxu1 %v4202_v32  ;;  %2851 = vmatpush3.msra.mxu0 %v4381_v38  ;;  %v5035_v38 = vld [vmem:[#allocation70_spill] sm:$0xff] }
 0x4b3   :  { %1619 = vmatpush1.msra.mxu1 %v4206_v45  ;;  %2852 = vmatprep.subr.mxu0 %v4873_v2 }
 0x4b4   :  { %1653 = vmatmul.mubr.f32.vlgmr.msra.gmra.mxu1 %v4290_v42  ;;  %1764 = vmatprep.subr.mxu1 %v4001_v13  ;;  %v5013_v42 = vld [vmem:[#allocation29_spill] sm:$0xff] }
 0x4b5   :  { %1765 = vmatpush1.msra.mxu1 %v4004_v15  ;;  %2853 = vmatpush3.msra.mxu0 %v4389_v44 }
 0x4b6   :  { %1766 = vmatprep.subr.mxu1 %v4008_v19  ;;  %2854 = vmatprep.mubr.msk.f32.mxu0 %vm3347_vm0, %v4873_v2 }
 0x4b7   :  { %1767 = vmatpush1.msra.mxu1 %v4013_v22  ;;  %1828 = vmatprep.mubr.f32.mxu1 %v4873_v2  ;;  %v5014_v22 = vld [vmem:[#allocation30_spill] sm:$0xff] }
 0x4b8   :  { %1768 = vmatprep.subr.mxu1 %v4017_v24  ;;  %1835 = vmatprep.subr.mxu0 %v4020_v26  ;;  %v5015_v24 = vld [vmem:[#allocation31_spill] sm:$0xff]  ;;  %v5016_v26 = vld [vmem:[#allocation32_spill] sm:$0xff] }
 0x4b9   :  { %1769 = vmatpush1.msra.mxu1 %v4023_v28  ;;  %v5017_v28 = vld [vmem:[#allocation59_spill] sm:$0xff] }
 0x4ba   :  { %1770 = vmatprep.subr.mxu1 %v4026_v31  ;;  %v5018_v31 = vld [vmem:[#allocation57_spill] sm:$0xff] }
 0x4bb   :  { %1771 = vmatpush1.msra.mxu1 %v4029_v33  ;;  %v5019_v33 = vld [vmem:[#allocation58_spill] sm:$0xff] }
 0x4bc   :  { %1772 = vmatprep.subr.mxu1 %v4032_v35  ;;  %v5020_v35 = vld [vmem:[#allocation60_spill] sm:$0xff] }
 0x4bd   :  { %1773 = vmatpush1.msra.mxu1 %v4035_v37  ;;  %v5021_v37 = vld [vmem:[#allocation52_spill] sm:$0xff] }
 0x4be   :  { %1774 = vmatprep.subr.mxu1 %v4038_v40  ;;  %v5022_v40 = vld [vmem:[#allocation55_spill] sm:$0xff] }
 0x4bf   :  { %1775 = vmatpush1.msra.mxu1 %v5012_v46  ;;  %v5023_v46 = vld [vmem:[#allocation54_spill] sm:$0xff] }
 0x4c0   :  { %1776 = vmatprep.subr.mxu1 %v5013_v42  ;;  %v5024_v42 = vld [vmem:[#allocation56_spill] sm:$0xff] }
 0x4c1   :  { %1777 = vmatpush1.msra.mxu1 %v5014_v22  ;;  %v5025_v22 = vld [vmem:[#allocation35_spill] sm:$0xff] }
 0x4c2   :  { %1778 = vmatprep.subr.mxu1 %v5015_v24  ;;  %v5026_v24 = vld [vmem:[#allocation36_spill] sm:$0xff] }
 0x4c3   :  { %1779 = vmatpush1.msra.mxu1 %v5016_v26  ;;  %v5027_v26 = vld [vmem:[#allocation37_spill] sm:$0xff] }
 0x4c4   :  { %1780 = vmatprep.subr.mxu1 %v5017_v28  ;;  %v5028_v28 = vld [vmem:[#allocation38_spill] sm:$0xff] }
 0x4c5   :  { %1781 = vmatpush1.msra.mxu1 %v5018_v31  ;;  %v5029_v31 = vld [vmem:[#allocation39_spill] sm:$0xff] }
 0x4c6   :  { %1782 = vmatprep.subr.mxu1 %v5019_v33  ;;  %v5030_v33 = vld [vmem:[#allocation40_spill] sm:$0xff] }
 0x4c7   :  { %1783 = vmatpush1.msra.mxu1 %v5020_v35  ;;  %v5031_v35 = vld [vmem:[#allocation41_spill] sm:$0xff] }
 0x4c8   :  { %1784 = vmatprep.subr.mxu1 %v5021_v37  ;;  %v5032_v37 = vld [vmem:[#allocation42_spill] sm:$0xff] }
 0x4c9   :  { %1785 = vmatpush1.msra.mxu1 %v5022_v40 }
 0x4ca   :  { %1786 = vmatprep.subr.mxu1 %v5023_v46 }
 0x4cb   :  { %1787 = vmatpush1.msra.mxu1 %v5024_v42 }
 0x4cc   :  { %1788 = vmatprep.subr.mxu1 %v5025_v22 }
 0x4cd   :  { %1789 = vmatpush1.msra.mxu1 %v5026_v24 }
 0x4ce   :  { %1790 = vmatprep.subr.mxu1 %v5027_v26  ;;  %v5033_v26 = vld [vmem:[#allocation71_spill] sm:$0xff] }
 0x4cf   :  { %1791 = vmatpush1.msra.mxu1 %v5028_v28  ;;  %v5034_v28 = vld [vmem:[#allocation69_spill] sm:$0xff] }
 0x4d0   :  { %1792 = vmatprep.subr.mxu1 %v5029_v31 }
 0x4d1   :  { %1793 = vmatpush1.msra.mxu1 %v5030_v33 }
 0x4d2   :  { %1794 = vmatprep.subr.mxu1 %v5031_v35 }
 0x4d3   :  { %1795 = vmatpush1.msra.mxu1 %v5032_v37 }
 0x4d4   :  { %2857 = vmatprep.subr.mxu1 %v4873_v2 }
 0x554   :  { %v1506_v46 = vpop.f32.mrf.mxu1  ;;  %v1583_v42 = vpop.f32.mrf.mxu0 }
 0x555   :  { %v1507_v22 = vadd.f32 %v3923_v18, %v1506_v46  ;;  %v1659_v44 = vadd.f32 %v1583_v42, %v5034_v28  ;;  %v5040_v46 = vld [vmem:[#allocation47_spill] sm:$0xff]  ;;  %v5041_v42 = vld [vmem:[#allocation50_spill] sm:$0xff] }
 0x556   :  { %v2821_v40 = vpop.f32.mrf.mxu1  ;;  %v1585_v24 = vpop.f32.mrf.mxu0 }
 0x557   :  { %1511 = vst [vmem:[#allocation13 + $0x18] sm:$0xff] %v1507_v22  ;;  %v1660_v19 = vadd.f32 %v1585_v24, %v5033_v26  ;;  %v2534_v15 = vmul.f32 -1.442695, %v1659_v44  ;;  %v5036_v22 = vld [vmem:[#allocation72_spill] sm:$0xff] }
 0x559   :  { %v2535_v31 = vmul.f32 -1.442695, %v1660_v19 }
 0x55b   :  { %3037 = vpow2.f32 %v2535_v31 }
 0x55c   :  { %3039 = vpow2.f32 %v2534_v15 }
 0x568   :  { %v3038_v35 = vpop.eup %3037 }
 0x569   :  { %v3040_v33 = vpop.eup %3039  ;;  %v1672_v37 = vadd.f32 1.0, %v3038_v35 }
 0x56a   :  { %v1666_v13 = vadd.f32 1.0, %v3040_v33 }
 0x56b   :  { %3041 = vrcp.f32 %v1672_v37 }
 0x56c   :  { %3043 = vrcp.f32 %v1666_v13 }
 0x574   :  { %v1654_v45 = vpop.f32.mrf.mxu1 }
 0x575   :  { %v1661_v32 = vadd.f32 %v1654_v45, %v5035_v38  ;;  %v5037_v45 = vld [vmem:[#allocation33_spill] sm:$0xff]  ;;  %v5039_v38 = vld [vmem:[#allocation34_spill] sm:$0xff] }
 0x576   :  { %v1656_v18 = vpop.f32.mrf.mxu1 }
 0x577   :  { %3045 = vtanh.f32 %v1661_v32  ;;  %v1662_v40 = vadd.f32 %v1656_v18, %v5036_v22  ;;  %v5042_v18 = vld [vmem:[#allocation44_spill] sm:$0xff]  ;;  %v5043_v22 = vld [vmem:[#allocation18_spill] sm:$0xff] }
 0x578   :  { %v3042_v26 = vpop.eup %3041 }
 0x579   :  { %v2536_v24 = vmul.f32 -1.442695, %v1662_v40  ;;  %v3044_v19 = vpop.eup %3043  ;;  %v1682_v15 = vmul.f32 %v3042_v26, %v4287_v56  ;;  %v5038_v56 = vld [vmem:[#allocation43_spill] sm:$0xff]  ;;  %v5044_v40 = vld [vmem:[#allocation20_spill] sm:$0xff]  ;;  %v5046_v26 = vld [vmem:[#allocation22_spill] sm:$0xff] }
 0x57b   :  { %3047 = vpow2.f32 %v2536_v24  ;;  %v5045_v24 = vld [vmem:[#allocation21_spill] sm:$0xff] }
 0x584   :  { %v3046_v28 = vpop.eup %3045 }
 0x585   :  { %v1683_v31 = vmul.f32 %v3046_v28, %v3044_v19  ;;  %v5047_v19 = vld [vmem:[#allocation23_spill] sm:$0xff] }
 0x586   :  { %v5048_v28 = vld [vmem:[#allocation19_spill] sm:$0xff] }
 0x587   :  { %v4433_v44 = vadd.f32 %v1683_v31, %v1682_v15  ;;  %v5049_v15 = vld [vmem:[#allocation24_spill] sm:$0xff]  ;;  %v5050_v31 = vld [vmem:[#allocation25_spill] sm:$0xff] }
 0x588   :  { %v3048_v33 = vpop.eup %3047 }
 0x589   :  { %v1679_v35 = vadd.f32 1.0, %v3048_v33  ;;  %3049 = vtanh.f32 %v4433_v44  ;;  %v5051_v33 = vld [vmem:[#allocation26_spill] sm:$0xff] }
 0x58b   :  { %3051 = vrcp.f32 %v1679_v35  ;;  %v5052_v35 = vld [vmem:[#allocation27_spill] sm:$0xff] }
 0x596   :  { %v3050_v13 = vpop.eup %3049 }
 0x598   :  { %v3052_v37 = vpop.eup %3051 }
 0x599   :  { %v4436_v32 = vmul.f32 %v3052_v37, %v3050_v13  ;;  %v5053_v13 = vld [vmem:[#allocation28_spill] sm:$0xff]  ;;  %v5054_v37 = vld [vmem:[#allocation29_spill] sm:$0xff] }
 0x59b   :  { %2855 = vmatmul.mubr.f32.vlgmr.msra.gmra.mxu0 %v4436_v32  ;;  %1829 = vmatmul.mubr.f32.vlgmr.msra.gmra.mxu1 %v4436_v32 }
 0x59c   :  { %1836 = vmatpush1.msra.mxu0 %v4086_v21  ;;  %1899 = vmatprep.mubr.f32.mxu0 %v4873_v2 }
 0x59d   :  { %1837 = vmatprep.subr.mxu0 %v4090_v23  ;;  %2858 = vmatpush3.msra.mxu1 %v4297_v49 }
 0x59e   :  { %1838 = vmatpush1.msra.mxu0 %v4094_v34  ;;  %2859 = vmatprep.subr.mxu1 %v4873_v2 }
 0x59f   :  { %1839 = vmatprep.subr.mxu0 %v4098_v25  ;;  %2860 = vmatpush3.msra.mxu1 %v4303_v1 }
 0x5a0   :  { %1840 = vmatpush1.msra.mxu0 %v4102_v14  ;;  %2861 = vmatprep.subr.mxu1 %v4873_v2 }
 0x5a1   :  { %1841 = vmatprep.subr.mxu0 %v4106_v27  ;;  %2862 = vmatpush3.msra.mxu1 %v4309_v41 }
 0x5a2   :  { %1842 = vmatpush1.msra.mxu0 %v4110_v52  ;;  %2863 = vmatprep.subr.mxu1 %v4873_v2 }
 0x5a3   :  { %1843 = vmatprep.subr.mxu0 %v4114_v6  ;;  %2864 = vmatpush3.msra.mxu1 %v4315_v3 }
 0x5a4   :  { %1844 = vmatpush1.msra.mxu0 %v4118_v59  ;;  %2865 = vmatprep.subr.mxu1 %v4873_v2 }
 0x5a5   :  { %1845 = vmatprep.subr.mxu0 %v4122_v10  ;;  %2866 = vmatpush3.msra.mxu1 %v4321_v39 }
 0x5a6   :  { %1846 = vmatpush1.msra.mxu0 %v4126_v11  ;;  %2867 = vmatprep.subr.mxu1 %v4873_v2 }
 0x5a7   :  { %1847 = vmatprep.subr.mxu0 %v4130_v53  ;;  %2868 = vmatpush3.msra.mxu1 %v4327_v4 }
 0x5a8   :  { %1848 = vmatpush1.msra.mxu0 %v4134_v0  ;;  %2869 = vmatprep.subr.mxu1 %v4873_v2 }
 0x5a9   :  { %1849 = vmatprep.subr.mxu0 %v4138_v55  ;;  %2870 = vmatpush3.msra.mxu1 %v4333_v30 }
 0x5aa   :  { %1850 = vmatpush1.msra.mxu0 %v4142_v47  ;;  %2871 = vmatprep.subr.mxu1 %v4873_v2 }
 0x5ab   :  { %1851 = vmatprep.subr.mxu0 %v4146_v58  ;;  %2872 = vmatpush3.msra.mxu1 %v4339_v12 }
 0x5ac   :  { %1852 = vmatpush1.msra.mxu0 %v4150_v29  ;;  %2873 = vmatprep.subr.mxu1 %v4873_v2 }
 0x5ad   :  { %1853 = vmatprep.subr.mxu0 %v4154_v60  ;;  %2874 = vmatpush3.msra.mxu1 %v4345_v5 }
 0x5ae   :  { %1854 = vmatpush1.msra.mxu0 %v4158_v63  ;;  %2875 = vmatprep.subr.mxu1 %v4873_v2 }
 0x5af   :  { %1855 = vmatprep.subr.mxu0 %v4162_v62  ;;  %2876 = vmatpush3.msra.mxu1 %v4351_v7 }
 0x5b0   :  { %1856 = vmatpush1.msra.mxu0 %v4166_v61  ;;  %2877 = vmatprep.subr.mxu1 %v4873_v2 }
 0x5b1   :  { %1857 = vmatprep.subr.mxu0 %v4170_v20  ;;  %2878 = vmatpush3.msra.mxu1 %v4357_v17 }
 0x5b2   :  { %1858 = vmatpush1.msra.mxu0 %v4174_v57  ;;  %2879 = vmatprep.subr.mxu1 %v4873_v2 }
 0x5b3   :  { %1859 = vmatprep.subr.mxu0 %v4178_v16  ;;  %2880 = vmatpush3.msra.mxu1 %v4363_v43 }
 0x5b4   :  { %1860 = vmatpush1.msra.mxu0 %v4182_v54  ;;  %2881 = vmatprep.subr.mxu1 %v4873_v2 }
 0x5b5   :  { %1861 = vmatprep.subr.mxu0 %v4186_v36  ;;  %2882 = vmatpush3.msra.mxu1 %v4369_v8 }
 0x5b6   :  { %1862 = vmatpush1.msra.mxu0 %v4190_v50  ;;  %2883 = vmatprep.subr.mxu1 %v4873_v2 }
 0x5b7   :  { %1863 = vmatprep.subr.mxu0 %v4194_v9  ;;  %2884 = vmatpush3.msra.mxu1 %v4375_v51 }
 0x5b8   :  { %1864 = vmatpush1.msra.mxu0 %v4198_v48  ;;  %2885 = vmatprep.subr.mxu1 %v4873_v2 }
 0x5b9   :  { %1865 = vmatprep.subr.mxu0 %v5037_v45  ;;  %2886 = vmatpush3.msra.mxu1 %v5038_v56  ;;  %v5076_v56 = vld [vmem:[#allocation74_spill] sm:$0xff] }
 0x5ba   :  { %1866 = vmatpush1.msra.mxu0 %v5039_v38  ;;  %2887 = vmatprep.subr.mxu1 %v4873_v2 }
 0x5bb   :  { %1900 = vmatmul.mubr.f32.vlgmr.msra.gmra.mxu0 %v4436_v32  ;;  %2011 = vmatprep.subr.mxu0 %v5040_v46  ;;  %v5055_v32 = vld [vmem:[#allocation30_spill] sm:$0xff]  ;;  %v5056_v46 = vld [vmem:[#allocation31_spill] sm:$0xff] }
 0x5bc   :  { %2012 = vmatpush1.msra.mxu0 %v5041_v42  ;;  %2888 = vmatpush3.msra.mxu1 %v5042_v18  ;;  %v5057_v42 = vld [vmem:[#allocation32_spill] sm:$0xff] }
 0x5bd   :  { %2013 = vmatprep.subr.mxu0 %v5043_v22  ;;  %2889 = vmatprep.mubr.msk.f32.mxu1 %vm3347_vm0, %v4873_v2  ;;  %v5058_v22 = vld [vmem:[#allocation59_spill] sm:$0xff] }
 0x5be   :  { %2014 = vmatpush1.msra.mxu0 %v5044_v40  ;;  %2075 = vmatprep.mubr.f32.mxu0 %v4873_v2  ;;  %v5059_v40 = vld [vmem:[#allocation57_spill] sm:$0xff] }
 0x5bf   :  { %2015 = vmatprep.subr.mxu0 %v5045_v24  ;;  %2082 = vmatprep.subr.mxu1 %v5046_v26  ;;  %v5060_v24 = vld [vmem:[#allocation58_spill] sm:$0xff]  ;;  %v5061_v26 = vld [vmem:[#allocation60_spill] sm:$0xff] }
 0x5c0   :  { %2016 = vmatpush1.msra.mxu0 %v5047_v19  ;;  %v5062_v19 = vld [vmem:[#allocation52_spill] sm:$0xff] }
 0x5c1   :  { %2017 = vmatprep.subr.mxu0 %v5048_v28  ;;  %v5063_v28 = vld [vmem:[#allocation55_spill] sm:$0xff] }
 0x5c2   :  { %2018 = vmatpush1.msra.mxu0 %v5049_v15  ;;  %v5064_v15 = vld [vmem:[#allocation54_spill] sm:$0xff] }
 0x5c3   :  { %2019 = vmatprep.subr.mxu0 %v5050_v31  ;;  %v5065_v31 = vld [vmem:[#allocation56_spill] sm:$0xff] }
 0x5c4   :  { %2020 = vmatpush1.msra.mxu0 %v5051_v33  ;;  %v5066_v33 = vld [vmem:[#allocation35_spill] sm:$0xff] }
 0x5c5   :  { %2021 = vmatprep.subr.mxu0 %v5052_v35  ;;  %v5067_v35 = vld [vmem:[#allocation36_spill] sm:$0xff] }
 0x5c6   :  { %2022 = vmatpush1.msra.mxu0 %v5053_v13  ;;  %v5068_v13 = vld [vmem:[#allocation37_spill] sm:$0xff] }
 0x5c7   :  { %2023 = vmatprep.subr.mxu0 %v5054_v37  ;;  %v5069_v37 = vld [vmem:[#allocation38_spill] sm:$0xff] }
 0x5c8   :  { %2024 = vmatpush1.msra.mxu0 %v5055_v32  ;;  %v5070_v32 = vld [vmem:[#allocation39_spill] sm:$0xff] }
 0x5c9   :  { %2025 = vmatprep.subr.mxu0 %v5056_v46  ;;  %v5071_v46 = vld [vmem:[#allocation40_spill] sm:$0xff] }
 0x5ca   :  { %2026 = vmatpush1.msra.mxu0 %v5057_v42  ;;  %v5072_v42 = vld [vmem:[#allocation41_spill] sm:$0xff] }
 0x5cb   :  { %2027 = vmatprep.subr.mxu0 %v5058_v22 }
 0x5cc   :  { %2028 = vmatpush1.msra.mxu0 %v5059_v40 }
 0x5cd   :  { %2029 = vmatprep.subr.mxu0 %v5060_v24 }
 0x5ce   :  { %2030 = vmatpush1.msra.mxu0 %v5061_v26 }
 0x5cf   :  { %2031 = vmatprep.subr.mxu0 %v5062_v19  ;;  %v5073_v19 = vld [vmem:[#allocation42_spill] sm:$0xff] }
 0x5d0   :  { %2032 = vmatpush1.msra.mxu0 %v5063_v28  ;;  %v5075_v28 = vld [vmem:[#allocation73_spill] sm:$0xff] }
 0x5d1   :  { %2033 = vmatprep.subr.mxu0 %v5064_v15 }
 0x5d2   :  { %2034 = vmatpush1.msra.mxu0 %v5065_v31 }
 0x5d3   :  { %2035 = vmatprep.subr.mxu0 %v5066_v33 }
 0x5d4   :  { %2036 = vmatpush1.msra.mxu0 %v5067_v35  ;;  %v4544_v35 = vld [vmem:[%s4709_s5] ss:$0 sm:$0xff]  ;;  %s3348_s5 = smov [#allocation13]  }
 0x5d5   :  { %2037 = vmatprep.subr.mxu0 %v5068_v13  ;;  %s2507_s22 = sshll.u32 %s3348_s5, 4  ;;  %s2508_s22 = int_to_ptr.vmem [resolvable:$true] %s2507_s22 }
 0x5d6   :  { %2038 = vmatpush1.msra.mxu0 %v5069_v37  ;;  %s3310_s23 = scalar_lea.vmem %s2508_s22, 1024  ;;  %p3315_p7 = scmp.lt.s32.totalorder %s2508_s22, %s2508_s22 }
 0x5d7   :  { %2039 = vmatprep.subr.mxu0 %v5070_v32  ;;  %v5074_v32 = vld [vmem:[#allocation75_spill] sm:$0xff]  ;;  %p3311_p6 = scmp.ne.s32.totalorder %s2508_s22, %s3310_s23  ;;  %p3316_p8 = scmp.lt.s32.totalorder %s3310_s23, %s3310_s23 }
 0x5d8   :  { %2040 = vmatpush1.msra.mxu0 %v5071_v46 }
 0x5d9   :  { %2041 = vmatprep.subr.mxu0 %v5072_v42  ;;  %p3317_p9 = por %p3316_p8, %p3315_p7 }
 0x5da   :  { %2042 = vmatpush1.msra.mxu0 %v5073_v19 }
 0x5db   :  { %2892 = vmatprep.subr.mxu0 %v4873_v2  ;;  %p3318_p10 = pnand %p3317_p9, %p3311_p6 }
 0x65b   :  { %v1753_v15 = vpop.f32.mrf.mxu0  ;;  %v1830_v31 = vpop.f32.mrf.mxu1 }
 0x65c   :  { %v1754_v13 = vadd.f32 %v4544_v35, %v1753_v15  ;;  %v1906_v42 = vadd.f32 %v1830_v31, %v5075_v28 }
 0x65d   :  { %v2856_v37 = vpop.f32.mrf.mxu0  ;;  %v1832_v33 = vpop.f32.mrf.mxu1 }
 0x65e   :  { %1758 = vst [vmem:[#allocation13 + $0x20] sm:$0xff] %v1754_v13  ;;  %v1907_v46 = vadd.f32 %v1832_v33, %v5074_v32  ;;  %v2537_v19 = vmul.f32 -1.442695, %v1906_v42  ;;  %v5077_v13 = vld [vmem:[#allocation76_spill] sm:$0xff]  ;;  %v5093_v42 = vld [vmem:[#allocation38_spill] sm:$0xff] }
 0x660   :  { %v2538_v26 = vmul.f32 -1.442695, %v1907_v46 }
 0x662   :  { %3053 = vpow2.f32 %v2538_v26 }
 0x663   :  { %3055 = vpow2.f32 %v2537_v19 }
 0x66f   :  { %v3054_v24 = vpop.eup %3053 }
 0x670   :  { %v3056_v40 = vpop.eup %3055  ;;  %v1919_v22 = vadd.f32 1.0, %v3054_v24 }
 0x671   :  { %v1913_v18 = vadd.f32 1.0, %v3056_v40 }
 0x672   :  { %3057 = vrcp.f32 %v1919_v22  ;;  %v5092_v22 = vld [vmem:[#allocation37_spill] sm:$0xff] }
 0x673   :  { %3059 = vrcp.f32 %v1913_v18  ;;  %v5091_v18 = vld [vmem:[#allocation36_spill] sm:$0xff] }
 0x67b   :  { %v1901_v38 = vpop.f32.mrf.mxu0 }
 0x67c   :  { %v1908_v45 = vadd.f32 %v1901_v38, %v5076_v56 }
 0x67d   :  { %v1903_v15 = vpop.f32.mrf.mxu0 }
 0x67e   :  { %3061 = vtanh.f32 %v1908_v45  ;;  %v1909_v37 = vadd.f32 %v1903_v15, %v5077_v13  ;;  %v5094_v15 = vld [vmem:[#allocation39_spill] sm:$0xff]  ;;  %v5095_v13 = vld [vmem:[#allocation40_spill] sm:$0xff] }
 0x67f   :  { %v3058_v28 = vpop.eup %3057 }
 0x680   :  { %v2539_v33 = vmul.f32 -1.442695, %v1909_v37  ;;  %v3060_v31 = vpop.eup %3059  ;;  %v1929_v26 = vmul.f32 %v3058_v28, %v4433_v44  ;;  %v5090_v44 = vld [vmem:[#allocation35_spill] sm:$0xff]  ;;  %v5096_v37 = vld [vmem:[#allocation41_spill] sm:$0xff] }
 0x682   :  { %3063 = vpow2.f32 %v2539_v33  ;;  %v5097_v33 = vld [vmem:[#allocation42_spill] sm:$0xff] }
 0x68b   :  { %v3062_v32 = vpop.eup %3061 }
 0x68c   :  { %v1930_v19 = vmul.f32 %v3062_v32, %v3060_v31 }
 0x68e   :  { %v4552_v46 = vadd.f32 %v1930_v19, %v1929_v26 }
 0x68f   :  { %v3064_v40 = vpop.eup %3063 }
 0x690   :  { %v1926_v24 = vadd.f32 1.0, %v3064_v40  ;;  %3065 = vtanh.f32 %v4552_v46  ;;  %v5098_v40 = vld [vmem:[#allocation79_spill] sm:$0xff] }
 0x692   :  { %3067 = vrcp.f32 %v1926_v24 }
 0x69d   :  { %v3066_v56 = vpop.eup %3065 }
 0x69f   :  { %v3068_v38 = vpop.eup %3067 }
 0x6a0   :  { %v4555_v45 = vmul.f32 %v3068_v38, %v3066_v56  ;;  %v5099_v56 = vld [vmem:[#allocation77_spill] sm:$0xff] }
 0x6a2   :  { %2890 = vmatmul.mubr.f32.vlgmr.msra.gmra.mxu1 %v4555_v45  ;;  %2076 = vmatmul.mubr.f32.vlgmr.msra.gmra.mxu0 %v4555_v45 }
 0x6a3   :  { %2083 = vmatpush1.msra.mxu1 %v4086_v21  ;;  %2146 = vmatprep.mubr.f32.mxu1 %v4873_v2  ;;  %v5078_v21 = vld [vmem:[#allocation33_spill] sm:$0xff] }
 0x6a4   :  { %2084 = vmatprep.subr.mxu1 %v4090_v23  ;;  %2893 = vmatpush3.msra.mxu0 %v4297_v49  ;;  %v5079_v23 = vld [vmem:[#allocation43_spill] sm:$0xff] }
 0x6a5   :  { %2085 = vmatpush1.msra.mxu1 %v4094_v34  ;;  %2894 = vmatprep.subr.mxu0 %v4873_v2  ;;  %v5080_v34 = vld [vmem:[#allocation34_spill] sm:$0xff] }
 0x6a6   :  { %2086 = vmatprep.subr.mxu1 %v4098_v25  ;;  %2895 = vmatpush3.msra.mxu0 %v4303_v1  ;;  %v3182_v25 = vld [vmem:[#allocation10 + $0x1e8] sm:$0xff] }
 0x6a7   :  { %2087 = vmatpush1.msra.mxu1 %v4102_v14  ;;  %2896 = vmatprep.subr.mxu0 %v4873_v2  ;;  %v3183_v14 = vld [vmem:[#allocation10 + $0x1e0] sm:$0xff] }
 0x6a8   :  { %2088 = vmatprep.subr.mxu1 %v4106_v27  ;;  %2897 = vmatpush3.msra.mxu0 %v4309_v41  ;;  %v5081_v27 = vld [vmem:[#allocation44_spill] sm:$0xff] }
 0x6a9   :  { %2089 = vmatpush1.msra.mxu1 %v4110_v52  ;;  %2898 = vmatprep.subr.mxu0 %v4873_v2  ;;  %v3184_v52 = vld [vmem:[#allocation10 + $0x1c8] sm:$0xff] }
 0x6aa   :  { %2090 = vmatprep.subr.mxu1 %v4114_v6  ;;  %2899 = vmatpush3.msra.mxu0 %v4315_v3  ;;  %v3185_v6 = vld [vmem:[#allocation10 + $0x1c0] sm:$0xff] }
 0x6ab   :  { %2091 = vmatpush1.msra.mxu1 %v4118_v59  ;;  %2900 = vmatprep.subr.mxu0 %v4873_v2  ;;  %v3186_v59 = vld [vmem:[#allocation10 + $0x1a8] sm:$0xff] }
 0x6ac   :  { %2092 = vmatprep.subr.mxu1 %v4122_v10  ;;  %2901 = vmatpush3.msra.mxu0 %v4321_v39  ;;  %v3187_v10 = vld [vmem:[#allocation10 + $0x1f8] sm:$0xff] }
 0x6ad   :  { %2093 = vmatpush1.msra.mxu1 %v4126_v11  ;;  %2902 = vmatprep.subr.mxu0 %v4873_v2  ;;  %v3188_v11 = vld [vmem:[#allocation10 + $0x1a0] sm:$0xff] }
 0x6ae   :  { %2094 = vmatprep.subr.mxu1 %v4130_v53  ;;  %2903 = vmatpush3.msra.mxu0 %v4327_v4  ;;  %v3189_v53 = vld [vmem:[#allocation10 + $0x188] sm:$0xff] }
 0x6af   :  { %2095 = vmatpush1.msra.mxu1 %v4134_v0  ;;  %2904 = vmatprep.subr.mxu0 %v4873_v2  ;;  %v3190_v0 = vld [vmem:[#allocation10 + $0x180] sm:$0xff] }
 0x6b0   :  { %2096 = vmatprep.subr.mxu1 %v4138_v55  ;;  %2905 = vmatpush3.msra.mxu0 %v4333_v30  ;;  %v3191_v55 = vld [vmem:[#allocation10 + $0x168] sm:$0xff] }
 0x6b1   :  { %2097 = vmatpush1.msra.mxu1 %v4142_v47  ;;  %2906 = vmatprep.subr.mxu0 %v4873_v2  ;;  %v3192_v47 = vld [vmem:[#allocation10 + $0x160] sm:$0xff] }
 0x6b2   :  { %2098 = vmatprep.subr.mxu1 %v4146_v58  ;;  %2907 = vmatpush3.msra.mxu0 %v4339_v12  ;;  %v3193_v58 = vld [vmem:[#allocation10 + $0x148] sm:$0xff] }
 0x6b3   :  { %2099 = vmatpush1.msra.mxu1 %v4150_v29  ;;  %2908 = vmatprep.subr.mxu0 %v4873_v2  ;;  %v3194_v29 = vld [vmem:[#allocation10 + $0x140] sm:$0xff] }
 0x6b4   :  { %2100 = vmatprep.subr.mxu1 %v4154_v60  ;;  %2909 = vmatpush3.msra.mxu0 %v4345_v5  ;;  %v3195_v60 = vld [vmem:[#allocation10 + $0x128] sm:$0xff] }
 0x6b5   :  { %2101 = vmatpush1.msra.mxu1 %v4158_v63  ;;  %2910 = vmatprep.subr.mxu0 %v4873_v2  ;;  %v3196_v63 = vld [vmem:[#allocation10 + $0x120] sm:$0xff] }
 0x6b6   :  { %2102 = vmatprep.subr.mxu1 %v4162_v62  ;;  %2911 = vmatpush3.msra.mxu0 %v4351_v7  ;;  %v3197_v62 = vld [vmem:[#allocation10 + $0x108] sm:$0xff] }
 0x6b7   :  { %2103 = vmatpush1.msra.mxu1 %v4166_v61  ;;  %2912 = vmatprep.subr.mxu0 %v4873_v2  ;;  %v3198_v61 = vld [vmem:[#allocation10 + $0x100] sm:$0xff] }
 0x6b8   :  { %2104 = vmatprep.subr.mxu1 %v4170_v20  ;;  %2913 = vmatpush3.msra.mxu0 %v4357_v17  ;;  %v5082_v20 = vld [vmem:[#allocation59_spill] sm:$0xff] }
 0x6b9   :  { %2105 = vmatpush1.msra.mxu1 %v4174_v57  ;;  %2914 = vmatprep.subr.mxu0 %v4873_v2  ;;  %v5083_v57 = vld [vmem:[#allocation57_spill] sm:$0xff] }
 0x6ba   :  { %2106 = vmatprep.subr.mxu1 %v4178_v16  ;;  %2915 = vmatpush3.msra.mxu0 %v4363_v43  ;;  %v5084_v16 = vld [vmem:[#allocation58_spill] sm:$0xff] }
 0x6bb   :  { %2107 = vmatpush1.msra.mxu1 %v4182_v54  ;;  %2916 = vmatprep.subr.mxu0 %v4873_v2  ;;  %v5085_v54 = vld [vmem:[#allocation60_spill] sm:$0xff] }
 0x6bc   :  { %2108 = vmatprep.subr.mxu1 %v4186_v36  ;;  %2917 = vmatpush3.msra.mxu0 %v4369_v8  ;;  %v5086_v36 = vld [vmem:[#allocation52_spill] sm:$0xff] }
 0x6bd   :  { %2109 = vmatpush1.msra.mxu1 %v4190_v50  ;;  %2918 = vmatprep.subr.mxu0 %v4873_v2  ;;  %v5087_v50 = vld [vmem:[#allocation55_spill] sm:$0xff] }
 0x6be   :  { %2110 = vmatprep.subr.mxu1 %v4194_v9  ;;  %2919 = vmatpush3.msra.mxu0 %v4375_v51  ;;  %v5088_v9 = vld [vmem:[#allocation54_spill] sm:$0xff] }
 0x6bf   :  { %2111 = vmatpush1.msra.mxu1 %v4198_v48  ;;  %2920 = vmatprep.subr.mxu0 %v4873_v2  ;;  %v5089_v48 = vld [vmem:[#allocation56_spill] sm:$0xff] }
 0x6c0   :  { %2112 = vmatprep.subr.mxu1 %v5078_v21  ;;  %2921 = vmatpush3.msra.mxu0 %v5079_v23 }
 0x6c1   :  { %2113 = vmatpush1.msra.mxu1 %v5080_v34  ;;  %2922 = vmatprep.subr.mxu0 %v4873_v2 }
 0x6c2   :  { %2147 = vmatmul.mubr.f32.vlgmr.msra.gmra.mxu1 %v4555_v45  ;;  %2258 = vmatprep.subr.mxu1 %v3182_v25 }
 0x6c3   :  { %2259 = vmatpush1.msra.mxu1 %v3183_v14  ;;  %2923 = vmatpush3.msra.mxu0 %v5081_v27 }
 0x6c4   :  { %2260 = vmatprep.subr.mxu1 %v3184_v52  ;;  %2924 = vmatprep.mubr.msk.f32.mxu0 %vm3347_vm0, %v4873_v2 }
 0x6c5   :  { %2261 = vmatpush1.msra.mxu1 %v3185_v6  ;;  %2322 = vmatprep.mubr.f32.mxu1 %v4873_v2 }
 0x6c6   :  { %2262 = vmatprep.subr.mxu1 %v3186_v59  ;;  %2329 = vmatprep.subr.mxu0 %v3187_v10  ;;  %v5100_v59 = vld [vmem:[#allocation78_spill] sm:$0xff] }
 0x6c7   :  { %2263 = vmatpush1.msra.mxu1 %v3188_v11 }
 0x6c8   :  { %2264 = vmatprep.subr.mxu1 %v3189_v53  ;;  %v5101_v53 = vld [vmem:[#allocation80_spill] sm:$0xff] }
 0x6c9   :  { %2265 = vmatpush1.msra.mxu1 %v3190_v0 }
 0x6ca   :  { %2266 = vmatprep.subr.mxu1 %v3191_v55 }
 0x6cb   :  { %2267 = vmatpush1.msra.mxu1 %v3192_v47 }
 0x6cc   :  { %2268 = vmatprep.subr.mxu1 %v3193_v58 }
 0x6cd   :  { %2269 = vmatpush1.msra.mxu1 %v3194_v29 }
 0x6ce   :  { %2270 = vmatprep.subr.mxu1 %v3195_v60 }
 0x6cf   :  { %2271 = vmatpush1.msra.mxu1 %v3196_v63 }
 0x6d0   :  { %2272 = vmatprep.subr.mxu1 %v3197_v62 }
 0x6d1   :  { %2273 = vmatpush1.msra.mxu1 %v3198_v61 }
 0x6d2   :  { %2274 = vmatprep.subr.mxu1 %v5082_v20 }
 0x6d3   :  { %2275 = vmatpush1.msra.mxu1 %v5083_v57 }
 0x6d4   :  { %2276 = vmatprep.subr.mxu1 %v5084_v16 }
 0x6d5   :  { %2277 = vmatpush1.msra.mxu1 %v5085_v54 }
 0x6d6   :  { %2278 = vmatprep.subr.mxu1 %v5086_v36  ;;  %v3199_v36 = vld [vmem:[#allocation10 + $0x1f0] sm:$0xff] }
 0x6d7   :  { %2279 = vmatpush1.msra.mxu1 %v5087_v50  ;;  %v3201_v50 = vld [vmem:[#allocation10 + $0x1d0] sm:$0xff] }
 0x6d8   :  { %2280 = vmatprep.subr.mxu1 %v5088_v9  ;;  %v3202_v9 = vld [vmem:[#allocation10 + $0x1b8] sm:$0xff] }
 0x6d9   :  { %2281 = vmatpush1.msra.mxu1 %v5089_v48  ;;  %v3203_v48 = vld [vmem:[#allocation10 + $0x1b0] sm:$0xff] }
 0x6da   :  { %2282 = vmatprep.subr.mxu1 %v5090_v44  ;;  %v3204_v44 = vld [vmem:[#allocation10 + $0x198] sm:$0xff] }
 0x6db   :  { %2283 = vmatpush1.msra.mxu1 %v5091_v18  ;;  %v3205_v18 = vld [vmem:[#allocation10 + $0x190] sm:$0xff] }
 0x6dc   :  { %2284 = vmatprep.subr.mxu1 %v5092_v22  ;;  %v3207_v22 = vld [vmem:[#allocation10 + $0x170] sm:$0xff] }
 0x6dd   :  { %2285 = vmatpush1.msra.mxu1 %v5093_v42  ;;  %v3209_v42 = vld [vmem:[#allocation10 + $0x150] sm:$0xff] }
 0x6de   :  { %2286 = vmatprep.subr.mxu1 %v5094_v15  ;;  %v3211_v15 = vld [vmem:[#allocation10 + $0x130] sm:$0xff] }
 0x6df   :  { %2287 = vmatpush1.msra.mxu1 %v5095_v13  ;;  %v3213_v13 = vld [vmem:[#allocation10 + $0x110] sm:$0xff] }
 0x6e0   :  { %2288 = vmatprep.subr.mxu1 %v5096_v37  ;;  %v3215_v37 = vld [vmem:[#allocation10 + $0xf0] sm:$0xff] }
 0x6e1   :  { %2289 = vmatpush1.msra.mxu1 %v5097_v33  ;;  %v3217_v33 = vld [vmem:[#allocation10 + $0xd0] sm:$0xff] }
 0x6e2   :  { %2927 = vmatprep.subr.mxu1 %v4873_v2 }
 0x762   :  { %v2000_v28 = vpop.f32.mrf.mxu1  ;;  %v2077_v31 = vpop.f32.mrf.mxu0 }
 0x763   :  { %v2001_v32 = vadd.f32 %v4544_v35, %v2000_v28  ;;  %v2153_v38 = vadd.f32 %v2077_v31, %v5099_v56  ;;  %v3219_v28 = vld [vmem:[#allocation10 + $0xb0] sm:$0xff] }
 0x764   :  { %v2891_v26 = vpop.f32.mrf.mxu1  ;;  %v2079_v19 = vpop.f32.mrf.mxu0  ;;  %v3221_v31 = vld [vmem:[#allocation10 + $0x90] sm:$0xff] }
 0x765   :  { %2005 = vst [vmem:[#allocation13 + $0x28] sm:$0xff] %v2001_v32  ;;  %v2154_v24 = vadd.f32 %v2079_v19, %v5098_v40  ;;  %v2540_v21 = vmul.f32 -1.442695, %v2153_v38  ;;  %v3223_v32 = vld [vmem:[#allocation10 + $0x70] sm:$0xff] }
 0x766   :  { %v3225_v26 = vld [vmem:[#allocation10 + $0x50] sm:$0xff] }
 0x767   :  { %v2541_v45 = vmul.f32 -1.442695, %v2154_v24  ;;  %v3227_v19 = vld [vmem:[#allocation10 + $0x30] sm:$0xff] }
 0x768   :  { %v3229_v40 = vld [vmem:[#allocation10 + $0x10] sm:$0xff] }
 0x769   :  { %3069 = vpow2.f32 %v2541_v45  ;;  %v5102_v45 = vld [vmem:[#allocation83_spill] sm:$0xff] }
 0x76a   :  { %3071 = vpow2.f32 %v2540_v21  ;;  %v5103_v21 = vld [vmem:[#allocation81_spill] sm:$0xff] }
 0x776   :  { %v3070_v34 = vpop.eup %3069 }
 0x777   :  { %v3072_v25 = vpop.eup %3071  ;;  %v2166_v14 = vadd.f32 1.0, %v3070_v34 }
 0x778   :  { %v2160_v52 = vadd.f32 1.0, %v3072_v25 }
 0x779   :  { %3073 = vrcp.f32 %v2166_v14 }
 0x77a   :  { %3075 = vrcp.f32 %v2160_v52 }
 0x782   :  { %v2148_v6 = vpop.f32.mrf.mxu1 }
 0x783   :  { %v2155_v10 = vadd.f32 %v2148_v6, %v5100_v59 }
 0x784   :  { %v2150_v11 = vpop.f32.mrf.mxu1 }
 0x785   :  { %3077 = vtanh.f32 %v2155_v10  ;;  %v2156_v0 = vadd.f32 %v2150_v11, %v5101_v53  ;;  %v5104_v10 = vld [vmem:[#allocation82_spill] sm:$0xff] }
 0x786   :  { %v3074_v47 = vpop.eup %3073 }
 0x787   :  { %v2542_v55 = vmul.f32 -1.442695, %v2156_v0  ;;  %v3076_v58 = vpop.eup %3075  ;;  %v2176_v60 = vmul.f32 %v3074_v47, %v4552_v46  ;;  %v3200_v46 = vld [vmem:[#allocation10 + $0x1d8] sm:$0xff]  ;;  %v5105_v0 = vld [vmem:[#allocation84_spill] sm:$0xff] }
 0x789   :  { %3079 = vpow2.f32 %v2542_v55 }
 0x792   :  { %v3078_v29 = vpop.eup %3077 }
 0x793   :  { %v2177_v63 = vmul.f32 %v3078_v29, %v3076_v58 }
 0x795   :  { %v4649_v62 = vadd.f32 %v2177_v63, %v2176_v60 }
 0x796   :  { %v3080_v61 = vpop.eup %3079 }
 0x797   :  { %v2173_v20 = vadd.f32 1.0, %v3080_v61  ;;  %3081 = vtanh.f32 %v4649_v62 }
 0x799   :  { %3083 = vrcp.f32 %v2173_v20 }
 0x7a4   :  { %v3082_v57 = vpop.eup %3081 }
 0x7a6   :  { %v3084_v16 = vpop.eup %3083 }
 0x7a7   :  { %v4652_v54 = vmul.f32 %v3084_v16, %v3082_v57 }
 0x7a9   :  { %2925 = vmatmul.mubr.f32.vlgmr.msra.gmra.mxu0 %v4652_v54  ;;  %2323 = vmatmul.mubr.f32.vlgmr.msra.gmra.mxu1 %v4652_v54 }
 0x7aa   :  { %2330 = vmatpush1.msra.mxu0 %v3199_v36  ;;  %2393 = vmatprep.mubr.f32.mxu0 %v4873_v2 }
 0x7ab   :  { %2331 = vmatprep.subr.mxu0 %v3200_v46  ;;  %2928 = vmatpush3.msra.mxu1 %v4297_v49  ;;  %v3206_v49 = vld [vmem:[#allocation10 + $0x178] sm:$0xff] }
 0x7ac   :  { %2332 = vmatpush1.msra.mxu0 %v3201_v50  ;;  %2929 = vmatprep.subr.mxu1 %v4873_v2 }
 0x7ad   :  { %2333 = vmatprep.subr.mxu0 %v3202_v9  ;;  %2930 = vmatpush3.msra.mxu1 %v4303_v1  ;;  %v3208_v1 = vld [vmem:[#allocation10 + $0x158] sm:$0xff] }
 0x7ae   :  { %2334 = vmatpush1.msra.mxu0 %v3203_v48  ;;  %2931 = vmatprep.subr.mxu1 %v4873_v2 }
 0x7af   :  { %2335 = vmatprep.subr.mxu0 %v3204_v44  ;;  %2932 = vmatpush3.msra.mxu1 %v4309_v41  ;;  %v3210_v41 = vld [vmem:[#allocation10 + $0x138] sm:$0xff] }
 0x7b0   :  { %2336 = vmatpush1.msra.mxu0 %v3205_v18  ;;  %2933 = vmatprep.subr.mxu1 %v4873_v2 }
 0x7b1   :  { %2337 = vmatprep.subr.mxu0 %v3206_v49  ;;  %2934 = vmatpush3.msra.mxu1 %v4315_v3  ;;  %v3212_v3 = vld [vmem:[#allocation10 + $0x118] sm:$0xff] }
 0x7b2   :  { %2338 = vmatpush1.msra.mxu0 %v3207_v22  ;;  %2935 = vmatprep.subr.mxu1 %v4873_v2 }
 0x7b3   :  { %2339 = vmatprep.subr.mxu0 %v3208_v1  ;;  %2936 = vmatpush3.msra.mxu1 %v4321_v39  ;;  %v3214_v39 = vld [vmem:[#allocation10 + $0xf8] sm:$0xff] }
 0x7b4   :  { %2340 = vmatpush1.msra.mxu0 %v3209_v42  ;;  %2937 = vmatprep.subr.mxu1 %v4873_v2 }
 0x7b5   :  { %2341 = vmatprep.subr.mxu0 %v3210_v41  ;;  %2938 = vmatpush3.msra.mxu1 %v4327_v4  ;;  %v3216_v4 = vld [vmem:[#allocation10 + $0xd8] sm:$0xff] }
 0x7b6   :  { %2342 = vmatpush1.msra.mxu0 %v3211_v15  ;;  %2939 = vmatprep.subr.mxu1 %v4873_v2 }
 0x7b7   :  { %2343 = vmatprep.subr.mxu0 %v3212_v3  ;;  %2940 = vmatpush3.msra.mxu1 %v4333_v30  ;;  %v3218_v30 = vld [vmem:[#allocation10 + $0xb8] sm:$0xff] }
 0x7b8   :  { %2344 = vmatpush1.msra.mxu0 %v3213_v13  ;;  %2941 = vmatprep.subr.mxu1 %v4873_v2 }
 0x7b9   :  { %2345 = vmatprep.subr.mxu0 %v3214_v39  ;;  %2942 = vmatpush3.msra.mxu1 %v4339_v12  ;;  %v3220_v12 = vld [vmem:[#allocation10 + $0x98] sm:$0xff] }
 0x7ba   :  { %2346 = vmatpush1.msra.mxu0 %v3215_v37  ;;  %2943 = vmatprep.subr.mxu1 %v4873_v2 }
 0x7bb   :  { %2347 = vmatprep.subr.mxu0 %v3216_v4  ;;  %2944 = vmatpush3.msra.mxu1 %v4345_v5  ;;  %v3222_v5 = vld [vmem:[#allocation10 + $0x78] sm:$0xff] }
 0x7bc   :  { %2348 = vmatpush1.msra.mxu0 %v3217_v33  ;;  %2945 = vmatprep.subr.mxu1 %v4873_v2 }
 0x7bd   :  { %2349 = vmatprep.subr.mxu0 %v3218_v30  ;;  %2946 = vmatpush3.msra.mxu1 %v4351_v7  ;;  %v3224_v7 = vld [vmem:[#allocation10 + $0x58] sm:$0xff] }
 0x7be   :  { %2350 = vmatpush1.msra.mxu0 %v3219_v28  ;;  %2947 = vmatprep.subr.mxu1 %v4873_v2 }
 0x7bf   :  { %2351 = vmatprep.subr.mxu0 %v3220_v12  ;;  %2948 = vmatpush3.msra.mxu1 %v4357_v17  ;;  %v3226_v17 = vld [vmem:[#allocation10 + $0x38] sm:$0xff] }
 0x7c0   :  { %2352 = vmatpush1.msra.mxu0 %v3221_v31  ;;  %2949 = vmatprep.subr.mxu1 %v4873_v2 }
 0x7c1   :  { %2353 = vmatprep.subr.mxu0 %v3222_v5  ;;  %2950 = vmatpush3.msra.mxu1 %v4363_v43  ;;  %v3228_v43 = vld [vmem:[#allocation10 + $0x18] sm:$0xff] }
 0x7c2   :  { %2354 = vmatpush1.msra.mxu0 %v3223_v32  ;;  %2951 = vmatprep.subr.mxu1 %v4873_v2 }
 0x7c3   :  { %2355 = vmatprep.subr.mxu0 %v3224_v7  ;;  %2952 = vmatpush3.msra.mxu1 %v4369_v8 }
 0x7c4   :  { %2356 = vmatpush1.msra.mxu0 %v3225_v26  ;;  %2953 = vmatprep.subr.mxu1 %v4873_v2 }
 0x7c5   :  { %2357 = vmatprep.subr.mxu0 %v3226_v17  ;;  %2954 = vmatpush3.msra.mxu1 %v4375_v51 }
 0x7c6   :  { %2358 = vmatpush1.msra.mxu0 %v3227_v19  ;;  %2955 = vmatprep.subr.mxu1 %v4873_v2 }
 0x7c7   :  { %2359 = vmatprep.subr.mxu0 %v3228_v43  ;;  %2956 = vmatpush3.msra.mxu1 %v5079_v23 }
 0x7c8   :  { %2360 = vmatpush1.msra.mxu0 %v3229_v40  ;;  %2957 = vmatprep.subr.mxu1 %v4873_v2 }
 0x7c9   :  { %2394 = vmatmul.mubr.f32.vlgmr.msra.gmra.mxu0 %v4652_v54  ;;  %2958 = vmatpush3.msra.mxu1 %v5081_v27 }
 0x7ca   :  { %2959 = vmatprep.mubr.msk.f32.mxu1 %vm3347_vm0, %v4873_v2 }
 0x869   :  { %v2247_v8 = vpop.f32.mrf.mxu0  ;;  %v2324_v51 = vpop.f32.mrf.mxu1 }
 0x86a   :  { %v2248_v24 = vadd.f32 %v4544_v35, %v2247_v8  ;;  %v2400_v34 = vadd.f32 %v2324_v51, %v5103_v21 }
 0x86b   :  { %v2926_v56 = vpop.f32.mrf.mxu0  ;;  %v2326_v38 = vpop.f32.mrf.mxu1 }
 0x86c   :  { %2252 = vst [vmem:[#allocation13 + $0x30] sm:$0xff] %v2248_v24  ;;  %v2401_v23 = vadd.f32 %v2326_v38, %v5102_v45  ;;  %v2543_v14 = vmul.f32 -1.442695, %v2400_v34 }
 0x86e   :  { %v2544_v25 = vmul.f32 -1.442695, %v2401_v23 }
 0x870   :  { %3085 = vpow2.f32 %v2544_v25 }
 0x871   :  { %3087 = vpow2.f32 %v2543_v14 }
 0x87d   :  { %v3086_v52 = vpop.eup %3085 }
 0x87e   :  { %v3088_v27 = vpop.eup %3087  ;;  %v2413_v6 = vadd.f32 1.0, %v3086_v52 }
 0x87f   :  { %v2407_v59 = vadd.f32 1.0, %v3088_v27 }
 0x880   :  { %3089 = vrcp.f32 %v2413_v6 }
 0x881   :  { %3091 = vrcp.f32 %v2407_v59 }
 0x889   :  { %v2395_v2 = vpop.f32.mrf.mxu0 }
 0x88a   :  { %v2402_v11 = vadd.f32 %v2395_v2, %v5104_v10 }
 0x88b   :  { %v2397_v53 = vpop.f32.mrf.mxu0 }
 0x88c   :  { %3093 = vtanh.f32 %v2402_v11  ;;  %v2403_v55 = vadd.f32 %v2397_v53, %v5105_v0 }
 0x88d   :  { %v3090_v58 = vpop.eup %3089 }
 0x88e   :  { %v2545_v47 = vmul.f32 -1.442695, %v2403_v55  ;;  %v3092_v29 = vpop.eup %3091  ;;  %v2423_v63 = vmul.f32 %v3090_v58, %v4649_v62 }
 0x890   :  { %3095 = vpow2.f32 %v2545_v47 }
 0x899   :  { %v3094_v60 = vpop.eup %3093 }
 0x89a   :  { %v2424_v61 = vmul.f32 %v3094_v60, %v3092_v29 }
 0x89c   :  { %v2425_v20 = vadd.f32 %v2424_v61, %v2423_v63 }
 0x89d   :  { %v3096_v57 = vpop.eup %3095 }
 0x89e   :  { %v2420_v16 = vadd.f32 1.0, %v3096_v57  ;;  %3097 = vtanh.f32 %v2425_v20 }
 0x8a0   :  { %3099 = vrcp.f32 %v2420_v16 }
 0x8ab   :  { %v3098_v54 = vpop.eup %3097 }
 0x8ad   :  { %v3100_v36 = vpop.eup %3099 }
 0x8ae   :  { %v2427_v46 = vmul.f32 %v3100_v36, %v3098_v54 }
 0x8b0   :  { %2960 = vmatmul.mubr.f32.vlgmr.msra.gmra.mxu1 %v2427_v46 }
 0x970   :  { %v2494_v50 = vpop.f32.mrf.mxu1 }
 0x971   :  { %v2495_v9 = vadd.f32 %v4544_v35, %v2494_v50 }
 0x972   :  { %v2961_v48 = vpop.f32.mrf.mxu1 }
 0x973   :  { %2499 = vst [vmem:[#allocation13 + $0x38] sm:$0xff] %v2495_v9 }
 0x974   :  { %3321 = shalt.err (!%p3318_p10)
}
 0x975   :  { %2513 = dma.vmem_to_hbm [thread:$0]  %s2508_s22, 1024, %s4710_s6, [#allocation7], %s3342_s7, %s3342_s7, %s3343_s8  }
 0x976   :  { %3336 = dma.done.wait [#allocation7], 1024  }
 0x977   :  { %3337 = vsyncadd [#allocation7], 4294966272 }
 0x978   :  { %2517 = vsyncpa [#allocation6], 1 }
 0x979   :  { %2518 = vsyncpa [#allocation9], 1 }
 0x97a   :  { %2519 = vsyncpa [#allocation12], 1 }
 0x97b   :  { %2520 = vsyncpa [#allocation7], 1 }

</bundles_post_ra>
